<compile_context>
chip_gen: v6e
topology: v6e:2x2x1
jax: 0.10.0
libtpu: 0.0.40
codegen_flags: <defaults>
</compile_context>

<pallas_src>
import functools

import jax
import jax.numpy as jnp
from jax.experimental import pallas as pl
from jax.experimental.pallas import tpu as pltpu

_LANE = 128
_CPAD = 8                          # coord channels padded 2 -> 8 (zero pad is an exact no-op)
_VMEM_LIMIT = 64 * 1024 * 1024     # fits v5e/v6e (128 MiB) and v7x (64 MiB) physical VMEM
_MASK_VAL = -1.0e30                # padded (col >= N) columns: below any real -dist^2


def _round_up(x, m):
    return ((x + m - 1) // m) * m


def _pick_tile(total, cap):
    """Largest multiple of 128 <= cap that divides `total` (total % 128 == 0)."""
    t = min(cap, total)
    while total % t:
        t -= _LANE
    return t


# ---------------------------------------------------------------------------
# Kernel 1: streaming negated-pairwise-distance top-k (bknn)
# ---------------------------------------------------------------------------
def _knn_topk_kernel(n_valid, k, xr_ref, xc_ref, sqr_ref, sqc_ref, idx_ref,
                     bv_ref, bi_ref):
    # xr_ref : (1, 8, TM)  row-tile coords (coords on sublanes, points on lanes)
    # xc_ref : (1, 8, TC)  column-tile coords
    # sqr_ref: (1, TM, 1)  squared norms of the row points
    # sqc_ref: (1, 1, TC)  squared norms of the column points
    # idx_ref: (1, TM, k)  int32 neighbour indices, descending inv-distance
    # bv_ref/bi_ref: (TM, k) running best values / indices across column tiles
    c = pl.program_id(2)
    tc = xc_ref.shape[2]

    @pl.when(c == 0)
    def _init():
        bv_ref[...] = jnp.full(bv_ref.shape, -jnp.inf, bv_ref.dtype)
        bi_ref[...] = jnp.full(bi_ref.shape, -1, bi_ref.dtype)

    xr = xr_ref[0].astype(jnp.float32)                         # (8, TM)
    xc = xc_ref[0].astype(jnp.float32)                         # (8, TC)
    # MXU contraction over the zero-padded coordinate axis; no transposes.
    inner2 = 2.0 * jax.lax.dot_general(
        xr, xc, (((0,), (0,)), ((), ())),
        preferred_element_type=jnp.float32)                    # (TM, TC)
    inv = inner2 - sqr_ref[0] - sqc_ref[0]                     # -pairwise_dist
    gcol = jax.lax.broadcasted_iota(jnp.int32, inv.shape, 1) + c * tc
    inv = jnp.where(gcol < n_valid, inv, _MASK_VAL)

    # Exact streaming top-k merge: best(prev tiles) U current block, k selection
    # steps, ties broken by lowest global index (matches lax.top_k).
    bv = bv_ref[...]                                           # (TM, k)
    bi = bi_ref[...]
    kcol = jax.lax.broadcasted_iota(jnp.int32, bv.shape, 1)
    out_v = jnp.full(bv.shape, -jnp.inf, jnp.float32)
    out_i = jnp.full(bi.shape, -1, jnp.int32)
    work = inv
    big = jnp.int32(2147483647)
    for t in range(k):
        m_blk = jnp.max(work, axis=1, keepdims=True)           # (TM, 1)
        m_bst = jnp.max(bv, axis=1, keepdims=True)
        m = jnp.maximum(m_blk, m_bst)
        a_blk = jnp.min(jnp.where(work == m, gcol, big), axis=1, keepdims=True)
        a_bst = jnp.min(jnp.where(bv == m, bi, big), axis=1, keepdims=True)
        a = jnp.minimum(a_blk, a_bst)                          # lowest-index tie-break
        work = jnp.where(gcol == a, -jnp.inf, work)            # knock out selected
        bv = jnp.where(bi == a, -jnp.inf, bv)
        out_v = jnp.where(kcol == t, m, out_v)
        out_i = jnp.where(kcol == t, a, out_i)
    bv_ref[...] = out_v
    bi_ref[...] = out_i
    idx_ref[0] = out_i                                         # final col tile wins


# ---------------------------------------------------------------------------
# Kernel 2a: folded Conv1d+Linear (one MXU matmul) + masked BN statistics
# ---------------------------------------------------------------------------
def _affine_transform_kernel(n_valid, L_ref, w_ref, b_ref, y_ref, stats_ref,
                             sum_sc, sq_sc):
    # L_ref   : (1, k*F, TN)  scrambled Laplacian features, N on lanes
    # w_ref   : (F, k*F)      folded weight  W'[g, a*F+f] = conv_w[a] * lin_w[g, f]
    # b_ref   : (F, 1)        folded bias    lin_b + conv_b * lin_w.sum(-1)
    # y_ref   : (1, F, TN)    pre-BN activations
    # stats_ref: (1, F, 2)    per-batch [sum, sumsq], written once at the last tile
    i = pl.program_id(1)

    @pl.when(i == 0)
    def _init():
        sum_sc[...] = jnp.zeros_like(sum_sc)
        sq_sc[...] = jnp.zeros_like(sq_sc)

    L = L_ref[0].astype(jnp.float32)                           # (k*F, TN)
    Y = jax.lax.dot_general(w_ref[...], L, (((1,), (0,)), ((), ())),
                            preferred_element_type=jnp.float32) + b_ref[...]
    y_ref[0] = Y                                               # (F, TN)

    tn = Y.shape[1]
    col = jax.lax.broadcasted_iota(jnp.int32, Y.shape, 1) + i * tn
    Ym = jnp.where(col < n_valid, Y, 0.0)
    sum_sc[...] += jnp.sum(Ym, axis=1, keepdims=True)          # (F, 1)
    sq_sc[...] += jnp.sum(Ym * Ym, axis=1, keepdims=True)

    @pl.when(i == pl.num_programs(1) - 1)
    def _store():
        stats_ref[0, :, 0:1] = sum_sc[...]
        stats_ref[0, :, 1:2] = sq_sc[...]


# ---------------------------------------------------------------------------
# Kernel 2b: BatchNorm normalize (folded scale/shift) + ReLU
# ---------------------------------------------------------------------------
def _bn_relu_kernel(y_ref, scale_ref, shift_ref, o_ref):
    y = y_ref[0]                                               # (F, TN)
    o_ref[0] = jnp.maximum(y * scale_ref[...] + shift_ref[...], 0.0)


# ---------------------------------------------------------------------------
# Wrappers
# ---------------------------------------------------------------------------
def bknn_pallas(x2, k, n_valid, n_pad):
    """x2: (B, 2, N) -> int32 neighbor indices (B, N, k) (torch bknn semantics)."""
    B = x2.shape[0]
    assert n_valid >= k
    xp = jnp.zeros((B, _CPAD, n_pad), jnp.float32).at[:, 0:2, 0:n_valid].set(
        x2.astype(jnp.float32))
    xx = jnp.sum(xp * xp, axis=1)                              # (B, Np)
    sq_col = xx[:, :, None]                                    # (B, Np, 1) row norms
    sq_row = xx[:, None, :]                                    # (B, 1, Np) col norms

    tm = _pick_tile(n_pad, 256)
    tc = _pick_tile(n_pad, 512)
    n_rt, n_ct = n_pad // tm, n_pad // tc

    idx = pl.pallas_call(
        functools.partial(_knn_topk_kernel, n_valid, k),
        out_shape=jax.ShapeDtypeStruct((B, n_pad, k), jnp.int32),
        grid=(B, n_rt, n_ct),
        in_specs=[
            pl.BlockSpec((1, _CPAD, tm), lambda b, r, c: (b, 0, r)),
            pl.BlockSpec((1, _CPAD, tc), lambda b, r, c: (b, 0, c)),
            pl.BlockSpec((1, tm, 1), lambda b, r, c: (b, r, 0)),
            pl.BlockSpec((1, 1, tc), lambda b, r, c: (b, 0, c)),
        ],
        out_specs=pl.BlockSpec((1, tm, k), lambda b, r, c: (b, r, 0)),
        scratch_shapes=[pltpu.VMEM((tm, k), jnp.float32),
                        pltpu.VMEM((tm, k), jnp.int32)],
        compiler_params=pltpu.CompilerParams(
            dimension_semantics=("parallel", "parallel", "arbitrary"),
            vmem_limit_bytes=_VMEM_LIMIT),
        cost_estimate=pl.CostEstimate(
            flops=int(B * n_pad * n_pad * (2 * _CPAD + 8 * k)),
            transcendentals=0,
            bytes_accessed=int(4 * B * (_CPAD * n_pad * (n_rt + n_ct)
                                        + n_pad * (n_rt + n_ct) + n_pad * k))),
    )(xp, xp, sq_col, sq_row)
    return idx[:, :n_valid, :]


def affine_geometry_forward(xyz, feat, params, k, eps=1e-5):
    B, _, N = xyz.shape
    _, F, _ = feat.shape
    n_pad = _round_up(N, _LANE)

    idx = bknn_pallas(xyz[:, 0:2, :], k, N, n_pad)             # (B, N, k), all < N

    # getLaplacian with torch's exact contiguous `.view(-1, N*F)` scramble, built as
    # a single fused gather directly in the kernel's (B, k*F, Np) lane-dense layout.
    idx_flat = idx.reshape(B, N * k)
    n_ar = jnp.minimum(jnp.arange(n_pad), N - 1)               # clamp padded columns
    off = (jnp.arange(k)[:, None, None] * (N * F)
           + n_ar[None, None, :] * F
           + jnp.arange(F)[None, :, None])                     # (k, F, Np)
    src_chan = off // (N * k)                                  # static
    src_rem = off % (N * k)                                    # static
    src_point = jnp.take(idx_flat, src_rem.reshape(-1), axis=1).reshape(B, k, F, n_pad)
    comb = (src_chan[None] * N + src_point).reshape(B, k * F, n_pad)
    feat_flat = feat.astype(jnp.float32).reshape(B, F * N)
    Lp = jax.vmap(jnp.take)(feat_flat, comb)                   # (B, k*F, Np)

    # Fold Conv1d(k->1, ks=1) into the Linear weight/bias.
    cw = params["conv_w"].reshape(k).astype(jnp.float32)
    cb = params["conv_b"].astype(jnp.float32)[0]
    W = params["lin_w"].astype(jnp.float32)                    # (F, F), y = x @ W.T + b
    lb = params["lin_b"].astype(jnp.float32)
    Wp = (cw[:, None, None] * W[None, :, :]).transpose(1, 0, 2).reshape(F, k * F)
    bp = (lb + cb * jnp.sum(W, axis=1)).reshape(F, 1)

    tn = _pick_tile(n_pad, 1024)
    y, stats = pl.pallas_call(
        functools.partial(_affine_transform_kernel, N),
        out_shape=(jax.ShapeDtypeStruct((B, F, n_pad), jnp.float32),
                   jax.ShapeDtypeStruct((B, F, 2), jnp.float32)),
        grid=(B, n_pad // tn),
        in_specs=[
            pl.BlockSpec((1, k * F, tn), lambda b, i: (b, 0, i)),
            pl.BlockSpec((F, k * F), lambda b, i: (0, 0)),
            pl.BlockSpec((F, 1), lambda b, i: (0, 0)),
        ],
        out_specs=(pl.BlockSpec((1, F, tn), lambda b, i: (b, 0, i)),
                   pl.BlockSpec((1, F, 2), lambda b, i: (b, 0, 0))),
        scratch_shapes=[pltpu.VMEM((F, 1), jnp.float32),
                        pltpu.VMEM((F, 1), jnp.float32)],
        compiler_params=pltpu.CompilerParams(
            dimension_semantics=("parallel", "arbitrary"),
            vmem_limit_bytes=_VMEM_LIMIT),
        cost_estimate=pl.CostEstimate(
            flops=int(B * n_pad * F * (2 * k * F + 6)),
            transcendentals=0,
            bytes_accessed=int(4 * (B * (k * F + F) * n_pad + F * (k * F + 3)))),
    )(Lp, Wp, bp)

    # Combine per-batch BN statistics (training-mode batch stats, biased variance)
    # and fold BatchNorm into a single per-channel scale/shift.
    count = jnp.float32(B * N)
    mean = jnp.sum(stats[:, :, 0], axis=0) / count             # (F,)
    ex2 = jnp.sum(stats[:, :, 1], axis=0) / count
    var = jnp.maximum(ex2 - mean * mean, 0.0)
    scale = params["bn_w"].reshape(F).astype(jnp.float32) * jax.lax.rsqrt(var + eps)
    shift = params["bn_b"].reshape(F).astype(jnp.float32) - mean * scale

    out = pl.pallas_call(
        _bn_relu_kernel,
        out_shape=jax.ShapeDtypeStruct((B, F, n_pad), jnp.float32),
        grid=(B, n_pad // tn),
        in_specs=[
            pl.BlockSpec((1, F, tn), lambda b, i: (b, 0, i)),
            pl.BlockSpec((F, 1), lambda b, i: (0, 0)),
            pl.BlockSpec((F, 1), lambda b, i: (0, 0)),
        ],
        out_specs=pl.BlockSpec((1, F, tn), lambda b, i: (b, 0, i)),
        compiler_params=pltpu.CompilerParams(
            dimension_semantics=("parallel", "parallel"),
            vmem_limit_bytes=_VMEM_LIMIT),
        cost_estimate=pl.CostEstimate(
            flops=int(3 * B * F * n_pad),
            transcendentals=0,
            bytes_accessed=int(4 * 2 * B * F * n_pad)),
    )(y, scale.reshape(F, 1), shift.reshape(F, 1))

    return out[:, :, :N]


# Pure-JAX reference of the same pipeline (sanity check of the kernels).
def _reference(xyz, feat, params, k):
    B, _, N = xyz.shape
    _, F, _ = feat.shape
    x = xyz[:, 0:2, :].astype(jnp.float32)
    inner = 2.0 * jnp.einsum("bcn,bcm->bnm", x, x)
    xx = jnp.sum(x * x, axis=1, keepdims=True)
    inv_dist = -(xx - inner + jnp.swapaxes(xx, 1, 2))
    _, idx = jax.lax.top_k(inv_dist, k)
    flat_idx = idx.reshape(B, 1, N * k)
    gathered = jnp.take_along_axis(feat.astype(jnp.float32), flat_idx, axis=2)
    L = gathered.reshape(B, k, N * F).reshape(B, k, N, F)
    A = jnp.einsum("bknf,k->bnf", L, params["conv_w"].reshape(k)) + params["conv_b"][0]
    Y = jnp.einsum("bnf,gf->bng", A, params["lin_w"]) + params["lin_b"]
    mean = jnp.mean(Y, axis=(0, 1), keepdims=True)
    var = jnp.mean((Y - mean) ** 2, axis=(0, 1), keepdims=True)
    yb = (Y - mean) / jnp.sqrt(var + 1e-5) * params["bn_w"] + params["bn_b"]
    return jnp.swapaxes(jnp.maximum(yb, 0.0), 1, 2)


if __name__ == "__main__":
    # Small shapes consistent with the module: n_points=16, k_value=4, n_feat=8.
    B, C, N, F, K = 2, 3, 16, 8, 4

    key = jax.random.PRNGKey(0)
    k_xyz, k_feat, k_cw, k_cb, k_lw, k_lb = jax.random.split(key, 6)

    xyz = jax.random.normal(k_xyz, (B, C, N), dtype=jnp.float32)
    feat = jax.random.normal(k_feat, (B, F, N), dtype=jnp.float32)

    # Deterministic synthetic parameters in torch-native shapes.
    params = {
        "conv_w": jax.random.normal(k_cw, (1, K, 1), dtype=jnp.float32) * 0.5,  # Conv1d(k,1,1).weight
        "conv_b": jax.random.normal(k_cb, (1,), dtype=jnp.float32) * 0.1,       # Conv1d bias
        "lin_w": jax.random.normal(k_lw, (F, F), dtype=jnp.float32) * (1.0 / jnp.sqrt(F)),
        "lin_b": jax.random.normal(k_lb, (F,), dtype=jnp.float32) * 0.1,
        "bn_w": jnp.ones((F,), dtype=jnp.float32),   # BatchNorm1d default weight
        "bn_b": jnp.zeros((F,), dtype=jnp.float32),  # BatchNorm1d default bias
    }

    fwd = jax.jit(functools.partial(affine_geometry_forward, k=K))
    out = jax.block_until_ready(fwd(xyz, feat, params))
    ref = jax.block_until_ready(_reference(xyz, feat, params, K))

    assert out.shape == (B, F, N), out.shape
    assert bool(jnp.all(jnp.isfinite(out)))
    err = float(jnp.max(jnp.abs(out - ref)))
    assert jnp.allclose(out, ref, rtol=1e-4, atol=1e-4), err

    print("KERNEL_OK")
</pallas_src>

<mosaic_0001>
module attributes {stable_mosaic.version = 11 : i64} {
  func.func @_knn_topk_kernel(%arg0: i32, %arg1: i32, %arg2: i32, %arg3: memref<1x8x128xf32, #tpu.memory_space<vmem>>, %arg4: memref<1x8x128xf32, #tpu.memory_space<vmem>>, %arg5: memref<1x128x1xf32, #tpu.memory_space<vmem>>, %arg6: memref<1x1x128xf32, #tpu.memory_space<vmem>>, %arg7: memref<1x128x4xi32, #tpu.memory_space<vmem>>, %arg8: memref<128x4xf32, #tpu.memory_space<vmem>>, %arg9: memref<128x4xi32, #tpu.memory_space<vmem>>) attributes {dimension_semantics = [#tpu.dimension_semantics<parallel>, #tpu.dimension_semantics<parallel>, #tpu.dimension_semantics<arbitrary>], iteration_bounds = array<i64: 2, 1, 1>, scalar_prefetch = 0 : i64, scratch_operands = 2 : i64, tpu.core_type = #tpu.core_type<tc>, window_params = [{transform_indices = @transform_0, window_bounds = array<i64: 1, 8, 128>}, {transform_indices = @transform_1, window_bounds = array<i64: 1, 8, 128>}, {transform_indices = @transform_2, window_bounds = array<i64: 1, 128, 1>}, {transform_indices = @transform_3, window_bounds = array<i64: 1, 1, 128>}, {transform_indices = @transform_4, window_bounds = array<i64: 1, 128, 4>}]} {
    %c0_i32 = arith.constant 0 : i32
    %0 = arith.cmpi eq, %arg2, %c0_i32 : i32
    %1 = arith.extui %0 : i1 to i32
    %c0_i32_0 = arith.constant 0 : i32
    %2 = arith.cmpi ne, %1, %c0_i32_0 : i32
    scf.if %2 {
      %cst_60 = arith.constant 0xFF800000 : f32
      %172 = vector.broadcast %cst_60 : f32 to vector<128x4xf32>
      %c0_61 = arith.constant 0 : index
      %c0_62 = arith.constant 0 : index
      %173 = vector.load %arg8[%c0_61, %c0_62] : memref<128x4xf32, #tpu.memory_space<vmem>>, vector<128x4xf32>
      tpu.vector_store %arg8[%c0_61, %c0_62], %172 {strides = array<i32>} : memref<128x4xf32, #tpu.memory_space<vmem>>, vector<128x4xf32>,
      %c-1_i32_63 = arith.constant -1 : i32
      %174 = vector.broadcast %c-1_i32_63 : i32 to vector<128x4xi32>
      %c0_64 = arith.constant 0 : index
      %c0_65 = arith.constant 0 : index
      %175 = vector.load %arg9[%c0_64, %c0_65] : memref<128x4xi32, #tpu.memory_space<vmem>>, vector<128x4xi32>
      tpu.vector_store %arg9[%c0_64, %c0_65], %174 {strides = array<i32>} : memref<128x4xi32, #tpu.memory_space<vmem>>, vector<128x4xi32>,
    } else {
    }
    %c0 = arith.constant 0 : index
    %c0_1 = arith.constant 0 : index
    %c0_2 = arith.constant 0 : index
    %3 = vector.load %arg3[%c0, %c0_1, %c0_2] : memref<1x8x128xf32, #tpu.memory_space<vmem>>, vector<1x8x128xf32>
    %4 = vector.shape_cast %3 : vector<1x8x128xf32> to vector<8x128xf32>
    %c0_3 = arith.constant 0 : index
    %c0_4 = arith.constant 0 : index
    %c0_5 = arith.constant 0 : index
    %5 = vector.load %arg4[%c0_3, %c0_4, %c0_5] : memref<1x8x128xf32, #tpu.memory_space<vmem>>, vector<1x8x128xf32>
    %6 = vector.shape_cast %5 : vector<1x8x128xf32> to vector<8x128xf32>
    %cst = arith.constant dense<0.000000e+00> : vector<128x128xf32>
    %7 = tpu.matmul %4, %6, %cst {dimension_numbers = #tpu.dot_dimension_numbers<[0], [0], [1], [1], [0, 1, 1, 1], [], []>} : vector<8x128xf32>, vector<8x128xf32>, vector<128x128xf32> -> vector<128x128xf32>
    %cst_6 = arith.constant 2.000000e+00 : f32
    %8 = vector.broadcast %cst_6 : f32 to vector<128x128xf32>
    %9 = arith.mulf %8, %7 : vector<128x128xf32>
    %c0_7 = arith.constant 0 : index
    %c0_8 = arith.constant 0 : index
    %c0_9 = arith.constant 0 : index
    %10 = vector.load %arg5[%c0_7, %c0_8, %c0_9] : memref<1x128x1xf32, #tpu.memory_space<vmem>>, vector<1x128x1xf32>
    %11 = vector.shape_cast %10 : vector<1x128x1xf32> to vector<128x1xf32>
    %12 = vector.broadcast %11 : vector<128x1xf32> to vector<128x128xf32>
    %13 = arith.subf %9, %12 : vector<128x128xf32>
    %c0_10 = arith.constant 0 : index
    %c0_11 = arith.constant 0 : index
    %c0_12 = arith.constant 0 : index
    %14 = vector.load %arg6[%c0_10, %c0_11, %c0_12] : memref<1x1x128xf32, #tpu.memory_space<vmem>>, vector<1x1x128xf32>
    %15 = vector.shape_cast %14 : vector<1x1x128xf32> to vector<1x128xf32>
    %16 = vector.broadcast %15 : vector<1x128xf32> to vector<128x128xf32>
    %17 = arith.subf %13, %16 : vector<128x128xf32>
    %18 = tpu.iota {dimensions = array<i32: 1>} : vector<128x128xi32>
    %c128_i32 = arith.constant 128 : i32
    %19 = arith.muli %arg2, %c128_i32 : i32
    %20 = vector.broadcast %19 : i32 to vector<128x128xi32>
    %21 = arith.addi %18, %20 : vector<128x128xi32>
    %c16_i32 = arith.constant 16 : i32
    %22 = vector.broadcast %c16_i32 : i32 to vector<128x128xi32>
    %23 = arith.cmpi slt, %21, %22 : vector<128x128xi32>
    %cst_13 = arith.constant -1.000000e+30 : f32
    %24 = vector.broadcast %cst_13 : f32 to vector<128x128xf32>
    %25 = arith.select %23, %17, %24 : vector<128x128xi1>, vector<128x128xf32>
    %c0_14 = arith.constant 0 : index
    %c0_15 = arith.constant 0 : index
    %26 = vector.load %arg8[%c0_14, %c0_15] : memref<128x4xf32, #tpu.memory_space<vmem>>, vector<128x4xf32>
    %c0_16 = arith.constant 0 : index
    %c0_17 = arith.constant 0 : index
    %27 = vector.load %arg9[%c0_16, %c0_17] : memref<128x4xi32, #tpu.memory_space<vmem>>, vector<128x4xi32>
    %28 = tpu.iota {dimensions = array<i32: 1>} : vector<128x4xi32>
    %cst_18 = arith.constant 0xFF800000 : f32
    %29 = vector.broadcast %cst_18 : f32 to vector<128x4xf32>
    %c-1_i32 = arith.constant -1 : i32
    %30 = vector.broadcast %c-1_i32 : i32 to vector<128x4xi32>
    %cst_19 = arith.constant dense<0xFF800000> : vector<128xf32>
    %31 = vector.multi_reduction <maximumf>, %25, %cst_19 [1] : vector<128x128xf32> to vector<128xf32>
    %32 = vector.shape_cast %31 : vector<128xf32> to vector<128x1xf32>
    %cst_20 = arith.constant dense<0xFF800000> : vector<128xf32>
    %33 = vector.multi_reduction <maximumf>, %26, %cst_20 [1] : vector<128x4xf32> to vector<128xf32>
    %34 = vector.shape_cast %33 : vector<128xf32> to vector<128x1xf32>
    %35 = arith.maximumf %32, %34 : vector<128x1xf32>
    %36 = vector.broadcast %35 : vector<128x1xf32> to vector<128x128xf32>
    %37 = arith.cmpf oeq, %25, %36 : vector<128x128xf32>
    %c2147483647_i32 = arith.constant 2147483647 : i32
    %38 = vector.broadcast %c2147483647_i32 : i32 to vector<128x128xi32>
    %39 = arith.select %37, %21, %38 : vector<128x128xi1>, vector<128x128xi32>
    %cst_21 = arith.constant dense<2147483647> : vector<128xi32>
    %40 = vector.multi_reduction <minsi>, %39, %cst_21 [1] : vector<128x128xi32> to vector<128xi32>
    %41 = vector.shape_cast %40 : vector<128xi32> to vector<128x1xi32>
    %42 = vector.broadcast %35 : vector<128x1xf32> to vector<128x4xf32>
    %43 = arith.cmpf oeq, %26, %42 : vector<128x4xf32>
    %c2147483647_i32_22 = arith.constant 2147483647 : i32
    %44 = vector.broadcast %c2147483647_i32_22 : i32 to vector<128x4xi32>
    %45 = arith.select %43, %27, %44 : vector<128x4xi1>, vector<128x4xi32>
    %cst_23 = arith.constant dense<2147483647> : vector<128xi32>
    %46 = vector.multi_reduction <minsi>, %45, %cst_23 [1] : vector<128x4xi32> to vector<128xi32>
    %47 = vector.shape_cast %46 : vector<128xi32> to vector<128x1xi32>
    %48 = arith.minsi %41, %47 : vector<128x1xi32>
    %49 = vector.broadcast %48 : vector<128x1xi32> to vector<128x128xi32>
    %50 = arith.cmpi eq, %21, %49 : vector<128x128xi32>
    %cst_24 = arith.constant 0xFF800000 : f32
    %51 = vector.broadcast %cst_24 : f32 to vector<128x128xf32>
    %52 = arith.select %50, %51, %25 : vector<128x128xi1>, vector<128x128xf32>
    %53 = vector.broadcast %48 : vector<128x1xi32> to vector<128x4xi32>
    %54 = arith.cmpi eq, %27, %53 : vector<128x4xi32>
    %cst_25 = arith.constant 0xFF800000 : f32
    %55 = vector.broadcast %cst_25 : f32 to vector<128x4xf32>
    %56 = arith.select %54, %55, %26 : vector<128x4xi1>, vector<128x4xf32>
    %c0_i32_26 = arith.constant 0 : i32
    %57 = vector.broadcast %c0_i32_26 : i32 to vector<128x4xi32>
    %58 = arith.cmpi eq, %28, %57 : vector<128x4xi32>
    %59 = vector.shape_cast %35 : vector<128x1xf32> to vector<128x1xf32>
    %60 = vector.broadcast %59 : vector<128x1xf32> to vector<128x4xf32>
    %61 = arith.select %58, %60, %29 : vector<128x4xi1>, vector<128x4xf32>
    %c0_i32_27 = arith.constant 0 : i32
    %62 = vector.broadcast %c0_i32_27 : i32 to vector<128x4xi32>
    %63 = arith.cmpi eq, %28, %62 : vector<128x4xi32>
    %64 = vector.shape_cast %48 : vector<128x1xi32> to vector<128x1xi32>
    %65 = vector.broadcast %64 : vector<128x1xi32> to vector<128x4xi32>
    %66 = arith.select %63, %65, %30 : vector<128x4xi1>, vector<128x4xi32>
    %cst_28 = arith.constant dense<0xFF800000> : vector<128xf32>
    %67 = vector.multi_reduction <maximumf>, %52, %cst_28 [1] : vector<128x128xf32> to vector<128xf32>
    %68 = vector.shape_cast %67 : vector<128xf32> to vector<128x1xf32>
    %cst_29 = arith.constant dense<0xFF800000> : vector<128xf32>
    %69 = vector.multi_reduction <maximumf>, %56, %cst_29 [1] : vector<128x4xf32> to vector<128xf32>
    %70 = vector.shape_cast %69 : vector<128xf32> to vector<128x1xf32>
    %71 = arith.maximumf %68, %70 : vector<128x1xf32>
    %72 = vector.broadcast %71 : vector<128x1xf32> to vector<128x128xf32>
    %73 = arith.cmpf oeq, %52, %72 : vector<128x128xf32>
    %c2147483647_i32_30 = arith.constant 2147483647 : i32
    %74 = vector.broadcast %c2147483647_i32_30 : i32 to vector<128x128xi32>
    %75 = arith.select %73, %21, %74 : vector<128x128xi1>, vector<128x128xi32>
    %cst_31 = arith.constant dense<2147483647> : vector<128xi32>
    %76 = vector.multi_reduction <minsi>, %75, %cst_31 [1] : vector<128x128xi32> to vector<128xi32>
    %77 = vector.shape_cast %76 : vector<128xi32> to vector<128x1xi32>
    %78 = vector.broadcast %71 : vector<128x1xf32> to vector<128x4xf32>
    %79 = arith.cmpf oeq, %56, %78 : vector<128x4xf32>
    %c2147483647_i32_32 = arith.constant 2147483647 : i32
    %80 = vector.broadcast %c2147483647_i32_32 : i32 to vector<128x4xi32>
    %81 = arith.select %79, %27, %80 : vector<128x4xi1>, vector<128x4xi32>
    %cst_33 = arith.constant dense<2147483647> : vector<128xi32>
    %82 = vector.multi_reduction <minsi>, %81, %cst_33 [1] : vector<128x4xi32> to vector<128xi32>
    %83 = vector.shape_cast %82 : vector<128xi32> to vector<128x1xi32>
    %84 = arith.minsi %77, %83 : vector<128x1xi32>
    %85 = vector.broadcast %84 : vector<128x1xi32> to vector<128x128xi32>
    %86 = arith.cmpi eq, %21, %85 : vector<128x128xi32>
    %cst_34 = arith.constant 0xFF800000 : f32
    %87 = vector.broadcast %cst_34 : f32 to vector<128x128xf32>
    %88 = arith.select %86, %87, %52 : vector<128x128xi1>, vector<128x128xf32>
    %89 = vector.broadcast %84 : vector<128x1xi32> to vector<128x4xi32>
    %90 = arith.cmpi eq, %27, %89 : vector<128x4xi32>
    %cst_35 = arith.constant 0xFF800000 : f32
    %91 = vector.broadcast %cst_35 : f32 to vector<128x4xf32>
    %92 = arith.select %90, %91, %56 : vector<128x4xi1>, vector<128x4xf32>
    %c1_i32 = arith.constant 1 : i32
    %93 = vector.broadcast %c1_i32 : i32 to vector<128x4xi32>
    %94 = arith.cmpi eq, %28, %93 : vector<128x4xi32>
    %95 = vector.shape_cast %71 : vector<128x1xf32> to vector<128x1xf32>
    %96 = vector.broadcast %95 : vector<128x1xf32> to vector<128x4xf32>
    %97 = arith.select %94, %96, %61 : vector<128x4xi1>, vector<128x4xf32>
    %c1_i32_36 = arith.constant 1 : i32
    %98 = vector.broadcast %c1_i32_36 : i32 to vector<128x4xi32>
    %99 = arith.cmpi eq, %28, %98 : vector<128x4xi32>
    %100 = vector.shape_cast %84 : vector<128x1xi32> to vector<128x1xi32>
    %101 = vector.broadcast %100 : vector<128x1xi32> to vector<128x4xi32>
    %102 = arith.select %99, %101, %66 : vector<128x4xi1>, vector<128x4xi32>
    %cst_37 = arith.constant dense<0xFF800000> : vector<128xf32>
    %103 = vector.multi_reduction <maximumf>, %88, %cst_37 [1] : vector<128x128xf32> to vector<128xf32>
    %104 = vector.shape_cast %103 : vector<128xf32> to vector<128x1xf32>
    %cst_38 = arith.constant dense<0xFF800000> : vector<128xf32>
    %105 = vector.multi_reduction <maximumf>, %92, %cst_38 [1] : vector<128x4xf32> to vector<128xf32>
    %106 = vector.shape_cast %105 : vector<128xf32> to vector<128x1xf32>
    %107 = arith.maximumf %104, %106 : vector<128x1xf32>
    %108 = vector.broadcast %107 : vector<128x1xf32> to vector<128x128xf32>
    %109 = arith.cmpf oeq, %88, %108 : vector<128x128xf32>
    %c2147483647_i32_39 = arith.constant 2147483647 : i32
    %110 = vector.broadcast %c2147483647_i32_39 : i32 to vector<128x128xi32>
    %111 = arith.select %109, %21, %110 : vector<128x128xi1>, vector<128x128xi32>
    %cst_40 = arith.constant dense<2147483647> : vector<128xi32>
    %112 = vector.multi_reduction <minsi>, %111, %cst_40 [1] : vector<128x128xi32> to vector<128xi32>
    %113 = vector.shape_cast %112 : vector<128xi32> to vector<128x1xi32>
    %114 = vector.broadcast %107 : vector<128x1xf32> to vector<128x4xf32>
    %115 = arith.cmpf oeq, %92, %114 : vector<128x4xf32>
    %c2147483647_i32_41 = arith.constant 2147483647 : i32
    %116 = vector.broadcast %c2147483647_i32_41 : i32 to vector<128x4xi32>
    %117 = arith.select %115, %27, %116 : vector<128x4xi1>, vector<128x4xi32>
    %cst_42 = arith.constant dense<2147483647> : vector<128xi32>
    %118 = vector.multi_reduction <minsi>, %117, %cst_42 [1] : vector<128x4xi32> to vector<128xi32>
    %119 = vector.shape_cast %118 : vector<128xi32> to vector<128x1xi32>
    %120 = arith.minsi %113, %119 : vector<128x1xi32>
    %121 = vector.broadcast %120 : vector<128x1xi32> to vector<128x128xi32>
    %122 = arith.cmpi eq, %21, %121 : vector<128x128xi32>
    %cst_43 = arith.constant 0xFF800000 : f32
    %123 = vector.broadcast %cst_43 : f32 to vector<128x128xf32>
    %124 = arith.select %122, %123, %88 : vector<128x128xi1>, vector<128x128xf32>
    %125 = vector.broadcast %120 : vector<128x1xi32> to vector<128x4xi32>
    %126 = arith.cmpi eq, %27, %125 : vector<128x4xi32>
    %cst_44 = arith.constant 0xFF800000 : f32
    %127 = vector.broadcast %cst_44 : f32 to vector<128x4xf32>
    %128 = arith.select %126, %127, %92 : vector<128x4xi1>, vector<128x4xf32>
    %c2_i32 = arith.constant 2 : i32
    %129 = vector.broadcast %c2_i32 : i32 to vector<128x4xi32>
    %130 = arith.cmpi eq, %28, %129 : vector<128x4xi32>
    %131 = vector.shape_cast %107 : vector<128x1xf32> to vector<128x1xf32>
    %132 = vector.broadcast %131 : vector<128x1xf32> to vector<128x4xf32>
    %133 = arith.select %130, %132, %97 : vector<128x4xi1>, vector<128x4xf32>
    %c2_i32_45 = arith.constant 2 : i32
    %134 = vector.broadcast %c2_i32_45 : i32 to vector<128x4xi32>
    %135 = arith.cmpi eq, %28, %134 : vector<128x4xi32>
    %136 = vector.shape_cast %120 : vector<128x1xi32> to vector<128x1xi32>
    %137 = vector.broadcast %136 : vector<128x1xi32> to vector<128x4xi32>
    %138 = arith.select %135, %137, %102 : vector<128x4xi1>, vector<128x4xi32>
    %cst_46 = arith.constant dense<0xFF800000> : vector<128xf32>
    %139 = vector.multi_reduction <maximumf>, %124, %cst_46 [1] : vector<128x128xf32> to vector<128xf32>
    %140 = vector.shape_cast %139 : vector<128xf32> to vector<128x1xf32>
    %cst_47 = arith.constant dense<0xFF800000> : vector<128xf32>
    %141 = vector.multi_reduction <maximumf>, %128, %cst_47 [1] : vector<128x4xf32> to vector<128xf32>
    %142 = vector.shape_cast %141 : vector<128xf32> to vector<128x1xf32>
    %143 = arith.maximumf %140, %142 : vector<128x1xf32>
    %144 = vector.broadcast %143 : vector<128x1xf32> to vector<128x128xf32>
    %145 = arith.cmpf oeq, %124, %144 : vector<128x128xf32>
    %c2147483647_i32_48 = arith.constant 2147483647 : i32
    %146 = vector.broadcast %c2147483647_i32_48 : i32 to vector<128x128xi32>
    %147 = arith.select %145, %21, %146 : vector<128x128xi1>, vector<128x128xi32>
    %cst_49 = arith.constant dense<2147483647> : vector<128xi32>
    %148 = vector.multi_reduction <minsi>, %147, %cst_49 [1] : vector<128x128xi32> to vector<128xi32>
    %149 = vector.shape_cast %148 : vector<128xi32> to vector<128x1xi32>
    %150 = vector.broadcast %143 : vector<128x1xf32> to vector<128x4xf32>
    %151 = arith.cmpf oeq, %128, %150 : vector<128x4xf32>
    %c2147483647_i32_50 = arith.constant 2147483647 : i32
    %152 = vector.broadcast %c2147483647_i32_50 : i32 to vector<128x4xi32>
    %153 = arith.select %151, %27, %152 : vector<128x4xi1>, vector<128x4xi32>
    %cst_51 = arith.constant dense<2147483647> : vector<128xi32>
    %154 = vector.multi_reduction <minsi>, %153, %cst_51 [1] : vector<128x4xi32> to vector<128xi32>
    %155 = vector.shape_cast %154 : vector<128xi32> to vector<128x1xi32>
    %156 = arith.minsi %149, %155 : vector<128x1xi32>
    %c3_i32 = arith.constant 3 : i32
    %157 = vector.broadcast %c3_i32 : i32 to vector<128x4xi32>
    %158 = arith.cmpi eq, %28, %157 : vector<128x4xi32>
    %159 = vector.shape_cast %143 : vector<128x1xf32> to vector<128x1xf32>
    %160 = vector.broadcast %159 : vector<128x1xf32> to vector<128x4xf32>
    %161 = arith.select %158, %160, %133 : vector<128x4xi1>, vector<128x4xf32>
    %c3_i32_52 = arith.constant 3 : i32
    %162 = vector.broadcast %c3_i32_52 : i32 to vector<128x4xi32>
    %163 = arith.cmpi eq, %28, %162 : vector<128x4xi32>
    %164 = vector.shape_cast %156 : vector<128x1xi32> to vector<128x1xi32>
    %165 = vector.broadcast %164 : vector<128x1xi32> to vector<128x4xi32>
    %166 = arith.select %163, %165, %138 : vector<128x4xi1>, vector<128x4xi32>
    %c0_53 = arith.constant 0 : index
    %c0_54 = arith.constant 0 : index
    %167 = vector.load %arg8[%c0_53, %c0_54] : memref<128x4xf32, #tpu.memory_space<vmem>>, vector<128x4xf32>
    tpu.vector_store %arg8[%c0_53, %c0_54], %161 {strides = array<i32>} : memref<128x4xf32, #tpu.memory_space<vmem>>, vector<128x4xf32>,
    %c0_55 = arith.constant 0 : index
    %c0_56 = arith.constant 0 : index
    %168 = vector.load %arg9[%c0_55, %c0_56] : memref<128x4xi32, #tpu.memory_space<vmem>>, vector<128x4xi32>
    tpu.vector_store %arg9[%c0_55, %c0_56], %166 {strides = array<i32>} : memref<128x4xi32, #tpu.memory_space<vmem>>, vector<128x4xi32>,
    %c0_57 = arith.constant 0 : index
    %c0_58 = arith.constant 0 : index
    %c0_59 = arith.constant 0 : index
    %169 = vector.load %arg7[%c0_57, %c0_58, %c0_59] : memref<1x128x4xi32, #tpu.memory_space<vmem>>, vector<1x128x4xi32>
    %170 = vector.shape_cast %169 : vector<1x128x4xi32> to vector<128x4xi32>
    %171 = vector.shape_cast %166 : vector<128x4xi32> to vector<1x128x4xi32>
    tpu.vector_store %arg7[%c0_57, %c0_58, %c0_59], %171 {strides = array<i32>} : memref<1x128x4xi32, #tpu.memory_space<vmem>>, vector<1x128x4xi32>,
    return
  }
  func.func @transform_0(%arg0: i32, %arg1: i32, %arg2: i32) -> (i32, i32, i32) {
    %c0_i32 = arith.constant 0 : i32
    %c0_i32_0 = arith.constant 0 : i32
    return %arg0, %c0_i32, %arg1 : i32, i32, i32
  }
  func.func @transform_1(%arg0: i32, %arg1: i32, %arg2: i32) -> (i32, i32, i32) {
    %c0_i32 = arith.constant 0 : i32
    %c0_i32_0 = arith.constant 0 : i32
    return %arg0, %c0_i32, %arg2 : i32, i32, i32
  }
  func.func @transform_2(%arg0: i32, %arg1: i32, %arg2: i32) -> (i32, i32, i32) {
    %c0_i32 = arith.constant 0 : i32
    %c0_i32_0 = arith.constant 0 : i32
    return %arg0, %arg1, %c0_i32 : i32, i32, i32
  }
  func.func @transform_3(%arg0: i32, %arg1: i32, %arg2: i32) -> (i32, i32, i32) {
    %c0_i32 = arith.constant 0 : i32
    %c0_i32_0 = arith.constant 0 : i32
    return %arg0, %c0_i32, %arg2 : i32, i32, i32
  }
  func.func @transform_4(%arg0: i32, %arg1: i32, %arg2: i32) -> (i32, i32, i32) {
    %c0_i32 = arith.constant 0 : i32
    %c0_i32_0 = arith.constant 0 : i32
    return %arg0, %arg1, %c0_i32 : i32, i32, i32
  }
}

module attributes {stable_mosaic.version = 11 : i64} {
  func.func @_bn_relu_kernel(%arg0: i32, %arg1: i32, %arg2: memref<1x8x128xf32, #tpu.memory_space<vmem>>, %arg3: memref<8x1xf32, #tpu.memory_space<vmem>>, %arg4: memref<8x1xf32, #tpu.memory_space<vmem>>, %arg5: memref<1x8x128xf32, #tpu.memory_space<vmem>>) attributes {dimension_semantics = [#tpu.dimension_semantics<parallel>, #tpu.dimension_semantics<parallel>], iteration_bounds = array<i64: 2, 1>, scalar_prefetch = 0 : i64, scratch_operands = 0 : i64, tpu.core_type = #tpu.core_type<tc>, window_params = [{transform_indices = @transform_0, window_bounds = array<i64: 1, 8, 128>}, {pipeline_mode = #tpu.pipeline_mode<synchronous>, transform_indices = @transform_1, window_bounds = array<i64: 8, 1>}, {pipeline_mode = #tpu.pipeline_mode<synchronous>, transform_indices = @transform_2, window_bounds = array<i64: 8, 1>}, {transform_indices = @transform_3, window_bounds = array<i64: 1, 8, 128>}]} {
    %c0 = arith.constant 0 : index
    %c0_0 = arith.constant 0 : index
    %c0_1 = arith.constant 0 : index
    %0 = vector.load %arg2[%c0, %c0_0, %c0_1] : memref<1x8x128xf32, #tpu.memory_space<vmem>>, vector<1x8x128xf32>
    %1 = vector.shape_cast %0 : vector<1x8x128xf32> to vector<8x128xf32>
    %c0_2 = arith.constant 0 : index
    %c0_3 = arith.constant 0 : index
    %2 = vector.load %arg3[%c0_2, %c0_3] : memref<8x1xf32, #tpu.memory_space<vmem>>, vector<8x1xf32>
    %3 = vector.broadcast %2 : vector<8x1xf32> to vector<8x128xf32>
    %4 = arith.mulf %1, %3 : vector<8x128xf32>
    %c0_4 = arith.constant 0 : index
    %c0_5 = arith.constant 0 : index
    %5 = vector.load %arg4[%c0_4, %c0_5] : memref<8x1xf32, #tpu.memory_space<vmem>>, vector<8x1xf32>
    %6 = vector.broadcast %5 : vector<8x1xf32> to vector<8x128xf32>
    %7 = arith.addf %4, %6 : vector<8x128xf32>
    %cst = arith.constant 0.000000e+00 : f32
    %8 = vector.broadcast %cst : f32 to vector<8x128xf32>
    %9 = arith.maximumf %7, %8 : vector<8x128xf32>
    %c0_6 = arith.constant 0 : index
    %c0_7 = arith.constant 0 : index
    %c0_8 = arith.constant 0 : index
    %10 = vector.load %arg5[%c0_6, %c0_7, %c0_8] : memref<1x8x128xf32, #tpu.memory_space<vmem>>, vector<1x8x128xf32>
    %11 = vector.shape_cast %10 : vector<1x8x128xf32> to vector<8x128xf32>
    %12 = vector.shape_cast %9 : vector<8x128xf32> to vector<1x8x128xf32>
    tpu.vector_store %arg5[%c0_6, %c0_7, %c0_8], %12 {strides = array<i32>} : memref<1x8x128xf32, #tpu.memory_space<vmem>>, vector<1x8x128xf32>,
    return
  }
  func.func @transform_0(%arg0: i32, %arg1: i32) -> (i32, i32, i32) {
    %c0_i32 = arith.constant 0 : i32
    %c0_i32_0 = arith.constant 0 : i32
    return %arg0, %c0_i32, %arg1 : i32, i32, i32
  }
  func.func @transform_1(%arg0: i32, %arg1: i32) -> (i32, i32) {
    %c0_i32 = arith.constant 0 : i32
    %c0_i32_0 = arith.constant 0 : i32
    %c0_i32_1 = arith.constant 0 : i32
    return %c0_i32, %c0_i32_0 : i32, i32
  }
  func.func @transform_2(%arg0: i32, %arg1: i32) -> (i32, i32) {
    %c0_i32 = arith.constant 0 : i32
    %c0_i32_0 = arith.constant 0 : i32
    %c0_i32_1 = arith.constant 0 : i32
    return %c0_i32, %c0_i32_0 : i32, i32
  }
  func.func @transform_3(%arg0: i32, %arg1: i32) -> (i32, i32, i32) {
    %c0_i32 = arith.constant 0 : i32
    %c0_i32_0 = arith.constant 0 : i32
    return %arg0, %c0_i32, %arg1 : i32, i32, i32
  }
}

module attributes {stable_mosaic.version = 11 : i64} {
  func.func @_affine_transform_kernel(%arg0: i32, %arg1: i32, %arg2: memref<1x32x128xf32, #tpu.memory_space<vmem>>, %arg3: memref<8x32xf32, #tpu.memory_space<vmem>>, %arg4: memref<8x1xf32, #tpu.memory_space<vmem>>, %arg5: memref<1x8x128xf32, #tpu.memory_space<vmem>>, %arg6: memref<1x8x2xf32, #tpu.memory_space<vmem>>, %arg7: memref<8x1xf32, #tpu.memory_space<vmem>>, %arg8: memref<8x1xf32, #tpu.memory_space<vmem>>) attributes {dimension_semantics = [#tpu.dimension_semantics<parallel>, #tpu.dimension_semantics<arbitrary>], iteration_bounds = array<i64: 2, 1>, scalar_prefetch = 0 : i64, scratch_operands = 2 : i64, tpu.core_type = #tpu.core_type<tc>, window_params = [{transform_indices = @transform_0, window_bounds = array<i64: 1, 32, 128>}, {pipeline_mode = #tpu.pipeline_mode<synchronous>, transform_indices = @transform_1, window_bounds = array<i64: 8, 32>}, {pipeline_mode = #tpu.pipeline_mode<synchronous>, transform_indices = @transform_2, window_bounds = array<i64: 8, 1>}, {transform_indices = @transform_3, window_bounds = array<i64: 1, 8, 128>}, {transform_indices = @transform_4, window_bounds = array<i64: 1, 8, 2>}]} {
    %c0_i32 = arith.constant 0 : i32
    %0 = arith.cmpi eq, %arg1, %c0_i32 : i32
    %1 = arith.extui %0 : i1 to i32
    %c0_i32_0 = arith.constant 0 : i32
    %2 = arith.cmpi ne, %1, %c0_i32_0 : i32
    scf.if %2 {
      %cst_23 = arith.constant 0.000000e+00 : f32
      %35 = vector.broadcast %cst_23 : f32 to vector<8x1xf32>
      %c0_24 = arith.constant 0 : index
      %c0_25 = arith.constant 0 : index
      %36 = vector.load %arg7[%c0_24, %c0_25] : memref<8x1xf32, #tpu.memory_space<vmem>>, vector<8x1xf32>
      tpu.vector_store %arg7[%c0_24, %c0_25], %35 {strides = array<i32>} : memref<8x1xf32, #tpu.memory_space<vmem>>, vector<8x1xf32>,
      %cst_26 = arith.constant 0.000000e+00 : f32
      %37 = vector.broadcast %cst_26 : f32 to vector<8x1xf32>
      %c0_27 = arith.constant 0 : index
      %c0_28 = arith.constant 0 : index
      %38 = vector.load %arg8[%c0_27, %c0_28] : memref<8x1xf32, #tpu.memory_space<vmem>>, vector<8x1xf32>
      tpu.vector_store %arg8[%c0_27, %c0_28], %37 {strides = array<i32>} : memref<8x1xf32, #tpu.memory_space<vmem>>, vector<8x1xf32>,
    } else {
    }
    %c0 = arith.constant 0 : index
    %c0_1 = arith.constant 0 : index
    %c0_2 = arith.constant 0 : index
    %3 = vector.load %arg2[%c0, %c0_1, %c0_2] : memref<1x32x128xf32, #tpu.memory_space<vmem>>, vector<1x32x128xf32>
    %4 = vector.shape_cast %3 : vector<1x32x128xf32> to vector<32x128xf32>
    %c0_3 = arith.constant 0 : index
    %c0_4 = arith.constant 0 : index
    %5 = vector.load %arg3[%c0_3, %c0_4] : memref<8x32xf32, #tpu.memory_space<vmem>>, vector<8x32xf32>
    %cst = arith.constant dense<0.000000e+00> : vector<8x128xf32>
    %6 = tpu.matmul %5, %4, %cst {dimension_numbers = #tpu.dot_dimension_numbers<[1], [0], [0], [1], [0, 0, 1, 1], [], []>} : vector<8x32xf32>, vector<32x128xf32>, vector<8x128xf32> -> vector<8x128xf32>
    %c0_5 = arith.constant 0 : index
    %c0_6 = arith.constant 0 : index
    %7 = vector.load %arg4[%c0_5, %c0_6] : memref<8x1xf32, #tpu.memory_space<vmem>>, vector<8x1xf32>
    %8 = vector.broadcast %7 : vector<8x1xf32> to vector<8x128xf32>
    %9 = arith.addf %6, %8 : vector<8x128xf32>
    %c0_7 = arith.constant 0 : index
    %c0_8 = arith.constant 0 : index
    %c0_9 = arith.constant 0 : index
    %10 = vector.load %arg5[%c0_7, %c0_8, %c0_9] : memref<1x8x128xf32, #tpu.memory_space<vmem>>, vector<1x8x128xf32>
    %11 = vector.shape_cast %10 : vector<1x8x128xf32> to vector<8x128xf32>
    %12 = vector.shape_cast %9 : vector<8x128xf32> to vector<1x8x128xf32>
    tpu.vector_store %arg5[%c0_7, %c0_8, %c0_9], %12 {strides = array<i32>} : memref<1x8x128xf32, #tpu.memory_space<vmem>>, vector<1x8x128xf32>,
    %13 = tpu.iota {dimensions = array<i32: 1>} : vector<8x128xi32>
    %c128_i32 = arith.constant 128 : i32
    %14 = arith.muli %arg1, %c128_i32 : i32
    %15 = vector.broadcast %14 : i32 to vector<8x128xi32>
    %16 = arith.addi %13, %15 : vector<8x128xi32>
    %c16_i32 = arith.constant 16 : i32
    %17 = vector.broadcast %c16_i32 : i32 to vector<8x128xi32>
    %18 = arith.cmpi slt, %16, %17 : vector<8x128xi32>
    %cst_10 = arith.constant 0.000000e+00 : f32
    %19 = vector.broadcast %cst_10 : f32 to vector<8x128xf32>
    %20 = arith.select %18, %9, %19 : vector<8x128xi1>, vector<8x128xf32>
    %c0_11 = arith.constant 0 : index
    %c0_12 = arith.constant 0 : index
    %21 = vector.load %arg7[%c0_11, %c0_12] : memref<8x1xf32, #tpu.memory_space<vmem>>, vector<8x1xf32>
    %cst_13 = arith.constant dense<0.000000e+00> : vector<8xf32>
    %22 = vector.multi_reduction <add>, %20, %cst_13 [1] : vector<8x128xf32> to vector<8xf32>
    %23 = vector.shape_cast %22 : vector<8xf32> to vector<8x1xf32>
    %24 = arith.addf %21, %23 : vector<8x1xf32>
    %c0_14 = arith.constant 0 : index
    %c0_15 = arith.constant 0 : index
    %25 = vector.load %arg7[%c0_14, %c0_15] : memref<8x1xf32, #tpu.memory_space<vmem>>, vector<8x1xf32>
    tpu.vector_store %arg7[%c0_14, %c0_15], %24 {strides = array<i32>} : memref<8x1xf32, #tpu.memory_space<vmem>>, vector<8x1xf32>,
    %c0_16 = arith.constant 0 : index
    %c0_17 = arith.constant 0 : index
    %26 = vector.load %arg8[%c0_16, %c0_17] : memref<8x1xf32, #tpu.memory_space<vmem>>, vector<8x1xf32>
    %27 = arith.mulf %20, %20 : vector<8x128xf32>
    %cst_18 = arith.constant dense<0.000000e+00> : vector<8xf32>
    %28 = vector.multi_reduction <add>, %27, %cst_18 [1] : vector<8x128xf32> to vector<8xf32>
    %29 = vector.shape_cast %28 : vector<8xf32> to vector<8x1xf32>
    %30 = arith.addf %26, %29 : vector<8x1xf32>
    %c0_19 = arith.constant 0 : index
    %c0_20 = arith.constant 0 : index
    %31 = vector.load %arg8[%c0_19, %c0_20] : memref<8x1xf32, #tpu.memory_space<vmem>>, vector<8x1xf32>
    tpu.vector_store %arg8[%c0_19, %c0_20], %30 {strides = array<i32>} : memref<8x1xf32, #tpu.memory_space<vmem>>, vector<8x1xf32>,
    %c0_i32_21 = arith.constant 0 : i32
    %32 = arith.cmpi eq, %arg1, %c0_i32_21 : i32
    %33 = arith.extui %32 : i1 to i32
    %c0_i32_22 = arith.constant 0 : i32
    %34 = arith.cmpi ne, %33, %c0_i32_22 : i32
    scf.if %34 {
      %c0_23 = arith.constant 0 : index
      %c0_24 = arith.constant 0 : index
      %35 = vector.load %arg7[%c0_23, %c0_24] : memref<8x1xf32, #tpu.memory_space<vmem>>, vector<8x1xf32>
      %c0_25 = arith.constant 0 : index
      %c0_26 = arith.constant 0 : index
      %c0_27 = arith.constant 0 : index
      %36 = vector.load %arg6[%c0_25, %c0_26, %c0_27] : memref<1x8x2xf32, #tpu.memory_space<vmem>>, vector<1x8x1xf32>
      %37 = vector.shape_cast %36 : vector<1x8x1xf32> to vector<8x1xf32>
      %38 = vector.shape_cast %35 : vector<8x1xf32> to vector<1x8x1xf32>
      tpu.vector_store %arg6[%c0_25, %c0_26, %c0_27], %38 {strides = array<i32>} : memref<1x8x2xf32, #tpu.memory_space<vmem>>, vector<1x8x1xf32>,
      %c0_28 = arith.constant 0 : index
      %c0_29 = arith.constant 0 : index
      %39 = vector.load %arg8[%c0_28, %c0_29] : memref<8x1xf32, #tpu.memory_space<vmem>>, vector<8x1xf32>
      %c0_30 = arith.constant 0 : index
      %c0_31 = arith.constant 0 : index
      %c1 = arith.constant 1 : index
      %40 = vector.load %arg6[%c0_30, %c0_31, %c1] : memref<1x8x2xf32, #tpu.memory_space<vmem>>, vector<1x8x1xf32>
      %41 = vector.shape_cast %40 : vector<1x8x1xf32> to vector<8x1xf32>
      %42 = vector.shape_cast %39 : vector<8x1xf32> to vector<1x8x1xf32>
      tpu.vector_store %arg6[%c0_30, %c0_31, %c1], %42 {strides = array<i32>} : memref<1x8x2xf32, #tpu.memory_space<vmem>>, vector<1x8x1xf32>,
    } else {
    }
    return
  }
  func.func @transform_0(%arg0: i32, %arg1: i32) -> (i32, i32, i32) {
    %c0_i32 = arith.constant 0 : i32
    %c0_i32_0 = arith.constant 0 : i32
    return %arg0, %c0_i32, %arg1 : i32, i32, i32
  }
  func.func @transform_1(%arg0: i32, %arg1: i32) -> (i32, i32) {
    %c0_i32 = arith.constant 0 : i32
    %c0_i32_0 = arith.constant 0 : i32
    %c0_i32_1 = arith.constant 0 : i32
    return %c0_i32, %c0_i32_0 : i32, i32
  }
  func.func @transform_2(%arg0: i32, %arg1: i32) -> (i32, i32) {
    %c0_i32 = arith.constant 0 : i32
    %c0_i32_0 = arith.constant 0 : i32
    %c0_i32_1 = arith.constant 0 : i32
    return %c0_i32, %c0_i32_0 : i32, i32
  }
  func.func @transform_3(%arg0: i32, %arg1: i32) -> (i32, i32, i32) {
    %c0_i32 = arith.constant 0 : i32
    %c0_i32_0 = arith.constant 0 : i32
    return %arg0, %c0_i32, %arg1 : i32, i32, i32
  }
  func.func @transform_4(%arg0: i32, %arg1: i32) -> (i32, i32, i32) {
    %c0_i32 = arith.constant 0 : i32
    %c0_i32_0 = arith.constant 0 : i32
    %c0_i32_1 = arith.constant 0 : i32
    return %arg0, %c0_i32, %c0_i32_0 : i32, i32, i32
  }
}

</mosaic_0001>

<bundles_post_ra>
// kernel: affine_geometry_forward.3
= control target key start
LH: loop header
LB: loop body
LE: loop exit
PB: predicated region body
PF: predicated region fallthrough
CT: control target
= control target key end

     0   :  { %s4147_s15 = smov 0   ;;  %s4149_s16 = smov 0   ;;  %s7603_s0 = inlined_call_operand.vmem [shape: f32[2,8,128], index: 0, kind: input, shape index: {}, may-alias: {0,1}]   ;;  %s7604_s1 = inlined_call_operand.vmem [shape: f32[2,8,128], index: 1, kind: input, shape index: {}, may-alias: {0,1}]   ;;  %s7605_s2 = inlined_call_operand.vmem [shape: f32[2,128,1], index: 2, kind: input, shape index: {}]   ;;  %s7606_s3 = inlined_call_operand.vmem [shape: f32[2,1,128], index: 3, kind: input, shape index: {}]   ;;  %s7607_s4 = inlined_call_operand.vmem [shape: s32[2,128,4], index: 4, kind: output, shape index: {}]  }
   0x1   :  { %s4151_s17 = smov 0  }
   0x2 LB: > { %s33_s18 = sadd.s32 1, %s4113_s16  ;;  %p3928_p0 = scmp.ge.s32.totalorder %s4117_s17, 1  ;;  %s4117_s17 = sphi %s4151_s17, %s14_s17   ;;  %s4113_s16 = sphi %s4149_s16, %s8308_s16   ;;  %s4109_s15 = sphi %s4147_s15, %s8307_s15  }
   0x3   : > { %p35_p1 = scmp.ge.s32.totalorder %s33_s18, 2  ;;  %p231_p2 = scmp.lt.s32.totalorder %s4117_s17, 3 }
   0x5   : > { %s8310_s18 = smov (%p35_p1, %s33_s18), 0  ;;  %p232_p3 = pnand %p3928_p0, %p231_p2 }
   0x7   : > { %235 = sbr.rel (%p232_p3) target bundleno = 2165 (0x875), region = 36 }
   0xc   : > { %p285_p4 = scmp.lt.s32.totalorder %s4109_s15, 1  ;;  %v4119_v2 = vmov 0   ;;  %vm329_vm0 = vcmask 31744   ;;  %v4120_v14 = vmov -inf   ;;  %vm396_vm1 = vcmask 64512  }
   0xd   : > { %4030 = vset.pattern.permute.xlu1 %v4119_v2  ;;  %331 = vst.msk [vmem:[#allocation2 + $0x8] sm:$0xff] %vm329_vm0, %v4120_v14  ;;  %330 = vst.msk [vmem:[#allocation2] sm:$0xff] %vm329_vm0, %v4120_v14 }
   0xe   : > { %s8312_s15 = smov (!%p285_p4, %s4109_s15), 1  ;;  %332 = vst.msk [vmem:[#allocation2 + $0x10] sm:$0xff] %vm329_vm0, %v4120_v14  ;;  %333 = vst.msk [vmem:[#allocation2 + $0x18] sm:$0xff] %vm329_vm0, %v4120_v14 }
   0xf   : > { %s3929_s19 = sshll.u32 %s8312_s15, 3  ;;  %s3954_s26 = sshll.u32 %s8312_s15, 7  ;;  %334 = vst.msk [vmem:[#allocation2 + $0x20] sm:$0xff] %vm329_vm0, %v4120_v14  ;;  %335 = vst.msk [vmem:[#allocation2 + $0x28] sm:$0xff] %vm329_vm0, %v4120_v14 }
  0x10   : > { %s291_s22 = scalar_lea.vmem %s7603_s0, %s3929_s19  ;;  %s298_s25 = scalar_lea.vmem %s7604_s1, %s3929_s19  ;;  %336 = vst.msk [vmem:[#allocation2 + $0x30] sm:$0xff] %vm329_vm0, %v4120_v14  ;;  %337 = vst.msk [vmem:[#allocation2 + $0x38] sm:$0xff] %vm329_vm0, %v4120_v14 }
  0x11   : > { %v362_v0 = vld [vmem:[%s291_s22] sm:$0xff]  ;;  %s4180_s29 = scalar_lea.vmem %s7605_s2, %s3954_s26  ;;  %338 = vst.msk [vmem:[#allocation2 + $0x40] sm:$0xff] %vm329_vm0, %v4120_v14  ;;  %339 = vst.msk [vmem:[#allocation2 + $0x48] sm:$0xff] %vm329_vm0, %v4120_v14  ;;  %s314_s6 = scalar_lea.vmem %s7606_s3, %s8312_s15 }
  0x12   : > { %v363_v1 = vld [vmem:[%s298_s25] sm:$0xff]  ;;  %364 = vxpose.xlu0.b32.start.end [1/1] (short) %v362_v0, 128  ;;  %v607_v3 = vld [vmem:[%s4180_s29 + $0x8] sm:$0xff]  ;;  %v608_v4 = vld [vmem:[%s4180_s29 + $0x10] sm:$0xff]  ;;  %340 = vst.msk [vmem:[#allocation2 + $0x50] sm:$0xff] %vm329_vm0, %v4120_v14  ;;  %s7469_s9 = scalar_lea.vmem %s7607_s4, %s3954_s26 }
  0x13   : > { %3973 = vmatprep.subr.mxu0 %v363_v1  ;;  %3999 = vmatprep.subr.mxu1 %v363_v1  ;;  %v609_v5 = vld [vmem:[%s4180_s29 + $0x18] sm:$0xff]  ;;  %v610_v6 = vld [vmem:[%s4180_s29 + $0x20] sm:$0xff]  ;;  %v611_v7 = vld [vmem:[%s4180_s29 + $0x28] sm:$0xff]  ;;  %341 = vst.msk [vmem:[#allocation2 + $0x58] sm:$0xff] %vm329_vm0, %v4120_v14 }
  0x14   : > { %3974 = vmatpush3.msra.mxu0 %v363_v1  ;;  %4000 = vmatpush3.msra.mxu1 %v363_v1  ;;  %v612_v8 = vld [vmem:[%s4180_s29 + $0x30] sm:$0xff]  ;;  %v613_v9 = vld [vmem:[%s4180_s29 + $0x38] sm:$0xff]  ;;  %v614_v10 = vld [vmem:[%s4180_s29 + $0x40] sm:$0xff]  ;;  %342 = vst.msk [vmem:[#allocation2 + $0x60] sm:$0xff] %vm329_vm0, %v4120_v14 }
  0x15   : > { %629 = vperm.xlu1 %4030, %v607_v3   ;;  %v615_v11 = vld [vmem:[%s4180_s29 + $0x48] sm:$0xff]  ;;  %v616_v12 = vld [vmem:[%s4180_s29 + $0x50] sm:$0xff]  ;;  %v617_v13 = vld [vmem:[%s4180_s29 + $0x58] sm:$0xff]  ;;  %343 = vst.msk [vmem:[#allocation2 + $0x68] sm:$0xff] %vm329_vm0, %v4120_v14 }
  0x16   : > { %344 = vst.msk [vmem:[#allocation2 + $0x70] sm:$0xff] %vm329_vm0, %v4120_v14  ;;  %345 = vst.msk [vmem:[#allocation2 + $0x78] sm:$0xff] %vm329_vm0, %v4120_v14  ;;  %v618_v15 = vld [vmem:[%s4180_s29 + $0x60] sm:$0xff]  ;;  %v619_v16 = vld [vmem:[%s4180_s29 + $0x68] sm:$0xff] }
  0x17   : > { %v620_v17 = vld [vmem:[%s4180_s29 + $0x70] sm:$0xff]  ;;  %v621_v18 = vld [vmem:[%s4180_s29 + $0x78] sm:$0xff]  ;;  %v606_v19 = vld [vmem:[%s4180_s29] sm:$0xff] }
  0x18   : > { %v4214_v20 = vld [vmem:[#allocation2 + $0x8] sm:$0xff]  ;;  %v4218_v22 = vld [vmem:[#allocation2 + $0x18] sm:$0xff]  ;;  %v4237_v32 = vld [vmem:[#allocation2] sm:$0xff] }
  0x19   : > { %634 = vperm.xlu1 %4030, %v608_v4   ;;  %v831_v21 = vsel %vm329_vm0, %v4214_v20, -inf  ;;  %v837_v23 = vsel %vm329_vm0, %v4218_v22, -inf  ;;  %v4222_v24 = vld [vmem:[#allocation2 + $0x28] sm:$0xff]  ;;  %v4226_v26 = vld [vmem:[#allocation2 + $0x38] sm:$0xff]  ;;  %v828_v35 = vsel %vm329_vm0, %v4237_v32, -inf  ;;  %v4258_v50 = vld [vmem:[#allocation2 + $0x10] sm:$0xff]  ;;  %v741_v4 = vlaneseq }
  0x1a   : > { %v843_v25 = vsel %vm329_vm0, %v4222_v24, -inf  ;;  %v849_v27 = vsel %vm329_vm0, %v4226_v26, -inf  ;;  %v4230_v28 = vld [vmem:[#allocation2 + $0x48] sm:$0xff]  ;;  %v4234_v31 = vld [vmem:[#allocation2 + $0x58] sm:$0xff]  ;;  %v834_v51 = vsel %vm329_vm0, %v4258_v50, -inf  ;;  %v4266_v54 = vld [vmem:[#allocation2 + $0x20] sm:$0xff] }
  0x1b   : > { %v855_v29 = vsel %vm329_vm0, %v4230_v28, -inf  ;;  %v861_v33 = vsel %vm329_vm0, %v4234_v31, -inf  ;;  %v840_v55 = vsel %vm329_vm0, %v4266_v54, -inf  ;;  %v4270_v56 = vld [vmem:[#allocation2 + $0x30] sm:$0xff]  ;;  %v4274_v58 = vld [vmem:[#allocation2 + $0x40] sm:$0xff] }
  0x1c   : > { %v4262_v52 = vld [vmem:[#allocation2 + $0x68] sm:$0xff]  ;;  %v846_v57 = vsel %vm329_vm0, %v4270_v56, -inf  ;;  %v852_v59 = vsel %vm329_vm0, %v4274_v58, -inf  ;;  %v4278_v60 = vld [vmem:[#allocation2 + $0x50] sm:$0xff]  ;;  %v4282_v62 = vld [vmem:[#allocation2 + $0x60] sm:$0xff] }
  0x1d   : > { %639 = vperm.xlu1 %4030, %v609_v5   ;;  %v867_v53 = vsel %vm329_vm0, %v4262_v52, -inf  ;;  %v858_v61 = vsel %vm329_vm0, %v4278_v60, -inf  ;;  %v864_v63 = vsel %vm329_vm0, %v4282_v62, -inf }
  0x21   : > { %644 = vperm.xlu1 %4030, %v610_v6  }
  0x25   : > { %649 = vperm.xlu1 %4030, %v611_v7   ;;  %v4290_v7 = vand.u32 127, %v741_v4 }
  0x27   : > { %7800 = vst [vmem:[#allocation4_spill] sm:$0xff] %v4290_v7  ;;  %vm746_vm2 = vcmp.lt.s32.totalorder %v4290_v7, 16 }
  0x29   : > { %654 = vperm.xlu1 %4030, %v612_v8  }
  0x2d   : > { %659 = vperm.xlu1 %4030, %v613_v9   ;;  %v4292_v9 = vld [vmem:[%s314_s6] ss:$0 sm:$0xff] }
  0x31   : > { %664 = vperm.xlu1 %4030, %v614_v10  }
  0x35   : > { %669 = vperm.xlu1 %4030, %v615_v11  }
  0x39   : > { %674 = vperm.xlu1 %4030, %v616_v12  }
  0x3b   : > { %4029 = vset.pattern.permute.xlu0 %v4119_v2 }
  0x3d   : > { %679 = vperm.xlu1 %4030, %v617_v13  }
  0x41   : > { %684 = vperm.xlu1 %4030, %v618_v15  }
  0x45   : > { %689 = vperm.xlu1 %4030, %v619_v16  }
  0x49   : > { %694 = vperm.xlu1 %4030, %v620_v17  }
  0x4d   : > { %699 = vperm.xlu1 %4030, %v621_v18  }
  0x71   : > { %832 = vmax.xlane.f32.xlu1 %v831_v21 }
  0x75   : > { %838 = vmax.xlane.f32.xlu1 %v837_v23 }
  0x77   : > { %624 = vperm.xlu0 %4029, %v606_v19  }
  0x79   : > { %844 = vmax.xlane.f32.xlu1 %v843_v25 }
  0x7d   : > { %850 = vmax.xlane.f32.xlu1 %v849_v27 }
  0x81   : > { %856 = vmax.xlane.f32.xlu1 %v855_v29 }
  0x85   : > { %862 = vmax.xlane.f32.xlu1 %v861_v33 }
  0x89   : > { %868 = vmax.xlane.f32.xlu1 %v867_v53 }
  0x8e   : > { %v380_v30 = vpop.trf.xlu0 }
  0x8f   : > { %3975 = vmatprep.mubr.msk.f32.mxu0 %vm396_vm1, %v380_v30 }
  0x90   : > { %v630_v0 = vpop.permute.xlu1 %629 }
  0x92   : > { %v381_v34 = vpop.trf.xlu0 }
  0x93   : > { %3976 = vmatmul.mubr.msk.f32.vlgmr.msra.gmra.mxu0 %vm396_vm1, %v381_v34 }
  0x94   : > { %v635_v1 = vpop.permute.xlu1 %634 }
  0x96   : > { %v382_v36 = vpop.trf.xlu0  ;;  %829 = vmax.xlane.f32.xlu0 %v828_v35  ;;  %v4121_v35 = vmov 4294967295  }
  0x97   : > { %3978 = vmatprep.mubr.msk.f32.mxu0 %vm396_vm1, %v382_v36  ;;  %347 = vst.msk [vmem:[#allocation3 + $0x8] sm:$0xff] %vm329_vm0, %v4121_v35  ;;  %346 = vst.msk [vmem:[#allocation3] sm:$0xff] %vm329_vm0, %v4121_v35 }
  0x98   : > { %v640_v2 = vpop.permute.xlu1 %639  ;;  %348 = vst.msk [vmem:[#allocation3 + $0x10] sm:$0xff] %vm329_vm0, %v4121_v35  ;;  %349 = vst.msk [vmem:[#allocation3 + $0x18] sm:$0xff] %vm329_vm0, %v4121_v35 }
  0x99   : > { %350 = vst.msk [vmem:[#allocation3 + $0x20] sm:$0xff] %vm329_vm0, %v4121_v35  ;;  %351 = vst.msk [vmem:[#allocation3 + $0x28] sm:$0xff] %vm329_vm0, %v4121_v35 }
  0x9a   : > { %v383_v37 = vpop.trf.xlu0  ;;  %835 = vmax.xlane.f32.xlu0 %v834_v51  ;;  %352 = vst.msk [vmem:[#allocation3 + $0x30] sm:$0xff] %vm329_vm0, %v4121_v35  ;;  %353 = vst.msk [vmem:[#allocation3 + $0x38] sm:$0xff] %vm329_vm0, %v4121_v35 }
  0x9b   : > { %3979 = vmatmul.mubr.msk.f32.gmra.mxu0 %vm396_vm1, %v383_v37  ;;  %354 = vst.msk [vmem:[#allocation3 + $0x40] sm:$0xff] %vm329_vm0, %v4121_v35  ;;  %355 = vst.msk [vmem:[#allocation3 + $0x48] sm:$0xff] %vm329_vm0, %v4121_v35 }
  0x9c   : > { %v645_v3 = vpop.permute.xlu1 %644  ;;  %356 = vst.msk [vmem:[#allocation3 + $0x50] sm:$0xff] %vm329_vm0, %v4121_v35  ;;  %357 = vst.msk [vmem:[#allocation3 + $0x58] sm:$0xff] %vm329_vm0, %v4121_v35 }
  0x9d   : > { %358 = vst.msk [vmem:[#allocation3 + $0x60] sm:$0xff] %vm329_vm0, %v4121_v35  ;;  %359 = vst.msk [vmem:[#allocation3 + $0x68] sm:$0xff] %vm329_vm0, %v4121_v35 }
  0x9e   : > { %v384_v38 = vpop.trf.xlu0  ;;  %841 = vmax.xlane.f32.xlu0 %v840_v55  ;;  %360 = vst.msk [vmem:[#allocation3 + $0x70] sm:$0xff] %vm329_vm0, %v4121_v35  ;;  %361 = vst.msk [vmem:[#allocation3 + $0x78] sm:$0xff] %vm329_vm0, %v4121_v35 }
  0x9f   : > { %3981 = vmatprep.mubr.msk.f32.mxu0 %vm396_vm1, %v384_v38 }
  0xa0   : > { %v650_v5 = vpop.permute.xlu1 %649 }
  0xa2   : > { %v385_v39 = vpop.trf.xlu0  ;;  %847 = vmax.xlane.f32.xlu0 %v846_v57 }
  0xa3   : > { %3982 = vmatmul.mubr.msk.f32.gmra.mxu0 %vm396_vm1, %v385_v39 }
  0xa4   : > { %v4294_v14 = vpop.permute.xlu1 %654 }
  0xa6   : > { %v386_v40 = vpop.trf.xlu0  ;;  %853 = vmax.xlane.f32.xlu0 %v852_v59 }
  0xa7   : > { %3984 = vmatprep.mubr.msk.f32.mxu0 %vm396_vm1, %v386_v40 }
  0xa8   : > { %v660_v23 = vpop.permute.xlu1 %659 }
  0xaa   : > { %v387_v41 = vpop.trf.xlu0  ;;  %859 = vmax.xlane.f32.xlu0 %v858_v61 }
  0xab   : > { %3985 = vmatmul.mubr.msk.f32.gmra.mxu0 %vm396_vm1, %v387_v41 }
  0xac   : > { %v665_v38 = vpop.permute.xlu1 %664 }
  0xae   : > { %v388_v42 = vpop.trf.xlu0  ;;  %865 = vmax.xlane.f32.xlu0 %v864_v63 }
  0xaf   : > { %3987 = vmatprep.mubr.msk.f32.mxu1 %vm396_vm1, %v388_v42 }
  0xb2   : > { %v389_v43 = vpop.trf.xlu0 }
  0xb3   : > { %3988 = vmatmul.mubr.msk.f32.vlgmr.msra.gmra.mxu1 %vm396_vm1, %v389_v43 }
  0xb6   : > { %v390_v44 = vpop.trf.xlu0 }
  0xb7   : > { %3990 = vmatprep.mubr.msk.f32.mxu1 %vm396_vm1, %v390_v44 }
  0xba   : > { %v391_v45 = vpop.trf.xlu0 }
  0xbb   : > { %3991 = vmatmul.mubr.msk.f32.gmra.mxu1 %vm396_vm1, %v391_v45 }
  0xbe   : > { %v392_v46 = vpop.trf.xlu0 }
  0xbf   : > { %3993 = vmatprep.mubr.msk.f32.mxu1 %vm396_vm1, %v392_v46 }
  0xc2   : > { %v393_v47 = vpop.trf.xlu0 }
  0xc3   : > { %3994 = vmatmul.mubr.msk.f32.gmra.mxu1 %vm396_vm1, %v393_v47  ;;  %v670_v47 = vpop.permute.xlu1 %669 }
  0xc6   : > { %v394_v48 = vpop.trf.xlu0 }
  0xc7   : > { %3996 = vmatprep.mubr.msk.f32.mxu1 %vm396_vm1, %v394_v48  ;;  %v675_v63 = vpop.permute.xlu1 %674 }
  0xca   : > { %v395_v49 = vpop.trf.xlu0 }
  0xcb   : > { %3997 = vmatmul.mubr.msk.f32.gmra.mxu1 %vm396_vm1, %v395_v49 }
  0xf2   : > { %v625_v11 = vpop.permute.xlu0 %624 }
 0x153   : > { %v3977_v6 = vpop.f32.mrf.mxu0 }
 0x154   : > { %v591_v8 = vmul.f32 2.0, %v3977_v6  ;;  %v680_v6 = vpop.permute.xlu1 %679 }
 0x155   : > { %v511_v10 = vpop.f32.mrf.mxu0 }
 0x156   : > { %v703_v12 = vsub.f32 %v591_v8, %v630_v0  ;;  %v590_v13 = vmul.f32 2.0, %v511_v10 }
 0x158   : > { %v702_v15 = vsub.f32 %v590_v13, %v625_v11  ;;  %v726_v16 = vsub.f32 %v703_v12, %v4292_v9 }
 0x15a   : > { %v4300_v17 = vsel %vm746_vm2, %v726_v16, -1e+30  ;;  %v725_v18 = vsub.f32 %v702_v15, %v4292_v9 }
 0x15b   : > { %7801 = vst [vmem:[#allocation5_spill] sm:$0xff] %v4300_v17  ;;  %797 = vmax.xlane.f32.xlu1 %v4300_v17  ;;  %v3980_v19 = vpop.f32.mrf.mxu0 }
 0x15c   : > { %v593_v21 = vmul.f32 2.0, %v3980_v19  ;;  %v4306_v30 = vsel %vm746_vm2, %v725_v18, -1e+30  ;;  %v685_v18 = vpop.permute.xlu1 %684 }
 0x15d   : > { %v521_v25 = vpop.f32.mrf.mxu0  ;;  %7802 = vst [vmem:[#allocation6_spill] sm:$0xff] %v4306_v30 }
 0x15e   : > { %v705_v27 = vsub.f32 %v593_v21, %v640_v2  ;;  %v592_v29 = vmul.f32 2.0, %v521_v25 }
 0x15f   : > { %795 = vmax.xlane.f32.xlu1 %v4306_v30 }
 0x160   : > { %v704_v33 = vsub.f32 %v592_v29, %v635_v1  ;;  %v728_v34 = vsub.f32 %v705_v27, %v4292_v9  ;;  %v690_v35 = vpop.permute.xlu1 %689 }
 0x162   : > { %v4328_v36 = vsel %vm746_vm2, %v728_v34, -1e+30  ;;  %v727_v37 = vsub.f32 %v704_v33, %v4292_v9 }
 0x163   : > { %7803 = vst [vmem:[#allocation7_spill] sm:$0xff] %v4328_v36  ;;  %v3983_v39 = vpop.f32.mrf.mxu0  ;;  %801 = vmax.xlane.f32.xlu1 %v4328_v36 }
 0x164   : > { %v595_v40 = vmul.f32 2.0, %v3983_v39  ;;  %v4334_v44 = vsel %vm746_vm2, %v727_v37, -1e+30 }
 0x165   : > { %v531_v41 = vpop.f32.mrf.mxu0  ;;  %7804 = vst [vmem:[#allocation8_spill] sm:$0xff] %v4334_v44 }
 0x166   : > { %v707_v42 = vsub.f32 %v595_v40, %v650_v5  ;;  %v594_v43 = vmul.f32 2.0, %v531_v41 }
 0x167   : > { %799 = vmax.xlane.f32.xlu1 %v4334_v44 }
 0x168   : > { %v706_v45 = vsub.f32 %v594_v43, %v645_v3  ;;  %v730_v46 = vsub.f32 %v707_v42, %v4292_v9 }
 0x16a   : > { %v4340_v48 = vsel %vm746_vm2, %v730_v46, -1e+30  ;;  %v729_v49 = vsub.f32 %v706_v45, %v4292_v9  ;;  %v695_v46 = vpop.permute.xlu1 %694 }
 0x16b   : > { %7805 = vst [vmem:[#allocation9_spill] sm:$0xff] %v4340_v48  ;;  %v3986_v51 = vpop.f32.mrf.mxu0  ;;  %805 = vmax.xlane.f32.xlu1 %v4340_v48 }
 0x16c   : > { %v597_v53 = vmul.f32 2.0, %v3986_v51  ;;  %v4346_v55 = vsel %vm746_vm2, %v729_v49, -1e+30 }
 0x16d   : > { %7806 = vst [vmem:[#allocation10_spill] sm:$0xff] %v4346_v55  ;;  %803 = vmax.xlane.f32.xlu0 %v4346_v55  ;;  %v541_v57 = vpop.f32.mrf.mxu0 }
 0x16e   : > { %v709_v59 = vsub.f32 %v597_v53, %v660_v23  ;;  %v596_v61 = vmul.f32 2.0, %v541_v57 }
 0x170   : > { %v708_v0 = vsub.f32 %v596_v61, %v4294_v14  ;;  %v732_v1 = vsub.f32 %v709_v59, %v4292_v9 }
 0x172   : > { %v4353_v2 = vsel %vm746_vm2, %v732_v1, -1e+30  ;;  %v731_v3 = vsub.f32 %v708_v0, %v4292_v9 }
 0x173   : > { %7807 = vst [vmem:[#allocation11_spill] sm:$0xff] %v4353_v2  ;;  %v3989_v4 = vpop.f32.mrf.mxu1  ;;  %809 = vmax.xlane.f32.xlu1 %v4353_v2 }
 0x174   : > { %v599_v5 = vmul.f32 2.0, %v3989_v4  ;;  %v4359_v12 = vsel %vm746_vm2, %v731_v3, -1e+30 }
 0x175   : > { %v551_v8 = vpop.f32.mrf.mxu1  ;;  %7808 = vst [vmem:[#allocation12_spill] sm:$0xff] %v4359_v12 }
 0x176   : > { %v711_v10 = vsub.f32 %v599_v5, %v670_v47  ;;  %v598_v11 = vmul.f32 2.0, %v551_v8 }
 0x177   : > { %807 = vmax.xlane.f32.xlu1 %v4359_v12 }
 0x178   : > { %v710_v13 = vsub.f32 %v598_v11, %v665_v38  ;;  %v734_v14 = vsub.f32 %v711_v10, %v4292_v9  ;;  %v4407_v11 = vld [vmem:[#allocation2 + $0x70] sm:$0xff] }
 0x17a   : > { %v4365_v15 = vsel %vm746_vm2, %v734_v14, -1e+30  ;;  %v733_v16 = vsub.f32 %v710_v13, %v4292_v9 }
 0x17b   : > { %7809 = vst [vmem:[#allocation13_spill] sm:$0xff] %v4365_v15  ;;  %v3992_v19 = vpop.f32.mrf.mxu1  ;;  %813 = vmax.xlane.f32.xlu1 %v4365_v15 }
 0x17c   : > { %v601_v21 = vmul.f32 2.0, %v3992_v19  ;;  %v4371_v29 = vsel %vm746_vm2, %v733_v16, -1e+30  ;;  %v870_v16 = vsel %vm329_vm0, %v4407_v11, -inf }
 0x17d   : > { %v561_v23 = vpop.f32.mrf.mxu1  ;;  %7810 = vst [vmem:[#allocation14_spill] sm:$0xff] %v4371_v29 }
 0x17e   : > { %v713_v25 = vsub.f32 %v601_v21, %v680_v6  ;;  %v600_v27 = vmul.f32 2.0, %v561_v23  ;;  %v4399_v6 = vld [vmem:[#allocation2 + $0x78] sm:$0xff]  ;;  %v830_v23 = vpop.xlane.xlu0 %829 }
 0x17f   : > { %811 = vmax.xlane.f32.xlu1 %v4371_v29  ;;  %v873_v14 = vsel %vm329_vm0, %v4399_v6, -inf }
 0x180   : > { %v712_v33 = vsub.f32 %v600_v27, %v675_v63  ;;  %v736_v34 = vsub.f32 %v713_v25, %v4292_v9  ;;  %v700_v63 = vpop.permute.xlu1 %699 }
 0x182   : > { %v4377_v37 = vsel %vm746_vm2, %v736_v34, -1e+30  ;;  %v735_v38 = vsub.f32 %v712_v33, %v4292_v9  ;;  %v836_v27 = vpop.xlane.xlu0 %835 }
 0x183   : > { %7811 = vst [vmem:[#allocation15_spill] sm:$0xff] %v4377_v37  ;;  %v3995_v39 = vpop.f32.mrf.mxu1  ;;  %817 = vmax.xlane.f32.xlu1 %v4377_v37 }
 0x184   : > { %v603_v40 = vmul.f32 2.0, %v3995_v39  ;;  %v4383_v45 = vsel %vm746_vm2, %v735_v38, -1e+30 }
 0x185   : > { %v571_v41 = vpop.f32.mrf.mxu1  ;;  %7812 = vst [vmem:[#allocation16_spill] sm:$0xff] %v4383_v45 }
 0x186   : > { %v715_v42 = vsub.f32 %v603_v40, %v690_v35  ;;  %v602_v43 = vmul.f32 2.0, %v571_v41  ;;  %v842_v34 = vpop.xlane.xlu0 %841 }
 0x187   : > { %815 = vmax.xlane.f32.xlu1 %v4383_v45 }
 0x188   : > { %v714_v47 = vsub.f32 %v602_v43, %v685_v18  ;;  %v738_v49 = vsub.f32 %v715_v42, %v4292_v9  ;;  %v833_v18 = vpop.xlane.xlu1 %832  ;;  %v4432_v42 = vld [vmem:[#allocation3 + $0x8] sm:$0xff] }
 0x189   : > { %7818 = vst [vmem:[#allocation22_spill] sm:$0xff] %v4432_v42 }
 0x18a   : > { %v4389_v51 = vsel %vm746_vm2, %v738_v49, -1e+30  ;;  %v737_v53 = vsub.f32 %v714_v47, %v4292_v9  ;;  %v4426_v38 = vpop.xlane.xlu0 %847 }
 0x18b   : > { %7813 = vst [vmem:[#allocation17_spill] sm:$0xff] %v4389_v51  ;;  %v3998_v57 = vpop.f32.mrf.mxu1  ;;  %821 = vmax.xlane.f32.xlu1 %v4389_v51 }
 0x18c   : > { %v605_v59 = vmul.f32 2.0, %v3998_v57  ;;  %v4395_v61 = vsel %vm746_vm2, %v737_v53, -1e+30 }
 0x18d   : > { %7814 = vst [vmem:[#allocation18_spill] sm:$0xff] %v4395_v61  ;;  %819 = vmax.xlane.f32.xlu0 %v4395_v61  ;;  %v581_v0 = vpop.f32.mrf.mxu1 }
 0x18e   : > { %v717_v1 = vsub.f32 %v605_v59, %v700_v63  ;;  %v604_v3 = vmul.f32 2.0, %v581_v0  ;;  %v4428_v40 = vpop.xlane.xlu0 %853  ;;  %v4448_v59 = vld [vmem:[#allocation3] sm:$0xff] }
 0x18f   : > { %7820 = vst [vmem:[#allocation24_spill] sm:$0xff] %v4448_v59 }
 0x190   : > { %v716_v4 = vsub.f32 %v604_v3, %v695_v46  ;;  %v740_v5 = vsub.f32 %v717_v1, %v4292_v9 }
 0x192   : > { %v4403_v8 = vsel %vm746_vm2, %v740_v5, -1e+30  ;;  %v739_v10 = vsub.f32 %v716_v4, %v4292_v9  ;;  %v839_v9 = vpop.xlane.xlu1 %838  ;;  %v4450_v63 = vpop.xlane.xlu0 %859 }
 0x193   : > { %7815 = vst [vmem:[#allocation19_spill] sm:$0xff] %v4403_v8  ;;  %825 = vmax.xlane.f32.xlu1 %v4403_v8 }
 0x194   : > { %v4411_v13 = vsel %vm746_vm2, %v739_v10, -1e+30 }
 0x195   : > { %7816 = vst [vmem:[#allocation20_spill] sm:$0xff] %v4411_v13  ;;  %823 = vmax.xlane.f32.xlu0 %v4411_v13 }
 0x196   : > { %v845_v19 = vpop.xlane.xlu1 %844 }
 0x197   : > { %874 = vmax.xlane.f32.xlu1 %v873_v14 }
 0x199   : > { %871 = vmax.xlane.f32.xlu0 %v870_v16  ;;  %v4470_v16 = vld [vmem:[#allocation3 + $0x18] sm:$0xff] }
 0x19a   : > { %v4418_v21 = vpop.xlane.xlu1 %850  ;;  %7822 = vst [vmem:[#allocation26_spill] sm:$0xff] %v4470_v16 }
 0x19e   : > { %v4420_v25 = vpop.xlane.xlu1 %856 }
 0x1a2   : > { %v4422_v33 = vpop.xlane.xlu1 %862 }
 0x1a6   : > { %v4424_v35 = vpop.xlane.xlu1 %868 }
 0x1e4   : > { %v798_v39 = vpop.xlane.xlu1 %797 }
 0x1e5   : > { %v4430_v41 = vmax.f32 %v798_v39, %v833_v18  ;;  %v4481_v39 = vpop.xlane.xlu0 %865 }
 0x1e7   : > { %7817 = vst [vmem:[#allocation21_spill] sm:$0xff] %v4430_v41  ;;  %vm893_vm3 = vcmp.eq.f32.partialorder %v4300_v17, %v4430_v41  ;;  %vm1149_vm4 = vcmp.eq.f32.partialorder %v4214_v20, %v4430_v41 }
 0x1e8   : > { %v796_v43 = vpop.xlane.xlu1 %795  ;;  %v4439_v46 = vsel %vm893_vm3, %v4290_v7, 2147483647  ;;  %v1165_v47 = vsel %vm1149_vm4, %v4432_v42, 2147483647 }
 0x1e9   : > { %v4442_v49 = vmax.f32 %v796_v43, %v830_v23  ;;  %v939_v53 = vshra.s32 %v4439_v46, 16  ;;  %v4446_v57 = vsel %vm329_vm0, %v1165_v47, 2147483647 }
 0x1ea   : > { %v1197_v0 = vshra.s32 %v4446_v57, 16 }
 0x1eb   : > { %7819 = vst [vmem:[#allocation23_spill] sm:$0xff] %v4442_v49  ;;  %v4453_v20 = vcvt.s32.f32 %v939_v53  ;;  %vm892_vm5 = vcmp.eq.f32.partialorder %v4306_v30, %v4442_v49  ;;  %vm1148_vm6 = vcmp.eq.f32.partialorder %v4237_v32, %v4442_v49 }
 0x1ec   : > { %v802_v1 = vpop.xlane.xlu1 %801  ;;  %v4460_v3 = vsel %vm892_vm5, %v4290_v7, 2147483647  ;;  %v1164_v4 = vsel %vm1148_vm6, %v4448_v59, 2147483647  ;;  %v4472_v18 = vcvt.s32.f32 %v1197_v0 }
 0x1ed   : > { %v4463_v5 = vmax.f32 %v802_v1, %v839_v9  ;;  %942 = vmin.xlane.f32.xlu1 %v4453_v20  ;;  %v925_v10 = vshra.s32 %v4460_v3, 16  ;;  %v4468_v14 = vsel %vm329_vm0, %v1164_v4, 2147483647 }
 0x1ee   : > { %v1182_v23 = vshra.s32 %v4468_v14, 16 }
 0x1ef   : > { %7821 = vst [vmem:[#allocation25_spill] sm:$0xff] %v4463_v5  ;;  %v4474_v32 = vcvt.s32.f32 %v925_v10  ;;  %vm895_vm7 = vcmp.eq.f32.partialorder %v4328_v36, %v4463_v5  ;;  %vm1151_vm8 = vcmp.eq.f32.partialorder %v4218_v22, %v4463_v5  ;;  %v4495_v22 = vld [vmem:[#allocation3 + $0x10] sm:$0xff] }
 0x1f0   : > { %v800_v9 = vpop.xlane.xlu1 %799  ;;  %v4484_v43 = vsel %vm895_vm7, %v4290_v7, 2147483647  ;;  %v1167_v47 = vsel %vm1151_vm8, %v4470_v16, 2147483647  ;;  %7824 = vst [vmem:[#allocation28_spill] sm:$0xff] %v4495_v22  ;;  %v4500_v5 = vcvt.s32.f32 %v1182_v23 }
 0x1f1   : > { %v4487_v53 = vmax.f32 %v800_v9, %v836_v27  ;;  %1200 = vmin.xlane.f32.xlu1 %v4472_v18  ;;  %928 = vmin.xlane.f32.xlu0 %v4474_v32  ;;  %v967_v0 = vshra.s32 %v4484_v43, 16  ;;  %v4493_v1 = vsel %vm329_vm0, %v1167_v47, 2147483647 }
 0x1f2   : > { %v1227_v4 = vshra.s32 %v4493_v1, 16 }
 0x1f3   : > { %7823 = vst [vmem:[#allocation27_spill] sm:$0xff] %v4487_v53  ;;  %v4498_v10 = vcvt.s32.f32 %v967_v0  ;;  %vm894_vm9 = vcmp.eq.f32.partialorder %v4334_v44, %v4487_v53  ;;  %vm1150_vm10 = vcmp.eq.f32.partialorder %v4258_v50, %v4487_v53  ;;  %v4520_v50 = vld [vmem:[#allocation3 + $0x28] sm:$0xff] }
 0x1f4   : > { %v806_v27 = vpop.xlane.xlu1 %805  ;;  %v4507_v9 = vsel %vm894_vm9, %v4290_v7, 2147483647  ;;  %v1166_v47 = vsel %vm1150_vm10, %v4495_v22, 2147483647  ;;  %v4518_v44 = vcvt.s32.f32 %v1227_v4  ;;  %7826 = vst [vmem:[#allocation30_spill] sm:$0xff] %v4520_v50  ;;  %v4538_v4 = vld [vmem:[#allocation3 + $0x20] sm:$0xff] }
 0x1f5   : > { %v4510_v49 = vmax.f32 %v806_v27, %v845_v19  ;;  %970 = vmin.xlane.f32.xlu1 %v4498_v10  ;;  %1185 = vmin.xlane.f32.xlu0 %v4500_v5  ;;  %v953_v23 = vshra.s32 %v4507_v9, 16  ;;  %v4516_v0 = vsel %vm329_vm0, %v1166_v47, 2147483647  ;;  %7828 = vst [vmem:[#allocation32_spill] sm:$0xff] %v4538_v4 }
 0x1f6   : > { %v804_v41 = vpop.xlane.xlu0 %803  ;;  %v1212_v19 = vshra.s32 %v4516_v0, 16 }
 0x1f7   : > { %7825 = vst [vmem:[#allocation29_spill] sm:$0xff] %v4510_v49  ;;  %v4522_v53 = vmax.f32 %v804_v41, %v842_v34  ;;  %v4524_v16 = vcvt.s32.f32 %v953_v23  ;;  %vm897_vm11 = vcmp.eq.f32.partialorder %v4340_v48, %v4510_v49  ;;  %vm1153_vm12 = vcmp.eq.f32.partialorder %v4222_v24, %v4510_v49 }
 0x1f8   : > { %v4530_v27 = vsel %vm897_vm11, %v4290_v7, 2147483647  ;;  %v1169_v41 = vsel %vm1153_vm12, %v4520_v50, 2147483647  ;;  %v4549_v23 = vcvt.s32.f32 %v1212_v19  ;;  %v4565_v19 = vld [vmem:[#allocation3 + $0x38] sm:$0xff] }
 0x1f9   : > { %7827 = vst [vmem:[#allocation31_spill] sm:$0xff] %v4522_v53  ;;  %1230 = vmin.xlane.f32.xlu1 %v4518_v44  ;;  %956 = vmin.xlane.f32.xlu0 %v4524_v16  ;;  %v995_v34 = vshra.s32 %v4530_v27, 16  ;;  %v4541_v47 = vsel %vm329_vm0, %v1169_v41, 2147483647  ;;  %vm896_vm13 = vcmp.eq.f32.partialorder %v4346_v55, %v4522_v53  ;;  %vm1152_vm14 = vcmp.eq.f32.partialorder %v4266_v54, %v4522_v53 }
 0x1fa   : > { %v1257_v49 = vshra.s32 %v4541_v47, 16  ;;  %v4553_v48 = vsel %vm896_vm13, %v4290_v7, 2147483647  ;;  %v1168_v41 = vsel %vm1152_vm14, %v4538_v4, 2147483647  ;;  %7830 = vst [vmem:[#allocation34_spill] sm:$0xff] %v4565_v19 }
 0x1fb   : > { %v4547_v24 = vcvt.s32.f32 %v995_v34  ;;  %v981_v22 = vshra.s32 %v4553_v48, 16  ;;  %v4563_v54 = vsel %vm329_vm0, %v1168_v41, 2147483647 }
 0x1fc   : > { %v810_v50 = vpop.xlane.xlu1 %809  ;;  %v4567_v34 = vcvt.s32.f32 %v1257_v49  ;;  %v1242_v4 = vshra.s32 %v4563_v54, 16 }
 0x1fd   : > { %v4558_v36 = vmax.f32 %v810_v50, %v4418_v21  ;;  %998 = vmin.xlane.f32.xlu1 %v4547_v24  ;;  %1215 = vmin.xlane.f32.xlu0 %v4549_v23  ;;  %v4569_v53 = vcvt.s32.f32 %v981_v22 }
 0x1fe   : > { %v4594_v59 = vcvt.s32.f32 %v1242_v4 }
 0x1ff   : > { %7829 = vst [vmem:[#allocation33_spill] sm:$0xff] %v4558_v36  ;;  %vm899_vm15 = vcmp.eq.f32.partialorder %v4353_v2, %v4558_v36  ;;  %vm1155_vm1 = vcmp.eq.f32.partialorder %v4226_v26, %v4558_v36  ;;  %v4589_v2 = vld [vmem:[#allocation3 + $0x30] sm:$0xff] }
 0x200   : > { %v808_v21 = vpop.xlane.xlu1 %807  ;;  %v4577_v50 = vsel %vm899_vm15, %v4290_v7, 2147483647  ;;  %v1171_v41 = vsel %vm1155_vm1, %v4565_v19, 2147483647  ;;  %7832 = vst [vmem:[#allocation36_spill] sm:$0xff] %v4589_v2 }
 0x201   : > { %v4581_v55 = vmax.f32 %v808_v21, %v4426_v38  ;;  %1260 = vmin.xlane.f32.xlu1 %v4567_v34  ;;  %984 = vmin.xlane.f32.xlu0 %v4569_v53  ;;  %v1023_v49 = vshra.s32 %v4577_v50, 16  ;;  %v4587_v22 = vsel %vm329_vm0, %v1171_v41, 2147483647 }
 0x202   : > { %v1287_v26 = vshra.s32 %v4587_v22, 16 }
 0x203   : > { %7831 = vst [vmem:[#allocation35_spill] sm:$0xff] %v4581_v55  ;;  %v4592_v36 = vcvt.s32.f32 %v1023_v49  ;;  %vm898_vm2 = vcmp.eq.f32.partialorder %v4359_v12, %v4581_v55  ;;  %vm1154_vm3 = vcmp.eq.f32.partialorder %v4270_v56, %v4581_v55  ;;  %v4613_v12 = vld [vmem:[#allocation3 + $0x48] sm:$0xff] }
 0x204   : > { %v814_v38 = vpop.xlane.xlu1 %813  ;;  %v4601_v21 = vsel %vm898_vm2, %v4290_v7, 2147483647  ;;  %v1170_v41 = vsel %vm1154_vm3, %v4589_v2, 2147483647  ;;  %7834 = vst [vmem:[#allocation38_spill] sm:$0xff] %v4613_v12  ;;  %v4615_v56 = vcvt.s32.f32 %v1287_v26 }
 0x205   : > { %v4605_v19 = vmax.f32 %v814_v38, %v4420_v25  ;;  %1026 = vmin.xlane.f32.xlu1 %v4592_v36  ;;  %1245 = vmin.xlane.f32.xlu0 %v4594_v59  ;;  %v1009_v4 = vshra.s32 %v4601_v21, 16  ;;  %v4611_v49 = vsel %vm329_vm0, %v1170_v41, 2147483647 }
 0x206   : > { %v1272_v25 = vshra.s32 %v4611_v49, 16 }
 0x207   : > { %7833 = vst [vmem:[#allocation37_spill] sm:$0xff] %v4605_v19  ;;  %v4617_v55 = vcvt.s32.f32 %v1009_v4  ;;  %vm901_vm4 = vcmp.eq.f32.partialorder %v4365_v15, %v4605_v19  ;;  %vm1157_vm5 = vcmp.eq.f32.partialorder %v4230_v28, %v4605_v19  ;;  %v4637_v15 = vld [vmem:[#allocation3 + $0x40] sm:$0xff] }
 0x208   : > { %v812_v38 = vpop.xlane.xlu1 %811  ;;  %v4625_v2 = vsel %vm901_vm4, %v4290_v7, 2147483647  ;;  %v1173_v41 = vsel %vm1157_vm5, %v4613_v12, 2147483647  ;;  %7836 = vst [vmem:[#allocation40_spill] sm:$0xff] %v4637_v15  ;;  %v4642_v42 = vcvt.s32.f32 %v1272_v25 }
 0x209   : > { %v4629_v30 = vmax.f32 %v812_v38, %v4428_v40  ;;  %1290 = vmin.xlane.f32.xlu1 %v4615_v56  ;;  %1012 = vmin.xlane.f32.xlu0 %v4617_v55  ;;  %v1051_v26 = vshra.s32 %v4625_v2, 16  ;;  %v4635_v4 = vsel %vm329_vm0, %v1173_v41, 2147483647 }
 0x20a   : > { %v1317_v28 = vshra.s32 %v4635_v4, 16 }
 0x20b   : > { %7835 = vst [vmem:[#allocation39_spill] sm:$0xff] %v4629_v30  ;;  %v4640_v19 = vcvt.s32.f32 %v1051_v26  ;;  %vm900_vm6 = vcmp.eq.f32.partialorder %v4371_v29, %v4629_v30  ;;  %vm1156_vm7 = vcmp.eq.f32.partialorder %v4274_v58, %v4629_v30  ;;  %v4661_v29 = vld [vmem:[#allocation3 + $0x58] sm:$0xff] }
 0x20c   : > { %v818_v40 = vpop.xlane.xlu1 %817  ;;  %v4649_v38 = vsel %vm900_vm6, %v4290_v7, 2147483647  ;;  %v1172_v41 = vsel %vm1156_vm7, %v4637_v15, 2147483647  ;;  %7839 = vst [vmem:[#allocation43_spill] sm:$0xff] %v4661_v29  ;;  %v4663_v58 = vcvt.s32.f32 %v1317_v28 }
 0x20d   : > { %v4653_v12 = vmax.f32 %v818_v40, %v4422_v33  ;;  %1054 = vmin.xlane.f32.xlu1 %v4640_v19  ;;  %1275 = vmin.xlane.f32.xlu0 %v4642_v42  ;;  %v1037_v25 = vshra.s32 %v4649_v38, 16  ;;  %v4659_v26 = vsel %vm329_vm0, %v1172_v41, 2147483647 }
 0x20e   : > { %7838 = vst [vmem:[#allocation42_spill] sm:$0xff] %v4659_v26  ;;  %v1302_v33 = vshra.s32 %v4659_v26, 16 }
 0x20f   : > { %7837 = vst [vmem:[#allocation41_spill] sm:$0xff] %v4653_v12  ;;  %v4665_v30 = vcvt.s32.f32 %v1037_v25  ;;  %vm903_vm8 = vcmp.eq.f32.partialorder %v4377_v37, %v4653_v12  ;;  %vm1159_vm9 = vcmp.eq.f32.partialorder %v4234_v31, %v4653_v12  ;;  %v4685_v37 = vld [vmem:[#allocation3 + $0x50] sm:$0xff] }
 0x210   : > { %v816_v40 = vpop.xlane.xlu1 %815  ;;  %v4673_v15 = vsel %vm903_vm8, %v4290_v7, 2147483647  ;;  %v1175_v41 = vsel %vm1159_vm9, %v4661_v29, 2147483647  ;;  %7841 = vst [vmem:[#allocation45_spill] sm:$0xff] %v4685_v37  ;;  %v4690_v26 = vcvt.s32.f32 %v1302_v33 }
 0x211   : > { %v4677_v17 = vmax.f32 %v816_v40, %v4450_v63  ;;  %1320 = vmin.xlane.f32.xlu1 %v4663_v58  ;;  %1040 = vmin.xlane.f32.xlu0 %v4665_v30  ;;  %v1079_v28 = vshra.s32 %v4673_v15, 16  ;;  %v4683_v25 = vsel %vm329_vm0, %v1175_v41, 2147483647 }
 0x212   : > { %v1347_v31 = vshra.s32 %v4683_v25, 16 }
 0x213   : > { %7840 = vst [vmem:[#allocation44_spill] sm:$0xff] %v4677_v17  ;;  %v4688_v12 = vcvt.s32.f32 %v1079_v28  ;;  %vm902_vm10 = vcmp.eq.f32.partialorder %v4383_v45, %v4677_v17  ;;  %vm1158_vm11 = vcmp.eq.f32.partialorder %v4278_v60, %v4677_v17  ;;  %v4709_v45 = vld [vmem:[#allocation3 + $0x68] sm:$0xff] }
 0x214   : > { %v822_v63 = vpop.xlane.xlu1 %821  ;;  %v4697_v40 = vsel %vm902_vm10, %v4290_v7, 2147483647  ;;  %v1174_v41 = vsel %vm1158_vm11, %v4685_v37, 2147483647  ;;  %7843 = vst [vmem:[#allocation47_spill] sm:$0xff] %v4709_v45  ;;  %v4711_v17 = vcvt.s32.f32 %v1347_v31 }
 0x215   : > { %v4701_v29 = vmax.f32 %v822_v63, %v4424_v35  ;;  %1082 = vmin.xlane.f32.xlu1 %v4688_v12  ;;  %1305 = vmin.xlane.f32.xlu0 %v4690_v26  ;;  %v1065_v33 = vshra.s32 %v4697_v40, 16  ;;  %v4707_v28 = vsel %vm329_vm0, %v1174_v41, 2147483647 }
 0x216   : > { %v820_v60 = vpop.xlane.xlu0 %819  ;;  %7844 = vst [vmem:[#allocation48_spill] sm:$0xff] %v4711_v17  ;;  %v1332_v37 = vshra.s32 %v4707_v28, 16 }
 0x217   : > { %7842 = vst [vmem:[#allocation46_spill] sm:$0xff] %v4701_v29  ;;  %vm1161_vm12 = vcmp.eq.f32.partialorder %v4262_v52, %v4701_v29  ;;  %v4716_v35 = vmax.f32 %v820_v60, %v4481_v39  ;;  %v4718_v63 = vcvt.s32.f32 %v1065_v33  ;;  %vm905_vm13 = vcmp.eq.f32.partialorder %v4389_v51, %v4701_v29  ;;  %v4734_v39 = vld [vmem:[#allocation3 + $0x60] sm:$0xff] }
 0x218   : > { %v1177_v41 = vsel %vm1161_vm12, %v4709_v45, 2147483647  ;;  %v4727_v31 = vsel %vm905_vm13, %v4290_v7, 2147483647  ;;  %7848 = vst [vmem:[#allocation52_spill] sm:$0xff] %v4734_v39  ;;  %v4740_v29 = vcvt.s32.f32 %v1332_v37 }
 0x219   : > { %7845 = vst [vmem:[#allocation49_spill] sm:$0xff] %v4716_v35  ;;  %7846 = vst [vmem:[#allocation50_spill] sm:$0xff] %v4718_v63  ;;  %1350 = vmin.xlane.f32.xlu1 %v4711_v17  ;;  %1068 = vmin.xlane.f32.xlu0 %v4718_v63  ;;  %v4730_v52 = vsel %vm329_vm0, %v1177_v41, 2147483647  ;;  %vm904_vm14 = vcmp.eq.f32.partialorder %v4395_v61, %v4716_v35  ;;  %v1107_v33 = vshra.s32 %v4727_v31, 16 }
 0x21a   : > { %7847 = vst [vmem:[#allocation51_spill] sm:$0xff] %v4727_v31  ;;  %v4738_v60 = vsel %vm904_vm14, %v4290_v7, 2147483647  ;;  %vm1160_vm15 = vcmp.eq.f32.partialorder %v4282_v62, %v4716_v35  ;;  %v1377_v63 = vshra.s32 %v4730_v52, 16 }
 0x21b   : > { %7849 = vst [vmem:[#allocation53_spill] sm:$0xff] %v4738_v60  ;;  %v1093_v51 = vshra.s32 %v4738_v60, 16  ;;  %v4745_v41 = vcvt.s32.f32 %v1107_v33  ;;  %v1176_v61 = vsel %vm1160_vm15, %v4734_v39, 2147483647  ;;  %v4762_v39 = vld [vmem:[#allocation3 + $0x78] sm:$0xff] }
 0x21c   : > { %v826_v45 = vpop.xlane.xlu1 %825  ;;  %v4751_v17 = vsel %vm329_vm0, %v1176_v61, 2147483647  ;;  %v4757_v35 = vcvt.s32.f32 %v1377_v63  ;;  %7853 = vst [vmem:[#allocation57_spill] sm:$0xff] %v4762_v39 }
 0x21d   : > { %1335 = vmin.xlane.f32.xlu0 %v4740_v29  ;;  %7850 = vst [vmem:[#allocation54_spill] sm:$0xff] %v4751_v17  ;;  %1110 = vmin.xlane.f32.xlu1 %v4745_v41  ;;  %v4754_v31 = vcvt.s32.f32 %v1093_v51  ;;  %v1362_v60 = vshra.s32 %v4751_v17, 16 }
 0x21e   : > { %v824_v37 = vpop.xlane.xlu0 %823  ;;  %7851 = vst [vmem:[#allocation55_spill] sm:$0xff] %v4757_v35 }
 0x21f   : > { %v4771_v17 = vcvt.s32.f32 %v1362_v60 }
 0x220   : > { %v875_v62 = vpop.xlane.xlu1 %874 }
 0x221   : > { %v4759_v33 = vmax.f32 %v826_v45, %v875_v62  ;;  %1096 = vmin.xlane.f32.xlu0 %v4754_v31  ;;  %1380 = vmin.xlane.f32.xlu1 %v4757_v35  ;;  %v4777_v62 = vld [vmem:[#allocation3 + $0x70] sm:$0xff] }
 0x222   : > { %v872_v61 = vpop.xlane.xlu0 %871  ;;  %7855 = vst [vmem:[#allocation59_spill] sm:$0xff] %v4777_v62 }
 0x223   : > { %7852 = vst [vmem:[#allocation56_spill] sm:$0xff] %v4759_v33  ;;  %vm907_vm1 = vcmp.eq.f32.partialorder %v4403_v8, %v4759_v33  ;;  %vm1163_vm2 = vcmp.eq.f32.partialorder %v4399_v6, %v4759_v33  ;;  %v4769_v51 = vmax.f32 %v824_v37, %v872_v61 }
 0x224   : > { %v4774_v45 = vsel %vm907_vm1, %v4290_v7, 2147483647  ;;  %v1179_v63 = vsel %vm1163_vm2, %v4762_v39, 2147483647 }
 0x225   : > { %7854 = vst [vmem:[#allocation58_spill] sm:$0xff] %v4769_v51  ;;  %1365 = vmin.xlane.f32.xlu0 %v4771_v17  ;;  %v1135_v35 = vshra.s32 %v4774_v45, 16  ;;  %vm906_vm3 = vcmp.eq.f32.partialorder %v4411_v13, %v4769_v51  ;;  %v4784_v6 = vsel %vm329_vm0, %v1179_v63, 2147483647  ;;  %vm1162_vm4 = vcmp.eq.f32.partialorder %v4407_v11, %v4769_v51 }
 0x226   : > { %v4787_v60 = vsel %vm906_vm3, %v4290_v7, 2147483647  ;;  %v1407_v33 = vshra.s32 %v4784_v6, 16  ;;  %v1178_v8 = vsel %vm1162_vm4, %v4777_v62, 2147483647  ;;  %v938_v51 = vand.u32 65535, %v4439_v46 }
 0x227   : > { %v4791_v37 = vcvt.s32.f32 %v1135_v35  ;;  %v1121_v61 = vshra.s32 %v4787_v60, 16  ;;  %v4797_v39 = vsel %vm329_vm0, %v1178_v8, 2147483647  ;;  %v1196_v8 = vand.u32 65535, %v4446_v57 }
 0x228   : > { %v1392_v13 = vshra.s32 %v4797_v39, 16  ;;  %v4804_v11 = vcvt.s32.f32 %v1407_v33  ;;  %v924_v7 = vand.u32 65535, %v4460_v3  ;;  %v1181_v57 = vand.u32 65535, %v4468_v14 }
 0x229   : > { %1138 = vmin.xlane.f32.xlu1 %v4791_v37  ;;  %v4800_v63 = vcvt.s32.f32 %v1121_v61  ;;  %v940_v61 = vcvt.s32.f32 %v938_v51  ;;  %v952_v14 = vand.u32 65535, %v4507_v9  ;;  %v1211_v9 = vand.u32 65535, %v4516_v0 }
 0x22a   : > { %7857 = vst [vmem:[#allocation61_spill] sm:$0xff] %v4804_v11  ;;  %v4807_v35 = vcvt.s32.f32 %v1392_v13  ;;  %v926_v46 = vcvt.s32.f32 %v924_v7  ;;  %v1183_v7 = vcvt.s32.f32 %v1181_v57  ;;  %v980_v0 = vand.u32 65535, %v4553_v48 }
 0x22b   : > { %7856 = vst [vmem:[#allocation60_spill] sm:$0xff] %v4800_v63  ;;  %1124 = vmin.xlane.f32.xlu0 %v4800_v63 }
 0x22c   : > { %7858 = vst [vmem:[#allocation62_spill] sm:$0xff] %v4807_v35  ;;  %v982_v48 = vcvt.s32.f32 %v980_v0 }
 0x22d   : > { %1410 = vmin.xlane.f32.xlu1 %v4804_v11  ;;  %v966_v11 = vand.u32 65535, %v4484_v43  ;;  %v1226_v43 = vand.u32 65535, %v4493_v1  ;;  %v994_v1 = vand.u32 65535, %v4530_v27  ;;  %v1256_v27 = vand.u32 65535, %v4541_v47 }
 0x22e   : > { %v1022_v47 = vand.u32 65535, %v4577_v50  ;;  %v1286_v50 = vand.u32 65535, %v4587_v22  ;;  %v1050_v22 = vand.u32 65535, %v4625_v2  ;;  %v1316_v2 = vand.u32 65535, %v4635_v4 }
 0x22f   : > { %1395 = vmin.xlane.f32.xlu0 %v4807_v35  ;;  %v1198_v35 = vcvt.s32.f32 %v1196_v8  ;;  %v968_v8 = vcvt.s32.f32 %v966_v11  ;;  %v1228_v11 = vcvt.s32.f32 %v1226_v43  ;;  %v1213_v43 = vcvt.s32.f32 %v1211_v9 }
 0x230   : > { %v1052_v0 = vcvt.s32.f32 %v1050_v22  ;;  %v1078_v4 = vand.u32 65535, %v4673_v15  ;;  %v1346_v15 = vand.u32 65535, %v4683_v25  ;;  %v1331_v25 = vand.u32 65535, %v4707_v28  ;;  %v7860_v22 = vld [vmem:[#allocation51_spill] sm:$0xff] }
 0x276   : > { %v4812_v62 = vpop.xlane.xlu1 %942 }
 0x277   : > { %vm944_vm5 = vcmp.eq.f32.partialorder %v4453_v20, %v4812_v62 }
 0x278   : > { %v945_v33 = vsel %vm944_vm5, %v940_v61, inf }
 0x279   : > { %946 = vmin.xlane.f32.xlu1 %v945_v33 }
 0x27a   : > { %v4818_v13 = vpop.xlane.xlu1 %1200  ;;  %v4820_v63 = vpop.xlane.xlu0 %928 }
 0x27b   : > { %vm1202_vm6 = vcmp.eq.f32.partialorder %v4472_v18, %v4818_v13  ;;  %vm930_vm7 = vcmp.eq.f32.partialorder %v4474_v32, %v4820_v63 }
 0x27c   : > { %v1203_v3 = vsel %vm1202_vm6, %v1198_v35, inf  ;;  %v931_v20 = vsel %vm930_vm7, %v926_v46, inf  ;;  %v954_v46 = vcvt.s32.f32 %v952_v14 }
 0x27d   : > { %1204 = vmin.xlane.f32.xlu1 %v1203_v3  ;;  %932 = vmin.xlane.f32.xlu0 %v931_v20  ;;  %v996_v20 = vcvt.s32.f32 %v994_v1 }
 0x27e   : > { %v4828_v51 = vpop.xlane.xlu1 %970  ;;  %v4830_v61 = vpop.xlane.xlu0 %1185 }
 0x27f   : > { %vm972_vm8 = vcmp.eq.f32.partialorder %v4498_v10, %v4828_v51  ;;  %vm1187_vm9 = vcmp.eq.f32.partialorder %v4500_v5, %v4830_v61 }
 0x280   : > { %v973_v18 = vsel %vm972_vm8, %v968_v8, inf  ;;  %v1188_v32 = vsel %vm1187_vm9, %v1183_v7, inf  ;;  %v1241_v8 = vand.u32 65535, %v4563_v54  ;;  %v1008_v54 = vand.u32 65535, %v4601_v21 }
 0x281   : > { %974 = vmin.xlane.f32.xlu1 %v973_v18  ;;  %1189 = vmin.xlane.f32.xlu0 %v1188_v32  ;;  %v1258_v18 = vcvt.s32.f32 %v1256_v27  ;;  %v1271_v21 = vand.u32 65535, %v4611_v49  ;;  %v1036_v49 = vand.u32 65535, %v4649_v38 }
 0x282   : > { %v4838_v35 = vpop.xlane.xlu1 %1230  ;;  %v4840_v33 = vpop.xlane.xlu0 %956  ;;  %v1010_v27 = vcvt.s32.f32 %v1008_v54  ;;  %v1080_v54 = vcvt.s32.f32 %v1078_v4  ;;  %v7864_v4 = vld [vmem:[#allocation54_spill] sm:$0xff] }
 0x283   : > { %vm1232_vm10 = vcmp.eq.f32.partialorder %v4518_v44, %v4838_v35  ;;  %vm958_vm11 = vcmp.eq.f32.partialorder %v4524_v16, %v4840_v33 }
 0x284   : > { %v1233_v5 = vsel %vm1232_vm10, %v1228_v11, inf  ;;  %v959_v10 = vsel %vm958_vm11, %v954_v46, inf  ;;  %v1024_v11 = vcvt.s32.f32 %v1022_v47  ;;  %v1243_v46 = vcvt.s32.f32 %v1241_v8 }
 0x285   : > { %1234 = vmin.xlane.f32.xlu1 %v1233_v5  ;;  %960 = vmin.xlane.f32.xlu0 %v959_v10  ;;  %v1288_v10 = vcvt.s32.f32 %v1286_v50 }
 0x286   : > { %v4848_v57 = vpop.xlane.xlu1 %998  ;;  %v4850_v3 = vpop.xlane.xlu0 %1215 }
 0x287   : > { %vm1000_vm12 = vcmp.eq.f32.partialorder %v4547_v24, %v4848_v57  ;;  %vm1217_vm13 = vcmp.eq.f32.partialorder %v4549_v23, %v4850_v3 }
 0x288   : > { %v1001_v44 = vsel %vm1000_vm12, %v996_v20, inf  ;;  %v1218_v16 = vsel %vm1217_vm13, %v1213_v43, inf }
 0x289   : > { %1002 = vmin.xlane.f32.xlu1 %v1001_v44  ;;  %1219 = vmin.xlane.f32.xlu0 %v1218_v16  ;;  %v1273_v44 = vcvt.s32.f32 %v1271_v21  ;;  %v7859_v16 = vld [vmem:[#allocation42_spill] sm:$0xff]  ;;  %v1106_v21 = vand.u32 65535, %v7860_v22 }
 0x28a   : > { %v4859_v7 = vpop.xlane.xlu1 %1260  ;;  %v4861_v14 = vpop.xlane.xlu0 %984  ;;  %v1301_v38 = vand.u32 65535, %v7859_v16  ;;  %v1361_v16 = vand.u32 65535, %v7864_v4  ;;  %v935_v4 = vcvt.f32.s32 %v4820_v63 }
 0x28b   : > { %vm1262_vm14 = vcmp.eq.f32.partialorder %v4567_v34, %v4859_v7  ;;  %vm986_vm15 = vcmp.eq.f32.partialorder %v4569_v53, %v4861_v14 }
 0x28c   : > { %v1263_v24 = vsel %vm1262_vm14, %v1258_v18, inf  ;;  %v987_v23 = vsel %vm986_vm15, %v982_v48, inf  ;;  %v1318_v18 = vcvt.s32.f32 %v1316_v2  ;;  %v1038_v48 = vcvt.s32.f32 %v1036_v49 }
 0x28d   : > { %1264 = vmin.xlane.f32.xlu1 %v1263_v24  ;;  %988 = vmin.xlane.f32.xlu0 %v987_v23  ;;  %v1064_v24 = vand.u32 65535, %v4697_v40  ;;  %v1333_v2 = vcvt.s32.f32 %v1331_v25  ;;  %v1391_v25 = vand.u32 65535, %v4797_v39 }
 0x28e   : > { %v4869_v32 = vpop.xlane.xlu1 %1026  ;;  %v4871_v1 = vpop.xlane.xlu0 %1245 }
 0x28f   : > { %vm1028_vm1 = vcmp.eq.f32.partialorder %v4592_v36, %v4869_v32  ;;  %vm1247_vm2 = vcmp.eq.f32.partialorder %v4594_v59, %v4871_v1  ;;  %v1393_v39 = vcvt.s32.f32 %v1391_v25 }
 0x290   : > { %v1029_v53 = vsel %vm1028_vm1, %v1024_v11, inf  ;;  %v1248_v34 = vsel %vm1247_vm2, %v1243_v46, inf  ;;  %v1303_v11 = vcvt.s32.f32 %v1301_v38 }
 0x291   : > { %1030 = vmin.xlane.f32.xlu1 %v1029_v53  ;;  %1249 = vmin.xlane.f32.xlu0 %v1248_v34  ;;  %v1348_v53 = vcvt.s32.f32 %v1346_v15  ;;  %v1066_v34 = vcvt.s32.f32 %v1064_v24  ;;  %v1363_v15 = vcvt.s32.f32 %v1361_v16  ;;  %v1134_v24 = vand.u32 65535, %v4774_v45 }
 0x292   : > { %v4879_v9 = vpop.xlane.xlu1 %1290  ;;  %v4881_v5 = vpop.xlane.xlu0 %1012  ;;  %v1192_v16 = vcvt.f32.s32 %v4830_v61 }
 0x293   : > { %vm1292_vm3 = vcmp.eq.f32.partialorder %v4615_v56, %v4879_v9  ;;  %vm1014_vm4 = vcmp.eq.f32.partialorder %v4617_v55, %v4881_v5 }
 0x294   : > { %v1293_v36 = vsel %vm1292_vm3, %v1288_v10, inf  ;;  %v1015_v59 = vsel %vm1014_vm4, %v1010_v27, inf  ;;  %v7861_v10 = vld [vmem:[#allocation48_spill] sm:$0xff] }
 0x295   : > { %1294 = vmin.xlane.f32.xlu1 %v1293_v36  ;;  %1016 = vmin.xlane.f32.xlu0 %v1015_v59  ;;  %v7863_v36 = vld [vmem:[#allocation53_spill] sm:$0xff] }
 0x296   : > { %v4889_v20 = vpop.xlane.xlu1 %1054  ;;  %v4891_v43 = vpop.xlane.xlu0 %1275  ;;  %v1092_v28 = vand.u32 65535, %v7863_v36 }
 0x297   : > { %vm1056_vm5 = vcmp.eq.f32.partialorder %v4640_v19, %v4889_v20  ;;  %vm1277_vm6 = vcmp.eq.f32.partialorder %v4642_v42, %v4891_v43 }
 0x298   : > { %v1057_v55 = vsel %vm1056_vm5, %v1052_v0, inf  ;;  %v1278_v56 = vsel %vm1277_vm6, %v1273_v44, inf  ;;  %v1108_v0 = vcvt.s32.f32 %v1106_v21  ;;  %v1376_v44 = vand.u32 65535, %v4730_v52 }
 0x299   : > { %1058 = vmin.xlane.f32.xlu1 %v1057_v55  ;;  %1279 = vmin.xlane.f32.xlu0 %v1278_v56 }
 0x29a   : > { %v4899_v47 = vpop.xlane.xlu1 %1320  ;;  %v4901_v8 = vpop.xlane.xlu0 %1040 }
 0x29b   : > { %vm1322_vm7 = vcmp.eq.f32.partialorder %v4663_v58, %v4899_v47  ;;  %vm1042_vm8 = vcmp.eq.f32.partialorder %v4665_v30, %v4901_v8 }
 0x29c   : > { %v1323_v42 = vsel %vm1322_vm7, %v1318_v18, inf  ;;  %v1043_v19 = vsel %vm1042_vm8, %v1038_v48, inf  ;;  %v1094_v18 = vcvt.s32.f32 %v1092_v28  ;;  %v1207_v28 = vcvt.f32.s32 %v4818_v13 }
 0x29d   : > { %1324 = vmin.xlane.f32.xlu1 %v1323_v42  ;;  %1044 = vmin.xlane.f32.xlu0 %v1043_v19  ;;  %v1378_v42 = vcvt.s32.f32 %v1376_v44  ;;  %v936_v13 = vshll.u32 %v935_v4, 16  ;;  %v7876_v4 = vld [vmem:[#allocation6_spill] sm:$0xff] }
 0x29e   : > { %v4909_v23 = vpop.xlane.xlu1 %1082  ;;  %v4911_v50 = vpop.xlane.xlu0 %1305 }
 0x29f   : > { %vm1084_vm9 = vcmp.eq.f32.partialorder %v4688_v12, %v4909_v23  ;;  %vm1307_vm10 = vcmp.eq.f32.partialorder %v4690_v26, %v4911_v50  ;;  %v7862_v12 = vld [vmem:[#allocation50_spill] sm:$0xff] }
 0x2a0   : > { %v1085_v30 = vsel %vm1084_vm9, %v1080_v54, inf  ;;  %v1308_v58 = vsel %vm1307_vm10, %v1303_v11, inf  ;;  %v1120_v54 = vand.u32 65535, %v4787_v60 }
 0x2a1   : > { %1086 = vmin.xlane.f32.xlu1 %v1085_v30  ;;  %1309 = vmin.xlane.f32.xlu0 %v1308_v58  ;;  %v1136_v30 = vcvt.s32.f32 %v1134_v24  ;;  %v1406_v58 = vand.u32 65535, %v4784_v6  ;;  %v7867_v6 = vld [vmem:[#allocation61_spill] sm:$0xff] }
 0x2a2   : > { %v4918_v46 = vpop.xlane.xlu1 %1350  ;;  %v4920_v40 = vpop.xlane.xlu0 %1068 }
 0x2a3   : > { %vm1352_vm11 = vcmp.eq.f32.partialorder %v7861_v10, %v4918_v46  ;;  %vm1070_vm12 = vcmp.eq.f32.partialorder %v7862_v12, %v4920_v40  ;;  %v1408_v21 = vcvt.s32.f32 %v1406_v58  ;;  %v7868_v12 = vld [vmem:[#allocation62_spill] sm:$0xff] }
 0x2a4   : > { %v1353_v26 = vsel %vm1352_vm11, %v1348_v53, inf  ;;  %v1071_v27 = vsel %vm1070_vm12, %v1066_v34, inf  ;;  %v1122_v34 = vcvt.s32.f32 %v1120_v54  ;;  %v1193_v54 = vshll.u32 %v1192_v16, 16 }
 0x2a5   : > { %1354 = vmin.xlane.f32.xlu1 %v1353_v26  ;;  %1072 = vmin.xlane.f32.xlu0 %v1071_v27  ;;  %v949_v27 = vcvt.f32.s32 %v4812_v62  ;;  %v1237_v62 = vcvt.f32.s32 %v4838_v35 }
 0x2a6   : > { %v4928_v59 = vpop.xlane.xlu0 %1335  ;;  %v4930_v49 = vpop.xlane.xlu1 %1110 }
 0x2a7   : > { %vm1337_vm13 = vcmp.eq.f32.partialorder %v4740_v29, %v4928_v59  ;;  %vm1112_vm14 = vcmp.eq.f32.partialorder %v4745_v41, %v4930_v49  ;;  %v7865_v29 = vld [vmem:[#allocation55_spill] sm:$0xff] }
 0x2a8   : > { %v1338_v55 = vsel %vm1337_vm13, %v1333_v2, inf  ;;  %v1113_v56 = vsel %vm1112_vm14, %v1108_v0, inf  ;;  %v950_v0 = vshll.u32 %v949_v27, 16  ;;  %v1005_v27 = vcvt.f32.s32 %v4848_v57  ;;  %v7878_v57 = vld [vmem:[#allocation24_spill] sm:$0xff] }
 0x2a9   : > { %1339 = vmin.xlane.f32.xlu0 %v1338_v55  ;;  %1114 = vmin.xlane.f32.xlu1 %v1113_v56  ;;  %v1208_v56 = vshll.u32 %v1207_v28, 16 }
 0x2aa   : > { %v4938_v38 = vpop.xlane.xlu0 %1096  ;;  %v4940_v48 = vpop.xlane.xlu1 %1380 }
 0x2ab   : > { %vm1098_vm15 = vcmp.eq.f32.partialorder %v4754_v31, %v4938_v38  ;;  %vm1382_vm1 = vcmp.eq.f32.partialorder %v7865_v29, %v4940_v48 }
 0x2ac   : > { %v1099_v52 = vsel %vm1098_vm15, %v1094_v18, inf  ;;  %v1383_v41 = vsel %vm1382_vm1, %v1378_v42, inf }
 0x2ad   : > { %1100 = vmin.xlane.f32.xlu0 %v1099_v52  ;;  %1384 = vmin.xlane.f32.xlu1 %v1383_v41  ;;  %v977_v41 = vcvt.f32.s32 %v4828_v51  ;;  %v1238_v51 = vshll.u32 %v1237_v62, 16 }
 0x2ae   : > { %v4946_v19 = vpop.xlane.xlu0 %1365 }
 0x2af   : > { %vm1367_vm2 = vcmp.eq.f32.partialorder %v4771_v17, %v4946_v19  ;;  %v7866_v17 = vld [vmem:[#allocation60_spill] sm:$0xff] }
 0x2b0   : > { %v1368_v11 = vsel %vm1367_vm2, %v1363_v15, inf }
 0x2b1   : > { %1369 = vmin.xlane.f32.xlu0 %v1368_v11 }
 0x2b2   : > { %v4952_v31 = vpop.xlane.xlu1 %1138 }
 0x2b3   : > { %vm1140_vm3 = vcmp.eq.f32.partialorder %v4791_v37, %v4952_v31 }
 0x2b4   : > { %v4958_v53 = vpop.xlane.xlu0 %1124  ;;  %v1141_v45 = vsel %vm1140_vm3, %v1136_v30, inf  ;;  %v963_v30 = vcvt.f32.s32 %v4840_v33  ;;  %v1222_v33 = vcvt.f32.s32 %v4850_v3  ;;  %v1267_v3 = vcvt.f32.s32 %v4859_v7 }
 0x2b5   : > { %1142 = vmin.xlane.f32.xlu1 %v1141_v45  ;;  %vm1126_vm4 = vcmp.eq.f32.partialorder %v7866_v17, %v4958_v53  ;;  %v7870_v45 = vld [vmem:[#allocation4_spill] sm:$0xff]  ;;  %v1006_v7 = vshll.u32 %v1005_v27, 16 }
 0x2b6   : > { %v4962_v60 = vpop.xlane.xlu1 %1410  ;;  %v1127_v22 = vsel %vm1126_vm4, %v1122_v34, inf  ;;  %v978_v34 = vshll.u32 %v977_v41, 16  ;;  %v991_v41 = vcvt.f32.s32 %v4861_v14  ;;  %v1252_v14 = vcvt.f32.s32 %v4871_v1 }
 0x2b7   : > { %1128 = vmin.xlane.f32.xlu0 %v1127_v22  ;;  %vm1412_vm5 = vcmp.eq.f32.partialorder %v7867_v6, %v4962_v60  ;;  %v7871_v22 = vld [vmem:[#allocation5_spill] sm:$0xff]  ;;  %v7873_v6 = vld [vmem:[#allocation22_spill] sm:$0xff]  ;;  %v1297_v1 = vcvt.f32.s32 %v4879_v9 }
 0x2b8   : > { %v4966_v10 = vpop.xlane.xlu0 %1395  ;;  %v1413_v37 = vsel %vm1412_vm5, %v1408_v21, inf }
 0x2b9   : > { %1414 = vmin.xlane.f32.xlu1 %v1413_v37  ;;  %vm1397_vm6 = vcmp.eq.f32.partialorder %v7868_v12, %v4966_v10 }
 0x2ba   : > { %v1398_v26 = vsel %vm1397_vm6, %v1393_v39, inf  ;;  %v4031_v39 = vld [vmem:[#allocation2 + $0x8] sm:$0xff] }
 0x2bb   : > { %1399 = vmin.xlane.f32.xlu0 %v1398_v26  ;;  %v964_v26 = vshll.u32 %v963_v30, 16 }
 0x302   : > { %v947_v36 = vpop.xlane.xlu1 %946 }
 0x303   : > { %v948_v2 = vcvt.f32.s32 %v947_v36 }
 0x305   : > { %v951_v42 = vadd.s32 %v950_v0, %v948_v2 }
 0x306   : > { %v1205_v44 = vpop.xlane.xlu1 %1204  ;;  %v933_v55 = vpop.xlane.xlu0 %932 }
 0x307   : > { %v1206_v18 = vcvt.f32.s32 %v1205_v44  ;;  %v934_v52 = vcvt.f32.s32 %v933_v55 }
 0x309   : > { %v1209_v29 = vadd.s32 %v1208_v56, %v1206_v18  ;;  %v937_v63 = vadd.s32 %v936_v13, %v934_v52  ;;  %v1223_v18 = vshll.u32 %v1222_v33, 16 }
 0x30a   : > { %v975_v15 = vpop.xlane.xlu1 %974  ;;  %v1190_v24 = vpop.xlane.xlu0 %1189 }
 0x30b   : > { %vm1422_vm7 = vcmp.lt.s32.totalorder %v951_v42, %v1209_v29  ;;  %v1191_v11 = vcvt.f32.s32 %v1190_v24  ;;  %v976_v61 = vcvt.f32.s32 %v975_v15 }
 0x30c   : > { %v4977_v58 = vsel %vm1422_vm7, %v951_v42, %v1209_v29  ;;  %v4032_v29 = vld [vmem:[#allocation2] sm:$0xff] }
 0x30d   : > { %7869 = vst [vmem:[#allocation42_spill] sm:$0xff] %v4977_v58  ;;  %v1194_v25 = vadd.s32 %v1193_v54, %v1191_v11  ;;  %vm1453_vm8 = vcmp.eq.s32.totalorder %v7870_v45, %v4977_v58  ;;  %vm1485_vm9 = vcmp.eq.s32.totalorder %v7873_v6, %v4977_v58  ;;  %v979_v28 = vadd.s32 %v978_v34, %v976_v61  ;;  %v7883_v34 = vld [vmem:[#allocation26_spill] sm:$0xff] }
 0x30e   : > { %v1235_v17 = vpop.xlane.xlu1 %1234  ;;  %v961_v35 = vpop.xlane.xlu0 %960  ;;  %v4982_v21 = vsel %vm1453_vm8, -inf, %v7871_v22  ;;  %v4988_v12 = vsel %vm1485_vm9, -inf, %v4031_v39  ;;  %v1268_v54 = vshll.u32 %v1267_v3, 16  ;;  %v992_v22 = vshll.u32 %v991_v41, 16 }
 0x30f   : > { %7872 = vst [vmem:[#allocation51_spill] sm:$0xff] %v4982_v21  ;;  %vm1420_vm10 = vcmp.lt.s32.totalorder %v937_v63, %v1194_v25  ;;  %v1236_v37 = vcvt.f32.s32 %v1235_v17  ;;  %1551 = vmax.xlane.f32.xlu1 %v4982_v21  ;;  %7874 = vst [vmem:[#allocation48_spill] sm:$0xff] %v4988_v12  ;;  %v962_v0 = vcvt.f32.s32 %v961_v35  ;;  %v1584_v56 = vsel %vm329_vm0, %v4988_v12, -inf  ;;  %v4033_v17 = vld [vmem:[#allocation2 + $0x18] sm:$0xff] }
 0x310   : > { %v4991_v36 = vsel %vm1420_vm10, %v937_v63, %v1194_v25  ;;  %v7881_v63 = vld [vmem:[#allocation7_spill] sm:$0xff]  ;;  %v1033_v6 = vcvt.f32.s32 %v4869_v32  ;;  %v7888_v32 = vld [vmem:[#allocation28_spill] sm:$0xff]  ;;  %v1298_v41 = vshll.u32 %v1297_v1, 16 }
 0x311   : > { %7875 = vst [vmem:[#allocation50_spill] sm:$0xff] %v4991_v36  ;;  %v1239_v2 = vadd.s32 %v1238_v51, %v1236_v37  ;;  %vm1452_vm11 = vcmp.eq.s32.totalorder %v7870_v45, %v4991_v36  ;;  %vm1484_vm12 = vcmp.eq.s32.totalorder %v7878_v57, %v4991_v36  ;;  %v965_v15 = vadd.s32 %v964_v26, %v962_v0  ;;  %v7886_v0 = vld [vmem:[#allocation8_spill] sm:$0xff]  ;;  %v4057_v36 = vld [vmem:[#allocation3 + $0x58] sm:$0xff] }
 0x312   : > { %v1003_v44 = vpop.xlane.xlu1 %1002  ;;  %v1220_v55 = vpop.xlane.xlu0 %1219  ;;  %v4999_v16 = vsel %vm1452_vm11, -inf, %v7876_v4  ;;  %v5004_v52 = vsel %vm1484_vm12, -inf, %v4032_v29  ;;  %v1034_v9 = vshll.u32 %v1033_v6, 16  ;;  %v1019_v57 = vcvt.f32.s32 %v4881_v5 }
 0x313   : > { %7877 = vst [vmem:[#allocation53_spill] sm:$0xff] %v4999_v16  ;;  %vm1426_vm13 = vcmp.lt.s32.totalorder %v979_v28, %v1239_v2  ;;  %v1221_v42 = vcvt.f32.s32 %v1220_v55  ;;  %1585 = vmax.xlane.f32.xlu1 %v1584_v56  ;;  %1549 = vmax.xlane.f32.xlu0 %v4999_v16  ;;  %7879 = vst [vmem:[#allocation54_spill] sm:$0xff] %v5004_v52  ;;  %v1004_v24 = vcvt.f32.s32 %v1003_v44  ;;  %v1581_v25 = vsel %vm329_vm0, %v5004_v52, -inf  ;;  %v4034_v56 = vld [vmem:[#allocation2 + $0x10] sm:$0xff] }
 0x314   : > { %v5007_v62 = vsel %vm1426_vm13, %v979_v28, %v1239_v2  ;;  %v1253_v44 = vshll.u32 %v1252_v14, 16  ;;  %v1282_v5 = vcvt.f32.s32 %v4891_v43  ;;  %v1020_v14 = vshll.u32 %v1019_v57, 16 }
 0x315   : > { %7880 = vst [vmem:[#allocation55_spill] sm:$0xff] %v5007_v62  ;;  %v1224_v13 = vadd.s32 %v1223_v18, %v1221_v42  ;;  %vm1455_vm14 = vcmp.eq.s32.totalorder %v7870_v45, %v5007_v62  ;;  %vm1487_vm15 = vcmp.eq.s32.totalorder %v7883_v34, %v5007_v62  ;;  %v1007_v37 = vadd.s32 %v1006_v7, %v1004_v24 }
 0x316   : > { %v1265_v11 = vpop.xlane.xlu1 %1264  ;;  %v989_v30 = vpop.xlane.xlu0 %988  ;;  %v5012_v61 = vsel %vm1455_vm14, -inf, %v7881_v63  ;;  %v5020_v35 = vsel %vm1487_vm15, -inf, %v4033_v17  ;;  %v1327_v43 = vcvt.f32.s32 %v4899_v47 }
 0x317   : > { %7882 = vst [vmem:[#allocation60_spill] sm:$0xff] %v5012_v61  ;;  %vm1424_vm1 = vcmp.lt.s32.totalorder %v965_v15, %v1224_v13  ;;  %v1266_v51 = vcvt.f32.s32 %v1265_v11  ;;  %1555 = vmax.xlane.f32.xlu1 %v5012_v61  ;;  %1582 = vmax.xlane.f32.xlu0 %v1581_v25  ;;  %7884 = vst [vmem:[#allocation61_spill] sm:$0xff] %v5020_v35  ;;  %v990_v26 = vcvt.f32.s32 %v989_v30  ;;  %v1590_v2 = vsel %vm329_vm0, %v5020_v35, -inf  ;;  %v7893_v30 = vld [vmem:[#allocation30_spill] sm:$0xff]  ;;  %v4035_v25 = vld [vmem:[#allocation2 + $0x28] sm:$0xff] }
 0x318   : > { %v5023_v33 = vsel %vm1424_vm1, %v965_v15, %v1224_v13  ;;  %v7891_v13 = vld [vmem:[#allocation9_spill] sm:$0xff] }
 0x319   : > { %7885 = vst [vmem:[#allocation62_spill] sm:$0xff] %v5023_v33  ;;  %v1269_v39 = vadd.s32 %v1268_v54, %v1266_v51  ;;  %vm1454_vm2 = vcmp.eq.s32.totalorder %v7870_v45, %v5023_v33  ;;  %vm1486_vm3 = vcmp.eq.s32.totalorder %v7888_v32, %v5023_v33  ;;  %v993_v42 = vadd.s32 %v992_v22, %v990_v26  ;;  %v4036_v32 = vld [vmem:[#allocation2 + $0x20] sm:$0xff] }
 0x31a   : > { %v1031_v27 = vpop.xlane.xlu1 %1030  ;;  %v1250_v28 = vpop.xlane.xlu0 %1249  ;;  %v5031_v3 = vsel %vm1454_vm2, -inf, %v7886_v0  ;;  %v5036_v4 = vsel %vm1486_vm3, -inf, %v4034_v56  ;;  %v1061_v51 = vcvt.f32.s32 %v4889_v20  ;;  %v7898_v20 = vld [vmem:[#allocation32_spill] sm:$0xff] }
 0x31b   : > { %7887 = vst [vmem:[#allocation5_spill] sm:$0xff] %v5031_v3  ;;  %vm1430_vm4 = vcmp.lt.s32.totalorder %v1007_v37, %v1269_v39  ;;  %v1251_v55 = vcvt.f32.s32 %v1250_v28  ;;  %1591 = vmax.xlane.f32.xlu1 %v1590_v2  ;;  %1553 = vmax.xlane.f32.xlu0 %v5031_v3  ;;  %7889 = vst [vmem:[#allocation22_spill] sm:$0xff] %v5036_v4  ;;  %v1032_v29 = vcvt.f32.s32 %v1031_v27  ;;  %v1587_v11 = vsel %vm329_vm0, %v5036_v4, -inf  ;;  %v7896_v27 = vld [vmem:[#allocation10_spill] sm:$0xff] }
 0x31c   : > { %v5039_v18 = vsel %vm1430_vm4, %v1007_v37, %v1269_v39  ;;  %v1283_v2 = vshll.u32 %v1282_v5, 16  ;;  %v1062_v47 = vshll.u32 %v1061_v51, 16  ;;  %v4037_v5 = vld [vmem:[#allocation2 + $0x38] sm:$0xff] }
 0x31d   : > { %7890 = vst [vmem:[#allocation6_spill] sm:$0xff] %v5039_v18  ;;  %v1254_v7 = vadd.s32 %v1253_v44, %v1251_v55  ;;  %vm1457_vm5 = vcmp.eq.s32.totalorder %v7870_v45, %v5039_v18  ;;  %vm1489_vm6 = vcmp.eq.s32.totalorder %v7893_v30, %v5039_v18  ;;  %v1035_v22 = vadd.s32 %v1034_v9, %v1032_v29 }
 0x31e   : > { %v1295_v15 = vpop.xlane.xlu1 %1294  ;;  %v1017_v24 = vpop.xlane.xlu0 %1016  ;;  %v5044_v54 = vsel %vm1457_vm5, -inf, %v7891_v13  ;;  %v5052_v34 = vsel %vm1489_vm6, -inf, %v4035_v25  ;;  %v1047_v55 = vcvt.f32.s32 %v4901_v8  ;;  %v1328_v29 = vshll.u32 %v1327_v43, 16 }
 0x31f   : > { %7892 = vst [vmem:[#allocation24_spill] sm:$0xff] %v5044_v54  ;;  %vm1428_vm7 = vcmp.lt.s32.totalorder %v993_v42, %v1254_v7  ;;  %v1296_v63 = vcvt.f32.s32 %v1295_v15  ;;  %1559 = vmax.xlane.f32.xlu1 %v5044_v54  ;;  %1588 = vmax.xlane.f32.xlu0 %v1587_v11  ;;  %7894 = vst [vmem:[#allocation7_spill] sm:$0xff] %v5052_v34  ;;  %v1018_v37 = vcvt.f32.s32 %v1017_v24  ;;  %v1596_v1 = vsel %vm329_vm0, %v5052_v34, -inf  ;;  %v7901_v15 = vld [vmem:[#allocation11_spill] sm:$0xff]  ;;  %v7903_v11 = vld [vmem:[#allocation34_spill] sm:$0xff] }
 0x320   : > { %v5055_v17 = vsel %vm1428_vm7, %v993_v42, %v1254_v7  ;;  %v1312_v8 = vcvt.f32.s32 %v4911_v50  ;;  %v1048_v25 = vshll.u32 %v1047_v55, 16  ;;  %v1357_v50 = vcvt.f32.s32 %v4918_v46 }
 0x321   : > { %7895 = vst [vmem:[#allocation26_spill] sm:$0xff] %v5055_v17  ;;  %v1299_v6 = vadd.s32 %v1298_v41, %v1296_v63  ;;  %vm1456_vm8 = vcmp.eq.s32.totalorder %v7870_v45, %v5055_v17  ;;  %vm1488_vm9 = vcmp.eq.s32.totalorder %v7898_v20, %v5055_v17  ;;  %v1021_v9 = vadd.s32 %v1020_v14, %v1018_v37 }
 0x322   : > { %v1059_v39 = vpop.xlane.xlu1 %1058  ;;  %v1280_v26 = vpop.xlane.xlu0 %1279  ;;  %v5063_v28 = vsel %vm1456_vm8, -inf, %v7896_v27  ;;  %v5068_v44 = vsel %vm1488_vm9, -inf, %v4036_v32  ;;  %v1089_v14 = vcvt.f32.s32 %v4909_v23  ;;  %v7908_v23 = vld [vmem:[#allocation36_spill] sm:$0xff]  ;;  %v1313_v20 = vshll.u32 %v1312_v8, 16  ;;  %v7913_v8 = vld [vmem:[#allocation38_spill] sm:$0xff] }
 0x323   : > { %7897 = vst [vmem:[#allocation8_spill] sm:$0xff] %v5063_v28  ;;  %vm1434_vm10 = vcmp.lt.s32.totalorder %v1035_v22, %v1299_v6  ;;  %v1281_v0 = vcvt.f32.s32 %v1280_v26  ;;  %1597 = vmax.xlane.f32.xlu1 %v1596_v1  ;;  %1557 = vmax.xlane.f32.xlu0 %v5063_v28  ;;  %7899 = vst [vmem:[#allocation28_spill] sm:$0xff] %v5068_v44  ;;  %v1060_v57 = vcvt.f32.s32 %v1059_v39  ;;  %v1593_v13 = vsel %vm329_vm0, %v5068_v44, -inf  ;;  %v7906_v1 = vld [vmem:[#allocation12_spill] sm:$0xff] }
 0x324   : > { %v5071_v56 = vsel %vm1434_vm10, %v1035_v22, %v1299_v6  ;;  %v1090_v46 = vshll.u32 %v1089_v14, 16 }
 0x325   : > { %7900 = vst [vmem:[#allocation9_spill] sm:$0xff] %v5071_v56  ;;  %v1284_v42 = vadd.s32 %v1283_v2, %v1281_v0  ;;  %vm1459_vm11 = vcmp.eq.s32.totalorder %v7870_v45, %v5071_v56  ;;  %vm1491_vm12 = vcmp.eq.s32.totalorder %v7903_v11, %v5071_v56  ;;  %v1063_v22 = vadd.s32 %v1062_v47, %v1060_v57  ;;  %v4038_v0 = vld [vmem:[#allocation2 + $0x30] sm:$0xff] }
 0x326   : > { %v1325_v7 = vpop.xlane.xlu1 %1324  ;;  %v1045_v41 = vpop.xlane.xlu0 %1044  ;;  %v5076_v24 = vsel %vm1459_vm11, -inf, %v7901_v15  ;;  %v5084_v63 = vsel %vm1491_vm12, -inf, %v4037_v5  ;;  %v1075_v47 = vcvt.f32.s32 %v4920_v40  ;;  %v7911_v15 = vld [vmem:[#allocation13_spill] sm:$0xff]  ;;  %v1342_v40 = vcvt.f32.s32 %v4928_v59 }
 0x327   : > { %7902 = vst [vmem:[#allocation30_spill] sm:$0xff] %v5076_v24  ;;  %vm1432_vm13 = vcmp.lt.s32.totalorder %v1021_v9, %v1284_v42  ;;  %v1326_v30 = vcvt.f32.s32 %v1325_v7  ;;  %1563 = vmax.xlane.f32.xlu1 %v5076_v24  ;;  %1594 = vmax.xlane.f32.xlu0 %v1593_v13  ;;  %7904 = vst [vmem:[#allocation10_spill] sm:$0xff] %v5084_v63  ;;  %v1046_v37 = vcvt.f32.s32 %v1045_v41  ;;  %v1602_v26 = vsel %vm329_vm0, %v5084_v63, -inf  ;;  %v4039_v5 = vld [vmem:[#allocation2 + $0x48] sm:$0xff] }
 0x328   : > { %v5087_v51 = vsel %vm1432_vm13, %v1021_v9, %v1284_v42 }
 0x329   : > { %7905 = vst [vmem:[#allocation32_spill] sm:$0xff] %v5087_v51  ;;  %v1329_v6 = vadd.s32 %v1328_v29, %v1326_v30  ;;  %vm1458_vm14 = vcmp.eq.s32.totalorder %v7870_v45, %v5087_v51  ;;  %vm1490_vm15 = vcmp.eq.s32.totalorder %v7908_v23, %v5087_v51  ;;  %v1049_v9 = vadd.s32 %v1048_v25, %v1046_v37 }
 0x32a   : > { %v1087_v43 = vpop.xlane.xlu1 %1086  ;;  %v1310_v39 = vpop.xlane.xlu0 %1309  ;;  %v5095_v27 = vsel %vm1458_vm14, -inf, %v7906_v1  ;;  %v5100_v32 = vsel %vm1490_vm15, -inf, %v4038_v0  ;;  %v1358_v29 = vshll.u32 %v1357_v50, 16  ;;  %v1076_v50 = vshll.u32 %v1075_v47, 16  ;;  %v7918_v1 = vld [vmem:[#allocation40_spill] sm:$0xff] }
 0x32b   : > { %7907 = vst [vmem:[#allocation11_spill] sm:$0xff] %v5095_v27  ;;  %vm1438_vm1 = vcmp.lt.s32.totalorder %v1063_v22, %v1329_v6  ;;  %v1311_v2 = vcvt.f32.s32 %v1310_v39  ;;  %1603 = vmax.xlane.f32.xlu1 %v1602_v26  ;;  %1561 = vmax.xlane.f32.xlu0 %v5095_v27  ;;  %7909 = vst [vmem:[#allocation34_spill] sm:$0xff] %v5100_v32  ;;  %v1088_v57 = vcvt.f32.s32 %v1087_v43  ;;  %v1599_v11 = vsel %vm329_vm0, %v5100_v32, -inf  ;;  %v7916_v39 = vld [vmem:[#allocation14_spill] sm:$0xff]  ;;  %v4040_v0 = vld [vmem:[#allocation2 + $0x40] sm:$0xff] }
 0x32c   : > { %v5103_v55 = vsel %vm1438_vm1, %v1063_v22, %v1329_v6  ;;  %v1343_v23 = vshll.u32 %v1342_v40, 16  ;;  %v1117_v47 = vcvt.f32.s32 %v4930_v49  ;;  %v1372_v40 = vcvt.f32.s32 %v4946_v19 }
 0x32d   : > { %7910 = vst [vmem:[#allocation12_spill] sm:$0xff] %v5103_v55  ;;  %v1314_v42 = vadd.s32 %v1313_v20, %v1311_v2  ;;  %vm1461_vm2 = vcmp.eq.s32.totalorder %v7870_v45, %v5103_v55  ;;  %vm1493_vm3 = vcmp.eq.s32.totalorder %v7913_v8, %v5103_v55  ;;  %v1091_v22 = vadd.s32 %v1090_v46, %v1088_v57 }
 0x32e   : > { %v1355_v7 = vpop.xlane.xlu1 %1354  ;;  %v1073_v41 = vpop.xlane.xlu0 %1072  ;;  %v5108_v13 = vsel %vm1461_vm2, -inf, %v7911_v15  ;;  %v5116_v25 = vsel %vm1493_vm3, -inf, %v4039_v5  ;;  %v4041_v5 = vld [vmem:[#allocation2 + $0x58] sm:$0xff] }
 0x32f   : > { %7912 = vst [vmem:[#allocation36_spill] sm:$0xff] %v5108_v13  ;;  %vm1436_vm4 = vcmp.lt.s32.totalorder %v1049_v9, %v1314_v42  ;;  %v1356_v30 = vcvt.f32.s32 %v1355_v7  ;;  %1567 = vmax.xlane.f32.xlu1 %v5108_v13  ;;  %1600 = vmax.xlane.f32.xlu0 %v1599_v11  ;;  %7914 = vst [vmem:[#allocation13_spill] sm:$0xff] %v5116_v25  ;;  %v1074_v37 = vcvt.f32.s32 %v1073_v41  ;;  %v1608_v59 = vsel %vm329_vm0, %v5116_v25, -inf  ;;  %v7921_v7 = vld [vmem:[#allocation43_spill] sm:$0xff] }
 0x330   : > { %v5118_v14 = vsel %vm1436_vm4, %v1049_v9, %v1314_v42  ;;  %v1387_v9 = vcvt.f32.s32 %v4940_v48  ;;  %v7922_v11 = vld [vmem:[#allocation15_spill] sm:$0xff]  ;;  %v1103_v48 = vcvt.f32.s32 %v4938_v38  ;;  %v7926_v38 = vld [vmem:[#allocation45_spill] sm:$0xff] }
 0x331   : > { %7915 = vst [vmem:[#allocation38_spill] sm:$0xff] %v5118_v14  ;;  %v1359_v6 = vadd.s32 %v1358_v29, %v1356_v30  ;;  %vm1460_vm5 = vcmp.eq.s32.totalorder %v7870_v45, %v5118_v14  ;;  %vm1492_vm6 = vcmp.eq.s32.totalorder %v7918_v1, %v5118_v14  ;;  %v1077_v42 = vadd.s32 %v1076_v50, %v1074_v37 }
 0x332   : > { %v1340_v43 = vpop.xlane.xlu0 %1339  ;;  %v5125_v26 = vsel %vm1460_vm5, -inf, %v7916_v39  ;;  %v1115_v20 = vpop.xlane.xlu1 %1114  ;;  %v5130_v46 = vsel %vm1492_vm6, -inf, %v4040_v0  ;;  %v1388_v37 = vshll.u32 %v1387_v9, 16  ;;  %v1104_v0 = vshll.u32 %v1103_v48, 16 }
 0x333   : > { %7917 = vst [vmem:[#allocation14_spill] sm:$0xff] %v5125_v26  ;;  %vm1442_vm7 = vcmp.lt.s32.totalorder %v1091_v22, %v1359_v6  ;;  %v1341_v2 = vcvt.f32.s32 %v1340_v43  ;;  %1609 = vmax.xlane.f32.xlu1 %v1608_v59  ;;  %1565 = vmax.xlane.f32.xlu0 %v5125_v26  ;;  %7919 = vst [vmem:[#allocation40_spill] sm:$0xff] %v5130_v46  ;;  %v1116_v41 = vcvt.f32.s32 %v1115_v20  ;;  %v1605_v49 = vsel %vm329_vm0, %v5130_v46, -inf  ;;  %v7927_v20 = vld [vmem:[#allocation16_spill] sm:$0xff] }
 0x334   : > { %v5134_v57 = vsel %vm1442_vm7, %v1091_v22, %v1359_v6  ;;  %v1118_v6 = vshll.u32 %v1117_v47, 16  ;;  %v1373_v47 = vshll.u32 %v1372_v40, 16  ;;  %v7931_v40 = vld [vmem:[#allocation47_spill] sm:$0xff] }
 0x335   : > { %7920 = vst [vmem:[#allocation63_spill] sm:$0xff] %v5134_v57  ;;  %v1344_v29 = vadd.s32 %v1343_v23, %v1341_v2  ;;  %vm1463_vm8 = vcmp.eq.s32.totalorder %v7870_v45, %v5134_v57  ;;  %vm1495_vm9 = vcmp.eq.s32.totalorder %v7921_v7, %v5134_v57  ;;  %v1145_v7 = vcvt.f32.s32 %v4952_v31 }
 0x336   : > { %v1101_v15 = vpop.xlane.xlu0 %1100  ;;  %v5141_v8 = vsel %vm1463_vm8, -inf, %v7922_v11  ;;  %v1385_v30 = vpop.xlane.xlu1 %1384  ;;  %v5148_v22 = vsel %vm1495_vm9, -inf, %v4041_v5  ;;  %v1119_v19 = vadd.s32 %v1118_v6, %v1116_v41  ;;  %v7932_v5 = vld [vmem:[#allocation17_spill] sm:$0xff]  ;;  %v1131_v31 = vcvt.f32.s32 %v4958_v53  ;;  %v7938_v53 = vld [vmem:[#allocation52_spill] sm:$0xff] }
 0x337   : > { %7923 = vst [vmem:[#allocation43_spill] sm:$0xff] %v5141_v8  ;;  %vm1440_vm10 = vcmp.lt.s32.totalorder %v1077_v42, %v1344_v29  ;;  %1571 = vmax.xlane.f32.xlu1 %v5141_v8  ;;  %1606 = vmax.xlane.f32.xlu0 %v1605_v49  ;;  %7924 = vst [vmem:[#allocation15_spill] sm:$0xff] %v5148_v22  ;;  %v1386_v50 = vcvt.f32.s32 %v1385_v30  ;;  %v1102_v59 = vcvt.f32.s32 %v1101_v15  ;;  %v1614_v23 = vsel %vm329_vm0, %v5148_v22, -inf }
 0x338   : > { %v5150_v43 = vsel %vm1440_vm10, %v1077_v42, %v1344_v29  ;;  %v4042_v42 = vld [vmem:[#allocation2 + $0x50] sm:$0xff]  ;;  %v1417_v49 = vcvt.f32.s32 %v4962_v60  ;;  %vm1516_vm10 = vcmp.eq.s32.totalorder %v7870_v45, 0 }
 0x339   : > { %7925 = vst [vmem:[#allocation64_spill] sm:$0xff] %v5150_v43  ;;  %vm1462_vm11 = vcmp.eq.s32.totalorder %v7870_v45, %v5150_v43  ;;  %vm1494_vm12 = vcmp.eq.s32.totalorder %v7926_v38, %v5150_v43  ;;  %v1389_v39 = vadd.s32 %v1388_v37, %v1386_v50  ;;  %v1105_v41 = vadd.s32 %v1104_v0, %v1102_v59  ;;  %v4043_v37 = vld [vmem:[#allocation2 + $0x68] sm:$0xff] }
 0x33a   : > { %v1370_v1 = vpop.xlane.xlu0 %1369  ;;  %v5159_v2 = vsel %vm1462_vm11, -inf, %v7927_v20  ;;  %v5162_v29 = vsel %vm1494_vm12, -inf, %v4042_v42  ;;  %v1402_v38 = vcvt.f32.s32 %v4966_v10  ;;  %v7936_v20 = vld [vmem:[#allocation18_spill] sm:$0xff]  ;;  %v4044_v10 = vld [vmem:[#allocation2 + $0x60] sm:$0xff]  ;;  %vm2269_vm11 = vcmp.eq.s32.totalorder %v7870_v45, 1 }
 0x33b   : > { %7928 = vst [vmem:[#allocation45_spill] sm:$0xff] %v5159_v2  ;;  %v1371_v9 = vcvt.f32.s32 %v1370_v1  ;;  %1615 = vmax.xlane.f32.xlu1 %v1614_v23  ;;  %1569 = vmax.xlane.f32.xlu0 %v5159_v2  ;;  %7929 = vst [vmem:[#allocation16_spill] sm:$0xff] %v5162_v29  ;;  %vm1446_vm13 = vcmp.lt.s32.totalorder %v1119_v19, %v1389_v39  ;;  %v1611_v48 = vsel %vm329_vm0, %v5162_v29, -inf  ;;  %v1418_v1 = vshll.u32 %v1417_v49, 16 }
 0x33c   : > { %v5165_v11 = vsel %vm1446_vm13, %v1119_v19, %v1389_v39  ;;  %v1146_v39 = vshll.u32 %v1145_v7, 16  ;;  %v1403_v49 = vshll.u32 %v1402_v38, 16  ;;  %v7942_v38 = vld [vmem:[#allocation19_spill] sm:$0xff] }
 0x33d   : > { %v1374_v15 = vadd.s32 %v1373_v47, %v1371_v9  ;;  %7930 = vst [vmem:[#allocation65_spill] sm:$0xff] %v5165_v11  ;;  %vm1465_vm14 = vcmp.eq.s32.totalorder %v7870_v45, %v5165_v11  ;;  %vm1497_vm15 = vcmp.eq.s32.totalorder %v7931_v40, %v5165_v11 }
 0x33e   : > { %v1143_v30 = vpop.xlane.xlu1 %1142  ;;  %v5175_v6 = vsel %vm1465_vm14, -inf, %v7932_v5  ;;  %v5179_v50 = vsel %vm1497_vm15, -inf, %v4043_v37 }
 0x33f   : > { %vm1444_vm1 = vcmp.lt.s32.totalorder %v1105_v41, %v1374_v15  ;;  %7933 = vst [vmem:[#allocation47_spill] sm:$0xff] %v5175_v6  ;;  %1612 = vmax.xlane.f32.xlu0 %v1611_v48  ;;  %1575 = vmax.xlane.f32.xlu1 %v5175_v6  ;;  %7934 = vst [vmem:[#allocation17_spill] sm:$0xff] %v5179_v50  ;;  %v1144_v19 = vcvt.f32.s32 %v1143_v30  ;;  %v1620_v42 = vsel %vm329_vm0, %v5179_v50, -inf }
 0x340   : > { %v1129_v60 = vpop.xlane.xlu0 %1128  ;;  %v5181_v59 = vsel %vm1444_vm1, %v1105_v41, %v1374_v15  ;;  %v1132_v15 = vshll.u32 %v1131_v31, 16  ;;  %v7941_v31 = vld [vmem:[#allocation57_spill] sm:$0xff] }
 0x341   : > { %7935 = vst [vmem:[#allocation66_spill] sm:$0xff] %v5181_v59  ;;  %vm1464_vm2 = vcmp.eq.s32.totalorder %v7870_v45, %v5181_v59  ;;  %vm1496_vm3 = vcmp.eq.s32.totalorder %v7938_v53, %v5181_v59  ;;  %v1130_v47 = vcvt.f32.s32 %v1129_v60  ;;  %v1147_v30 = vadd.s32 %v1146_v39, %v1144_v19  ;;  %v7946_v53 = vld [vmem:[#allocation59_spill] sm:$0xff] }
 0x342   : > { %v1415_v23 = vpop.xlane.xlu1 %1414  ;;  %v5187_v0 = vsel %vm1464_vm2, -inf, %v7936_v20  ;;  %v5194_v41 = vsel %vm1496_vm3, -inf, %v4044_v10 }
 0x343   : > { %7937 = vst [vmem:[#allocation18_spill] sm:$0xff] %v5187_v0  ;;  %v1416_v9 = vcvt.f32.s32 %v1415_v23  ;;  %1573 = vmax.xlane.f32.xlu0 %v5187_v0  ;;  %7939 = vst [vmem:[#allocation52_spill] sm:$0xff] %v5194_v41  ;;  %1621 = vmax.xlane.f32.xlu1 %v1620_v42  ;;  %v1617_v5 = vsel %vm329_vm0, %v5194_v41, -inf  ;;  %v1133_v60 = vadd.s32 %v1132_v15, %v1130_v47  ;;  %v7947_v47 = vld [vmem:[#allocation20_spill] sm:$0xff]  ;;  %v4046_v42 = vld [vmem:[#allocation2 + $0x70] sm:$0xff] }
 0x344   : > { %v1400_v7 = vpop.xlane.xlu0 %1399 }
 0x345   : > { %v1419_v48 = vadd.s32 %v1418_v1, %v1416_v9  ;;  %v1401_v40 = vcvt.f32.s32 %v1400_v7  ;;  %v4045_v1 = vld [vmem:[#allocation2 + $0x78] sm:$0xff] }
 0x347   : > { %vm1450_vm4 = vcmp.lt.s32.totalorder %v1147_v30, %v1419_v48  ;;  %v1404_v37 = vadd.s32 %v1403_v49, %v1401_v40  ;;  %1618 = vmax.xlane.f32.xlu0 %v1617_v5  ;;  %v7950_v5 = vld [vmem:[#allocation21_spill] sm:$0xff] }
 0x348   : > { %v5198_v23 = vsel %vm1450_vm4, %v1147_v30, %v1419_v48 }
 0x349   : > { %7940 = vst [vmem:[#allocation67_spill] sm:$0xff] %v5198_v23  ;;  %vm1448_vm5 = vcmp.lt.s32.totalorder %v1133_v60, %v1404_v37  ;;  %vm1467_vm6 = vcmp.eq.s32.totalorder %v7870_v45, %v5198_v23  ;;  %vm1499_vm7 = vcmp.eq.s32.totalorder %v7941_v31, %v5198_v23 }
 0x34a   : > { %v5205_v19 = vsel %vm1467_vm6, -inf, %v7942_v38  ;;  %v5207_v39 = vsel %vm1448_vm5, %v1133_v60, %v1404_v37  ;;  %v5212_v20 = vsel %vm1499_vm7, -inf, %v4045_v1  ;;  %v1518_v60 = vsel %vm1516_vm10, %v7950_v5, -inf }
 0x34b   : > { %7943 = vst [vmem:[#allocation57_spill] sm:$0xff] %v5205_v19  ;;  %7944 = vst [vmem:[#allocation19_spill] sm:$0xff] %v5207_v39  ;;  %1579 = vmax.xlane.f32.xlu1 %v5205_v19  ;;  %vm1466_vm8 = vcmp.eq.s32.totalorder %v7870_v45, %v5207_v39  ;;  %vm1498_vm9 = vcmp.eq.s32.totalorder %v7946_v53, %v5207_v39  ;;  %v1626_v15 = vsel %vm329_vm0, %v5212_v20, -inf  ;;  %v5240_v53 = vld [vmem:[#allocation3 + $0x8] sm:$0xff] }
 0x34c   : > { %7945 = vst [vmem:[#allocation68_spill] sm:$0xff] %v5212_v20  ;;  %v5217_v9 = vsel %vm1466_vm8, -inf, %v7947_v47  ;;  %v5220_v10 = vsel %vm1498_vm9, -inf, %v4046_v42  ;;  %7952 = vst [vmem:[#allocation69_spill] sm:$0xff] %v5240_v53 }
 0x34d   : > { %7948 = vst [vmem:[#allocation59_spill] sm:$0xff] %v5217_v9  ;;  %1577 = vmax.xlane.f32.xlu0 %v5217_v9  ;;  %7949 = vst [vmem:[#allocation20_spill] sm:$0xff] %v5220_v10  ;;  %v1623_v7 = vsel %vm329_vm0, %v5220_v10, -inf }
 0x34f   : > { %1627 = vmax.xlane.f32.xlu1 %v1626_v15 }
 0x351   : > { %1624 = vmax.xlane.f32.xlu0 %v1623_v7 }
 0x398   : > { %v1552_v49 = vpop.xlane.xlu1 %1551 }
 0x39c   : > { %v1586_v30 = vpop.xlane.xlu1 %1585  ;;  %v1550_v48 = vpop.xlane.xlu0 %1549 }
 0x39d   : > { %v1630_v40 = vmax.f32 %v1552_v49, %v1586_v30  ;;  %v7953_v49 = vld [vmem:[#allocation23_spill] sm:$0xff] }
 0x39e   : > { %v1517_v30 = vsel %vm1516_vm10, %v7953_v49, -inf }
 0x39f   : > { %vm1646_vm12 = vcmp.eq.f32.partialorder %v4982_v21, %v1630_v40  ;;  %vm1902_vm13 = vcmp.eq.f32.partialorder %v4988_v12, %v1630_v40  ;;  %v5235_v37 = vsel %vm2269_vm11, %v1630_v40, %v1518_v60 }
 0x3a0   : > { %7951 = vst [vmem:[#allocation21_spill] sm:$0xff] %v5235_v37  ;;  %v1556_v31 = vpop.xlane.xlu1 %1555  ;;  %v1583_v38 = vpop.xlane.xlu0 %1582  ;;  %v5238_v1 = vsel %vm1646_vm12, %v7870_v45, 2147483647  ;;  %v1918_v47 = vsel %vm1902_vm13, %v5240_v53, 2147483647  ;;  %v5262_v37 = vld [vmem:[#allocation3] sm:$0xff] }
 0x3a1   : > { %v1629_v42 = vmax.f32 %v1550_v48, %v1583_v38  ;;  %v1692_v15 = vshra.s32 %v5238_v1, 16  ;;  %v5245_v7 = vsel %vm329_vm0, %v1918_v47, 2147483647  ;;  %7955 = vst [vmem:[#allocation70_spill] sm:$0xff] %v5262_v37 }
 0x3a2   : > { %v1950_v40 = vshra.s32 %v5245_v7, 16 }
 0x3a3   : > { %vm1645_vm14 = vcmp.eq.f32.partialorder %v4999_v16, %v1629_v42  ;;  %vm1901_vm15 = vcmp.eq.f32.partialorder %v5004_v52, %v1629_v42  ;;  %v5255_v5 = vsel %vm2269_vm11, %v1629_v42, %v1517_v30  ;;  %v5257_v48 = vcvt.s32.f32 %v1692_v15  ;;  %v7956_v42 = vld [vmem:[#allocation25_spill] sm:$0xff] }
 0x3a4   : > { %7954 = vst [vmem:[#allocation23_spill] sm:$0xff] %v5255_v5  ;;  %v1592_v60 = vpop.xlane.xlu1 %1591  ;;  %v1554_v38 = vpop.xlane.xlu0 %1553  ;;  %v5260_v47 = vsel %vm1645_vm14, %v7870_v45, 2147483647  ;;  %v1917_v49 = vsel %vm1901_vm15, %v5262_v37, 2147483647  ;;  %v1520_v15 = vsel %vm1516_vm10, %v7956_v42, -inf  ;;  %v5273_v30 = vcvt.s32.f32 %v1950_v40 }
 0x3a5   : > { %v1632_v39 = vmax.f32 %v1556_v31, %v1592_v60  ;;  %1695 = vmin.xlane.f32.xlu1 %v5257_v48  ;;  %v1678_v23 = vshra.s32 %v5260_v47, 16  ;;  %v5268_v59 = vsel %vm329_vm0, %v1917_v49, 2147483647  ;;  %v5287_v42 = vld [vmem:[#allocation3 + $0x18] sm:$0xff] }
 0x3a6   : > { %v1935_v5 = vshra.s32 %v5268_v59, 16  ;;  %7958 = vst [vmem:[#allocation71_spill] sm:$0xff] %v5287_v42 }
 0x3a7   : > { %vm1648_vm1 = vcmp.eq.f32.partialorder %v5012_v61, %v1632_v39  ;;  %vm1904_vm2 = vcmp.eq.f32.partialorder %v5020_v35, %v1632_v39  ;;  %v5280_v31 = vsel %vm2269_vm11, %v1632_v39, %v1520_v15  ;;  %v5282_v60 = vcvt.s32.f32 %v1678_v23  ;;  %v7959_v23 = vld [vmem:[#allocation27_spill] sm:$0xff] }
 0x3a8   : > { %7957 = vst [vmem:[#allocation25_spill] sm:$0xff] %v5280_v31  ;;  %v1560_v49 = vpop.xlane.xlu1 %1559  ;;  %v1589_v11 = vpop.xlane.xlu0 %1588  ;;  %v5285_v43 = vsel %vm1648_vm1, %v7870_v45, 2147483647  ;;  %v1920_v40 = vsel %vm1904_vm2, %v5287_v42, 2147483647  ;;  %v1519_v15 = vsel %vm1516_vm10, %v7959_v23, -inf  ;;  %v5299_v31 = vcvt.s32.f32 %v1935_v5 }
 0x3a9   : > { %v1631_v57 = vmax.f32 %v1554_v38, %v1589_v11  ;;  %1953 = vmin.xlane.f32.xlu1 %v5273_v30  ;;  %1681 = vmin.xlane.f32.xlu0 %v5282_v60  ;;  %v1720_v14 = vshra.s32 %v5285_v43, 16  ;;  %v5294_v39 = vsel %vm329_vm0, %v1920_v40, 2147483647  ;;  %v5313_v23 = vld [vmem:[#allocation3 + $0x10] sm:$0xff] }
 0x3aa   : > { %v1980_v35 = vshra.s32 %v5294_v39, 16  ;;  %7961 = vst [vmem:[#allocation72_spill] sm:$0xff] %v5313_v23 }
 0x3ab   : > { %vm1647_vm3 = vcmp.eq.f32.partialorder %v5031_v3, %v1631_v57  ;;  %vm1903_vm4 = vcmp.eq.f32.partialorder %v5036_v4, %v1631_v57  ;;  %v5306_v11 = vsel %vm2269_vm11, %v1631_v57, %v1519_v15  ;;  %v5308_v38 = vcvt.s32.f32 %v1720_v14  ;;  %v7962_v14 = vld [vmem:[#allocation29_spill] sm:$0xff] }
 0x3ac   : > { %7960 = vst [vmem:[#allocation27_spill] sm:$0xff] %v5306_v11  ;;  %v1598_v40 = vpop.xlane.xlu1 %1597  ;;  %v1558_v42 = vpop.xlane.xlu0 %1557  ;;  %v5311_v61 = vsel %vm1647_vm3, %v7870_v45, 2147483647  ;;  %v1919_v5 = vsel %vm1903_vm4, %v5313_v23, 2147483647  ;;  %v1522_v15 = vsel %vm1516_vm10, %v7962_v14, -inf  ;;  %v5325_v11 = vcvt.s32.f32 %v1980_v35 }
 0x3ad   : > { %v1634_v52 = vmax.f32 %v1560_v49, %v1598_v40  ;;  %1723 = vmin.xlane.f32.xlu1 %v5308_v38  ;;  %1938 = vmin.xlane.f32.xlu0 %v5299_v31  ;;  %v1706_v4 = vshra.s32 %v5311_v61, 16  ;;  %v5320_v57 = vsel %vm329_vm0, %v1919_v5, 2147483647  ;;  %v5339_v14 = vld [vmem:[#allocation3 + $0x28] sm:$0xff] }
 0x3ae   : > { %v1965_v3 = vshra.s32 %v5320_v57, 16  ;;  %7964 = vst [vmem:[#allocation73_spill] sm:$0xff] %v5339_v14 }
 0x3af   : > { %vm1650_vm5 = vcmp.eq.f32.partialorder %v5044_v54, %v1634_v52  ;;  %vm1906_vm6 = vcmp.eq.f32.partialorder %v5052_v34, %v1634_v52  ;;  %v5332_v49 = vsel %vm2269_vm11, %v1634_v52, %v1522_v15  ;;  %v5334_v40 = vcvt.s32.f32 %v1706_v4  ;;  %v7965_v4 = vld [vmem:[#allocation31_spill] sm:$0xff] }
 0x3b0   : > { %7963 = vst [vmem:[#allocation29_spill] sm:$0xff] %v5332_v49  ;;  %v1564_v5 = vpop.xlane.xlu1 %1563  ;;  %v1595_v23 = vpop.xlane.xlu0 %1594  ;;  %v5337_v37 = vsel %vm1650_vm5, %v7870_v45, 2147483647  ;;  %v1922_v35 = vsel %vm1906_vm6, %v5339_v14, 2147483647  ;;  %v1521_v15 = vsel %vm1516_vm10, %v7965_v4, -inf  ;;  %v5351_v49 = vcvt.s32.f32 %v1965_v3 }
 0x3b1   : > { %v1633_v16 = vmax.f32 %v1558_v42, %v1595_v23  ;;  %1983 = vmin.xlane.f32.xlu1 %v5325_v11  ;;  %1709 = vmin.xlane.f32.xlu0 %v5334_v40  ;;  %v1748_v34 = vshra.s32 %v5337_v37, 16  ;;  %v5346_v52 = vsel %vm329_vm0, %v1922_v35, 2147483647  ;;  %v5365_v4 = vld [vmem:[#allocation3 + $0x20] sm:$0xff] }
 0x3b2   : > { %v2010_v54 = vshra.s32 %v5346_v52, 16  ;;  %7967 = vst [vmem:[#allocation74_spill] sm:$0xff] %v5365_v4 }
 0x3b3   : > { %vm1649_vm7 = vcmp.eq.f32.partialorder %v5063_v28, %v1633_v16  ;;  %vm1905_vm8 = vcmp.eq.f32.partialorder %v5068_v44, %v1633_v16  ;;  %v5358_v42 = vsel %vm2269_vm11, %v1633_v16, %v1521_v15  ;;  %v5360_v23 = vcvt.s32.f32 %v1748_v34  ;;  %v7968_v34 = vld [vmem:[#allocation33_spill] sm:$0xff] }
 0x3b4   : > { %7966 = vst [vmem:[#allocation31_spill] sm:$0xff] %v5358_v42  ;;  %v1604_v35 = vpop.xlane.xlu1 %1603  ;;  %v1562_v14 = vpop.xlane.xlu0 %1561  ;;  %v5363_v12 = vsel %vm1649_vm7, %v7870_v45, 2147483647  ;;  %v1921_v3 = vsel %vm1905_vm8, %v5365_v4, 2147483647  ;;  %v1524_v15 = vsel %vm1516_vm10, %v7968_v34, -inf  ;;  %v5377_v42 = vcvt.s32.f32 %v2010_v54 }
 0x3b5   : > { %v1636_v53 = vmax.f32 %v1564_v5, %v1604_v35  ;;  %1751 = vmin.xlane.f32.xlu1 %v5360_v23  ;;  %1968 = vmin.xlane.f32.xlu0 %v5351_v49  ;;  %v1734_v44 = vshra.s32 %v5363_v12, 16  ;;  %v5372_v16 = vsel %vm329_vm0, %v1921_v3, 2147483647  ;;  %v5391_v34 = vld [vmem:[#allocation3 + $0x38] sm:$0xff] }
 0x3b6   : > { %v1995_v28 = vshra.s32 %v5372_v16, 16  ;;  %7970 = vst [vmem:[#allocation75_spill] sm:$0xff] %v5391_v34 }
 0x3b7   : > { %vm1652_vm9 = vcmp.eq.f32.partialorder %v5076_v24, %v1636_v53  ;;  %vm1908_vm12 = vcmp.eq.f32.partialorder %v5084_v63, %v1636_v53  ;;  %v5384_v5 = vsel %vm2269_vm11, %v1636_v53, %v1524_v15  ;;  %v5386_v35 = vcvt.s32.f32 %v1734_v44  ;;  %v7971_v44 = vld [vmem:[#allocation35_spill] sm:$0xff] }
 0x3b8   : > { %7969 = vst [vmem:[#allocation33_spill] sm:$0xff] %v5384_v5  ;;  %v1568_v3 = vpop.xlane.xlu1 %1567  ;;  %v1601_v4 = vpop.xlane.xlu0 %1600  ;;  %v5389_v21 = vsel %vm1652_vm9, %v7870_v45, 2147483647  ;;  %v1924_v54 = vsel %vm1908_vm12, %v5391_v34, 2147483647  ;;  %v1523_v15 = vsel %vm1516_vm10, %v7971_v44, -inf  ;;  %v5403_v5 = vcvt.s32.f32 %v1995_v28 }
 0x3b9   : > { %v1635_v55 = vmax.f32 %v1562_v14, %v1601_v4  ;;  %2013 = vmin.xlane.f32.xlu1 %v5377_v42  ;;  %1737 = vmin.xlane.f32.xlu0 %v5386_v35  ;;  %v1776_v63 = vshra.s32 %v5389_v21, 16  ;;  %v5398_v53 = vsel %vm329_vm0, %v1924_v54, 2147483647  ;;  %v5417_v44 = vld [vmem:[#allocation3 + $0x30] sm:$0xff] }
 0x3ba   : > { %v2040_v24 = vshra.s32 %v5398_v53, 16  ;;  %7973 = vst [vmem:[#allocation76_spill] sm:$0xff] %v5417_v44 }
 0x3bb   : > { %vm1651_vm13 = vcmp.eq.f32.partialorder %v5095_v27, %v1635_v55  ;;  %vm1907_vm14 = vcmp.eq.f32.partialorder %v5100_v32, %v1635_v55  ;;  %v5410_v14 = vsel %vm2269_vm11, %v1635_v55, %v1523_v15  ;;  %v5412_v4 = vcvt.s32.f32 %v1776_v63  ;;  %v7974_v63 = vld [vmem:[#allocation37_spill] sm:$0xff] }
 0x3bc   : > { %7972 = vst [vmem:[#allocation35_spill] sm:$0xff] %v5410_v14  ;;  %v1610_v54 = vpop.xlane.xlu1 %1609  ;;  %v1566_v34 = vpop.xlane.xlu0 %1565  ;;  %v5415_v51 = vsel %vm1651_vm13, %v7870_v45, 2147483647  ;;  %v1923_v28 = vsel %vm1907_vm14, %v5417_v44, 2147483647  ;;  %v1526_v15 = vsel %vm1516_vm10, %v7974_v63, -inf  ;;  %v5429_v14 = vcvt.s32.f32 %v2040_v24 }
 0x3bd   : > { %v1638_v56 = vmax.f32 %v1568_v3, %v1610_v54  ;;  %1779 = vmin.xlane.f32.xlu1 %v5412_v4  ;;  %1998 = vmin.xlane.f32.xlu0 %v5403_v5  ;;  %v1762_v32 = vshra.s32 %v5415_v51, 16  ;;  %v5424_v55 = vsel %vm329_vm0, %v1923_v28, 2147483647  ;;  %v4055_v63 = vld [vmem:[#allocation3 + $0x48] sm:$0xff] }
 0x3be   : > { %v2025_v27 = vshra.s32 %v5424_v55, 16 }
 0x3bf   : > { %vm1654_vm15 = vcmp.eq.f32.partialorder %v5108_v13, %v1638_v56  ;;  %vm1910_vm1 = vcmp.eq.f32.partialorder %v5116_v25, %v1638_v56  ;;  %v5436_v3 = vsel %vm2269_vm11, %v1638_v56, %v1526_v15  ;;  %v5438_v54 = vcvt.s32.f32 %v1762_v32  ;;  %v7976_v56 = vld [vmem:[#allocation39_spill] sm:$0xff] }
 0x3c0   : > { %7975 = vst [vmem:[#allocation37_spill] sm:$0xff] %v5436_v3  ;;  %v1572_v28 = vpop.xlane.xlu1 %1571  ;;  %v1607_v44 = vpop.xlane.xlu0 %1606  ;;  %v5441_v17 = vsel %vm1654_vm15, %v7870_v45, 2147483647  ;;  %v1926_v24 = vsel %vm1910_vm1, %v4055_v63, 2147483647  ;;  %v1525_v32 = vsel %vm1516_vm10, %v7976_v56, -inf  ;;  %v5452_v15 = vcvt.s32.f32 %v2025_v27 }
 0x3c1   : > { %v1637_v18 = vmax.f32 %v1566_v34, %v1607_v44  ;;  %2043 = vmin.xlane.f32.xlu1 %v5429_v14  ;;  %1765 = vmin.xlane.f32.xlu0 %v5438_v54  ;;  %v1804_v25 = vshra.s32 %v5441_v17, 16  ;;  %v5447_v13 = vsel %vm329_vm0, %v1926_v24, 2147483647  ;;  %v4056_v56 = vld [vmem:[#allocation3 + $0x40] sm:$0xff] }
 0x3c2   : > { %v2070_v3 = vshra.s32 %v5447_v13, 16 }
 0x3c3   : > { %vm1653_vm2 = vcmp.eq.f32.partialorder %v5125_v26, %v1637_v18  ;;  %vm1909_vm3 = vcmp.eq.f32.partialorder %v5130_v46, %v1637_v18  ;;  %v5459_v34 = vsel %vm2269_vm11, %v1637_v18, %v1525_v32  ;;  %v5461_v44 = vcvt.s32.f32 %v1804_v25  ;;  %v7978_v18 = vld [vmem:[#allocation41_spill] sm:$0xff] }
 0x3c4   : > { %7977 = vst [vmem:[#allocation39_spill] sm:$0xff] %v5459_v34  ;;  %v1616_v63 = vpop.xlane.xlu1 %1615  ;;  %v1570_v24 = vpop.xlane.xlu0 %1569  ;;  %v5464_v33 = vsel %vm1653_vm2, %v7870_v45, 2147483647  ;;  %v1925_v27 = vsel %vm1909_vm3, %v4056_v56, 2147483647  ;;  %v1528_v25 = vsel %vm1516_vm10, %v7978_v18, -inf  ;;  %v5475_v32 = vcvt.s32.f32 %v2070_v3 }
 0x3c5   : > { %v1640_v62 = vmax.f32 %v1572_v28, %v1616_v63  ;;  %1807 = vmin.xlane.f32.xlu1 %v5461_v44  ;;  %2028 = vmin.xlane.f32.xlu0 %v5452_v15  ;;  %v1790_v46 = vshra.s32 %v5464_v33, 16  ;;  %v5470_v26 = vsel %vm329_vm0, %v1925_v27, 2147483647 }
 0x3c6   : > { %v2055_v34 = vshra.s32 %v5470_v26, 16 }
 0x3c7   : > { %vm1656_vm4 = vcmp.eq.f32.partialorder %v5141_v8, %v1640_v62  ;;  %vm1912_vm5 = vcmp.eq.f32.partialorder %v5148_v22, %v1640_v62  ;;  %v5482_v28 = vsel %vm2269_vm11, %v1640_v62, %v1528_v25  ;;  %v5484_v63 = vcvt.s32.f32 %v1790_v46  ;;  %v7982_v62 = vld [vmem:[#allocation44_spill] sm:$0xff] }
 0x3c8   : > { %7979 = vst [vmem:[#allocation41_spill] sm:$0xff] %v5482_v28  ;;  %v1613_v56 = vpop.xlane.xlu0 %1612  ;;  %v5487_v27 = vsel %vm1656_vm4, %v7870_v45, 2147483647  ;;  %v1928_v18 = vsel %vm1912_vm5, %v4057_v36, 2147483647  ;;  %v1576_v3 = vpop.xlane.xlu1 %1575  ;;  %v1527_v46 = vsel %vm1516_vm10, %v7982_v62, -inf  ;;  %v5498_v25 = vcvt.s32.f32 %v2055_v34 }
 0x3c9   : > { %7980 = vst [vmem:[#allocation77_spill] sm:$0xff] %v5484_v63  ;;  %v1639_v58 = vmax.f32 %v1570_v24, %v1613_v56  ;;  %2073 = vmin.xlane.f32.xlu1 %v5475_v32  ;;  %1793 = vmin.xlane.f32.xlu0 %v5484_v63  ;;  %v1832_v22 = vshra.s32 %v5487_v27, 16  ;;  %v5493_v8 = vsel %vm329_vm0, %v1928_v18, 2147483647  ;;  %v4058_v63 = vld [vmem:[#allocation3 + $0x50] sm:$0xff] }
 0x3ca   : > { %7981 = vst [vmem:[#allocation78_spill] sm:$0xff] %v5493_v8  ;;  %7983 = vst [vmem:[#allocation44_spill] sm:$0xff] %v5498_v25  ;;  %v2100_v28 = vshra.s32 %v5493_v8, 16 }
 0x3cb   : > { %vm1655_vm6 = vcmp.eq.f32.partialorder %v5159_v2, %v1639_v58  ;;  %vm1911_vm7 = vcmp.eq.f32.partialorder %v5162_v29, %v1639_v58  ;;  %v5505_v36 = vsel %vm2269_vm11, %v1639_v58, %v1527_v46  ;;  %v5507_v24 = vcvt.s32.f32 %v1832_v22  ;;  %v7985_v46 = vld [vmem:[#allocation46_spill] sm:$0xff] }
 0x3cc   : > { %7984 = vst [vmem:[#allocation79_spill] sm:$0xff] %v5505_v36  ;;  %v1574_v56 = vpop.xlane.xlu0 %1573  ;;  %v5510_v18 = vsel %vm1655_vm6, %v7870_v45, 2147483647  ;;  %v1927_v62 = vsel %vm1911_vm7, %v4058_v63, 2147483647  ;;  %v1622_v34 = vpop.xlane.xlu1 %1621  ;;  %v1530_v22 = vsel %vm1516_vm10, %v7985_v46, -inf  ;;  %v5521_v36 = vcvt.s32.f32 %v2100_v28 }
 0x3cd   : > { %1835 = vmin.xlane.f32.xlu1 %v5507_v24  ;;  %2058 = vmin.xlane.f32.xlu0 %v5498_v25  ;;  %v1818_v2 = vshra.s32 %v5510_v18, 16  ;;  %v5516_v29 = vsel %vm329_vm0, %v1927_v62, 2147483647  ;;  %v1642_v58 = vmax.f32 %v1576_v3, %v1622_v34  ;;  %v7988_v46 = vld [vmem:[#allocation49_spill] sm:$0xff] }
 0x3ce   : > { %v2085_v63 = vshra.s32 %v5516_v29, 16 }
 0x3cf   : > { %v5523_v8 = vcvt.s32.f32 %v1818_v2  ;;  %vm1658_vm8 = vcmp.eq.f32.partialorder %v5175_v6, %v1642_v58  ;;  %vm1914_vm9 = vcmp.eq.f32.partialorder %v5179_v50, %v1642_v58  ;;  %v5530_v25 = vsel %vm2269_vm11, %v1642_v58, %v1530_v22  ;;  %v4059_v2 = vld [vmem:[#allocation3 + $0x68] sm:$0xff] }
 0x3d0   : > { %7986 = vst [vmem:[#allocation46_spill] sm:$0xff] %v5530_v25  ;;  %v1619_v62 = vpop.xlane.xlu0 %1618  ;;  %v5535_v28 = vsel %vm1658_vm8, %v7870_v45, 2147483647  ;;  %v1930_v34 = vsel %vm1914_vm9, %v4059_v2, 2147483647  ;;  %v1529_v6 = vsel %vm1516_vm10, %v7988_v46, -inf  ;;  %v5550_v22 = vcvt.s32.f32 %v2085_v63 }
 0x3d1   : > { %v1641_v3 = vmax.f32 %v1574_v56, %v1619_v62  ;;  %2103 = vmin.xlane.f32.xlu1 %v5521_v36  ;;  %1821 = vmin.xlane.f32.xlu0 %v5523_v8  ;;  %7987 = vst [vmem:[#allocation80_spill] sm:$0xff] %v5535_v28  ;;  %v1860_v50 = vshra.s32 %v5535_v28, 16  ;;  %v5542_v58 = vsel %vm329_vm0, %v1930_v34, 2147483647  ;;  %v4060_v34 = vld [vmem:[#allocation3 + $0x60] sm:$0xff] }
 0x3d2   : > { %7989 = vst [vmem:[#allocation49_spill] sm:$0xff] %v5542_v58  ;;  %7991 = vst [vmem:[#allocation82_spill] sm:$0xff] %v5550_v22  ;;  %v2130_v46 = vshra.s32 %v5542_v58, 16 }
 0x3d3   : > { %vm1657_vm12 = vcmp.eq.f32.partialorder %v5187_v0, %v1641_v3  ;;  %vm1913_vm13 = vcmp.eq.f32.partialorder %v5194_v41, %v1641_v3  ;;  %v5548_v56 = vsel %vm2269_vm11, %v1641_v3, %v1529_v6  ;;  %v5552_v2 = vcvt.s32.f32 %v1860_v50 }
 0x3d4   : > { %7990 = vst [vmem:[#allocation81_spill] sm:$0xff] %v5548_v56  ;;  %v1580_v62 = vpop.xlane.xlu1 %1579  ;;  %v5556_v25 = vsel %vm1657_vm12, %v7870_v45, 2147483647  ;;  %v1929_v28 = vsel %vm1913_vm13, %v4060_v34, 2147483647  ;;  %v5567_v56 = vcvt.s32.f32 %v2130_v46  ;;  %v7995_v34 = vld [vmem:[#allocation56_spill] sm:$0xff] }
 0x3d5   : > { %7992 = vst [vmem:[#allocation83_spill] sm:$0xff] %v5556_v25  ;;  %2088 = vmin.xlane.f32.xlu0 %v5550_v22  ;;  %v1846_v41 = vshra.s32 %v5556_v25, 16  ;;  %v5561_v0 = vsel %vm329_vm0, %v1929_v28, 2147483647  ;;  %1863 = vmin.xlane.f32.xlu1 %v5552_v2  ;;  %v1532_v22 = vsel %vm1516_vm10, %v7995_v34, -inf  ;;  %v7997_v46 = vld [vmem:[#allocation58_spill] sm:$0xff] }
 0x3d6   : > { %v1578_v6 = vpop.xlane.xlu0 %1577  ;;  %v2115_v50 = vshra.s32 %v5561_v0, 16  ;;  %7994 = vst [vmem:[#allocation85_spill] sm:$0xff] %v5567_v56 }
 0x3d7   : > { %v5565_v63 = vcvt.s32.f32 %v1846_v41 }
 0x3d8   : > { %v1628_v3 = vpop.xlane.xlu1 %1627  ;;  %v5574_v25 = vcvt.s32.f32 %v2115_v50 }
 0x3d9   : > { %7993 = vst [vmem:[#allocation84_spill] sm:$0xff] %v5565_v63  ;;  %v1644_v58 = vmax.f32 %v1580_v62, %v1628_v3  ;;  %1849 = vmin.xlane.f32.xlu0 %v5565_v63  ;;  %2133 = vmin.xlane.f32.xlu1 %v5567_v56  ;;  %v1531_v3 = vsel %vm1516_vm10, %v7997_v46, -inf  ;;  %v4061_v56 = vld [vmem:[#allocation3 + $0x78] sm:$0xff] }
 0x3da   : > { %v1625_v28 = vpop.xlane.xlu0 %1624 }
 0x3db   : > { %vm1660_vm14 = vcmp.eq.f32.partialorder %v5205_v19, %v1644_v58  ;;  %vm1916_vm15 = vcmp.eq.f32.partialorder %v5212_v20, %v1644_v58  ;;  %v5580_v41 = vsel %vm2269_vm11, %v1644_v58, %v1532_v22  ;;  %v1643_v62 = vmax.f32 %v1578_v6, %v1625_v28  ;;  %v4062_v28 = vld [vmem:[#allocation3 + $0x70] sm:$0xff] }
 0x3dc   : > { %7996 = vst [vmem:[#allocation56_spill] sm:$0xff] %v5580_v41  ;;  %v5586_v34 = vsel %vm1660_vm14, %v7870_v45, 2147483647  ;;  %v1932_v63 = vsel %vm1916_vm15, %v4061_v56, 2147483647  ;;  %v1677_v20 = vand.u32 65535, %v5260_v47 }
 0x3dd   : > { %vm1659_vm1 = vcmp.eq.f32.partialorder %v5217_v9, %v1643_v62  ;;  %vm1915_vm2 = vcmp.eq.f32.partialorder %v5220_v10, %v1643_v62  ;;  %v5592_v50 = vsel %vm2269_vm11, %v1643_v62, %v1531_v3  ;;  %2118 = vmin.xlane.f32.xlu0 %v5574_v25  ;;  %v1888_v58 = vshra.s32 %v5586_v34, 16 }
 0x3de   : > { %7998 = vst [vmem:[#allocation58_spill] sm:$0xff] %v5592_v50  ;;  %v5597_v22 = vsel %vm1659_vm1, %v7870_v45, 2147483647  ;;  %v5600_v6 = vsel %vm329_vm0, %v1932_v63, 2147483647 }
 0x3df   : > { %v1931_v56 = vsel %vm1915_vm2, %v4062_v28, 2147483647  ;;  %v5602_v46 = vcvt.s32.f32 %v1888_v58  ;;  %v1874_v41 = vshra.s32 %v5597_v22, 16  ;;  %v2160_v10 = vshra.s32 %v5600_v6, 16 }
 0x3e0   : > { %v5607_v62 = vsel %vm329_vm0, %v1931_v56, 2147483647  ;;  %v1691_v28 = vand.u32 65535, %v5238_v1  ;;  %v1719_v1 = vand.u32 65535, %v5285_v43  ;;  %v1979_v43 = vand.u32 65535, %v5294_v39 }
 0x3e1   : > { %1891 = vmin.xlane.f32.xlu1 %v5602_v46  ;;  %v5610_v3 = vcvt.s32.f32 %v1874_v41  ;;  %v2145_v50 = vshra.s32 %v5607_v62, 16  ;;  %v5614_v63 = vcvt.s32.f32 %v2160_v10  ;;  %v1949_v41 = vand.u32 65535, %v5245_v7 }
 0x3e2   : > { %v1693_v9 = vcvt.s32.f32 %v1691_v28  ;;  %v1721_v28 = vcvt.s32.f32 %v1719_v1  ;;  %v1747_v39 = vand.u32 65535, %v5337_v37  ;;  %v2009_v37 = vand.u32 65535, %v5346_v52 }
 0x3e3   : > { %1877 = vmin.xlane.f32.xlu0 %v5610_v3  ;;  %7999 = vst [vmem:[#allocation86_spill] sm:$0xff] %v5614_v63  ;;  %v5617_v58 = vcvt.s32.f32 %v2145_v50  ;;  %v1951_v45 = vcvt.s32.f32 %v1949_v41  ;;  %v1981_v41 = vcvt.s32.f32 %v1979_v43  ;;  %v1775_v52 = vand.u32 65535, %v5389_v21 }
 0x3e4   : > { %v2011_v43 = vcvt.s32.f32 %v2009_v37  ;;  %v2039_v21 = vand.u32 65535, %v5398_v53  ;;  %v1803_v53 = vand.u32 65535, %v5441_v17  ;;  %v2069_v17 = vand.u32 65535, %v5447_v13 }
 0x3e5   : > { %2163 = vmin.xlane.f32.xlu1 %v5614_v63  ;;  %8000 = vst [vmem:[#allocation87_spill] sm:$0xff] %v5617_v58  ;;  %v1934_v63 = vand.u32 65535, %v5268_v59  ;;  %v1705_v59 = vand.u32 65535, %v5311_v61  ;;  %v1964_v61 = vand.u32 65535, %v5320_v57  ;;  %v1733_v57 = vand.u32 65535, %v5363_v12 }
 0x3e6   : > { %v1994_v12 = vand.u32 65535, %v5372_v16  ;;  %v1761_v16 = vand.u32 65535, %v5415_v51  ;;  %v2024_v51 = vand.u32 65535, %v5424_v55  ;;  %v1805_v37 = vcvt.s32.f32 %v1803_v53 }
 0x3e7   : > { %2148 = vmin.xlane.f32.xlu0 %v5617_v58  ;;  %v1679_v58 = vcvt.s32.f32 %v1677_v20  ;;  %v1936_v20 = vcvt.s32.f32 %v1934_v63  ;;  %v1707_v63 = vcvt.s32.f32 %v1705_v59  ;;  %v1735_v59 = vcvt.s32.f32 %v1733_v57 }
 0x3e8   : > { %v2026_v57 = vcvt.s32.f32 %v2024_v51  ;;  %v1789_v55 = vand.u32 65535, %v5464_v33  ;;  %v1831_v13 = vand.u32 65535, %v5487_v27  ;;  %v2054_v33 = vand.u32 65535, %v5470_v26 }
 0x3e9   : > { %v1817_v26 = vand.u32 65535, %v5510_v18  ;;  %v2084_v53 = vand.u32 65535, %v5516_v29 }
 0x42e   : > { %v5621_v56 = vpop.xlane.xlu1 %1695 }
 0x42f   : > { %vm1697_vm3 = vcmp.eq.f32.partialorder %v5257_v48, %v5621_v56 }
 0x430   : > { %v1698_v10 = vsel %vm1697_vm3, %v1693_v9, inf }
 0x431   : > { %1699 = vmin.xlane.f32.xlu1 %v1698_v10 }
 0x432   : > { %v5627_v19 = vpop.xlane.xlu1 %1953  ;;  %v5629_v50 = vpop.xlane.xlu0 %1681 }
 0x433   : > { %vm1955_vm4 = vcmp.eq.f32.partialorder %v5273_v30, %v5627_v19  ;;  %vm1683_vm5 = vcmp.eq.f32.partialorder %v5282_v60, %v5629_v50 }
 0x434   : > { %v1956_v7 = vsel %vm1955_vm4, %v1951_v45, inf  ;;  %v1684_v48 = vsel %vm1683_vm5, %v1679_v58, inf }
 0x435   : > { %1957 = vmin.xlane.f32.xlu1 %v1956_v7  ;;  %1685 = vmin.xlane.f32.xlu0 %v1684_v48  ;;  %v1749_v7 = vcvt.s32.f32 %v1747_v39  ;;  %v1966_v48 = vcvt.s32.f32 %v1964_v61 }
 0x436   : > { %v5637_v9 = vpop.xlane.xlu1 %1723  ;;  %v5639_v47 = vpop.xlane.xlu0 %1938 }
 0x437   : > { %vm1725_vm6 = vcmp.eq.f32.partialorder %v5308_v38, %v5637_v9  ;;  %vm1940_vm7 = vcmp.eq.f32.partialorder %v5299_v31, %v5639_v47 }
 0x438   : > { %v1726_v45 = vsel %vm1725_vm6, %v1721_v28, inf  ;;  %v1941_v30 = vsel %vm1940_vm7, %v1936_v20, inf }
 0x439   : > { %1727 = vmin.xlane.f32.xlu1 %v1726_v45  ;;  %1942 = vmin.xlane.f32.xlu0 %v1941_v30 }
 0x43a   : > { %v5647_v60 = vpop.xlane.xlu1 %1983  ;;  %v5649_v58 = vpop.xlane.xlu0 %1709 }
 0x43b   : > { %vm1985_vm8 = vcmp.eq.f32.partialorder %v5325_v11, %v5647_v60  ;;  %vm1711_vm9 = vcmp.eq.f32.partialorder %v5334_v40, %v5649_v58 }
 0x43c   : > { %v1986_v31 = vsel %vm1985_vm8, %v1981_v41, inf  ;;  %v1712_v38 = vsel %vm1711_vm9, %v1707_v63, inf  ;;  %v1777_v41 = vcvt.s32.f32 %v1775_v52  ;;  %v1996_v63 = vcvt.s32.f32 %v1994_v12 }
 0x43d   : > { %1987 = vmin.xlane.f32.xlu1 %v1986_v31  ;;  %1713 = vmin.xlane.f32.xlu0 %v1712_v38  ;;  %v2041_v31 = vcvt.s32.f32 %v2039_v21  ;;  %v1763_v38 = vcvt.s32.f32 %v1761_v16 }
 0x43e   : > { %v5657_v10 = vpop.xlane.xlu1 %1751  ;;  %v5659_v1 = vpop.xlane.xlu0 %1968 }
 0x43f   : > { %vm1753_vm12 = vcmp.eq.f32.partialorder %v5360_v23, %v5657_v10  ;;  %vm1970_vm13 = vcmp.eq.f32.partialorder %v5351_v49, %v5659_v1 }
 0x440   : > { %v1754_v11 = vsel %vm1753_vm12, %v1749_v7, inf  ;;  %v1971_v40 = vsel %vm1970_vm13, %v1966_v48, inf }
 0x441   : > { %1755 = vmin.xlane.f32.xlu1 %v1754_v11  ;;  %1972 = vmin.xlane.f32.xlu0 %v1971_v40 }
 0x442   : > { %v5667_v28 = vpop.xlane.xlu1 %2013  ;;  %v5669_v20 = vpop.xlane.xlu0 %1737 }
 0x443   : > { %vm2015_vm14 = vcmp.eq.f32.partialorder %v5377_v42, %v5667_v28  ;;  %vm1739_vm15 = vcmp.eq.f32.partialorder %v5386_v35, %v5669_v20 }
 0x444   : > { %v2016_v49 = vsel %vm2015_vm14, %v2011_v43, inf  ;;  %v1740_v23 = vsel %vm1739_vm15, %v1735_v59, inf  ;;  %v2071_v43 = vcvt.s32.f32 %v2069_v17  ;;  %v1791_v59 = vcvt.s32.f32 %v1789_v55 }
 0x445   : > { %2017 = vmin.xlane.f32.xlu1 %v2016_v49  ;;  %1741 = vmin.xlane.f32.xlu0 %v1740_v23  ;;  %v1833_v23 = vcvt.s32.f32 %v1831_v13 }
 0x446   : > { %v5677_v45 = vpop.xlane.xlu1 %1779  ;;  %v5679_v30 = vpop.xlane.xlu0 %1998 }
 0x447   : > { %vm1781_vm1 = vcmp.eq.f32.partialorder %v5412_v4, %v5677_v45  ;;  %vm2000_vm2 = vcmp.eq.f32.partialorder %v5403_v5, %v5679_v30 }
 0x448   : > { %v1782_v42 = vsel %vm1781_vm1, %v1777_v41, inf  ;;  %v2001_v35 = vsel %vm2000_vm2, %v1996_v63, inf  ;;  %v2056_v41 = vcvt.s32.f32 %v2054_v33  ;;  %v8002_v63 = vld [vmem:[#allocation78_spill] sm:$0xff]  ;;  %v2114_v33 = vand.u32 65535, %v5561_v0 }
 0x449   : > { %1783 = vmin.xlane.f32.xlu1 %v1782_v42  ;;  %2002 = vmin.xlane.f32.xlu0 %v2001_v35  ;;  %v2099_v27 = vand.u32 65535, %v8002_v63 }
 0x44a   : > { %v5687_v39 = vpop.xlane.xlu1 %2043  ;;  %v5689_v61 = vpop.xlane.xlu0 %1765 }
 0x44b   : > { %vm2045_vm3 = vcmp.eq.f32.partialorder %v5429_v14, %v5687_v39  ;;  %vm1767_vm4 = vcmp.eq.f32.partialorder %v5438_v54, %v5689_v61 }
 0x44c   : > { %v2046_v5 = vsel %vm2045_vm3, %v2041_v31, inf  ;;  %v1768_v4 = vsel %vm1767_vm4, %v1763_v38, inf  ;;  %v2101_v31 = vcvt.s32.f32 %v2099_v27  ;;  %v1819_v38 = vcvt.s32.f32 %v1817_v26 }
 0x44d   : > { %2047 = vmin.xlane.f32.xlu1 %v2046_v5  ;;  %1769 = vmin.xlane.f32.xlu0 %v1768_v4  ;;  %v2116_v27 = vcvt.s32.f32 %v2114_v33  ;;  %v1887_v26 = vand.u32 65535, %v5586_v34  ;;  %v2144_v34 = vand.u32 65535, %v5607_v62 }
 0x44e   : > { %v5697_v7 = vpop.xlane.xlu1 %1807  ;;  %v5699_v48 = vpop.xlane.xlu0 %2028 }
 0x44f   : > { %vm1809_vm5 = vcmp.eq.f32.partialorder %v5461_v44, %v5697_v7  ;;  %vm2030_vm6 = vcmp.eq.f32.partialorder %v5452_v15, %v5699_v48  ;;  %v8001_v44 = vld [vmem:[#allocation77_spill] sm:$0xff] }
 0x450   : > { %v1810_v14 = vsel %vm1809_vm5, %v1805_v37, inf  ;;  %v2031_v54 = vsel %vm2030_vm6, %v2026_v57, inf  ;;  %v2086_v37 = vcvt.s32.f32 %v2084_v53  ;;  %v8005_v57 = vld [vmem:[#allocation83_spill] sm:$0xff] }
 0x451   : > { %1811 = vmin.xlane.f32.xlu1 %v1810_v14  ;;  %2032 = vmin.xlane.f32.xlu0 %v2031_v54  ;;  %v1845_v17 = vand.u32 65535, %v8005_v57  ;;  %v8006_v14 = vld [vmem:[#allocation82_spill] sm:$0xff] }
 0x452   : > { %v5707_v11 = vpop.xlane.xlu1 %2073  ;;  %v5709_v40 = vpop.xlane.xlu0 %1793 }
 0x453   : > { %vm2075_vm7 = vcmp.eq.f32.partialorder %v5475_v32, %v5707_v11  ;;  %vm1795_vm8 = vcmp.eq.f32.partialorder %v8001_v44, %v5709_v40  ;;  %v8003_v32 = vld [vmem:[#allocation44_spill] sm:$0xff]  ;;  %v1847_v13 = vcvt.s32.f32 %v1845_v17  ;;  %v1960_v17 = vcvt.f32.s32 %v5627_v19 }
 0x454   : > { %v2076_v15 = vsel %vm2075_vm7, %v2071_v43, inf  ;;  %v1796_v52 = vsel %vm1795_vm8, %v1791_v59, inf }
 0x455   : > { %2077 = vmin.xlane.f32.xlu1 %v2076_v15  ;;  %1797 = vmin.xlane.f32.xlu0 %v1796_v52  ;;  %v8008_v52 = vld [vmem:[#allocation84_spill] sm:$0xff] }
 0x456   : > { %v5717_v12 = vpop.xlane.xlu1 %1835  ;;  %v5719_v49 = vpop.xlane.xlu0 %2058 }
 0x457   : > { %vm1837_vm9 = vcmp.eq.f32.partialorder %v5507_v24, %v5717_v12  ;;  %vm2060_vm12 = vcmp.eq.f32.partialorder %v8003_v32, %v5719_v49  ;;  %v8004_v24 = vld [vmem:[#allocation80_spill] sm:$0xff]  ;;  %v1873_v32 = vand.u32 65535, %v5597_v22 }
 0x458   : > { %v1838_v21 = vsel %vm1837_vm9, %v1833_v23, inf  ;;  %v2061_v16 = vsel %vm2060_vm12, %v2056_v41, inf  ;;  %v1859_v18 = vand.u32 65535, %v8004_v24  ;;  %v8009_v23 = vld [vmem:[#allocation85_spill] sm:$0xff] }
 0x459   : > { %1839 = vmin.xlane.f32.xlu1 %v1838_v21  ;;  %2062 = vmin.xlane.f32.xlu0 %v2061_v16  ;;  %v1889_v16 = vcvt.s32.f32 %v1887_v26  ;;  %v1875_v24 = vcvt.s32.f32 %v1873_v32  ;;  %v8018_v32 = vld [vmem:[#allocation26_spill] sm:$0xff] }
 0x45a   : > { %v5727_v42 = vpop.xlane.xlu1 %2103  ;;  %v5729_v35 = vpop.xlane.xlu0 %1821  ;;  %v1861_v29 = vcvt.s32.f32 %v1859_v18 }
 0x45b   : > { %vm2105_vm13 = vcmp.eq.f32.partialorder %v5521_v36, %v5727_v42  ;;  %vm1823_vm14 = vcmp.eq.f32.partialorder %v5523_v8, %v5729_v35  ;;  %v8007_v36 = vld [vmem:[#allocation49_spill] sm:$0xff] }
 0x45c   : > { %v2106_v51 = vsel %vm2105_vm13, %v2101_v31, inf  ;;  %v1824_v5 = vsel %vm1823_vm14, %v1819_v38, inf  ;;  %v2129_v54 = vand.u32 65535, %v8007_v36  ;;  %v2159_v31 = vand.u32 65535, %v5600_v6  ;;  %v8010_v6 = vld [vmem:[#allocation86_spill] sm:$0xff]  ;;  %v8013_v36 = vld [vmem:[#allocation4_spill] sm:$0xff] }
 0x45d   : > { %2107 = vmin.xlane.f32.xlu1 %v2106_v51  ;;  %1825 = vmin.xlane.f32.xlu0 %v1824_v5  ;;  %v2146_v5 = vcvt.s32.f32 %v2144_v34 }
 0x45e   : > { %v5737_v4 = vpop.xlane.xlu0 %2088  ;;  %v5740_v55 = vpop.xlane.xlu1 %1863  ;;  %v2131_v15 = vcvt.s32.f32 %v2129_v54  ;;  %v2161_v18 = vcvt.s32.f32 %v2159_v31 }
 0x45f   : > { %vm2090_vm15 = vcmp.eq.f32.partialorder %v8006_v14, %v5737_v4  ;;  %vm1865_vm1 = vcmp.eq.f32.partialorder %v5552_v2, %v5740_v55  ;;  %v8012_v14 = vld [vmem:[#allocation42_spill] sm:$0xff] }
 0x460   : > { %v2091_v8 = vsel %vm2090_vm15, %v2086_v37, inf  ;;  %v1866_v43 = vsel %vm1865_vm1, %v1861_v29, inf  ;;  %v8011_v37 = vld [vmem:[#allocation87_spill] sm:$0xff]  ;;  %v1534_v54 = vsel %vm1516_vm10, %v8012_v14, 4294967295  ;;  %v1716_v14 = vcvt.f32.s32 %v5649_v58 }
 0x461   : > { %2092 = vmin.xlane.f32.xlu0 %v2091_v8  ;;  %1867 = vmin.xlane.f32.xlu1 %v1866_v43  ;;  %v1688_v8 = vcvt.f32.s32 %v5629_v50  ;;  %v1975_v58 = vcvt.f32.s32 %v5659_v1  ;;  %v2020_v1 = vcvt.f32.s32 %v5667_v28 }
 0x462   : > { %v5747_v59 = vpop.xlane.xlu0 %1849  ;;  %v5750_v44 = vpop.xlane.xlu1 %2133 }
 0x463   : > { %vm1851_vm2 = vcmp.eq.f32.partialorder %v8008_v52, %v5747_v59  ;;  %vm2135_vm3 = vcmp.eq.f32.partialorder %v8009_v23, %v5750_v44  ;;  %v1945_v52 = vcvt.f32.s32 %v5639_v47 }
 0x464   : > { %v1852_v41 = vsel %vm1851_vm2, %v1847_v13, inf  ;;  %v2136_v2 = vsel %vm2135_vm3, %v2131_v15, inf  ;;  %v1961_v15 = vshll.u32 %v1960_v17, 16  ;;  %v8021_v17 = vld [vmem:[#allocation12_spill] sm:$0xff] }
 0x465   : > { %1853 = vmin.xlane.f32.xlu0 %v1852_v41  ;;  %2137 = vmin.xlane.f32.xlu1 %v2136_v2  ;;  %v8014_v41 = vld [vmem:[#allocation50_spill] sm:$0xff]  ;;  %v8015_v2 = vld [vmem:[#allocation55_spill] sm:$0xff] }
 0x466   : > { %v5756_v63 = vpop.xlane.xlu0 %2118  ;;  %v5793_v19 = vsel %vm1516_vm10, %v8015_v2, 4294967295 }
 0x467   : > { %vm2120_vm4 = vcmp.eq.f32.partialorder %v5574_v25, %v5756_v63 }
 0x468   : > { %v2121_v0 = vsel %vm2120_vm4, %v2116_v27, inf  ;;  %v8016_v27 = vld [vmem:[#allocation62_spill] sm:$0xff] }
 0x469   : > { %2122 = vmin.xlane.f32.xlu0 %v2121_v0  ;;  %v5798_v50 = vsel %vm1516_vm10, %v8016_v27, 4294967295  ;;  %v8017_v0 = vld [vmem:[#allocation6_spill] sm:$0xff]  ;;  %v8025_v27 = vld [vmem:[#allocation69_spill] sm:$0xff] }
 0x46a   : > { %v5762_v21 = vpop.xlane.xlu1 %1891  ;;  %v5803_v47 = vsel %vm1516_vm10, %v8017_v0, 4294967295  ;;  %v8026_v0 = vld [vmem:[#allocation48_spill] sm:$0xff] }
 0x46b   : > { %vm1893_vm5 = vcmp.eq.f32.partialorder %v5602_v46, %v5762_v21 }
 0x46c   : > { %v5767_v38 = vpop.xlane.xlu0 %1877  ;;  %v1894_v53 = vsel %vm1893_vm5, %v1889_v16, inf  ;;  %v5808_v16 = vsel %vm1516_vm10, %v8018_v32, 4294967295 }
 0x46d   : > { %1895 = vmin.xlane.f32.xlu1 %v1894_v53  ;;  %vm1879_vm6 = vcmp.eq.f32.partialorder %v5610_v3, %v5767_v38  ;;  %v1702_v3 = vcvt.f32.s32 %v5621_v56  ;;  %v1533_v56 = vsel %vm1516_vm10, %v8014_v41, 4294967295  ;;  %v8023_v41 = vld [vmem:[#allocation51_spill] sm:$0xff] }
 0x46e   : > { %v5772_v25 = vpop.xlane.xlu1 %2163  ;;  %v1880_v22 = vsel %vm1879_vm6, %v1875_v24, inf  ;;  %v8019_v24 = vld [vmem:[#allocation9_spill] sm:$0xff] }
 0x46f   : > { %1881 = vmin.xlane.f32.xlu0 %v1880_v22  ;;  %vm2165_vm7 = vcmp.eq.f32.partialorder %v8010_v6, %v5772_v25  ;;  %v1703_v33 = vshll.u32 %v1702_v3, 16  ;;  %v5813_v34 = vsel %vm1516_vm10, %v8019_v24, 4294967295  ;;  %v1689_v22 = vshll.u32 %v1688_v8, 16 }
 0x470   : > { %v5776_v51 = vpop.xlane.xlu0 %2148  ;;  %v2166_v46 = vsel %vm2165_vm7, %v2161_v18, inf  ;;  %v1730_v18 = vcvt.f32.s32 %v5637_v9  ;;  %v1990_v6 = vcvt.f32.s32 %v5647_v60 }
 0x471   : > { %2167 = vmin.xlane.f32.xlu1 %v2166_v46  ;;  %vm2150_vm8 = vcmp.eq.f32.partialorder %v8011_v37, %v5776_v51  ;;  %v8020_v37 = vld [vmem:[#allocation32_spill] sm:$0xff] }
 0x472   : > { %v2151_v62 = vsel %vm2150_vm8, %v2146_v5, inf }
 0x473   : > { %2152 = vmin.xlane.f32.xlu0 %v2151_v62  ;;  %v5820_v62 = vsel %vm1516_vm10, %v8020_v37, 4294967295 }
 0x4ba   : > { %v1700_v57 = vpop.xlane.xlu1 %1699 }
 0x4bb   : > { %v1701_v29 = vcvt.f32.s32 %v1700_v57  ;;  %v1946_v57 = vshll.u32 %v1945_v52, 16 }
 0x4bd   : > { %v1704_v31 = vadd.s32 %v1703_v33, %v1701_v29  ;;  %v5825_v29 = vsel %vm1516_vm10, %v8021_v17, 4294967295  ;;  %v1731_v33 = vshll.u32 %v1730_v18, 16  ;;  %v1976_v17 = vshll.u32 %v1975_v58, 16  ;;  %v8035_v58 = vld [vmem:[#allocation60_spill] sm:$0xff] }
 0x4be   : > { %v1958_v43 = vpop.xlane.xlu1 %1957  ;;  %v1686_v13 = vpop.xlane.xlu0 %1685 }
 0x4bf   : > { %v1959_v23 = vcvt.f32.s32 %v1958_v43  ;;  %v1687_v26 = vcvt.f32.s32 %v1686_v13 }
 0x4c1   : > { %v1962_v53 = vadd.s32 %v1961_v15, %v1959_v23  ;;  %v1690_v9 = vadd.s32 %v1689_v22, %v1687_v26  ;;  %v1991_v15 = vshll.u32 %v1990_v6, 16 }
 0x4c2   : > { %v1728_v46 = vpop.xlane.xlu1 %1727  ;;  %v1943_v5 = vpop.xlane.xlu0 %1942 }
 0x4c3   : > { %vm2175_vm9 = vcmp.lt.s32.totalorder %v1704_v31, %v1962_v53  ;;  %v1944_v3 = vcvt.f32.s32 %v1943_v5  ;;  %v1729_v60 = vcvt.f32.s32 %v1728_v46 }
 0x4c4   : > { %v2176_v8 = vsel %vm2175_vm9, %v1704_v31, %v1962_v53  ;;  %v1758_v31 = vcvt.f32.s32 %v5657_v10  ;;  %v8031_v10 = vld [vmem:[#allocation70_spill] sm:$0xff] }
 0x4c5   : > { %v1947_v43 = vadd.s32 %v1946_v57, %v1944_v3  ;;  %vm2206_vm12 = vcmp.eq.s32.totalorder %v8013_v36, %v2176_v8  ;;  %v5831_v13 = vsel %vm2269_vm11, %v2176_v8, %v1534_v54  ;;  %vm2238_vm13 = vcmp.eq.s32.totalorder %v8025_v27, %v2176_v8  ;;  %v8029_v57 = vld [vmem:[#allocation53_spill] sm:$0xff] }
 0x4c6   : > { %8022 = vst [vmem:[#allocation77_spill] sm:$0xff] %v5831_v13  ;;  %v1988_v52 = vpop.xlane.xlu1 %1987  ;;  %v1714_v23 = vpop.xlane.xlu0 %1713  ;;  %v5834_v2 = vsel %vm2206_vm12, -inf, %v8023_v41  ;;  %v5840_v32 = vsel %vm2238_vm13, -inf, %v8026_v0  ;;  %v1717_v54 = vshll.u32 %v1716_v14, 16  ;;  %v1732_v22 = vadd.s32 %v1731_v33, %v1729_v60  ;;  %v8037_v0 = vld [vmem:[#allocation71_spill] sm:$0xff] }
 0x4c7   : > { %8024 = vst [vmem:[#allocation78_spill] sm:$0xff] %v5834_v2  ;;  %vm2173_vm14 = vcmp.lt.s32.totalorder %v1690_v9, %v1947_v43  ;;  %v1989_v26 = vcvt.f32.s32 %v1988_v52  ;;  %2304 = vmax.xlane.f32.xlu1 %v5834_v2  ;;  %8027 = vst [vmem:[#allocation44_spill] sm:$0xff] %v5840_v32  ;;  %v1715_v53 = vcvt.f32.s32 %v1714_v23  ;;  %v2337_v37 = vsel %vm329_vm0, %v5840_v32, -inf }
 0x4c8   : > { %v2174_v24 = vsel %vm2173_vm14, %v1690_v9, %v1947_v43  ;;  %v1759_v28 = vshll.u32 %v1758_v31, 16  ;;  %v1744_v8 = vcvt.f32.s32 %v5669_v20  ;;  %v2021_v23 = vshll.u32 %v2020_v1, 16 }
 0x4c9   : > { %v1992_v18 = vadd.s32 %v1991_v15, %v1989_v26  ;;  %vm2205_vm15 = vcmp.eq.s32.totalorder %v8013_v36, %v2174_v24  ;;  %v5846_v6 = vsel %vm2269_vm11, %v2174_v24, %v1533_v56  ;;  %vm2237_vm1 = vcmp.eq.s32.totalorder %v8031_v10, %v2174_v24  ;;  %v8032_v56 = vld [vmem:[#allocation54_spill] sm:$0xff] }
 0x4ca   : > { %8028 = vst [vmem:[#allocation80_spill] sm:$0xff] %v5846_v6  ;;  %v1756_v46 = vpop.xlane.xlu1 %1755  ;;  %v1973_v5 = vpop.xlane.xlu0 %1972  ;;  %v5852_v3 = vsel %vm2205_vm15, -inf, %v8029_v57  ;;  %v5857_v9 = vsel %vm2237_vm1, -inf, %v8032_v56  ;;  %v1718_v60 = vadd.s32 %v1717_v54, %v1715_v53  ;;  %v2005_v54 = vcvt.f32.s32 %v5679_v30  ;;  %v8043_v56 = vld [vmem:[#allocation72_spill] sm:$0xff] }
 0x4cb   : > { %8030 = vst [vmem:[#allocation83_spill] sm:$0xff] %v5852_v3  ;;  %vm2179_vm2 = vcmp.lt.s32.totalorder %v1732_v22, %v1992_v18  ;;  %v1974_v14 = vcvt.f32.s32 %v1973_v5  ;;  %2338 = vmax.xlane.f32.xlu1 %v2337_v37  ;;  %2302 = vmax.xlane.f32.xlu0 %v5852_v3  ;;  %8033 = vst [vmem:[#allocation82_spill] sm:$0xff] %v5857_v9  ;;  %v1757_v33 = vcvt.f32.s32 %v1756_v46  ;;  %v2334_v20 = vsel %vm329_vm0, %v5857_v9, -inf }
 0x4cc   : > { %v2180_v43 = vsel %vm2179_vm2, %v1732_v22, %v1992_v18  ;;  %v1745_v24 = vshll.u32 %v1744_v8, 16  ;;  %v1786_v22 = vcvt.f32.s32 %v5677_v45  ;;  %v2050_v37 = vcvt.f32.s32 %v5687_v39 }
 0x4cd   : > { %v1977_v15 = vadd.s32 %v1976_v17, %v1974_v14  ;;  %vm2208_vm3 = vcmp.eq.s32.totalorder %v8013_v36, %v2180_v43  ;;  %v5864_v52 = vsel %vm2269_vm11, %v2180_v43, %v5793_v19  ;;  %vm2240_vm4 = vcmp.eq.s32.totalorder %v8037_v0, %v2180_v43  ;;  %v8038_v19 = vld [vmem:[#allocation61_spill] sm:$0xff] }
 0x4ce   : > { %8034 = vst [vmem:[#allocation49_spill] sm:$0xff] %v5864_v52  ;;  %v2018_v41 = vpop.xlane.xlu1 %2017  ;;  %v1742_v27 = vpop.xlane.xlu0 %1741  ;;  %v5867_v26 = vsel %vm2208_vm3, -inf, %v8035_v58  ;;  %v5875_v53 = vsel %vm2240_vm4, -inf, %v8038_v19  ;;  %v1760_v46 = vadd.s32 %v1759_v28, %v1757_v33  ;;  %v8041_v14 = vld [vmem:[#allocation5_spill] sm:$0xff]  ;;  %v2006_v28 = vshll.u32 %v2005_v54, 16  ;;  %v8047_v54 = vld [vmem:[#allocation24_spill] sm:$0xff] }
 0x4cf   : > { %8036 = vst [vmem:[#allocation84_spill] sm:$0xff] %v5867_v26  ;;  %vm2177_vm5 = vcmp.lt.s32.totalorder %v1718_v60, %v1977_v15  ;;  %v2019_v31 = vcvt.f32.s32 %v2018_v41  ;;  %2308 = vmax.xlane.f32.xlu1 %v5867_v26  ;;  %2335 = vmax.xlane.f32.xlu0 %v2334_v20  ;;  %8039 = vst [vmem:[#allocation85_spill] sm:$0xff] %v5875_v53  ;;  %v1743_v18 = vcvt.f32.s32 %v1742_v27  ;;  %v2343_v17 = vsel %vm329_vm0, %v5875_v53, -inf  ;;  %v8049_v19 = vld [vmem:[#allocation73_spill] sm:$0xff] }
 0x4d0   : > { %v2178_v1 = vsel %vm2177_vm5, %v1718_v60, %v1977_v15  ;;  %v1787_v39 = vshll.u32 %v1786_v22, 16  ;;  %v1772_v43 = vcvt.f32.s32 %v5689_v61  ;;  %v2051_v58 = vshll.u32 %v2050_v37, 16 }
 0x4d1   : > { %v2022_v5 = vadd.s32 %v2021_v23, %v2019_v31  ;;  %vm2207_vm6 = vcmp.eq.s32.totalorder %v8013_v36, %v2178_v1  ;;  %v5882_v30 = vsel %vm2269_vm11, %v2178_v1, %v5798_v50  ;;  %vm2239_vm7 = vcmp.eq.s32.totalorder %v8043_v56, %v2178_v1  ;;  %v8044_v50 = vld [vmem:[#allocation22_spill] sm:$0xff] }
 0x4d2   : > { %8040 = vst [vmem:[#allocation86_spill] sm:$0xff] %v5882_v30  ;;  %v1784_v57 = vpop.xlane.xlu1 %1783  ;;  %v2003_v10 = vpop.xlane.xlu0 %2002  ;;  %v5888_v45 = vsel %vm2207_vm6, -inf, %v8041_v14  ;;  %v5893_v60 = vsel %vm2239_vm7, -inf, %v8044_v50  ;;  %v1746_v33 = vadd.s32 %v1745_v24, %v1743_v18  ;;  %v2035_v24 = vcvt.f32.s32 %v5699_v48  ;;  %v8055_v50 = vld [vmem:[#allocation74_spill] sm:$0xff] }
 0x4d3   : > { %8042 = vst [vmem:[#allocation87_spill] sm:$0xff] %v5888_v45  ;;  %vm2183_vm8 = vcmp.lt.s32.totalorder %v1760_v46, %v2022_v5  ;;  %v2004_v8 = vcvt.f32.s32 %v2003_v10  ;;  %2344 = vmax.xlane.f32.xlu1 %v2343_v17  ;;  %2306 = vmax.xlane.f32.xlu0 %v5888_v45  ;;  %8045 = vst [vmem:[#allocation42_spill] sm:$0xff] %v5893_v60  ;;  %v1785_v23 = vcvt.f32.s32 %v1784_v57  ;;  %v2340_v61 = vsel %vm329_vm0, %v5893_v60, -inf }
 0x4d4   : > { %v2184_v15 = vsel %vm2183_vm8, %v1760_v46, %v2022_v5  ;;  %v1773_v1 = vshll.u32 %v1772_v43, 16  ;;  %v1814_v46 = vcvt.f32.s32 %v5697_v7  ;;  %v2080_v17 = vcvt.f32.s32 %v5707_v11 }
 0x4d5   : > { %v2007_v41 = vadd.s32 %v2006_v28, %v2004_v8  ;;  %vm2210_vm9 = vcmp.eq.s32.totalorder %v8013_v36, %v2184_v15  ;;  %v5900_v27 = vsel %vm2269_vm11, %v2184_v15, %v5803_v47  ;;  %vm2242_vm12 = vcmp.eq.s32.totalorder %v8049_v19, %v2184_v15  ;;  %v8050_v47 = vld [vmem:[#allocation7_spill] sm:$0xff]  ;;  %v8053_v8 = vld [vmem:[#allocation8_spill] sm:$0xff] }
 0x4d6   : > { %8046 = vst [vmem:[#allocation50_spill] sm:$0xff] %v5900_v27  ;;  %v2048_v20 = vpop.xlane.xlu1 %2047  ;;  %v1770_v0 = vpop.xlane.xlu0 %1769  ;;  %v5903_v31 = vsel %vm2210_vm9, -inf, %v8047_v54  ;;  %v5911_v18 = vsel %vm2242_vm12, -inf, %v8050_v47  ;;  %v1788_v57 = vadd.s32 %v1787_v39, %v1785_v23  ;;  %v2036_v39 = vshll.u32 %v2035_v24, 16  ;;  %v8059_v24 = vld [vmem:[#allocation30_spill] sm:$0xff]  ;;  %v8061_v47 = vld [vmem:[#allocation75_spill] sm:$0xff] }
 0x4d7   : > { %8048 = vst [vmem:[#allocation55_spill] sm:$0xff] %v5903_v31  ;;  %vm2181_vm13 = vcmp.lt.s32.totalorder %v1746_v33, %v2007_v41  ;;  %v2049_v22 = vcvt.f32.s32 %v2048_v20  ;;  %2312 = vmax.xlane.f32.xlu1 %v5903_v31  ;;  %2341 = vmax.xlane.f32.xlu0 %v2340_v61  ;;  %8051 = vst [vmem:[#allocation62_spill] sm:$0xff] %v5911_v18  ;;  %v1771_v5 = vcvt.f32.s32 %v1770_v0  ;;  %v2349_v28 = vsel %vm329_vm0, %v5911_v18, -inf }
 0x4d8   : > { %v2182_v37 = vsel %vm2181_vm13, %v1746_v33, %v2007_v41  ;;  %v1815_v11 = vshll.u32 %v1814_v46, 16  ;;  %v1800_v15 = vcvt.f32.s32 %v5709_v40  ;;  %v2081_v54 = vshll.u32 %v2080_v17, 16 }
 0x4d9   : > { %v2052_v10 = vadd.s32 %v2051_v58, %v2049_v22  ;;  %vm2209_vm14 = vcmp.eq.s32.totalorder %v8013_v36, %v2182_v37  ;;  %v5918_v48 = vsel %vm2269_vm11, %v2182_v37, %v5808_v16  ;;  %vm2241_vm15 = vcmp.eq.s32.totalorder %v8055_v50, %v2182_v37  ;;  %v8056_v16 = vld [vmem:[#allocation28_spill] sm:$0xff] }
 0x4da   : > { %8052 = vst [vmem:[#allocation6_spill] sm:$0xff] %v5918_v48  ;;  %v1812_v14 = vpop.xlane.xlu1 %1811  ;;  %v2033_v56 = vpop.xlane.xlu0 %2032  ;;  %v5924_v7 = vsel %vm2209_vm14, -inf, %v8053_v8  ;;  %v5929_v33 = vsel %vm2241_vm15, -inf, %v8056_v16  ;;  %v1774_v23 = vadd.s32 %v1773_v1, %v1771_v5  ;;  %v2065_v1 = vcvt.f32.s32 %v5719_v49  ;;  %v8067_v16 = vld [vmem:[#allocation76_spill] sm:$0xff] }
 0x4db   : > { %8054 = vst [vmem:[#allocation26_spill] sm:$0xff] %v5924_v7  ;;  %vm2187_vm1 = vcmp.lt.s32.totalorder %v1788_v57, %v2052_v10  ;;  %v2034_v43 = vcvt.f32.s32 %v2033_v56  ;;  %2350 = vmax.xlane.f32.xlu1 %v2349_v28  ;;  %2310 = vmax.xlane.f32.xlu0 %v5924_v7  ;;  %8057 = vst [vmem:[#allocation9_spill] sm:$0xff] %v5929_v33  ;;  %v1813_v58 = vcvt.f32.s32 %v1812_v14  ;;  %v2346_v40 = vsel %vm329_vm0, %v5929_v33, -inf }
 0x4dc   : > { %v2188_v41 = vsel %vm2187_vm1, %v1788_v57, %v2052_v10  ;;  %v1801_v37 = vshll.u32 %v1800_v15, 16  ;;  %v1842_v57 = vcvt.f32.s32 %v5717_v12  ;;  %v2110_v28 = vcvt.f32.s32 %v5727_v42 }
 0x4dd   : > { %v2037_v20 = vadd.s32 %v2036_v39, %v2034_v43  ;;  %vm2212_vm2 = vcmp.eq.s32.totalorder %v8013_v36, %v2188_v41  ;;  %v5936_v0 = vsel %vm2269_vm11, %v2188_v41, %v5813_v34  ;;  %vm2244_vm3 = vcmp.eq.s32.totalorder %v8061_v47, %v2188_v41  ;;  %v8062_v34 = vld [vmem:[#allocation10_spill] sm:$0xff]  ;;  %v8065_v43 = vld [vmem:[#allocation11_spill] sm:$0xff] }
 0x4de   : > { %8058 = vst [vmem:[#allocation32_spill] sm:$0xff] %v5936_v0  ;;  %v2078_v61 = vpop.xlane.xlu1 %2077  ;;  %v1798_v19 = vpop.xlane.xlu0 %1797  ;;  %v5939_v22 = vsel %vm2212_vm2, -inf, %v8059_v24  ;;  %v5947_v5 = vsel %vm2244_vm3, -inf, %v8062_v34  ;;  %v1816_v14 = vadd.s32 %v1815_v11, %v1813_v58  ;;  %v2066_v11 = vshll.u32 %v2065_v1, 16  ;;  %v8071_v1 = vld [vmem:[#allocation36_spill] sm:$0xff]  ;;  %v5979_v34 = vld [vmem:[#allocation3 + $0x48] sm:$0xff] }
 0x4df   : > { %8060 = vst [vmem:[#allocation12_spill] sm:$0xff] %v5939_v22  ;;  %vm2185_vm4 = vcmp.lt.s32.totalorder %v1774_v23, %v2037_v20  ;;  %v2079_v46 = vcvt.f32.s32 %v2078_v61  ;;  %2316 = vmax.xlane.f32.xlu1 %v5939_v22  ;;  %2347 = vmax.xlane.f32.xlu0 %v2346_v40  ;;  %8063 = vst [vmem:[#allocation51_spill] sm:$0xff] %v5947_v5  ;;  %v1799_v10 = vcvt.f32.s32 %v1798_v19  ;;  %v2355_v39 = vsel %vm329_vm0, %v5947_v5, -inf }
 0x4e0   : > { %v2186_v17 = vsel %vm2185_vm4, %v1774_v23, %v2037_v20  ;;  %v1843_v42 = vshll.u32 %v1842_v57, 16  ;;  %v1828_v41 = vcvt.f32.s32 %v5729_v35  ;;  %v2111_v24 = vshll.u32 %v2110_v28, 16 }
 0x4e1   : > { %v2082_v56 = vadd.s32 %v2081_v54, %v2079_v46  ;;  %vm2211_vm5 = vcmp.eq.s32.totalorder %v8013_v36, %v2186_v17  ;;  %v5954_v49 = vsel %vm2269_vm11, %v2186_v17, %v5820_v62  ;;  %vm2243_vm6 = vcmp.eq.s32.totalorder %v8067_v16, %v2186_v17  ;;  %v8068_v62 = vld [vmem:[#allocation34_spill] sm:$0xff] }
 0x4e2   : > { %8064 = vst [vmem:[#allocation69_spill] sm:$0xff] %v5954_v49  ;;  %v1840_v8 = vpop.xlane.xlu1 %1839  ;;  %v2063_v50 = vpop.xlane.xlu0 %2062  ;;  %v5960_v12 = vsel %vm2211_vm5, -inf, %v8065_v43  ;;  %v5965_v23 = vsel %vm2243_vm6, -inf, %v8068_v62  ;;  %v1802_v58 = vadd.s32 %v1801_v37, %v1799_v10  ;;  %v2095_v37 = vcvt.f32.s32 %v5737_v4  ;;  %v8075_v17 = vld [vmem:[#allocation38_spill] sm:$0xff] }
 0x4e3   : > { %8066 = vst [vmem:[#allocation48_spill] sm:$0xff] %v5960_v12  ;;  %vm2191_vm7 = vcmp.lt.s32.totalorder %v1816_v14, %v2082_v56  ;;  %v2064_v15 = vcvt.f32.s32 %v2063_v50  ;;  %2356 = vmax.xlane.f32.xlu1 %v2355_v39  ;;  %2314 = vmax.xlane.f32.xlu0 %v5960_v12  ;;  %8069 = vst [vmem:[#allocation53_spill] sm:$0xff] %v5965_v23  ;;  %v1841_v54 = vcvt.f32.s32 %v1840_v8  ;;  %v2352_v35 = vsel %vm329_vm0, %v5965_v23, -inf  ;;  %v8078_v62 = vld [vmem:[#allocation14_spill] sm:$0xff] }
 0x4e4   : > { %v2192_v20 = vsel %vm2191_vm7, %v1816_v14, %v2082_v56  ;;  %v1541_v14 = vsel %vm1516_vm10, %v8075_v17, 4294967295  ;;  %v8076_v56 = vld [vmem:[#allocation63_spill] sm:$0xff]  ;;  %v1829_v16 = vshll.u32 %v1828_v41, 16  ;;  %v8083_v17 = vld [vmem:[#allocation64_spill] sm:$0xff] }
 0x4e5   : > { %v2067_v61 = vadd.s32 %v2066_v11, %v2064_v15  ;;  %vm2214_vm8 = vcmp.eq.s32.totalorder %v8013_v36, %v2192_v20  ;;  %v5972_v19 = vsel %vm2269_vm11, %v2192_v20, %v5825_v29  ;;  %vm2246_vm9 = vcmp.eq.s32.totalorder %v5979_v34, %v2192_v20  ;;  %v8073_v29 = vld [vmem:[#allocation13_spill] sm:$0xff] }
 0x4e6   : > { %8070 = vst [vmem:[#allocation70_spill] sm:$0xff] %v5972_v19  ;;  %v2108_v40 = vpop.xlane.xlu1 %2107  ;;  %v1826_v47 = vpop.xlane.xlu0 %1825  ;;  %v5975_v46 = vsel %vm2214_vm8, -inf, %v8071_v1  ;;  %v5985_v10 = vsel %vm2246_vm9, -inf, %v8073_v29  ;;  %v1544_v28 = vsel %vm1516_vm10, %v8076_v56, 4294967295  ;;  %v1844_v39 = vadd.s32 %v1843_v42, %v1841_v54  ;;  %v6017_v29 = vld [vmem:[#allocation3 + $0x58] sm:$0xff] }
 0x4e7   : > { %8072 = vst [vmem:[#allocation54_spill] sm:$0xff] %v5975_v46  ;;  %vm2189_vm12 = vcmp.lt.s32.totalorder %v1802_v58, %v2067_v61  ;;  %v2109_v57 = vcvt.f32.s32 %v2108_v40  ;;  %2320 = vmax.xlane.f32.xlu1 %v5975_v46  ;;  %2353 = vmax.xlane.f32.xlu0 %v2352_v35  ;;  %8074 = vst [vmem:[#allocation60_spill] sm:$0xff] %v5985_v10  ;;  %v1827_v8 = vcvt.f32.s32 %v1826_v47  ;;  %v2361_v15 = vsel %vm329_vm0, %v5985_v10, -inf  ;;  %v6003_v40 = vld [vmem:[#allocation3 + $0x40] sm:$0xff] }
 0x4e8   : > { %v2190_v50 = vsel %vm2189_vm12, %v1802_v58, %v2067_v61  ;;  %v2096_v42 = vshll.u32 %v2095_v37, 16  ;;  %v8080_v61 = vld [vmem:[#allocation40_spill] sm:$0xff]  ;;  %v2140_v47 = vcvt.f32.s32 %v5750_v44  ;;  %v8084_v44 = vld [vmem:[#allocation43_spill] sm:$0xff] }
 0x4e9   : > { %v2112_v4 = vadd.s32 %v2111_v24, %v2109_v57  ;;  %vm2213_vm13 = vcmp.eq.s32.totalorder %v8013_v36, %v2190_v50  ;;  %v5996_v43 = vsel %vm2269_vm11, %v2190_v50, %v1541_v14  ;;  %vm2245_vm14 = vcmp.eq.s32.totalorder %v6003_v40, %v2190_v50 }
 0x4ea   : > { %8077 = vst [vmem:[#allocation71_spill] sm:$0xff] %v5996_v43  ;;  %v2093_v11 = vpop.xlane.xlu0 %2092  ;;  %v6001_v20 = vsel %vm2213_vm13, -inf, %v8078_v62  ;;  %v1868_v58 = vpop.xlane.xlu1 %1867  ;;  %v6008_v41 = vsel %vm2245_vm14, -inf, %v8080_v61  ;;  %v1870_v24 = vcvt.f32.s32 %v5740_v55  ;;  %v1830_v1 = vadd.s32 %v1829_v16, %v1827_v8  ;;  %v8086_v16 = vld [vmem:[#allocation15_spill] sm:$0xff] }
 0x4eb   : > { %8079 = vst [vmem:[#allocation61_spill] sm:$0xff] %v6001_v20  ;;  %vm2195_vm15 = vcmp.lt.s32.totalorder %v1844_v39, %v2112_v4  ;;  %v2094_v54 = vcvt.f32.s32 %v2093_v11  ;;  %2362 = vmax.xlane.f32.xlu1 %v2361_v15  ;;  %2318 = vmax.xlane.f32.xlu0 %v6001_v20  ;;  %8081 = vst [vmem:[#allocation5_spill] sm:$0xff] %v6008_v41  ;;  %v1543_v14 = vsel %vm1516_vm10, %v8083_v17, 4294967295  ;;  %v1869_v55 = vcvt.f32.s32 %v1868_v58 }
 0x4ec   : > { %v2196_v35 = vsel %vm2195_vm15, %v1844_v39, %v2112_v4  ;;  %v2358_v50 = vsel %vm329_vm0, %v6008_v41, -inf  ;;  %v1856_v39 = vcvt.f32.s32 %v5747_v59  ;;  %v1871_v15 = vshll.u32 %v1870_v24, 16 }
 0x4ed   : > { %v2097_v57 = vadd.s32 %v2096_v42, %v2094_v54  ;;  %vm2216_vm1 = vcmp.eq.s32.totalorder %v8013_v36, %v2196_v35  ;;  %v6015_v37 = vsel %vm2269_vm11, %v2196_v35, %v1544_v28  ;;  %vm2248_vm2 = vcmp.eq.s32.totalorder %v6017_v29, %v2196_v35 }
 0x4ee   : > { %8082 = vst [vmem:[#allocation72_spill] sm:$0xff] %v6015_v37  ;;  %v1854_v56 = vpop.xlane.xlu0 %1853  ;;  %v6024_v8 = vsel %vm2216_vm1, -inf, %v8084_v44  ;;  %v2125_v28 = vcvt.f32.s32 %v5756_v63  ;;  %v2138_v4 = vpop.xlane.xlu1 %2137  ;;  %v6032_v11 = vsel %vm2248_vm2, -inf, %v8086_v16  ;;  %v2141_v62 = vshll.u32 %v2140_v47, 16  ;;  %v6039_v63 = vld [vmem:[#allocation3 + $0x50] sm:$0xff]  ;;  %v8089_v47 = vld [vmem:[#allocation45_spill] sm:$0xff] }
 0x4ef   : > { %8085 = vst [vmem:[#allocation22_spill] sm:$0xff] %v6024_v8  ;;  %vm2193_vm3 = vcmp.lt.s32.totalorder %v1830_v1, %v2097_v57  ;;  %2324 = vmax.xlane.f32.xlu1 %v6024_v8  ;;  %2359 = vmax.xlane.f32.xlu0 %v2358_v50  ;;  %8087 = vst [vmem:[#allocation24_spill] sm:$0xff] %v6032_v11  ;;  %v2139_v42 = vcvt.f32.s32 %v2138_v4  ;;  %v1855_v54 = vcvt.f32.s32 %v1854_v56  ;;  %v2367_v24 = vsel %vm329_vm0, %v6032_v11, -inf  ;;  %v8093_v4 = vld [vmem:[#allocation65_spill] sm:$0xff]  ;;  %v8105_v37 = vld [vmem:[#allocation67_spill] sm:$0xff] }
 0x4f0   : > { %v2194_v58 = vsel %vm2193_vm3, %v1830_v1, %v2097_v57  ;;  %v1872_v61 = vadd.s32 %v1871_v15, %v1869_v55  ;;  %v1857_v1 = vshll.u32 %v1856_v39, 16  ;;  %v2126_v57 = vshll.u32 %v2125_v28, 16 }
 0x4f1   : > { %vm2215_vm4 = vcmp.eq.s32.totalorder %v8013_v36, %v2194_v58  ;;  %v6037_v59 = vsel %vm2269_vm11, %v2194_v58, %v1543_v14  ;;  %vm2247_vm5 = vcmp.eq.s32.totalorder %v6039_v63, %v2194_v58  ;;  %v2142_v35 = vadd.s32 %v2141_v62, %v2139_v42  ;;  %v8091_v14 = vld [vmem:[#allocation16_spill] sm:$0xff] }
 0x4f2   : > { %8088 = vst [vmem:[#allocation73_spill] sm:$0xff] %v6037_v59  ;;  %v2123_v17 = vpop.xlane.xlu0 %2122  ;;  %v6045_v44 = vsel %vm2215_vm4, -inf, %v8089_v47  ;;  %v6049_v50 = vsel %vm2247_vm5, -inf, %v8091_v14  ;;  %v1546_v55 = vsel %vm1516_vm10, %v8093_v4, 4294967295  ;;  %v1898_v16 = vcvt.f32.s32 %v5762_v21  ;;  %v8095_v21 = vld [vmem:[#allocation47_spill] sm:$0xff] }
 0x4f3   : > { %8090 = vst [vmem:[#allocation7_spill] sm:$0xff] %v6045_v44  ;;  %v2124_v56 = vcvt.f32.s32 %v2123_v17  ;;  %2368 = vmax.xlane.f32.xlu1 %v2367_v24  ;;  %2322 = vmax.xlane.f32.xlu0 %v6045_v44  ;;  %8092 = vst [vmem:[#allocation8_spill] sm:$0xff] %v6049_v50  ;;  %vm2199_vm6 = vcmp.lt.s32.totalorder %v1872_v61, %v2142_v35  ;;  %v2170_v15 = vcvt.f32.s32 %v5772_v25  ;;  %v2364_v17 = vsel %vm329_vm0, %v6049_v50, -inf  ;;  %v6063_v24 = vld [vmem:[#allocation3 + $0x68] sm:$0xff] }
 0x4f4   : > { %v1858_v62 = vadd.s32 %v1857_v1, %v1855_v54  ;;  %v2200_v39 = vsel %vm2199_vm6, %v1872_v61, %v2142_v35  ;;  %v8097_v54 = vld [vmem:[#allocation66_spill] sm:$0xff]  ;;  %v1884_v35 = vcvt.f32.s32 %v5767_v38  ;;  %v8098_v1 = vld [vmem:[#allocation17_spill] sm:$0xff]  ;;  %v2155_v14 = vcvt.f32.s32 %v5776_v51 }
 0x4f5   : > { %v2127_v42 = vadd.s32 %v2126_v57, %v2124_v56  ;;  %vm2218_vm7 = vcmp.eq.s32.totalorder %v8013_v36, %v2200_v39  ;;  %v6059_v58 = vsel %vm2269_vm11, %v2200_v39, %v1546_v55  ;;  %vm2250_vm8 = vcmp.eq.s32.totalorder %v6063_v24, %v2200_v39  ;;  %v8101_v38 = vld [vmem:[#allocation18_spill] sm:$0xff] }
 0x4f6   : > { %v1896_v28 = vpop.xlane.xlu1 %1895  ;;  %8094 = vst [vmem:[#allocation74_spill] sm:$0xff] %v6059_v58  ;;  %v6067_v25 = vsel %vm2218_vm7, -inf, %v8095_v21  ;;  %v1545_v61 = vsel %vm1516_vm10, %v8097_v54, 4294967295  ;;  %v6075_v57 = vsel %vm2250_vm8, -inf, %v8098_v1  ;;  %v1899_v39 = vshll.u32 %v1898_v16, 16  ;;  %v6086_v58 = vld [vmem:[#allocation3 + $0x60] sm:$0xff] }
 0x4f7   : > { %vm2197_vm9 = vcmp.lt.s32.totalorder %v1858_v62, %v2127_v42  ;;  %8096 = vst [vmem:[#allocation28_spill] sm:$0xff] %v6067_v25  ;;  %2365 = vmax.xlane.f32.xlu0 %v2364_v17  ;;  %2328 = vmax.xlane.f32.xlu1 %v6067_v25  ;;  %8099 = vst [vmem:[#allocation30_spill] sm:$0xff] %v6075_v57  ;;  %v1897_v4 = vcvt.f32.s32 %v1896_v28  ;;  %v2171_v17 = vshll.u32 %v2170_v15, 16  ;;  %v2373_v51 = vsel %vm329_vm0, %v6075_v57, -inf  ;;  %v8103_v28 = vld [vmem:[#allocation52_spill] sm:$0xff] }
 0x4f8   : > { %v1882_v47 = vpop.xlane.xlu0 %1881  ;;  %v2198_v56 = vsel %vm2197_vm9, %v1858_v62, %v2127_v42  ;;  %v1885_v16 = vshll.u32 %v1884_v35, 16  ;;  %v2156_v1 = vshll.u32 %v2155_v14, 16  ;;  %v1548_v43 = vsel %vm1516_vm10, %v8105_v37, 4294967295  ;;  %v6105_v14 = vld [vmem:[#allocation3 + $0x78] sm:$0xff] }
 0x4f9   : > { %vm2217_vm12 = vcmp.eq.s32.totalorder %v8013_v36, %v2198_v56  ;;  %v6081_v55 = vsel %vm2269_vm11, %v2198_v56, %v1545_v61  ;;  %vm2249_vm13 = vcmp.eq.s32.totalorder %v6086_v58, %v2198_v56  ;;  %v1883_v62 = vcvt.f32.s32 %v1882_v47 }
 0x4fa   : > { %8100 = vst [vmem:[#allocation75_spill] sm:$0xff] %v6081_v55  ;;  %v2168_v21 = vpop.xlane.xlu1 %2167  ;;  %v6084_v54 = vsel %vm2217_vm12, -inf, %v8101_v38  ;;  %v6093_v61 = vsel %vm2249_vm13, -inf, %v8103_v28  ;;  %v1900_v38 = vadd.s32 %v1899_v39, %v1897_v4  ;;  %v8107_v4 = vld [vmem:[#allocation19_spill] sm:$0xff]  ;;  %v8108_v39 = vld [vmem:[#allocation57_spill] sm:$0xff] }
 0x4fb   : > { %8102 = vst [vmem:[#allocation10_spill] sm:$0xff] %v6084_v54  ;;  %v2169_v42 = vcvt.f32.s32 %v2168_v21  ;;  %2326 = vmax.xlane.f32.xlu0 %v6084_v54  ;;  %8104 = vst [vmem:[#allocation11_spill] sm:$0xff] %v6093_v61  ;;  %2374 = vmax.xlane.f32.xlu1 %v2373_v51  ;;  %v2370_v56 = vsel %vm329_vm0, %v6093_v61, -inf  ;;  %v1886_v47 = vadd.s32 %v1885_v16, %v1883_v62  ;;  %v8113_v51 = vld [vmem:[#allocation59_spill] sm:$0xff] }
 0x4fc   : > { %v2153_v15 = vpop.xlane.xlu0 %2152 }
 0x4fd   : > { %v2172_v55 = vadd.s32 %v2171_v17, %v2169_v42  ;;  %v2154_v59 = vcvt.f32.s32 %v2153_v15  ;;  %v6123_v42 = vld [vmem:[#allocation3 + $0x70] sm:$0xff]  ;;  %v8115_v15 = vld [vmem:[#allocation20_spill] sm:$0xff] }
 0x4ff   : > { %vm2203_vm14 = vcmp.lt.s32.totalorder %v1900_v38, %v2172_v55  ;;  %v2157_v21 = vadd.s32 %v2156_v1, %v2154_v59  ;;  %2371 = vmax.xlane.f32.xlu0 %v2370_v56  ;;  %v1547_v59 = vsel %vm1516_vm10, %v8107_v4, 4294967295  ;;  %vm3022_vm10 = vcmp.eq.s32.totalorder %v8013_v36, 2 }
 0x500   : > { %v2204_v28 = vsel %vm2203_vm14, %v1900_v38, %v2172_v55  ;;  %v8111_v55 = vld [vmem:[#allocation68_spill] sm:$0xff] }
 0x501   : > { %vm2201_vm15 = vcmp.lt.s32.totalorder %v1886_v47, %v2157_v21  ;;  %vm2220_vm1 = vcmp.eq.s32.totalorder %v8013_v36, %v2204_v28  ;;  %v6103_v35 = vsel %vm2269_vm11, %v2204_v28, %v1548_v43  ;;  %vm2252_vm2 = vcmp.eq.s32.totalorder %v6105_v14, %v2204_v28 }
 0x502   : > { %8106 = vst [vmem:[#allocation76_spill] sm:$0xff] %v6103_v35  ;;  %v6112_v17 = vsel %vm2220_vm1, -inf, %v8108_v39  ;;  %v2202_v37 = vsel %vm2201_vm15, %v1886_v47, %v2157_v21  ;;  %v6121_v62 = vsel %vm2252_vm2, -inf, %v8111_v55 }
 0x503   : > { %8109 = vst [vmem:[#allocation34_spill] sm:$0xff] %v6112_v17  ;;  %2332 = vmax.xlane.f32.xlu1 %v6112_v17  ;;  %vm2219_vm3 = vcmp.eq.s32.totalorder %v8013_v36, %v2202_v37  ;;  %v6118_v43 = vsel %vm2269_vm11, %v2202_v37, %v1547_v59  ;;  %8112 = vst [vmem:[#allocation13_spill] sm:$0xff] %v6121_v62  ;;  %vm2251_vm4 = vcmp.eq.s32.totalorder %v6123_v42, %v2202_v37  ;;  %v8117_v59 = vld [vmem:[#allocation21_spill] sm:$0xff] }
 0x504   : > { %8110 = vst [vmem:[#allocation36_spill] sm:$0xff] %v6118_v43  ;;  %v6127_v16 = vsel %vm2219_vm3, -inf, %v8113_v51  ;;  %v6131_v1 = vsel %vm2251_vm4, -inf, %v8115_v15  ;;  %v2379_v38 = vsel %vm329_vm0, %v6121_v62, -inf  ;;  %v6148_v15 = vld [vmem:[#allocation3 + $0x8] sm:$0xff] }
 0x505   : > { %8114 = vst [vmem:[#allocation38_spill] sm:$0xff] %v6127_v16  ;;  %2330 = vmax.xlane.f32.xlu0 %v6127_v16  ;;  %8116 = vst [vmem:[#allocation63_spill] sm:$0xff] %v6131_v1  ;;  %v2376_v56 = vsel %vm329_vm0, %v6131_v1, -inf }
 0x506   : > { %8119 = vst [vmem:[#allocation40_spill] sm:$0xff] %v6148_v15 }
 0x507   : > { %2380 = vmax.xlane.f32.xlu1 %v2379_v38 }
 0x509   : > { %2377 = vmax.xlane.f32.xlu0 %v2376_v56 }
 0x550   : > { %v2305_v47 = vpop.xlane.xlu1 %2304 }
 0x554   : > { %v2339_v21 = vpop.xlane.xlu1 %2338  ;;  %v2303_v28 = vpop.xlane.xlu0 %2302 }
 0x555   : > { %v2383_v4 = vmax.f32 %v2305_v47, %v2339_v21 }
 0x557   : > { %vm2399_vm11 = vcmp.eq.f32.partialorder %v5834_v2, %v2383_v4  ;;  %vm2655_vm5 = vcmp.eq.f32.partialorder %v5840_v32, %v2383_v4  ;;  %v6143_v39 = vsel %vm3022_vm10, %v2383_v4, %v8117_v59  ;;  %v8120_v4 = vld [vmem:[#allocation23_spill] sm:$0xff] }
 0x558   : > { %8118 = vst [vmem:[#allocation14_spill] sm:$0xff] %v6143_v39  ;;  %v2309_v37 = vpop.xlane.xlu1 %2308  ;;  %v2336_v55 = vpop.xlane.xlu0 %2335  ;;  %v6146_v51 = vsel %vm2399_vm11, %v8013_v36, 2147483647  ;;  %v2671_v38 = vsel %vm2655_vm5, %v6148_v15, 2147483647 }
 0x559   : > { %v2382_v56 = vmax.f32 %v2303_v28, %v2336_v55  ;;  %v2445_v47 = vshra.s32 %v6146_v51, 16  ;;  %v6153_v21 = vsel %vm329_vm0, %v2671_v38, 2147483647  ;;  %v6168_v38 = vld [vmem:[#allocation3] sm:$0xff] }
 0x55a   : > { %v2703_v43 = vshra.s32 %v6153_v21, 16  ;;  %8122 = vst [vmem:[#allocation43_spill] sm:$0xff] %v6168_v38 }
 0x55b   : > { %vm2398_vm6 = vcmp.eq.f32.partialorder %v5852_v3, %v2382_v56  ;;  %vm2654_vm7 = vcmp.eq.f32.partialorder %v5857_v9, %v2382_v56  ;;  %v6161_v59 = vsel %vm3022_vm10, %v2382_v56, %v8120_v4  ;;  %v6163_v39 = vcvt.s32.f32 %v2445_v47  ;;  %v8123_v4 = vld [vmem:[#allocation25_spill] sm:$0xff] }
 0x55c   : > { %8121 = vst [vmem:[#allocation64_spill] sm:$0xff] %v6161_v59  ;;  %v2345_v35 = vpop.xlane.xlu1 %2344  ;;  %v2307_v28 = vpop.xlane.xlu0 %2306  ;;  %v6166_v55 = vsel %vm2398_vm6, %v8013_v36, 2147483647  ;;  %v2670_v19 = vsel %vm2654_vm7, %v6168_v38, 2147483647  ;;  %v6176_v56 = vcvt.s32.f32 %v2703_v43  ;;  %v6191_v43 = vld [vmem:[#allocation3 + $0x18] sm:$0xff] }
 0x55d   : > { %v2385_v49 = vmax.f32 %v2309_v37, %v2345_v35  ;;  %2448 = vmin.xlane.f32.xlu1 %v6163_v39  ;;  %v2431_v0 = vshra.s32 %v6166_v55, 16  ;;  %v6174_v48 = vsel %vm329_vm0, %v2670_v19, 2147483647  ;;  %8125 = vst [vmem:[#allocation45_spill] sm:$0xff] %v6191_v43 }
 0x55e   : > { %v2688_v47 = vshra.s32 %v6174_v48, 16 }
 0x55f   : > { %vm2401_vm8 = vcmp.eq.f32.partialorder %v5867_v26, %v2385_v49  ;;  %vm2657_vm9 = vcmp.eq.f32.partialorder %v5875_v53, %v2385_v49  ;;  %v6184_v59 = vsel %vm3022_vm10, %v2385_v49, %v8123_v4  ;;  %v6186_v35 = vcvt.s32.f32 %v2431_v0 }
 0x560   : > { %8124 = vst [vmem:[#allocation15_spill] sm:$0xff] %v6184_v59  ;;  %v2313_v37 = vpop.xlane.xlu1 %2312  ;;  %v2342_v27 = vpop.xlane.xlu0 %2341  ;;  %v6189_v19 = vsel %vm2401_vm8, %v8013_v36, 2147483647  ;;  %v2673_v30 = vsel %vm2657_vm9, %v6191_v43, 2147483647  ;;  %v6200_v0 = vcvt.s32.f32 %v2688_v47  ;;  %v8126_v59 = vld [vmem:[#allocation27_spill] sm:$0xff] }
 0x561   : > { %v2384_v52 = vmax.f32 %v2307_v28, %v2342_v27  ;;  %2706 = vmin.xlane.f32.xlu1 %v6176_v56  ;;  %2434 = vmin.xlane.f32.xlu0 %v6186_v35  ;;  %v2473_v53 = vshra.s32 %v6189_v19, 16  ;;  %v6198_v49 = vsel %vm329_vm0, %v2673_v30, 2147483647  ;;  %v6215_v47 = vld [vmem:[#allocation3 + $0x10] sm:$0xff] }
 0x562   : > { %v2733_v4 = vshra.s32 %v6198_v49, 16  ;;  %8128 = vst [vmem:[#allocation65_spill] sm:$0xff] %v6215_v47 }
 0x563   : > { %vm2400_vm12 = vcmp.eq.f32.partialorder %v5888_v45, %v2384_v52  ;;  %vm2656_vm13 = vcmp.eq.f32.partialorder %v5893_v60, %v2384_v52  ;;  %v6208_v27 = vsel %vm3022_vm10, %v2384_v52, %v8126_v59  ;;  %v6210_v28 = vcvt.s32.f32 %v2473_v53 }
 0x564   : > { %8127 = vst [vmem:[#allocation16_spill] sm:$0xff] %v6208_v27  ;;  %v2351_v43 = vpop.xlane.xlu1 %2350  ;;  %v2311_v26 = vpop.xlane.xlu0 %2310  ;;  %v6213_v30 = vsel %vm2400_vm12, %v8013_v36, 2147483647  ;;  %v2672_v9 = vsel %vm2656_vm13, %v6215_v47, 2147483647  ;;  %v6224_v53 = vcvt.s32.f32 %v2733_v4  ;;  %v8129_v27 = vld [vmem:[#allocation29_spill] sm:$0xff] }
 0x565   : > { %v2387_v38 = vmax.f32 %v2313_v37, %v2351_v43  ;;  %2476 = vmin.xlane.f32.xlu1 %v6210_v28  ;;  %2691 = vmin.xlane.f32.xlu0 %v6200_v0  ;;  %v2459_v60 = vshra.s32 %v6213_v30, 16  ;;  %v6222_v52 = vsel %vm329_vm0, %v2672_v9, 2147483647  ;;  %v6239_v4 = vld [vmem:[#allocation3 + $0x28] sm:$0xff] }
 0x566   : > { %v2718_v59 = vshra.s32 %v6222_v52, 16  ;;  %8131 = vst [vmem:[#allocation66_spill] sm:$0xff] %v6239_v4 }
 0x567   : > { %vm2403_vm14 = vcmp.eq.f32.partialorder %v5903_v31, %v2387_v38  ;;  %vm2659_vm15 = vcmp.eq.f32.partialorder %v5911_v18, %v2387_v38  ;;  %v6232_v37 = vsel %vm3022_vm10, %v2387_v38, %v8129_v27  ;;  %v6234_v43 = vcvt.s32.f32 %v2459_v60 }
 0x568   : > { %8130 = vst [vmem:[#allocation47_spill] sm:$0xff] %v6232_v37  ;;  %v2317_v47 = vpop.xlane.xlu1 %2316  ;;  %v2348_v45 = vpop.xlane.xlu0 %2347  ;;  %v6237_v9 = vsel %vm2403_vm14, %v8013_v36, 2147483647  ;;  %v2675_v3 = vsel %vm2659_vm15, %v6239_v4, 2147483647  ;;  %v6248_v60 = vcvt.s32.f32 %v2718_v59  ;;  %v8132_v37 = vld [vmem:[#allocation31_spill] sm:$0xff] }
 0x569   : > { %v2386_v6 = vmax.f32 %v2311_v26, %v2348_v45  ;;  %2736 = vmin.xlane.f32.xlu1 %v6224_v53  ;;  %2462 = vmin.xlane.f32.xlu0 %v6234_v43  ;;  %v2501_v18 = vshra.s32 %v6237_v9, 16  ;;  %v6246_v38 = vsel %vm329_vm0, %v2675_v3, 2147483647  ;;  %v6263_v59 = vld [vmem:[#allocation3 + $0x20] sm:$0xff] }
 0x56a   : > { %v2763_v27 = vshra.s32 %v6246_v38, 16  ;;  %8134 = vst [vmem:[#allocation18_spill] sm:$0xff] %v6263_v59 }
 0x56b   : > { %vm2402_vm1 = vcmp.eq.f32.partialorder %v5924_v7, %v2386_v6  ;;  %vm2658_vm2 = vcmp.eq.f32.partialorder %v5929_v33, %v2386_v6  ;;  %v6256_v26 = vsel %vm3022_vm10, %v2386_v6, %v8132_v37  ;;  %v6258_v45 = vcvt.s32.f32 %v2501_v18 }
 0x56c   : > { %8133 = vst [vmem:[#allocation17_spill] sm:$0xff] %v6256_v26  ;;  %v2357_v4 = vpop.xlane.xlu1 %2356  ;;  %v2315_v31 = vpop.xlane.xlu0 %2314  ;;  %v6261_v3 = vsel %vm2402_vm1, %v8013_v36, 2147483647  ;;  %v2674_v32 = vsel %vm2658_vm2, %v6263_v59, 2147483647  ;;  %v6272_v18 = vcvt.s32.f32 %v2763_v27  ;;  %v8135_v26 = vld [vmem:[#allocation33_spill] sm:$0xff] }
 0x56d   : > { %v2389_v15 = vmax.f32 %v2317_v47, %v2357_v4  ;;  %2504 = vmin.xlane.f32.xlu1 %v6258_v45  ;;  %2721 = vmin.xlane.f32.xlu0 %v6248_v60  ;;  %v2487_v33 = vshra.s32 %v6261_v3, 16  ;;  %v6270_v6 = vsel %vm329_vm0, %v2674_v32, 2147483647  ;;  %v6287_v27 = vld [vmem:[#allocation3 + $0x38] sm:$0xff] }
 0x56e   : > { %v2748_v37 = vshra.s32 %v6270_v6, 16  ;;  %8138 = vst [vmem:[#allocation19_spill] sm:$0xff] %v6287_v27 }
 0x56f   : > { %vm2405_vm3 = vcmp.eq.f32.partialorder %v5939_v22, %v2389_v15  ;;  %vm2661_vm4 = vcmp.eq.f32.partialorder %v5947_v5, %v2389_v15  ;;  %v6280_v47 = vsel %vm3022_vm10, %v2389_v15, %v8135_v26  ;;  %v6282_v4 = vcvt.s32.f32 %v2487_v33 }
 0x570   : > { %8136 = vst [vmem:[#allocation52_spill] sm:$0xff] %v6280_v47  ;;  %v2321_v59 = vpop.xlane.xlu1 %2320  ;;  %v2354_v7 = vpop.xlane.xlu0 %2353  ;;  %v6285_v32 = vsel %vm2405_vm3, %v8013_v36, 2147483647  ;;  %v2677_v2 = vsel %vm2661_vm4, %v6287_v27, 2147483647  ;;  %v6296_v33 = vcvt.s32.f32 %v2748_v37  ;;  %v8141_v47 = vld [vmem:[#allocation35_spill] sm:$0xff] }
 0x571   : > { %8137 = vst [vmem:[#allocation67_spill] sm:$0xff] %v6282_v4  ;;  %v2388_v13 = vmax.f32 %v2315_v31, %v2354_v7  ;;  %2766 = vmin.xlane.f32.xlu1 %v6272_v18  ;;  %2490 = vmin.xlane.f32.xlu0 %v6282_v4  ;;  %v2529_v5 = vshra.s32 %v6285_v32, 16  ;;  %v6294_v15 = vsel %vm329_vm0, %v2677_v2, 2147483647  ;;  %v6311_v37 = vld [vmem:[#allocation3 + $0x30] sm:$0xff] }
 0x572   : > { %8139 = vst [vmem:[#allocation57_spill] sm:$0xff] %v6294_v15  ;;  %8140 = vst [vmem:[#allocation68_spill] sm:$0xff] %v6296_v33  ;;  %v2793_v26 = vshra.s32 %v6294_v15, 16 }
 0x573   : > { %vm2404_vm11 = vcmp.eq.f32.partialorder %v5960_v12, %v2388_v13  ;;  %vm2660_vm5 = vcmp.eq.f32.partialorder %v5965_v23, %v2388_v13  ;;  %v6304_v31 = vsel %vm3022_vm10, %v2388_v13, %v8141_v47  ;;  %v6306_v7 = vcvt.s32.f32 %v2529_v5  ;;  %8143 = vst [vmem:[#allocation20_spill] sm:$0xff] %v6311_v37 }
 0x574   : > { %8142 = vst [vmem:[#allocation59_spill] sm:$0xff] %v6304_v31  ;;  %v2363_v27 = vpop.xlane.xlu1 %2362  ;;  %v2319_v22 = vpop.xlane.xlu0 %2318  ;;  %v6309_v2 = vsel %vm2404_vm11, %v8013_v36, 2147483647  ;;  %v2676_v15 = vsel %vm2660_vm5, %v6311_v37, 2147483647  ;;  %v6320_v5 = vcvt.s32.f32 %v2793_v26  ;;  %v8144_v31 = vld [vmem:[#allocation37_spill] sm:$0xff] }
 0x575   : > { %v2391_v4 = vmax.f32 %v2321_v59, %v2363_v27  ;;  %2532 = vmin.xlane.f32.xlu1 %v6306_v7  ;;  %2751 = vmin.xlane.f32.xlu0 %v6296_v33  ;;  %v2515_v23 = vshra.s32 %v6309_v2, 16  ;;  %v6318_v13 = vsel %vm329_vm0, %v2676_v15, 2147483647 }
 0x576   : > { %v2778_v47 = vshra.s32 %v6318_v13, 16 }
 0x577   : > { %vm2407_vm6 = vcmp.eq.f32.partialorder %v5975_v46, %v2391_v4  ;;  %vm2663_vm7 = vcmp.eq.f32.partialorder %v5985_v10, %v2391_v4  ;;  %v6328_v59 = vsel %vm3022_vm10, %v2391_v4, %v8144_v31  ;;  %v6330_v27 = vcvt.s32.f32 %v2515_v23  ;;  %v8148_v31 = vld [vmem:[#allocation39_spill] sm:$0xff] }
 0x578   : > { %8145 = vst [vmem:[#allocation21_spill] sm:$0xff] %v6328_v59  ;;  %v2325_v37 = vpop.xlane.xlu1 %2324  ;;  %v2360_v12 = vpop.xlane.xlu0 %2359  ;;  %v6333_v15 = vsel %vm2407_vm6, %v8013_v36, 2147483647  ;;  %v2679_v26 = vsel %vm2663_vm7, %v5979_v34, 2147483647  ;;  %v6342_v4 = vcvt.s32.f32 %v2778_v47 }
 0x579   : > { %8146 = vst [vmem:[#allocation23_spill] sm:$0xff] %v6330_v27  ;;  %v2390_v33 = vmax.f32 %v2319_v22, %v2360_v12  ;;  %2796 = vmin.xlane.f32.xlu1 %v6320_v5  ;;  %2518 = vmin.xlane.f32.xlu0 %v6330_v27  ;;  %v2557_v10 = vshra.s32 %v6333_v15, 16  ;;  %v6340_v46 = vsel %vm329_vm0, %v2679_v26, 2147483647 }
 0x57a   : > { %8147 = vst [vmem:[#allocation25_spill] sm:$0xff] %v6342_v4  ;;  %v2823_v23 = vshra.s32 %v6340_v46, 16 }
 0x57b   : > { %vm2406_vm8 = vcmp.eq.f32.partialorder %v6001_v20, %v2390_v33  ;;  %vm2662_vm9 = vcmp.eq.f32.partialorder %v6008_v41, %v2390_v33  ;;  %v6350_v22 = vsel %vm3022_vm10, %v2390_v33, %v8148_v31  ;;  %v6352_v12 = vcvt.s32.f32 %v2557_v10  ;;  %v8150_v31 = vld [vmem:[#allocation41_spill] sm:$0xff] }
 0x57c   : > { %8149 = vst [vmem:[#allocation27_spill] sm:$0xff] %v6350_v22  ;;  %v2369_v34 = vpop.xlane.xlu1 %2368  ;;  %v2323_v59 = vpop.xlane.xlu0 %2322  ;;  %v6355_v26 = vsel %vm2406_vm8, %v8013_v36, 2147483647  ;;  %v2678_v47 = vsel %vm2662_vm9, %v6003_v40, 2147483647  ;;  %v6364_v33 = vcvt.s32.f32 %v2823_v23 }
 0x57d   : > { %v2393_v27 = vmax.f32 %v2325_v37, %v2369_v34  ;;  %2560 = vmin.xlane.f32.xlu1 %v6352_v12  ;;  %2781 = vmin.xlane.f32.xlu0 %v6342_v4  ;;  %v2543_v41 = vshra.s32 %v6355_v26, 16  ;;  %v6362_v20 = vsel %vm329_vm0, %v2678_v47, 2147483647 }
 0x57e   : > { %v2808_v10 = vshra.s32 %v6362_v20, 16 }
 0x57f   : > { %vm2409_vm12 = vcmp.eq.f32.partialorder %v6024_v8, %v2393_v27  ;;  %vm2665_vm13 = vcmp.eq.f32.partialorder %v6032_v11, %v2393_v27  ;;  %v6372_v40 = vsel %vm3022_vm10, %v2393_v27, %v8150_v31  ;;  %v6374_v37 = vcvt.s32.f32 %v2543_v41 }
 0x580   : > { %8151 = vst [vmem:[#allocation29_spill] sm:$0xff] %v6372_v40  ;;  %v2366_v34 = vpop.xlane.xlu0 %2365  ;;  %v6377_v22 = vsel %vm2409_vm12, %v8013_v36, 2147483647  ;;  %v2681_v23 = vsel %vm2665_vm13, %v6017_v29, 2147483647  ;;  %v2329_v47 = vpop.xlane.xlu1 %2328  ;;  %v6386_v27 = vcvt.s32.f32 %v2808_v10  ;;  %v8153_v29 = vld [vmem:[#allocation79_spill] sm:$0xff] }
 0x581   : > { %v2392_v4 = vmax.f32 %v2323_v59, %v2366_v34  ;;  %2826 = vmin.xlane.f32.xlu1 %v6364_v33  ;;  %2546 = vmin.xlane.f32.xlu0 %v6374_v37  ;;  %v2585_v11 = vshra.s32 %v6377_v22, 16  ;;  %v6384_v8 = vsel %vm329_vm0, %v2681_v23, 2147483647 }
 0x582   : > { %8152 = vst [vmem:[#allocation31_spill] sm:$0xff] %v6386_v27  ;;  %v2853_v41 = vshra.s32 %v6384_v8, 16 }
 0x583   : > { %vm2408_vm14 = vcmp.eq.f32.partialorder %v6045_v44, %v2392_v4  ;;  %vm2664_vm15 = vcmp.eq.f32.partialorder %v6049_v50, %v2392_v4  ;;  %v6394_v59 = vsel %vm3022_vm10, %v2392_v4, %v8153_v29  ;;  %v6396_v31 = vcvt.s32.f32 %v2585_v11 }
 0x584   : > { %8154 = vst [vmem:[#allocation33_spill] sm:$0xff] %v6394_v59  ;;  %v2327_v34 = vpop.xlane.xlu0 %2326  ;;  %v6399_v40 = vsel %vm2408_vm14, %v8013_v36, 2147483647  ;;  %v2680_v10 = vsel %vm2664_vm15, %v6039_v63, 2147483647  ;;  %v2375_v23 = vpop.xlane.xlu1 %2374  ;;  %v6408_v29 = vcvt.s32.f32 %v2853_v41  ;;  %v8157_v63 = vld [vmem:[#allocation46_spill] sm:$0xff] }
 0x585   : > { %8155 = vst [vmem:[#allocation35_spill] sm:$0xff] %v6396_v31  ;;  %8156 = vst [vmem:[#allocation37_spill] sm:$0xff] %v6399_v40  ;;  %2588 = vmin.xlane.f32.xlu1 %v6396_v31  ;;  %2811 = vmin.xlane.f32.xlu0 %v6386_v27  ;;  %v2571_v50 = vshra.s32 %v6399_v40, 16  ;;  %v6406_v44 = vsel %vm329_vm0, %v2680_v10, 2147483647  ;;  %v2395_v4 = vmax.f32 %v2329_v47, %v2375_v23  ;;  %v8159_v23 = vld [vmem:[#allocation81_spill] sm:$0xff] }
 0x586   : > { %v2838_v59 = vshra.s32 %v6406_v44, 16 }
 0x587   : > { %v6410_v11 = vcvt.s32.f32 %v2571_v50  ;;  %vm2411_vm1 = vcmp.eq.f32.partialorder %v6067_v25, %v2395_v4  ;;  %vm2667_vm2 = vcmp.eq.f32.partialorder %v6075_v57, %v2395_v4  ;;  %v6418_v27 = vsel %vm3022_vm10, %v2395_v4, %v8157_v63 }
 0x588   : > { %8158 = vst [vmem:[#allocation39_spill] sm:$0xff] %v6418_v27  ;;  %v2372_v31 = vpop.xlane.xlu0 %2371  ;;  %v6423_v50 = vsel %vm2411_vm1, %v8013_v36, 2147483647  ;;  %v2683_v47 = vsel %vm2667_vm2, %v6063_v24, 2147483647 }
 0x589   : > { %v2394_v40 = vmax.f32 %v2327_v34, %v2372_v31  ;;  %2856 = vmin.xlane.f32.xlu1 %v6408_v29  ;;  %2574 = vmin.xlane.f32.xlu0 %v6410_v11  ;;  %v2613_v41 = vshra.s32 %v6423_v50, 16  ;;  %v6428_v10 = vsel %vm329_vm0, %v2683_v47, 2147483647  ;;  %v6437_v34 = vcvt.s32.f32 %v2838_v59 }
 0x58a   : > { %v2883_v24 = vshra.s32 %v6428_v10, 16 }
 0x58b   : > { %vm2410_vm3 = vcmp.eq.f32.partialorder %v6084_v54, %v2394_v40  ;;  %vm2666_vm4 = vcmp.eq.f32.partialorder %v6093_v61, %v2394_v40  ;;  %v6435_v31 = vsel %vm3022_vm10, %v2394_v40, %v8159_v23  ;;  %v6439_v63 = vcvt.s32.f32 %v2613_v41 }
 0x58c   : > { %8160 = vst [vmem:[#allocation41_spill] sm:$0xff] %v6435_v31  ;;  %v2333_v4 = vpop.xlane.xlu1 %2332  ;;  %v6443_v27 = vsel %vm2410_vm3, %v8013_v36, 2147483647  ;;  %v2682_v47 = vsel %vm2666_vm4, %v6086_v58, 2147483647  ;;  %v6455_v31 = vcvt.s32.f32 %v2883_v24 }
 0x58d   : > { %2841 = vmin.xlane.f32.xlu0 %v6437_v34  ;;  %v2599_v61 = vshra.s32 %v6443_v27, 16  ;;  %v6449_v54 = vsel %vm329_vm0, %v2682_v47, 2147483647  ;;  %2616 = vmin.xlane.f32.xlu1 %v6439_v63  ;;  %v8162_v47 = vld [vmem:[#allocation56_spill] sm:$0xff] }
 0x58e   : > { %8161 = vst [vmem:[#allocation79_spill] sm:$0xff] %v6449_v54  ;;  %v2331_v40 = vpop.xlane.xlu0 %2330  ;;  %v2868_v59 = vshra.s32 %v6449_v54, 16 }
 0x58f   : > { %v6453_v41 = vcvt.s32.f32 %v2599_v61 }
 0x590   : > { %v2381_v23 = vpop.xlane.xlu1 %2380  ;;  %v6459_v25 = vcvt.s32.f32 %v2868_v59  ;;  %v8164_v59 = vld [vmem:[#allocation58_spill] sm:$0xff] }
 0x591   : > { %v2397_v57 = vmax.f32 %v2333_v4, %v2381_v23  ;;  %2602 = vmin.xlane.f32.xlu0 %v6453_v41  ;;  %2886 = vmin.xlane.f32.xlu1 %v6455_v31 }
 0x592   : > { %v2378_v58 = vpop.xlane.xlu0 %2377 }
 0x593   : > { %vm2413_vm11 = vcmp.eq.f32.partialorder %v6112_v17, %v2397_v57  ;;  %vm2669_vm5 = vcmp.eq.f32.partialorder %v6121_v62, %v2397_v57  ;;  %v6466_v61 = vsel %vm3022_vm10, %v2397_v57, %v8162_v47  ;;  %v2396_v54 = vmax.f32 %v2331_v40, %v2378_v58 }
 0x594   : > { %8163 = vst [vmem:[#allocation46_spill] sm:$0xff] %v6466_v61  ;;  %v6469_v24 = vsel %vm2413_vm11, %v8013_v36, 2147483647  ;;  %v2685_v4 = vsel %vm2669_vm5, %v6105_v14, 2147483647  ;;  %v2430_v62 = vand.u32 65535, %v6166_v55 }
 0x595   : > { %vm2412_vm6 = vcmp.eq.f32.partialorder %v6127_v16, %v2396_v54  ;;  %vm2668_vm7 = vcmp.eq.f32.partialorder %v6131_v1, %v2396_v54  ;;  %v6477_v23 = vsel %vm3022_vm10, %v2396_v54, %v8164_v59  ;;  %2871 = vmin.xlane.f32.xlu0 %v6459_v25  ;;  %v2641_v57 = vshra.s32 %v6469_v24, 16 }
 0x596   : > { %8165 = vst [vmem:[#allocation81_spill] sm:$0xff] %v6477_v23  ;;  %v6482_v40 = vsel %vm2412_vm6, %v8013_v36, 2147483647  ;;  %v6485_v58 = vsel %vm329_vm0, %v2685_v4, 2147483647 }
 0x597   : > { %v2684_v14 = vsel %vm2668_vm7, %v6123_v42, 2147483647  ;;  %v6488_v47 = vcvt.s32.f32 %v2641_v57  ;;  %v2627_v61 = vshra.s32 %v6482_v40, 16  ;;  %v2913_v1 = vshra.s32 %v6485_v58, 16 }
 0x598   : > { %v6493_v54 = vsel %vm329_vm0, %v2684_v14, 2147483647  ;;  %v2444_v57 = vand.u32 65535, %v6146_v51  ;;  %v2472_v51 = vand.u32 65535, %v6189_v19  ;;  %v2732_v19 = vand.u32 65535, %v6198_v49 }
 0x599   : > { %2644 = vmin.xlane.f32.xlu1 %v6488_v47  ;;  %v6496_v59 = vcvt.s32.f32 %v2627_v61  ;;  %v2898_v23 = vshra.s32 %v6493_v54, 16  ;;  %v6500_v4 = vcvt.s32.f32 %v2913_v1  ;;  %v2702_v61 = vand.u32 65535, %v6153_v21 }
 0x59a   : > { %v2446_v16 = vcvt.s32.f32 %v2444_v57  ;;  %v2474_v57 = vcvt.s32.f32 %v2472_v51  ;;  %v2500_v49 = vand.u32 65535, %v6237_v9  ;;  %v2762_v9 = vand.u32 65535, %v6246_v38 }
 0x59b   : > { %2630 = vmin.xlane.f32.xlu0 %v6496_v59  ;;  %8166 = vst [vmem:[#allocation56_spill] sm:$0xff] %v6500_v4  ;;  %v6503_v42 = vcvt.s32.f32 %v2898_v23  ;;  %v2704_v36 = vcvt.s32.f32 %v2702_v61  ;;  %v2734_v61 = vcvt.s32.f32 %v2732_v19  ;;  %v2528_v38 = vand.u32 65535, %v6285_v32 }
 0x59c   : > { %v2764_v19 = vcvt.s32.f32 %v2762_v9 }
 0x59d   : > { %2916 = vmin.xlane.f32.xlu1 %v6500_v4  ;;  %8167 = vst [vmem:[#allocation58_spill] sm:$0xff] %v6503_v42  ;;  %v2687_v4 = vand.u32 65535, %v6174_v48  ;;  %v2458_v48 = vand.u32 65535, %v6213_v30  ;;  %v2717_v30 = vand.u32 65535, %v6222_v52  ;;  %v2486_v52 = vand.u32 65535, %v6261_v3 }
 0x59e   : > { %v2747_v3 = vand.u32 65535, %v6270_v6  ;;  %v2514_v6 = vand.u32 65535, %v6309_v2  ;;  %v2777_v2 = vand.u32 65535, %v6318_v13  ;;  %v2542_v13 = vand.u32 65535, %v6355_v26 }
 0x59f   : > { %2901 = vmin.xlane.f32.xlu0 %v6503_v42  ;;  %v2432_v42 = vcvt.s32.f32 %v2430_v62  ;;  %v2689_v62 = vcvt.s32.f32 %v2687_v4  ;;  %v2460_v4 = vcvt.s32.f32 %v2458_v48  ;;  %v2488_v48 = vcvt.s32.f32 %v2486_v52 }
 0x5a0   : > { %v2516_v52 = vcvt.s32.f32 %v2514_v6  ;;  %v2807_v26 = vand.u32 65535, %v6362_v20 }
 0x5e6   : > { %v6507_v14 = vpop.xlane.xlu1 %2448 }
 0x5e7   : > { %vm2450_vm8 = vcmp.eq.f32.partialorder %v6163_v39, %v6507_v14 }
 0x5e8   : > { %v2451_v1 = vsel %vm2450_vm8, %v2446_v16, inf }
 0x5e9   : > { %2452 = vmin.xlane.f32.xlu1 %v2451_v1 }
 0x5ea   : > { %v6513_v17 = vpop.xlane.xlu1 %2706  ;;  %v6515_v23 = vpop.xlane.xlu0 %2434 }
 0x5eb   : > { %vm2708_vm9 = vcmp.eq.f32.partialorder %v6176_v56, %v6513_v17  ;;  %vm2436_vm12 = vcmp.eq.f32.partialorder %v6186_v35, %v6515_v23 }
 0x5ec   : > { %v2709_v21 = vsel %vm2708_vm9, %v2704_v36, inf  ;;  %v2437_v39 = vsel %vm2436_vm12, %v2432_v42, inf }
 0x5ed   : > { %2710 = vmin.xlane.f32.xlu1 %v2709_v21  ;;  %2438 = vmin.xlane.f32.xlu0 %v2437_v39  ;;  %v2502_v21 = vcvt.s32.f32 %v2500_v49  ;;  %v2719_v39 = vcvt.s32.f32 %v2717_v30  ;;  %v2749_v49 = vcvt.s32.f32 %v2747_v3  ;;  %v8169_v30 = vld [vmem:[#allocation57_spill] sm:$0xff] }
 0x5ee   : > { %v6523_v16 = vpop.xlane.xlu1 %2476  ;;  %v6525_v55 = vpop.xlane.xlu0 %2691  ;;  %v2792_v32 = vand.u32 65535, %v8169_v30 }
 0x5ef   : > { %vm2478_vm13 = vcmp.eq.f32.partialorder %v6210_v28, %v6523_v16  ;;  %vm2693_vm14 = vcmp.eq.f32.partialorder %v6200_v0, %v6525_v55 }
 0x5f0   : > { %v2479_v36 = vsel %vm2478_vm13, %v2474_v57, inf  ;;  %v2694_v56 = vsel %vm2693_vm14, %v2689_v62, inf  ;;  %v2794_v9 = vcvt.s32.f32 %v2792_v32  ;;  %v2544_v32 = vcvt.s32.f32 %v2542_v13 }
 0x5f1   : > { %2480 = vmin.xlane.f32.xlu1 %v2479_v36  ;;  %2695 = vmin.xlane.f32.xlu0 %v2694_v56 }
 0x5f2   : > { %v6533_v35 = vpop.xlane.xlu1 %2736  ;;  %v6535_v42 = vpop.xlane.xlu0 %2462 }
 0x5f3   : > { %vm2738_vm15 = vcmp.eq.f32.partialorder %v6224_v53, %v6533_v35  ;;  %vm2464_vm1 = vcmp.eq.f32.partialorder %v6234_v43, %v6535_v42 }
 0x5f4   : > { %v2739_v0 = vsel %vm2738_vm15, %v2734_v61, inf  ;;  %v2465_v28 = vsel %vm2464_vm1, %v2460_v4, inf  ;;  %v2530_v4 = vcvt.s32.f32 %v2528_v38 }
 0x5f5   : > { %2740 = vmin.xlane.f32.xlu1 %v2739_v0  ;;  %2466 = vmin.xlane.f32.xlu0 %v2465_v28 }
 0x5f6   : > { %v6543_v1 = vpop.xlane.xlu1 %2504  ;;  %v6545_v51 = vpop.xlane.xlu0 %2721 }
 0x5f7   : > { %vm2506_vm2 = vcmp.eq.f32.partialorder %v6258_v45, %v6543_v1  ;;  %vm2723_vm3 = vcmp.eq.f32.partialorder %v6248_v60, %v6545_v51  ;;  %v8168_v45 = vld [vmem:[#allocation67_spill] sm:$0xff] }
 0x5f8   : > { %v2507_v53 = vsel %vm2506_vm2, %v2502_v21, inf  ;;  %v2724_v43 = vsel %vm2723_vm3, %v2719_v39, inf }
 0x5f9   : > { %2508 = vmin.xlane.f32.xlu1 %v2507_v53  ;;  %2725 = vmin.xlane.f32.xlu0 %v2724_v43  ;;  %v2556_v53 = vand.u32 65535, %v6333_v15  ;;  %v2822_v15 = vand.u32 65535, %v6340_v46  ;;  %v2584_v46 = vand.u32 65535, %v6377_v22  ;;  %v2852_v22 = vand.u32 65535, %v6384_v8 }
 0x5fa   : > { %v6553_v57 = vpop.xlane.xlu1 %2766  ;;  %v6555_v62 = vpop.xlane.xlu0 %2490  ;;  %v2837_v8 = vand.u32 65535, %v6406_v44 }
 0x5fb   : > { %vm2768_vm4 = vcmp.eq.f32.partialorder %v6272_v18, %v6553_v57  ;;  %vm2492_vm11 = vcmp.eq.f32.partialorder %v8168_v45, %v6555_v62  ;;  %v8170_v18 = vld [vmem:[#allocation68_spill] sm:$0xff]  ;;  %v2558_v3 = vcvt.s32.f32 %v2556_v53  ;;  %v2779_v45 = vcvt.s32.f32 %v2777_v2  ;;  %v8174_v53 = vld [vmem:[#allocation35_spill] sm:$0xff] }
 0x5fc   : > { %v2769_v60 = vsel %vm2768_vm4, %v2764_v19, inf  ;;  %v2493_v36 = vsel %vm2492_vm11, %v2488_v48, inf  ;;  %v2824_v30 = vcvt.s32.f32 %v2822_v15 }
 0x5fd   : > { %2770 = vmin.xlane.f32.xlu1 %v2769_v60  ;;  %2494 = vmin.xlane.f32.xlu0 %v2493_v36 }
 0x5fe   : > { %v6563_v56 = vpop.xlane.xlu1 %2532  ;;  %v6565_v61 = vpop.xlane.xlu0 %2751 }
 0x5ff   : > { %vm2534_vm5 = vcmp.eq.f32.partialorder %v6306_v7, %v6563_v56  ;;  %vm2753_vm6 = vcmp.eq.f32.partialorder %v8170_v18, %v6565_v61  ;;  %v8171_v7 = vld [vmem:[#allocation23_spill] sm:$0xff] }
 0x600   : > { %v2535_v0 = vsel %vm2534_vm5, %v2530_v4, inf  ;;  %v2754_v28 = vsel %vm2753_vm6, %v2749_v49, inf }
 0x601   : > { %2536 = vmin.xlane.f32.xlu1 %v2535_v0  ;;  %2755 = vmin.xlane.f32.xlu0 %v2754_v28  ;;  %v2586_v28 = vcvt.s32.f32 %v2584_v46 }
 0x602   : > { %v6573_v21 = vpop.xlane.xlu1 %2796  ;;  %v6575_v39 = vpop.xlane.xlu0 %2518 }
 0x603   : > { %vm2798_vm7 = vcmp.eq.f32.partialorder %v6320_v5, %v6573_v21  ;;  %vm2520_vm8 = vcmp.eq.f32.partialorder %v8171_v7, %v6575_v39  ;;  %v8172_v5 = vld [vmem:[#allocation25_spill] sm:$0xff] }
 0x604   : > { %v2799_v43 = vsel %vm2798_vm7, %v2794_v9, inf  ;;  %v2521_v19 = vsel %vm2520_vm8, %v2516_v52, inf  ;;  %v2809_v9 = vcvt.s32.f32 %v2807_v26  ;;  %v8173_v52 = vld [vmem:[#allocation37_spill] sm:$0xff]  ;;  %v8176_v26 = vld [vmem:[#allocation79_spill] sm:$0xff] }
 0x605   : > { %2800 = vmin.xlane.f32.xlu1 %v2799_v43  ;;  %2522 = vmin.xlane.f32.xlu0 %v2521_v19  ;;  %v2570_v20 = vand.u32 65535, %v8173_v52  ;;  %v2854_v19 = vcvt.s32.f32 %v2852_v22  ;;  %v2626_v52 = vand.u32 65535, %v6482_v40 }
 0x606   : > { %v6583_v48 = vpop.xlane.xlu1 %2560  ;;  %v6585_v38 = vpop.xlane.xlu0 %2781 }
 0x607   : > { %vm2562_vm9 = vcmp.eq.f32.partialorder %v6352_v12, %v6583_v48  ;;  %vm2783_vm12 = vcmp.eq.f32.partialorder %v8172_v5, %v6585_v38 }
 0x608   : > { %v2563_v60 = vsel %vm2562_vm9, %v2558_v3, inf  ;;  %v2784_v36 = vsel %vm2783_vm12, %v2779_v45, inf  ;;  %v2572_v3 = vcvt.s32.f32 %v2570_v20  ;;  %v2612_v45 = vand.u32 65535, %v6423_v50 }
 0x609   : > { %2564 = vmin.xlane.f32.xlu1 %v2563_v60  ;;  %2785 = vmin.xlane.f32.xlu0 %v2784_v36  ;;  %v2839_v60 = vcvt.s32.f32 %v2837_v8  ;;  %v2598_v36 = vand.u32 65535, %v6443_v27  ;;  %v2867_v27 = vand.u32 65535, %v8176_v26  ;;  %v8178_v8 = vld [vmem:[#allocation58_spill] sm:$0xff] }
 0x60a   : > { %v6593_v4 = vpop.xlane.xlu1 %2826  ;;  %v6595_v49 = vpop.xlane.xlu0 %2546  ;;  %v2614_v44 = vcvt.s32.f32 %v2612_v45 }
 0x60b   : > { %vm2828_vm13 = vcmp.eq.f32.partialorder %v6364_v33, %v6593_v4  ;;  %vm2548_vm14 = vcmp.eq.f32.partialorder %v6374_v37, %v6595_v49  ;;  %v8175_v33 = vld [vmem:[#allocation31_spill] sm:$0xff]  ;;  %v2600_v46 = vcvt.s32.f32 %v2598_v36 }
 0x60c   : > { %v2829_v12 = vsel %vm2828_vm13, %v2824_v30, inf  ;;  %v2549_v6 = vsel %vm2548_vm14, %v2544_v32, inf }
 0x60d   : > { %2830 = vmin.xlane.f32.xlu1 %v2829_v12  ;;  %2550 = vmin.xlane.f32.xlu0 %v2549_v6 }
 0x60e   : > { %v6603_v18 = vpop.xlane.xlu1 %2588  ;;  %v6605_v0 = vpop.xlane.xlu0 %2811 }
 0x60f   : > { %vm2590_vm15 = vcmp.eq.f32.partialorder %v8174_v53, %v6603_v18  ;;  %vm2813_vm1 = vcmp.eq.f32.partialorder %v8175_v33, %v6605_v0 }
 0x610   : > { %v2591_v37 = vsel %vm2590_vm15, %v2586_v28, inf  ;;  %v2814_v2 = vsel %vm2813_vm1, %v2809_v9, inf  ;;  %v2869_v28 = vcvt.s32.f32 %v2867_v27  ;;  %v2640_v9 = vand.u32 65535, %v6469_v24 }
 0x611   : > { %2592 = vmin.xlane.f32.xlu1 %v2591_v37  ;;  %2815 = vmin.xlane.f32.xlu0 %v2814_v2  ;;  %v2628_v37 = vcvt.s32.f32 %v2626_v52  ;;  %v2897_v24 = vand.u32 65535, %v6493_v54 }
 0x612   : > { %v6613_v7 = vpop.xlane.xlu1 %2856  ;;  %v6615_v43 = vpop.xlane.xlu0 %2574  ;;  %v2642_v20 = vcvt.s32.f32 %v2640_v9 }
 0x613   : > { %vm2858_vm2 = vcmp.eq.f32.partialorder %v6408_v29, %v6613_v7  ;;  %vm2576_vm3 = vcmp.eq.f32.partialorder %v6410_v11, %v6615_v43  ;;  %v2882_v29 = vand.u32 65535, %v6428_v10 }
 0x614   : > { %v2859_v15 = vsel %vm2858_vm2, %v2854_v19, inf  ;;  %v2577_v13 = vsel %vm2576_vm3, %v2572_v3, inf  ;;  %v2899_v3 = vcvt.s32.f32 %v2897_v24 }
 0x615   : > { %2860 = vmin.xlane.f32.xlu1 %v2859_v15  ;;  %2578 = vmin.xlane.f32.xlu0 %v2577_v13  ;;  %v2884_v6 = vcvt.s32.f32 %v2882_v29  ;;  %v2713_v15 = vcvt.f32.s32 %v6513_v17 }
 0x616   : > { %v6623_v5 = vpop.xlane.xlu0 %2841  ;;  %v6626_v30 = vpop.xlane.xlu1 %2616 }
 0x617   : > { %vm2843_vm4 = vcmp.eq.f32.partialorder %v6437_v34, %v6623_v5  ;;  %vm2618_vm11 = vcmp.eq.f32.partialorder %v6439_v63, %v6626_v30 }
 0x618   : > { %v2844_v11 = vsel %vm2843_vm4, %v2839_v60, inf  ;;  %v2619_v50 = vsel %vm2618_vm11, %v2614_v44, inf  ;;  %v2441_v60 = vcvt.f32.s32 %v6515_v23 }
 0x619   : > { %2845 = vmin.xlane.f32.xlu0 %v2844_v11  ;;  %2620 = vmin.xlane.f32.xlu1 %v2619_v50  ;;  %v2714_v11 = vshll.u32 %v2713_v15, 16  ;;  %v2698_v50 = vcvt.f32.s32 %v6525_v55  ;;  %v2511_v15 = vcvt.f32.s32 %v6543_v1 }
 0x61a   : > { %v6633_v32 = vpop.xlane.xlu0 %2602  ;;  %v6636_v12 = vpop.xlane.xlu1 %2886 }
 0x61b   : > { %vm2604_vm5 = vcmp.eq.f32.partialorder %v6453_v41, %v6633_v32  ;;  %vm2888_vm6 = vcmp.eq.f32.partialorder %v6455_v31, %v6636_v12  ;;  %v2912_v31 = vand.u32 65535, %v6485_v58  ;;  %v8177_v58 = vld [vmem:[#allocation56_spill] sm:$0xff]  ;;  %v2699_v9 = vshll.u32 %v2698_v50, 16 }
 0x61c   : > { %v2605_v10 = vsel %vm2604_vm5, %v2600_v46, inf  ;;  %v2889_v34 = vsel %vm2888_vm6, %v2884_v6, inf }
 0x61d   : > { %2606 = vmin.xlane.f32.xlu0 %v2605_v10  ;;  %2890 = vmin.xlane.f32.xlu1 %v2889_v34  ;;  %v2914_v2 = vcvt.s32.f32 %v2912_v31  ;;  %v2442_v10 = vshll.u32 %v2441_v60, 16  ;;  %v2483_v34 = vcvt.f32.s32 %v6523_v16 }
 0x61e   : > { %v6642_v63 = vpop.xlane.xlu0 %2871 }
 0x61f   : > { %vm2873_vm7 = vcmp.eq.f32.partialorder %v6459_v25, %v6642_v63  ;;  %v2484_v16 = vshll.u32 %v2483_v34, 16 }
 0x620   : > { %v2874_v22 = vsel %vm2873_vm7, %v2869_v28, inf }
 0x621   : > { %2875 = vmin.xlane.f32.xlu0 %v2874_v22  ;;  %v2469_v22 = vcvt.f32.s32 %v6535_v42  ;;  %v2728_v42 = vcvt.f32.s32 %v6545_v51 }
 0x622   : > { %v6648_v41 = vpop.xlane.xlu1 %2644 }
 0x623   : > { %vm2646_vm8 = vcmp.eq.f32.partialorder %v6488_v47, %v6648_v41 }
 0x624   : > { %v6653_v53 = vpop.xlane.xlu0 %2630  ;;  %v2647_v33 = vsel %vm2646_vm8, %v2642_v20, inf }
 0x625   : > { %2648 = vmin.xlane.f32.xlu1 %v2647_v33  ;;  %vm2632_vm9 = vcmp.eq.f32.partialorder %v6496_v59, %v6653_v53  ;;  %v2455_v59 = vcvt.f32.s32 %v6507_v14  ;;  %v2743_v14 = vcvt.f32.s32 %v6533_v35  ;;  %v8179_v33 = vld [vmem:[#allocation4_spill] sm:$0xff] }
 0x626   : > { %v6658_v25 = vpop.xlane.xlu1 %2916  ;;  %v2633_v40 = vsel %vm2632_vm9, %v2628_v37, inf  ;;  %v8180_v37 = vld [vmem:[#allocation77_spill] sm:$0xff] }
 0x627   : > { %2634 = vmin.xlane.f32.xlu0 %v2633_v40  ;;  %vm2918_vm12 = vcmp.eq.f32.partialorder %v8177_v58, %v6658_v25  ;;  %v2456_v29 = vshll.u32 %v2455_v59, 16  ;;  %v2744_v35 = vshll.u32 %v2743_v14, 16  ;;  %v8182_v58 = vld [vmem:[#allocation78_spill] sm:$0xff]  ;;  %v2470_v59 = vshll.u32 %v2469_v22, 16 }
 0x628   : > { %v6662_v19 = vpop.xlane.xlu0 %2901  ;;  %v2919_v47 = vsel %vm2918_vm12, %v2914_v2, inf  ;;  %v8189_v14 = vld [vmem:[#allocation82_spill] sm:$0xff] }
 0x629   : > { %2920 = vmin.xlane.f32.xlu1 %v2919_v47  ;;  %vm2903_vm13 = vcmp.eq.f32.partialorder %v8178_v8, %v6662_v19 }
 0x62a   : > { %v2904_v54 = vsel %vm2903_vm13, %v2899_v3, inf  ;;  %v8183_v3 = vld [vmem:[#allocation40_spill] sm:$0xff] }
 0x62b   : > { %2905 = vmin.xlane.f32.xlu0 %v2904_v54  ;;  %v8184_v54 = vld [vmem:[#allocation44_spill] sm:$0xff] }
 0x672   : > { %v2453_v45 = vpop.xlane.xlu1 %2452 }
 0x673   : > { %v2454_v13 = vcvt.f32.s32 %v2453_v45 }
 0x675   : > { %v2457_v27 = vadd.s32 %v2456_v29, %v2454_v13  ;;  %v8185_v29 = vld [vmem:[#allocation80_spill] sm:$0xff] }
 0x676   : > { %v2711_v36 = vpop.xlane.xlu1 %2710  ;;  %v2439_v44 = vpop.xlane.xlu0 %2438 }
 0x677   : > { %v2712_v46 = vcvt.f32.s32 %v2711_v36  ;;  %v2440_v26 = vcvt.f32.s32 %v2439_v44 }
 0x679   : > { %v2715_v6 = vadd.s32 %v2714_v11, %v2712_v46  ;;  %v2443_v52 = vadd.s32 %v2442_v10, %v2440_v26  ;;  %v2773_v11 = vcvt.f32.s32 %v6553_v57  ;;  %v2729_v10 = vshll.u32 %v2728_v42, 16  ;;  %v8194_v42 = vld [vmem:[#allocation85_spill] sm:$0xff] }
 0x67a   : > { %v2481_v28 = vpop.xlane.xlu1 %2480  ;;  %v2696_v17 = vpop.xlane.xlu0 %2695  ;;  %v2512_v57 = vshll.u32 %v2511_v15, 16 }
 0x67b   : > { %vm2928_vm14 = vcmp.lt.s32.totalorder %v2457_v27, %v2715_v6  ;;  %v2697_v23 = vcvt.f32.s32 %v2696_v17  ;;  %v2482_v31 = vcvt.f32.s32 %v2481_v28  ;;  %v2497_v17 = vcvt.f32.s32 %v6555_v62 }
 0x67c   : > { %v2929_v20 = vsel %vm2928_vm14, %v2457_v27, %v2715_v6  ;;  %v8187_v27 = vld [vmem:[#allocation83_spill] sm:$0xff] }
 0x67d   : > { %v2700_v55 = vadd.s32 %v2699_v9, %v2697_v23  ;;  %vm2959_vm15 = vcmp.eq.s32.totalorder %v8179_v33, %v2929_v20  ;;  %v6677_v24 = vsel %vm3022_vm10, %v2929_v20, %v8180_v37  ;;  %vm2991_vm1 = vcmp.eq.s32.totalorder %v8183_v3, %v2929_v20  ;;  %v8188_v6 = vld [vmem:[#allocation43_spill] sm:$0xff]  ;;  %v8190_v20 = vld [vmem:[#allocation49_spill] sm:$0xff] }
 0x67e   : > { %8181 = vst [vmem:[#allocation67_spill] sm:$0xff] %v6677_v24  ;;  %v2741_v40 = vpop.xlane.xlu1 %2740  ;;  %v2467_v2 = vpop.xlane.xlu0 %2466  ;;  %v6680_v47 = vsel %vm2959_vm15, -inf, %v8182_v58  ;;  %v6686_v45 = vsel %vm2991_vm1, -inf, %v8184_v54  ;;  %v2485_v36 = vadd.s32 %v2484_v16, %v2482_v31  ;;  %v2758_v58 = vcvt.f32.s32 %v6565_v61 }
 0x67f   : > { %vm2926_vm2 = vcmp.lt.s32.totalorder %v2443_v52, %v2700_v55  ;;  %v2742_v8 = vcvt.f32.s32 %v2741_v40  ;;  %3057 = vmax.xlane.f32.xlu1 %v6680_v47  ;;  %v2468_v13 = vcvt.f32.s32 %v2467_v2  ;;  %v3090_v26 = vsel %vm329_vm0, %v6686_v45, -inf  ;;  %v8193_v2 = vld [vmem:[#allocation45_spill] sm:$0xff] }
 0x680   : > { %v2927_v60 = vsel %vm2926_vm2, %v2443_v52, %v2700_v55  ;;  %v2774_v55 = vshll.u32 %v2773_v11, 16  ;;  %v2498_v54 = vshll.u32 %v2497_v17, 16 }
 0x681   : > { %v2745_v44 = vadd.s32 %v2744_v35, %v2742_v8  ;;  %vm2958_vm3 = vcmp.eq.s32.totalorder %v8179_v33, %v2927_v60  ;;  %v6693_v51 = vsel %vm3022_vm10, %v2927_v60, %v8185_v29  ;;  %vm2990_vm4 = vcmp.eq.s32.totalorder %v8188_v6, %v2927_v60  ;;  %v8192_v35 = vld [vmem:[#allocation84_spill] sm:$0xff] }
 0x682   : > { %8186 = vst [vmem:[#allocation57_spill] sm:$0xff] %v6693_v51  ;;  %v2509_v50 = vpop.xlane.xlu1 %2508  ;;  %v2726_v46 = vpop.xlane.xlu0 %2725  ;;  %v6699_v1 = vsel %vm2958_vm3, -inf, %v8187_v27  ;;  %v6704_v28 = vsel %vm2990_vm4, -inf, %v8189_v14  ;;  %v2471_v9 = vadd.s32 %v2470_v59, %v2468_v13  ;;  %v2539_v59 = vcvt.f32.s32 %v6563_v56  ;;  %v8198_v27 = vld [vmem:[#allocation65_spill] sm:$0xff] }
 0x683   : > { %vm2932_vm11 = vcmp.lt.s32.totalorder %v2485_v36, %v2745_v44  ;;  %v2727_v34 = vcvt.f32.s32 %v2726_v46  ;;  %3091 = vmax.xlane.f32.xlu1 %v3090_v26  ;;  %3055 = vmax.xlane.f32.xlu0 %v6699_v1  ;;  %v2510_v22 = vcvt.f32.s32 %v2509_v50  ;;  %v3087_v62 = vsel %vm329_vm0, %v6704_v28, -inf  ;;  %v8197_v26 = vld [vmem:[#allocation87_spill] sm:$0xff] }
 0x684   : > { %v2933_v23 = vsel %vm2932_vm11, %v2485_v36, %v2745_v44  ;;  %v8195_v44 = vld [vmem:[#allocation86_spill] sm:$0xff]  ;;  %v2803_v29 = vcvt.f32.s32 %v6573_v21  ;;  %v2759_v6 = vshll.u32 %v2758_v58, 16  ;;  %v2540_v21 = vshll.u32 %v2539_v59, 16 }
 0x685   : > { %v2730_v52 = vadd.s32 %v2729_v10, %v2727_v34  ;;  %vm2961_vm5 = vcmp.eq.s32.totalorder %v8179_v33, %v2933_v23  ;;  %v6711_v31 = vsel %vm3022_vm10, %v2933_v23, %v8190_v20  ;;  %vm2993_vm6 = vcmp.eq.s32.totalorder %v8193_v2, %v2933_v23  ;;  %v8199_v34 = vld [vmem:[#allocation42_spill] sm:$0xff] }
 0x686   : > { %8191 = vst [vmem:[#allocation68_spill] sm:$0xff] %v6711_v31  ;;  %v2771_v37 = vpop.xlane.xlu1 %2770  ;;  %v2495_v16 = vpop.xlane.xlu0 %2494  ;;  %v6714_v40 = vsel %vm2961_vm5, -inf, %v8192_v35  ;;  %v6722_v8 = vsel %vm2993_vm6, -inf, %v8194_v42  ;;  %v2513_v60 = vadd.s32 %v2512_v57, %v2510_v22  ;;  %v2525_v57 = vcvt.f32.s32 %v6575_v39  ;;  %v8202_v35 = vld [vmem:[#allocation55_spill] sm:$0xff]  ;;  %v8203_v2 = vld [vmem:[#allocation66_spill] sm:$0xff] }
 0x687   : > { %vm2930_vm7 = vcmp.lt.s32.totalorder %v2471_v9, %v2730_v52  ;;  %v2772_v3 = vcvt.f32.s32 %v2771_v37  ;;  %3061 = vmax.xlane.f32.xlu1 %v6714_v40  ;;  %3088 = vmax.xlane.f32.xlu0 %v3087_v62  ;;  %v2496_v15 = vcvt.f32.s32 %v2495_v16  ;;  %v3096_v46 = vsel %vm329_vm0, %v6722_v8, -inf  ;;  %v8204_v42 = vld [vmem:[#allocation62_spill] sm:$0xff] }
 0x688   : > { %v2931_v13 = vsel %vm2930_vm7, %v2471_v9, %v2730_v52  ;;  %v8200_v52 = vld [vmem:[#allocation50_spill] sm:$0xff]  ;;  %v2788_v58 = vcvt.f32.s32 %v6585_v38  ;;  %v2526_v59 = vshll.u32 %v2525_v57, 16 }
 0x689   : > { %v2775_v36 = vadd.s32 %v2774_v55, %v2772_v3  ;;  %vm2960_vm8 = vcmp.eq.s32.totalorder %v8179_v33, %v2931_v13  ;;  %v6729_v61 = vsel %vm3022_vm10, %v2931_v13, %v8195_v44  ;;  %vm2992_vm9 = vcmp.eq.s32.totalorder %v8198_v27, %v2931_v13  ;;  %v8207_v27 = vld [vmem:[#allocation26_spill] sm:$0xff] }
 0x68a   : > { %8196 = vst [vmem:[#allocation23_spill] sm:$0xff] %v6729_v61  ;;  %v2537_v11 = vpop.xlane.xlu1 %2536  ;;  %v2756_v50 = vpop.xlane.xlu0 %2755  ;;  %v6735_v56 = vsel %vm2960_vm8, -inf, %v8197_v26  ;;  %v6740_v14 = vsel %vm2992_vm9, -inf, %v8199_v34  ;;  %v2499_v17 = vadd.s32 %v2498_v54, %v2496_v15  ;;  %v2804_v55 = vshll.u32 %v2803_v29, 16  ;;  %v8205_v29 = vld [vmem:[#allocation6_spill] sm:$0xff] }
 0x68b   : > { %vm2936_vm12 = vcmp.lt.s32.totalorder %v2513_v60, %v2775_v36  ;;  %v2757_v10 = vcvt.f32.s32 %v2756_v50  ;;  %3097 = vmax.xlane.f32.xlu1 %v3096_v46  ;;  %3059 = vmax.xlane.f32.xlu0 %v6735_v56  ;;  %v2538_v23 = vcvt.f32.s32 %v2537_v11  ;;  %v3093_v39 = vsel %vm329_vm0, %v6740_v14, -inf }
 0x68c   : > { %v2937_v9 = vsel %vm2936_vm12, %v2513_v60, %v2775_v36  ;;  %v2567_v15 = vcvt.f32.s32 %v6583_v48  ;;  %v2833_v11 = vcvt.f32.s32 %v6593_v4 }
 0x68d   : > { %v2760_v22 = vadd.s32 %v2759_v6, %v2757_v10  ;;  %vm2963_vm13 = vcmp.eq.s32.totalorder %v8179_v33, %v2937_v9  ;;  %v6747_v20 = vsel %vm3022_vm10, %v2937_v9, %v8200_v52  ;;  %vm2995_vm14 = vcmp.eq.s32.totalorder %v8203_v2, %v2937_v9  ;;  %v8208_v6 = vld [vmem:[#allocation18_spill] sm:$0xff]  ;;  %v8212_v2 = vld [vmem:[#allocation12_spill] sm:$0xff] }
 0x68e   : > { %8201 = vst [vmem:[#allocation25_spill] sm:$0xff] %v6747_v20  ;;  %v2801_v37 = vpop.xlane.xlu1 %2800  ;;  %v2523_v16 = vpop.xlane.xlu0 %2522  ;;  %v6750_v62 = vsel %vm2963_vm13, -inf, %v8202_v35  ;;  %v6758_v54 = vsel %vm2995_vm14, -inf, %v8204_v42  ;;  %v2541_v36 = vadd.s32 %v2540_v21, %v2538_v23  ;;  %v2789_v10 = vshll.u32 %v2788_v58, 16  ;;  %v8209_v21 = vld [vmem:[#allocation9_spill] sm:$0xff] }
 0x68f   : > { %vm2934_vm15 = vcmp.lt.s32.totalorder %v2499_v17, %v2760_v22  ;;  %v2802_v3 = vcvt.f32.s32 %v2801_v37  ;;  %3065 = vmax.xlane.f32.xlu1 %v6750_v62  ;;  %3094 = vmax.xlane.f32.xlu0 %v3093_v39  ;;  %v2524_v13 = vcvt.f32.s32 %v2523_v16  ;;  %v3102_v26 = vsel %vm329_vm0, %v6758_v54, -inf }
 0x690   : > { %v2935_v60 = vsel %vm2934_vm15, %v2499_v17, %v2760_v22  ;;  %v2568_v4 = vshll.u32 %v2567_v15, 16  ;;  %v2553_v17 = vcvt.f32.s32 %v6595_v49  ;;  %v2834_v16 = vshll.u32 %v2833_v11, 16  ;;  %v8214_v15 = vld [vmem:[#allocation51_spill] sm:$0xff] }
 0x691   : > { %v2805_v44 = vadd.s32 %v2804_v55, %v2802_v3  ;;  %vm2962_vm1 = vcmp.eq.s32.totalorder %v8179_v33, %v2935_v60  ;;  %v6765_v38 = vsel %vm3022_vm10, %v2935_v60, %v8205_v29  ;;  %vm2994_vm2 = vcmp.eq.s32.totalorder %v8208_v6, %v2935_v60  ;;  %v8210_v55 = vld [vmem:[#allocation32_spill] sm:$0xff]  ;;  %v8213_v3 = vld [vmem:[#allocation19_spill] sm:$0xff] }
 0x692   : > { %8206 = vst [vmem:[#allocation37_spill] sm:$0xff] %v6765_v38  ;;  %v2565_v50 = vpop.xlane.xlu1 %2564  ;;  %v2786_v46 = vpop.xlane.xlu0 %2785  ;;  %v6771_v48 = vsel %vm2962_vm1, -inf, %v8207_v27  ;;  %v6776_v57 = vsel %vm2994_vm2, -inf, %v8209_v21  ;;  %v2527_v9 = vadd.s32 %v2526_v59, %v2524_v13  ;;  %v2818_v42 = vcvt.f32.s32 %v6605_v0  ;;  %v8218_v21 = vld [vmem:[#allocation20_spill] sm:$0xff] }
 0x693   : > { %vm2940_vm3 = vcmp.lt.s32.totalorder %v2541_v36, %v2805_v44  ;;  %v2787_v34 = vcvt.f32.s32 %v2786_v46  ;;  %3103 = vmax.xlane.f32.xlu1 %v3102_v26  ;;  %3063 = vmax.xlane.f32.xlu0 %v6771_v48  ;;  %v2566_v22 = vcvt.f32.s32 %v2565_v50  ;;  %v3099_v49 = vsel %vm329_vm0, %v6776_v57, -inf  ;;  %v8215_v46 = vld [vmem:[#allocation69_spill] sm:$0xff] }
 0x694   : > { %v2941_v23 = vsel %vm2940_vm3, %v2541_v36, %v2805_v44  ;;  %v2554_v60 = vshll.u32 %v2553_v17, 16  ;;  %v2595_v36 = vcvt.f32.s32 %v6603_v18  ;;  %v2863_v26 = vcvt.f32.s32 %v6613_v7 }
 0x695   : > { %v2790_v52 = vadd.s32 %v2789_v10, %v2787_v34  ;;  %vm2965_vm4 = vcmp.eq.s32.totalorder %v8179_v33, %v2941_v23  ;;  %v6783_v37 = vsel %vm3022_vm10, %v2941_v23, %v8210_v55  ;;  %vm2997_vm11 = vcmp.eq.s32.totalorder %v8213_v3, %v2941_v23  ;;  %v8217_v34 = vld [vmem:[#allocation48_spill] sm:$0xff] }
 0x696   : > { %8211 = vst [vmem:[#allocation35_spill] sm:$0xff] %v6783_v37  ;;  %v2831_v35 = vpop.xlane.xlu1 %2830  ;;  %v2551_v39 = vpop.xlane.xlu0 %2550  ;;  %v6786_v58 = vsel %vm2965_vm4, -inf, %v8212_v2  ;;  %v6794_v13 = vsel %vm2997_vm11, -inf, %v8214_v15  ;;  %v2569_v11 = vadd.s32 %v2568_v4, %v2566_v22  ;;  %v2819_v4 = vshll.u32 %v2818_v42, 16 }
 0x697   : > { %vm2938_vm5 = vcmp.lt.s32.totalorder %v2527_v9, %v2790_v52  ;;  %v2832_v59 = vcvt.f32.s32 %v2831_v35  ;;  %3069 = vmax.xlane.f32.xlu1 %v6786_v58  ;;  %3100 = vmax.xlane.f32.xlu0 %v3099_v49  ;;  %v2552_v44 = vcvt.f32.s32 %v2551_v39  ;;  %v3108_v10 = vsel %vm329_vm0, %v6794_v13, -inf  ;;  %v8220_v39 = vld [vmem:[#allocation70_spill] sm:$0xff] }
 0x698   : > { %v2939_v29 = vsel %vm2938_vm5, %v2527_v9, %v2790_v52  ;;  %v8219_v9 = vld [vmem:[#allocation53_spill] sm:$0xff]  ;;  %v2596_v7 = vshll.u32 %v2595_v36, 16  ;;  %v2581_v22 = vcvt.f32.s32 %v6615_v43  ;;  %v2864_v49 = vshll.u32 %v2863_v26, 16 }
 0x699   : > { %v2835_v50 = vadd.s32 %v2834_v16, %v2832_v59  ;;  %vm2964_vm6 = vcmp.eq.s32.totalorder %v8179_v33, %v2939_v29  ;;  %v6801_v0 = vsel %vm3022_vm10, %v2939_v29, %v8215_v46  ;;  %vm2996_vm7 = vcmp.eq.s32.totalorder %v8218_v21, %v2939_v29  ;;  %v8222_v59 = vld [vmem:[#allocation54_spill] sm:$0xff]  ;;  %v8223_v29 = vld [vmem:[#allocation60_spill] sm:$0xff] }
 0x69a   : > { %8216 = vst [vmem:[#allocation31_spill] sm:$0xff] %v6801_v0  ;;  %v2593_v27 = vpop.xlane.xlu1 %2592  ;;  %v2816_v6 = vpop.xlane.xlu0 %2815  ;;  %v6807_v18 = vsel %vm2964_vm6, -inf, %v8217_v34  ;;  %v6812_v23 = vsel %vm2996_vm7, -inf, %v8219_v9  ;;  %v2555_v52 = vadd.s32 %v2554_v60, %v2552_v44  ;;  %v6826_v60 = vld [vmem:[#allocation3 + $0x48] sm:$0xff]  ;;  %v2848_v36 = vcvt.f32.s32 %v6623_v5  ;;  %v6845_v9 = vld [vmem:[#allocation3 + $0x40] sm:$0xff] }
 0x69b   : > { %vm2944_vm8 = vcmp.lt.s32.totalorder %v2569_v11, %v2835_v50  ;;  %v2817_v17 = vcvt.f32.s32 %v2816_v6  ;;  %3109 = vmax.xlane.f32.xlu1 %v3108_v10  ;;  %3067 = vmax.xlane.f32.xlu0 %v6807_v18  ;;  %v2594_v16 = vcvt.f32.s32 %v2593_v27  ;;  %v3105_v43 = vsel %vm329_vm0, %v6812_v23, -inf  ;;  %v8224_v6 = vld [vmem:[#allocation71_spill] sm:$0xff] }
 0x69c   : > { %v2945_v55 = vsel %vm2944_vm8, %v2569_v11, %v2835_v50  ;;  %v2582_v5 = vshll.u32 %v2581_v22, 16 }
 0x69d   : > { %v2820_v35 = vadd.s32 %v2819_v4, %v2817_v17  ;;  %vm2967_vm9 = vcmp.eq.s32.totalorder %v8179_v33, %v2945_v55  ;;  %v6819_v2 = vsel %vm3022_vm10, %v2945_v55, %v8220_v39  ;;  %vm2999_vm12 = vcmp.eq.s32.totalorder %v6826_v60, %v2945_v55  ;;  %v8226_v4 = vld [vmem:[#allocation61_spill] sm:$0xff] }
 0x69e   : > { %8221 = vst [vmem:[#allocation79_spill] sm:$0xff] %v6819_v2  ;;  %v2861_v3 = vpop.xlane.xlu1 %2860  ;;  %v2579_v42 = vpop.xlane.xlu0 %2578  ;;  %v6822_v15 = vsel %vm2967_vm9, -inf, %v8222_v59  ;;  %v6832_v11 = vsel %vm2999_vm12, -inf, %v8223_v29  ;;  %v2597_v26 = vadd.s32 %v2596_v7, %v2594_v16  ;;  %v2849_v7 = vshll.u32 %v2848_v36, 16  ;;  %v8227_v16 = vld [vmem:[#allocation5_spill] sm:$0xff]  ;;  %v8228_v59 = vld [vmem:[#allocation72_spill] sm:$0xff] }
 0x69f   : > { %vm2942_vm13 = vcmp.lt.s32.totalorder %v2555_v52, %v2820_v35  ;;  %v2862_v44 = vcvt.f32.s32 %v2861_v3  ;;  %3073 = vmax.xlane.f32.xlu1 %v6822_v15  ;;  %3106 = vmax.xlane.f32.xlu0 %v3105_v43  ;;  %v2580_v50 = vcvt.f32.s32 %v2579_v42  ;;  %v3114_v21 = vsel %vm329_vm0, %v6832_v11, -inf  ;;  %v6860_v36 = vld [vmem:[#allocation3 + $0x58] sm:$0xff] }
 0x6a0   : > { %v2943_v46 = vsel %vm2942_vm13, %v2555_v52, %v2820_v35  ;;  %v2623_v35 = vcvt.f32.s32 %v6626_v30  ;;  %v2893_v39 = vcvt.f32.s32 %v6636_v12 }
 0x6a1   : > { %v2865_v27 = vadd.s32 %v2864_v49, %v2862_v44  ;;  %vm2966_vm14 = vcmp.eq.s32.totalorder %v8179_v33, %v2943_v46  ;;  %v6838_v10 = vsel %vm3022_vm10, %v2943_v46, %v8224_v6  ;;  %vm2998_vm15 = vcmp.eq.s32.totalorder %v6845_v9, %v2943_v46  ;;  %v8230_v46 = vld [vmem:[#allocation22_spill] sm:$0xff]  ;;  %v8231_v6 = vld [vmem:[#allocation24_spill] sm:$0xff] }
 0x6a2   : > { %8225 = vst [vmem:[#allocation56_spill] sm:$0xff] %v6838_v10  ;;  %v2846_v34 = vpop.xlane.xlu0 %2845  ;;  %v6843_v17 = vsel %vm2966_vm14, -inf, %v8226_v4  ;;  %v2621_v52 = vpop.xlane.xlu1 %2620  ;;  %v6850_v22 = vsel %vm2998_vm15, -inf, %v8227_v16  ;;  %v2583_v49 = vadd.s32 %v2582_v5, %v2580_v50  ;;  %v2609_v50 = vcvt.f32.s32 %v6633_v32 }
 0x6a3   : > { %vm2948_vm1 = vcmp.lt.s32.totalorder %v2597_v26, %v2865_v27  ;;  %v2847_v55 = vcvt.f32.s32 %v2846_v34  ;;  %3115 = vmax.xlane.f32.xlu1 %v3114_v21  ;;  %3071 = vmax.xlane.f32.xlu0 %v6843_v17  ;;  %v2622_v44 = vcvt.f32.s32 %v2621_v52  ;;  %v3111_v12 = vsel %vm329_vm0, %v6850_v22, -inf }
 0x6a4   : > { %v2949_v3 = vsel %vm2948_vm1, %v2597_v26, %v2865_v27  ;;  %v2878_v26 = vcvt.f32.s32 %v6642_v63  ;;  %v2624_v34 = vshll.u32 %v2623_v35, 16  ;;  %v2894_v21 = vshll.u32 %v2893_v39, 16  ;;  %v6880_v63 = vld [vmem:[#allocation3 + $0x50] sm:$0xff]  ;;  %v8234_v39 = vld [vmem:[#allocation7_spill] sm:$0xff] }
 0x6a5   : > { %v2850_v42 = vadd.s32 %v2849_v7, %v2847_v55  ;;  %vm2969_vm2 = vcmp.eq.s32.totalorder %v8179_v33, %v2949_v3  ;;  %v6858_v43 = vsel %vm3022_vm10, %v2949_v3, %v8228_v59  ;;  %vm3001_vm3 = vcmp.eq.s32.totalorder %v6860_v36, %v2949_v3  ;;  %v8232_v55 = vld [vmem:[#allocation73_spill] sm:$0xff] }
 0x6a6   : > { %8229 = vst [vmem:[#allocation58_spill] sm:$0xff] %v6858_v43  ;;  %v2607_v29 = vpop.xlane.xlu0 %2606  ;;  %v6864_v30 = vsel %vm2969_vm2, -inf, %v8230_v46  ;;  %v2891_v27 = vpop.xlane.xlu1 %2890  ;;  %v6872_v5 = vsel %vm3001_vm3, -inf, %v8231_v6  ;;  %v2625_v16 = vadd.s32 %v2624_v34, %v2622_v44  ;;  %v2651_v6 = vcvt.f32.s32 %v6648_v41  ;;  %v8238_v41 = vld [vmem:[#allocation28_spill] sm:$0xff] }
 0x6a7   : > { %vm2946_vm4 = vcmp.lt.s32.totalorder %v2583_v49, %v2850_v42  ;;  %3077 = vmax.xlane.f32.xlu1 %v6864_v30  ;;  %3112 = vmax.xlane.f32.xlu0 %v3111_v12  ;;  %v2892_v4 = vcvt.f32.s32 %v2891_v27  ;;  %v2608_v52 = vcvt.f32.s32 %v2607_v29  ;;  %v3120_v35 = vsel %vm329_vm0, %v6872_v5, -inf  ;;  %v8235_v12 = vld [vmem:[#allocation8_spill] sm:$0xff] }
 0x6a8   : > { %v2947_v7 = vsel %vm2946_vm4, %v2583_v49, %v2850_v42  ;;  %v2610_v42 = vshll.u32 %v2609_v50, 16  ;;  %v2879_v29 = vshll.u32 %v2878_v26, 16  ;;  %v2923_v44 = vcvt.f32.s32 %v6658_v25  ;;  %v8236_v50 = vld [vmem:[#allocation74_spill] sm:$0xff] }
 0x6a9   : > { %vm2968_vm11 = vcmp.eq.s32.totalorder %v8179_v33, %v2947_v7  ;;  %v6878_v32 = vsel %vm3022_vm10, %v2947_v7, %v8232_v55  ;;  %vm3000_vm5 = vcmp.eq.s32.totalorder %v6880_v63, %v2947_v7  ;;  %v2895_v3 = vadd.s32 %v2894_v21, %v2892_v4 }
 0x6aa   : > { %8233 = vst [vmem:[#allocation77_spill] sm:$0xff] %v6878_v32  ;;  %v2876_v59 = vpop.xlane.xlu0 %2875  ;;  %v6886_v49 = vsel %vm2968_vm11, -inf, %v8234_v39  ;;  %v6890_v27 = vsel %vm3000_vm5, -inf, %v8235_v12  ;;  %v2611_v34 = vadd.s32 %v2610_v42, %v2608_v52  ;;  %v2637_v52 = vcvt.f32.s32 %v6653_v53 }
 0x6ab   : > { %v2877_v46 = vcvt.f32.s32 %v2876_v59  ;;  %3121 = vmax.xlane.f32.xlu1 %v3120_v35  ;;  %3075 = vmax.xlane.f32.xlu0 %v6886_v49  ;;  %vm2952_vm6 = vcmp.lt.s32.totalorder %v2625_v16, %v2895_v3  ;;  %v3117_v55 = vsel %vm329_vm0, %v6890_v27, -inf  ;;  %v6902_v59 = vld [vmem:[#allocation3 + $0x68] sm:$0xff]  ;;  %v2908_v42 = vcvt.f32.s32 %v6662_v19 }
 0x6ac   : > { %v2953_v4 = vsel %vm2952_vm6, %v2625_v16, %v2895_v3  ;;  %v8239_v3 = vld [vmem:[#allocation30_spill] sm:$0xff] }
 0x6ad   : > { %v2880_v21 = vadd.s32 %v2879_v29, %v2877_v46  ;;  %vm2971_vm7 = vcmp.eq.s32.totalorder %v8179_v33, %v2953_v4  ;;  %v6898_v26 = vsel %vm3022_vm10, %v2953_v4, %v8236_v50  ;;  %vm3003_vm8 = vcmp.eq.s32.totalorder %v6902_v59, %v2953_v4  ;;  %v8240_v46 = vld [vmem:[#allocation75_spill] sm:$0xff] }
 0x6ae   : > { %v2649_v7 = vpop.xlane.xlu1 %2648  ;;  %8237 = vst [vmem:[#allocation78_spill] sm:$0xff] %v6898_v26  ;;  %v6906_v25 = vsel %vm2971_vm7, -inf, %v8238_v41  ;;  %v6911_v35 = vsel %vm3003_vm8, -inf, %v8239_v3  ;;  %v2652_v4 = vshll.u32 %v2651_v6, 16  ;;  %v2924_v50 = vshll.u32 %v2923_v44, 16  ;;  %v6923_v26 = vld [vmem:[#allocation3 + $0x60] sm:$0xff] }
 0x6af   : > { %vm2950_vm9 = vcmp.lt.s32.totalorder %v2611_v34, %v2880_v21  ;;  %3118 = vmax.xlane.f32.xlu0 %v3117_v55  ;;  %3081 = vmax.xlane.f32.xlu1 %v6906_v25  ;;  %v2650_v29 = vcvt.f32.s32 %v2649_v7  ;;  %v8242_v55 = vld [vmem:[#allocation10_spill] sm:$0xff]  ;;  %v8243_v7 = vld [vmem:[#allocation11_spill] sm:$0xff]  ;;  %v2638_v6 = vshll.u32 %v2637_v52, 16 }
 0x6b0   : > { %v2635_v16 = vpop.xlane.xlu0 %2634  ;;  %v2951_v39 = vsel %vm2950_vm9, %v2611_v34, %v2880_v21  ;;  %v3126_v21 = vsel %vm329_vm0, %v6911_v35, -inf }
 0x6b1   : > { %vm2970_vm12 = vcmp.eq.s32.totalorder %v8179_v33, %v2951_v39  ;;  %v6918_v12 = vsel %vm3022_vm10, %v2951_v39, %v8240_v46  ;;  %vm3002_vm13 = vcmp.eq.s32.totalorder %v6923_v26, %v2951_v39  ;;  %v2636_v34 = vcvt.f32.s32 %v2635_v16 }
 0x6b2   : > { %8241 = vst [vmem:[#allocation40_spill] sm:$0xff] %v6918_v12  ;;  %v2921_v53 = vpop.xlane.xlu1 %2920  ;;  %v6921_v41 = vsel %vm2970_vm12, -inf, %v8242_v55  ;;  %v6930_v3 = vsel %vm3002_vm13, -inf, %v8243_v7  ;;  %v2909_v46 = vshll.u32 %v2908_v42, 16  ;;  %v2653_v55 = vadd.s32 %v2652_v4, %v2650_v29  ;;  %v8244_v7 = vld [vmem:[#allocation76_spill] sm:$0xff]  ;;  %v6940_v42 = vld [vmem:[#allocation3 + $0x78] sm:$0xff] }
 0x6b3   : > { %v2922_v19 = vcvt.f32.s32 %v2921_v53  ;;  %3079 = vmax.xlane.f32.xlu0 %v6921_v41  ;;  %3127 = vmax.xlane.f32.xlu1 %v3126_v21  ;;  %v3123_v39 = vsel %vm329_vm0, %v6930_v3, -inf  ;;  %v2639_v16 = vadd.s32 %v2638_v6, %v2636_v34  ;;  %v8246_v29 = vld [vmem:[#allocation34_spill] sm:$0xff]  ;;  %v8249_v34 = vld [vmem:[#allocation13_spill] sm:$0xff] }
 0x6b4   : > { %v2906_v44 = vpop.xlane.xlu0 %2905  ;;  %v6956_v21 = vld [vmem:[#allocation3 + $0x70] sm:$0xff] }
 0x6b5   : > { %v2925_v12 = vadd.s32 %v2924_v50, %v2922_v19  ;;  %v2907_v32 = vcvt.f32.s32 %v2906_v44  ;;  %v8251_v44 = vld [vmem:[#allocation63_spill] sm:$0xff] }
 0x6b7   : > { %vm2956_vm14 = vcmp.lt.s32.totalorder %v2653_v55, %v2925_v12  ;;  %v2910_v53 = vadd.s32 %v2909_v46, %v2907_v32  ;;  %3124 = vmax.xlane.f32.xlu0 %v3123_v39  ;;  %v8247_v32 = vld [vmem:[#allocation36_spill] sm:$0xff] }
 0x6b8   : > { %v2957_v43 = vsel %vm2956_vm14, %v2653_v55, %v2925_v12 }
 0x6b9   : > { %vm2954_vm15 = vcmp.lt.s32.totalorder %v2639_v16, %v2910_v53  ;;  %vm2973_vm1 = vcmp.eq.s32.totalorder %v8179_v33, %v2957_v43  ;;  %v6938_v52 = vsel %vm3022_vm10, %v2957_v43, %v8244_v7  ;;  %vm3005_vm2 = vcmp.eq.s32.totalorder %v6940_v42, %v2957_v43  ;;  %v8250_v43 = vld [vmem:[#allocation38_spill] sm:$0xff] }
 0x6ba   : > { %8245 = vst [vmem:[#allocation44_spill] sm:$0xff] %v6938_v52  ;;  %v6944_v4 = vsel %vm2973_vm1, -inf, %v8246_v29  ;;  %v2955_v50 = vsel %vm2954_vm15, %v2639_v16, %v2910_v53  ;;  %v6954_v19 = vsel %vm3005_vm2, -inf, %v8249_v34  ;;  %v4087_v34 = vld [vmem:[#allocation3 + $0x8] sm:$0xff] }
 0x6bb   : > { %3085 = vmax.xlane.f32.xlu1 %v6944_v4  ;;  %vm2972_vm3 = vcmp.eq.s32.totalorder %v8179_v33, %v2955_v50  ;;  %v6951_v12 = vsel %vm3022_vm10, %v2955_v50, %v8247_v32  ;;  %vm3004_vm4 = vcmp.eq.s32.totalorder %v6956_v21, %v2955_v50  ;;  %v3132_v55 = vsel %vm329_vm0, %v6954_v19, -inf  ;;  %v8252_v50 = vld [vmem:[#allocation14_spill] sm:$0xff] }
 0x6bc   : > { %8248 = vst [vmem:[#allocation80_spill] sm:$0xff] %v6951_v12  ;;  %v6960_v6 = vsel %vm2972_vm3, -inf, %v8250_v43  ;;  %v6964_v46 = vsel %vm3004_vm4, -inf, %v8251_v44  ;;  %vm3711_vm10 = vcmp.eq.s32.totalorder %v8179_v33, 3 }
 0x6bd   : > { %3083 = vmax.xlane.f32.xlu0 %v6960_v6  ;;  %v3129_v39 = vsel %vm329_vm0, %v6964_v46, -inf }
 0x6bf   : > { %3133 = vmax.xlane.f32.xlu1 %v3132_v55 }
 0x6c1   : > { %3130 = vmax.xlane.f32.xlu0 %v3129_v39 }
 0x708   : > { %v3058_v16 = vpop.xlane.xlu1 %3057 }
 0x70c   : > { %v3092_v53 = vpop.xlane.xlu1 %3091  ;;  %v3056_v7 = vpop.xlane.xlu0 %3055 }
 0x70d   : > { %v3136_v29 = vmax.f32 %v3058_v16, %v3092_v53  ;;  %v8253_v53 = vld [vmem:[#allocation64_spill] sm:$0xff] }
 0x70f   : > { %vm3152_vm11 = vcmp.eq.f32.partialorder %v6680_v47, %v3136_v29  ;;  %vm3408_vm5 = vcmp.eq.f32.partialorder %v6686_v45, %v3136_v29  ;;  %v3713_v32 = vsel %vm3711_vm10, %v3136_v29, %v8252_v50 }
 0x710   : > { %v3424_v43 = vsel %vm3408_vm5, %v4087_v34, 2147483647  ;;  %3745 = vst.msk [vmem:[#allocation2 + $0x8] sm:$0xff] %vm329_vm0, %v3713_v32  ;;  %v3062_v44 = vpop.xlane.xlu1 %3061  ;;  %v3089_v55 = vpop.xlane.xlu0 %3088  ;;  %v6978_v39 = vsel %vm3152_vm11, %v8179_v33, 2147483647  ;;  %v4088_v32 = vld [vmem:[#allocation3] sm:$0xff] }
 0x711   : > { %v3135_v12 = vmax.f32 %v3056_v7, %v3089_v55  ;;  %v3198_v16 = vshra.s32 %v6978_v39, 16  ;;  %v6982_v47 = vsel %vm329_vm0, %v3424_v43, 2147483647 }
 0x712   : > { %v3456_v45 = vshra.s32 %v6982_v47, 16 }
 0x713   : > { %vm3151_vm6 = vcmp.eq.f32.partialorder %v6699_v1, %v3135_v12  ;;  %vm3407_vm7 = vcmp.eq.f32.partialorder %v6704_v28, %v3135_v12  ;;  %v3712_v29 = vsel %vm3711_vm10, %v3135_v12, %v8253_v53  ;;  %v6990_v50 = vcvt.s32.f32 %v3198_v16  ;;  %v8254_v53 = vld [vmem:[#allocation15_spill] sm:$0xff] }
 0x714   : > { %v3423_v34 = vsel %vm3407_vm7, %v4088_v32, 2147483647  ;;  %3744 = vst.msk [vmem:[#allocation2] sm:$0xff] %vm329_vm0, %v3712_v29  ;;  %v3098_v7 = vpop.xlane.xlu1 %3097  ;;  %v3060_v55 = vpop.xlane.xlu0 %3059  ;;  %v6994_v43 = vsel %vm3151_vm6, %v8179_v33, 2147483647  ;;  %v7001_v12 = vcvt.s32.f32 %v3456_v45  ;;  %v4089_v32 = vld [vmem:[#allocation3 + $0x18] sm:$0xff] }
 0x715   : > { %v3138_v52 = vmax.f32 %v3062_v44, %v3098_v7  ;;  %3201 = vmin.xlane.f32.xlu1 %v6990_v50  ;;  %v3184_v1 = vshra.s32 %v6994_v43, 16  ;;  %v6999_v28 = vsel %vm329_vm0, %v3423_v34, 2147483647 }
 0x716   : > { %v3441_v16 = vshra.s32 %v6999_v28, 16 }
 0x717   : > { %vm3154_vm8 = vcmp.eq.f32.partialorder %v6714_v40, %v3138_v52  ;;  %vm3410_vm9 = vcmp.eq.f32.partialorder %v6722_v8, %v3138_v52  ;;  %v3715_v29 = vsel %vm3711_vm10, %v3138_v52, %v8254_v53  ;;  %v7009_v44 = vcvt.s32.f32 %v3184_v1  ;;  %v8255_v53 = vld [vmem:[#allocation16_spill] sm:$0xff] }
 0x718   : > { %v3426_v7 = vsel %vm3410_vm9, %v4089_v32, 2147483647  ;;  %3747 = vst.msk [vmem:[#allocation2 + $0x18] sm:$0xff] %vm329_vm0, %v3715_v29  ;;  %v3066_v34 = vpop.xlane.xlu1 %3065  ;;  %v3095_v10 = vpop.xlane.xlu0 %3094  ;;  %v7013_v45 = vsel %vm3154_vm8, %v8179_v33, 2147483647  ;;  %v7021_v52 = vcvt.s32.f32 %v3441_v16  ;;  %v4090_v29 = vld [vmem:[#allocation3 + $0x10] sm:$0xff] }
 0x719   : > { %v3137_v2 = vmax.f32 %v3060_v55, %v3095_v10  ;;  %3459 = vmin.xlane.f32.xlu1 %v7001_v12  ;;  %3187 = vmin.xlane.f32.xlu0 %v7009_v44  ;;  %v3226_v40 = vshra.s32 %v7013_v45, 16  ;;  %v7019_v8 = vsel %vm329_vm0, %v3426_v7, 2147483647 }
 0x71a   : > { %v3486_v1 = vshra.s32 %v7019_v8, 16 }
 0x71b   : > { %vm3153_vm12 = vcmp.eq.f32.partialorder %v6735_v56, %v3137_v2  ;;  %vm3409_vm13 = vcmp.eq.f32.partialorder %v6740_v14, %v3137_v2  ;;  %v3714_v10 = vsel %vm3711_vm10, %v3137_v2, %v8255_v53  ;;  %v7029_v55 = vcvt.s32.f32 %v3226_v40  ;;  %v8256_v53 = vld [vmem:[#allocation47_spill] sm:$0xff] }
 0x71c   : > { %v3425_v32 = vsel %vm3409_vm13, %v4090_v29, 2147483647  ;;  %3746 = vst.msk [vmem:[#allocation2 + $0x10] sm:$0xff] %vm329_vm0, %v3714_v10  ;;  %v3104_v7 = vpop.xlane.xlu1 %3103  ;;  %v3064_v0 = vpop.xlane.xlu0 %3063  ;;  %v7033_v16 = vsel %vm3153_vm12, %v8179_v33, 2147483647  ;;  %v7041_v2 = vcvt.s32.f32 %v3486_v1  ;;  %v4091_v29 = vld [vmem:[#allocation3 + $0x28] sm:$0xff] }
 0x71d   : > { %v3140_v37 = vmax.f32 %v3066_v34, %v3104_v7  ;;  %3229 = vmin.xlane.f32.xlu1 %v7029_v55  ;;  %3444 = vmin.xlane.f32.xlu0 %v7021_v52  ;;  %v3212_v56 = vshra.s32 %v7033_v16, 16  ;;  %v7039_v14 = vsel %vm329_vm0, %v3425_v32, 2147483647 }
 0x71e   : > { %v3471_v40 = vshra.s32 %v7039_v14, 16 }
 0x71f   : > { %vm3156_vm14 = vcmp.eq.f32.partialorder %v6750_v62, %v3140_v37  ;;  %vm3412_vm15 = vcmp.eq.f32.partialorder %v6758_v54, %v3140_v37  ;;  %v3717_v34 = vsel %vm3711_vm10, %v3140_v37, %v8256_v53  ;;  %v7049_v10 = vcvt.s32.f32 %v3212_v56  ;;  %v8257_v53 = vld [vmem:[#allocation17_spill] sm:$0xff] }
 0x720   : > { %v3428_v7 = vsel %vm3412_vm15, %v4091_v29, 2147483647  ;;  %3749 = vst.msk [vmem:[#allocation2 + $0x28] sm:$0xff] %vm329_vm0, %v3717_v34  ;;  %v3070_v32 = vpop.xlane.xlu1 %3069  ;;  %v3101_v38 = vpop.xlane.xlu0 %3100  ;;  %v7053_v1 = vsel %vm3156_vm14, %v8179_v33, 2147483647  ;;  %v7061_v37 = vcvt.s32.f32 %v3471_v40  ;;  %v4092_v34 = vld [vmem:[#allocation3 + $0x20] sm:$0xff] }
 0x721   : > { %v3139_v20 = vmax.f32 %v3064_v0, %v3101_v38  ;;  %3489 = vmin.xlane.f32.xlu1 %v7041_v2  ;;  %3215 = vmin.xlane.f32.xlu0 %v7049_v10  ;;  %v3254_v62 = vshra.s32 %v7053_v1, 16  ;;  %v7059_v54 = vsel %vm329_vm0, %v3428_v7, 2147483647 }
 0x722   : > { %v3516_v56 = vshra.s32 %v7059_v54, 16 }
 0x723   : > { %vm3155_vm1 = vcmp.eq.f32.partialorder %v6771_v48, %v3139_v20  ;;  %vm3411_vm2 = vcmp.eq.f32.partialorder %v6776_v57, %v3139_v20  ;;  %v3716_v38 = vsel %vm3711_vm10, %v3139_v20, %v8257_v53  ;;  %v7069_v0 = vcvt.s32.f32 %v3254_v62  ;;  %v8258_v53 = vld [vmem:[#allocation52_spill] sm:$0xff] }
 0x724   : > { %v3427_v29 = vsel %vm3411_vm2, %v4092_v34, 2147483647  ;;  %3748 = vst.msk [vmem:[#allocation2 + $0x20] sm:$0xff] %vm329_vm0, %v3716_v38  ;;  %v3110_v7 = vpop.xlane.xlu1 %3109  ;;  %v3068_v61 = vpop.xlane.xlu0 %3067  ;;  %v7073_v40 = vsel %vm3155_vm1, %v8179_v33, 2147483647  ;;  %v7081_v57 = vcvt.s32.f32 %v3516_v56  ;;  %v4093_v34 = vld [vmem:[#allocation3 + $0x38] sm:$0xff] }
 0x725   : > { %v3142_v31 = vmax.f32 %v3070_v32, %v3110_v7  ;;  %3257 = vmin.xlane.f32.xlu1 %v7069_v0  ;;  %3474 = vmin.xlane.f32.xlu0 %v7061_v37  ;;  %v3240_v48 = vshra.s32 %v7073_v40, 16  ;;  %v7079_v20 = vsel %vm329_vm0, %v3427_v29, 2147483647 }
 0x726   : > { %v3501_v62 = vshra.s32 %v7079_v20, 16 }
 0x727   : > { %vm3158_vm3 = vcmp.eq.f32.partialorder %v6786_v58, %v3142_v31  ;;  %vm3414_vm4 = vcmp.eq.f32.partialorder %v6794_v13, %v3142_v31  ;;  %v3719_v32 = vsel %vm3711_vm10, %v3142_v31, %v8258_v53  ;;  %v7089_v38 = vcvt.s32.f32 %v3240_v48  ;;  %v8261_v53 = vld [vmem:[#allocation59_spill] sm:$0xff] }
 0x728   : > { %v3430_v7 = vsel %vm3414_vm4, %v4093_v34, 2147483647  ;;  %3751 = vst.msk [vmem:[#allocation2 + $0x38] sm:$0xff] %vm329_vm0, %v3719_v32  ;;  %v3074_v29 = vpop.xlane.xlu1 %3073  ;;  %v3107_v51 = vpop.xlane.xlu0 %3106  ;;  %v7093_v56 = vsel %vm3158_vm3, %v8179_v33, 2147483647  ;;  %v7101_v13 = vcvt.s32.f32 %v3501_v62  ;;  %v4094_v32 = vld [vmem:[#allocation3 + $0x30] sm:$0xff] }
 0x729   : > { %8259 = vst [vmem:[#allocation83_spill] sm:$0xff] %v7089_v38  ;;  %v3141_v24 = vmax.f32 %v3068_v61, %v3107_v51  ;;  %3519 = vmin.xlane.f32.xlu1 %v7081_v57  ;;  %3243 = vmin.xlane.f32.xlu0 %v7089_v38  ;;  %v3282_v58 = vshra.s32 %v7093_v56, 16  ;;  %v7099_v31 = vsel %vm329_vm0, %v3430_v7, 2147483647 }
 0x72a   : > { %8260 = vst [vmem:[#allocation43_spill] sm:$0xff] %v7099_v31  ;;  %v3546_v48 = vshra.s32 %v7099_v31, 16 }
 0x72b   : > { %vm3157_vm11 = vcmp.eq.f32.partialorder %v6807_v18, %v3141_v24  ;;  %vm3413_vm5 = vcmp.eq.f32.partialorder %v6812_v23, %v3141_v24  ;;  %v3718_v51 = vsel %vm3711_vm10, %v3141_v24, %v8261_v53  ;;  %v7109_v61 = vcvt.s32.f32 %v3282_v58  ;;  %v8263_v53 = vld [vmem:[#allocation21_spill] sm:$0xff] }
 0x72c   : > { %v3429_v34 = vsel %vm3413_vm5, %v4094_v32, 2147483647  ;;  %3750 = vst.msk [vmem:[#allocation2 + $0x30] sm:$0xff] %vm329_vm0, %v3718_v51  ;;  %v3116_v7 = vpop.xlane.xlu1 %3115  ;;  %v3072_v38 = vpop.xlane.xlu0 %3071  ;;  %v7113_v62 = vsel %vm3157_vm11, %v8179_v33, 2147483647  ;;  %v7121_v23 = vcvt.s32.f32 %v3546_v48 }
 0x72d   : > { %v3144_v31 = vmax.f32 %v3074_v29, %v3116_v7  ;;  %3285 = vmin.xlane.f32.xlu1 %v7109_v61  ;;  %3504 = vmin.xlane.f32.xlu0 %v7101_v13  ;;  %v3268_v18 = vshra.s32 %v7113_v62, 16  ;;  %v7119_v24 = vsel %vm329_vm0, %v3429_v34, 2147483647 }
 0x72e   : > { %8262 = vst [vmem:[#allocation82_spill] sm:$0xff] %v7119_v24  ;;  %v3531_v58 = vshra.s32 %v7119_v24, 16 }
 0x72f   : > { %vm3160_vm6 = vcmp.eq.f32.partialorder %v6822_v15, %v3144_v31  ;;  %vm3416_vm7 = vcmp.eq.f32.partialorder %v6832_v11, %v3144_v31  ;;  %v3721_v29 = vsel %vm3711_vm10, %v3144_v31, %v8263_v53  ;;  %v7129_v51 = vcvt.s32.f32 %v3268_v18  ;;  %v8265_v18 = vld [vmem:[#allocation27_spill] sm:$0xff] }
 0x730   : > { %v3432_v32 = vsel %vm3416_vm7, %v6826_v60, 2147483647  ;;  %3753 = vst.msk [vmem:[#allocation2 + $0x48] sm:$0xff] %vm329_vm0, %v3721_v29  ;;  %v3078_v34 = vpop.xlane.xlu1 %3077  ;;  %v3113_v7 = vpop.xlane.xlu0 %3112  ;;  %v7134_v48 = vsel %vm3160_vm6, %v8179_v33, 2147483647  ;;  %v7142_v31 = vcvt.s32.f32 %v3531_v58 }
 0x731   : > { %v3143_v24 = vmax.f32 %v3072_v38, %v3113_v7  ;;  %3549 = vmin.xlane.f32.xlu1 %v7121_v23  ;;  %3271 = vmin.xlane.f32.xlu0 %v7129_v51  ;;  %v3310_v15 = vshra.s32 %v7134_v48, 16  ;;  %v7140_v11 = vsel %vm329_vm0, %v3432_v32, 2147483647 }
 0x732   : > { %8264 = vst [vmem:[#allocation49_spill] sm:$0xff] %v7140_v11  ;;  %v3576_v60 = vshra.s32 %v7140_v11, 16 }
 0x733   : > { %vm3159_vm8 = vcmp.eq.f32.partialorder %v6843_v17, %v3143_v24  ;;  %vm3415_vm9 = vcmp.eq.f32.partialorder %v6850_v22, %v3143_v24  ;;  %v3720_v38 = vsel %vm3711_vm10, %v3143_v24, %v8265_v18  ;;  %v7150_v53 = vcvt.s32.f32 %v3310_v15  ;;  %v8267_v15 = vld [vmem:[#allocation29_spill] sm:$0xff] }
 0x734   : > { %v3431_v29 = vsel %vm3415_vm9, %v6845_v9, 2147483647  ;;  %3752 = vst.msk [vmem:[#allocation2 + $0x40] sm:$0xff] %vm329_vm0, %v3720_v38  ;;  %v3122_v32 = vpop.xlane.xlu1 %3121  ;;  %v3076_v7 = vpop.xlane.xlu0 %3075  ;;  %v7155_v58 = vsel %vm3159_vm8, %v8179_v33, 2147483647  ;;  %v7163_v24 = vcvt.s32.f32 %v3576_v60 }
 0x735   : > { %v3146_v11 = vmax.f32 %v3078_v34, %v3122_v32  ;;  %3313 = vmin.xlane.f32.xlu1 %v7150_v53  ;;  %3534 = vmin.xlane.f32.xlu0 %v7142_v31  ;;  %v3296_v17 = vshra.s32 %v7155_v58, 16  ;;  %v7161_v22 = vsel %vm329_vm0, %v3431_v29, 2147483647 }
 0x736   : > { %8266 = vst [vmem:[#allocation84_spill] sm:$0xff] %v7161_v22  ;;  %v3561_v9 = vshra.s32 %v7161_v22, 16 }
 0x737   : > { %vm3162_vm12 = vcmp.eq.f32.partialorder %v6864_v30, %v3146_v11  ;;  %vm3418_vm13 = vcmp.eq.f32.partialorder %v6872_v5, %v3146_v11  ;;  %v3723_v34 = vsel %vm3711_vm10, %v3146_v11, %v8267_v15  ;;  %v7171_v18 = vcvt.s32.f32 %v3296_v17  ;;  %v8269_v17 = vld [vmem:[#allocation33_spill] sm:$0xff] }
 0x738   : > { %v3434_v38 = vsel %vm3418_vm13, %v6860_v36, 2147483647  ;;  %3755 = vst.msk [vmem:[#allocation2 + $0x58] sm:$0xff] %vm329_vm0, %v3723_v34  ;;  %v3119_v29 = vpop.xlane.xlu0 %3118  ;;  %v7176_v60 = vsel %vm3162_vm12, %v8179_v33, 2147483647  ;;  %v3082_v32 = vpop.xlane.xlu1 %3081  ;;  %v7184_v11 = vcvt.s32.f32 %v3561_v9 }
 0x739   : > { %v3145_v22 = vmax.f32 %v3076_v7, %v3119_v29  ;;  %3579 = vmin.xlane.f32.xlu1 %v7163_v24  ;;  %3299 = vmin.xlane.f32.xlu0 %v7171_v18  ;;  %v3338_v30 = vshra.s32 %v7176_v60, 16  ;;  %v7182_v5 = vsel %vm329_vm0, %v3434_v38, 2147483647 }
 0x73a   : > { %8268 = vst [vmem:[#allocation45_spill] sm:$0xff] %v7184_v11  ;;  %v3606_v36 = vshra.s32 %v7182_v5, 16 }
 0x73b   : > { %vm3161_vm14 = vcmp.eq.f32.partialorder %v6886_v49, %v3145_v22  ;;  %vm3417_vm15 = vcmp.eq.f32.partialorder %v6890_v27, %v3145_v22  ;;  %v3722_v7 = vsel %vm3711_vm10, %v3145_v22, %v8269_v17  ;;  %v7192_v15 = vcvt.s32.f32 %v3338_v30 }
 0x73c   : > { %v3433_v34 = vsel %vm3417_vm15, %v6880_v63, 2147483647  ;;  %3754 = vst.msk [vmem:[#allocation2 + $0x50] sm:$0xff] %vm329_vm0, %v3722_v7  ;;  %v3080_v38 = vpop.xlane.xlu0 %3079  ;;  %v7197_v9 = vsel %vm3161_vm14, %v8179_v33, 2147483647  ;;  %v3128_v29 = vpop.xlane.xlu1 %3127  ;;  %v7205_v30 = vcvt.s32.f32 %v3606_v36  ;;  %v8272_v7 = vld [vmem:[#allocation39_spill] sm:$0xff] }
 0x73d   : > { %8270 = vst [vmem:[#allocation85_spill] sm:$0xff] %v7192_v15  ;;  %8271 = vst [vmem:[#allocation86_spill] sm:$0xff] %v7197_v9  ;;  %3341 = vmin.xlane.f32.xlu1 %v7192_v15  ;;  %3564 = vmin.xlane.f32.xlu0 %v7184_v11  ;;  %v3324_v49 = vshra.s32 %v7197_v9, 16  ;;  %v7203_v27 = vsel %vm329_vm0, %v3433_v34, 2147483647  ;;  %v3148_v22 = vmax.f32 %v3082_v32, %v3128_v29 }
 0x73e   : > { %v3591_v17 = vshra.s32 %v7203_v27, 16 }
 0x73f   : > { %v7207_v63 = vcvt.s32.f32 %v3324_v49  ;;  %vm3164_vm1 = vcmp.eq.f32.partialorder %v6906_v25, %v3148_v22  ;;  %vm3420_vm2 = vcmp.eq.f32.partialorder %v6911_v35, %v3148_v22  ;;  %v3725_v11 = vsel %vm3711_vm10, %v3148_v22, %v8272_v7 }
 0x740   : > { %v3125_v15 = vpop.xlane.xlu0 %3124  ;;  %v3436_v9 = vsel %vm3420_vm2, %v6902_v59, 2147483647  ;;  %3757 = vst.msk [vmem:[#allocation2 + $0x68] sm:$0xff] %vm329_vm0, %v3725_v11  ;;  %v7220_v36 = vsel %vm3164_vm1, %v8179_v33, 2147483647  ;;  %v8273_v59 = vld [vmem:[#allocation41_spill] sm:$0xff] }
 0x741   : > { %v3147_v32 = vmax.f32 %v3080_v38, %v3125_v15  ;;  %3609 = vmin.xlane.f32.xlu1 %v7205_v30  ;;  %3327 = vmin.xlane.f32.xlu0 %v7207_v63  ;;  %v3366_v25 = vshra.s32 %v7220_v36, 16  ;;  %v7224_v35 = vsel %vm329_vm0, %v3436_v9, 2147483647  ;;  %v7231_v15 = vcvt.s32.f32 %v3591_v17 }
 0x742   : > { %v3636_v9 = vshra.s32 %v7224_v35, 16 }
 0x743   : > { %vm3163_vm3 = vcmp.eq.f32.partialorder %v6921_v41, %v3147_v32  ;;  %vm3419_vm4 = vcmp.eq.f32.partialorder %v6930_v3, %v3147_v32  ;;  %v3724_v11 = vsel %vm3711_vm10, %v3147_v32, %v8273_v59  ;;  %v7235_v29 = vcvt.s32.f32 %v3366_v25 }
 0x744   : > { %v3435_v34 = vsel %vm3419_vm4, %v6923_v26, 2147483647  ;;  %3756 = vst.msk [vmem:[#allocation2 + $0x60] sm:$0xff] %vm329_vm0, %v3724_v11  ;;  %v3086_v38 = vpop.xlane.xlu1 %3085  ;;  %v7239_v49 = vsel %vm3163_vm3, %v8179_v33, 2147483647  ;;  %v7250_v32 = vcvt.s32.f32 %v3636_v9 }
 0x745   : > { %3594 = vmin.xlane.f32.xlu0 %v7231_v15  ;;  %v3352_v41 = vshra.s32 %v7239_v49, 16  ;;  %v7244_v3 = vsel %vm329_vm0, %v3435_v34, 2147483647  ;;  %3369 = vmin.xlane.f32.xlu1 %v7235_v29  ;;  %v8275_v34 = vld [vmem:[#allocation46_spill] sm:$0xff] }
 0x746   : > { %8274 = vst [vmem:[#allocation87_spill] sm:$0xff] %v7244_v3  ;;  %v3084_v26 = vpop.xlane.xlu0 %3083  ;;  %v3621_v22 = vshra.s32 %v7244_v3, 16 }
 0x747   : > { %v7248_v17 = vcvt.s32.f32 %v3352_v41 }
 0x748   : > { %v3134_v7 = vpop.xlane.xlu1 %3133  ;;  %v7254_v11 = vcvt.s32.f32 %v3621_v22  ;;  %v8276_v22 = vld [vmem:[#allocation81_spill] sm:$0xff] }
 0x749   : > { %v3150_v25 = vmax.f32 %v3086_v38, %v3134_v7  ;;  %3355 = vmin.xlane.f32.xlu0 %v7248_v17  ;;  %3639 = vmin.xlane.f32.xlu1 %v7250_v32 }
 0x74a   : > { %v3131_v59 = vpop.xlane.xlu0 %3130 }
 0x74b   : > { %vm3166_vm11 = vcmp.eq.f32.partialorder %v6944_v4, %v3150_v25  ;;  %vm3422_vm5 = vcmp.eq.f32.partialorder %v6954_v19, %v3150_v25  ;;  %v3727_v41 = vsel %vm3711_vm10, %v3150_v25, %v8275_v34  ;;  %v3149_v3 = vmax.f32 %v3084_v26, %v3131_v59 }
 0x74c   : > { %v3438_v9 = vsel %vm3422_vm5, %v6940_v42, 2147483647  ;;  %3759 = vst.msk [vmem:[#allocation2 + $0x78] sm:$0xff] %vm329_vm0, %v3727_v41  ;;  %v7264_v38 = vsel %vm3166_vm11, %v8179_v33, 2147483647 }
 0x74d   : > { %vm3165_vm6 = vcmp.eq.f32.partialorder %v6960_v6, %v3149_v3  ;;  %vm3421_vm7 = vcmp.eq.f32.partialorder %v6964_v46, %v3149_v3  ;;  %v3726_v4 = vsel %vm3711_vm10, %v3149_v3, %v8276_v22  ;;  %3624 = vmin.xlane.f32.xlu0 %v7254_v11  ;;  %v3394_v19 = vshra.s32 %v7264_v38, 16 }
 0x74e   : > { %v3437_v26 = vsel %vm3421_vm7, %v6956_v21, 2147483647  ;;  %3758 = vst.msk [vmem:[#allocation2 + $0x70] sm:$0xff] %vm329_vm0, %v3726_v4  ;;  %v7276_v42 = vsel %vm3165_vm6, %v8179_v33, 2147483647 }
 0x74f   : > { %v7279_v7 = vsel %vm329_vm0, %v3438_v9, 2147483647  ;;  %v7281_v6 = vcvt.s32.f32 %v3394_v19  ;;  %v3380_v46 = vshra.s32 %v7276_v42, 16  ;;  %v7286_v25 = vsel %vm329_vm0, %v3437_v26, 2147483647 }
 0x750   : > { %v3666_v3 = vshra.s32 %v7279_v7, 16  ;;  %v3651_v59 = vshra.s32 %v7286_v25, 16  ;;  %v3197_v9 = vand.u32 65535, %v6978_v39  ;;  %v3455_v19 = vand.u32 65535, %v6982_v47 }
 0x751   : > { %3397 = vmin.xlane.f32.xlu1 %v7281_v6  ;;  %v7289_v21 = vcvt.s32.f32 %v3380_v46  ;;  %v3183_v26 = vand.u32 65535, %v6994_v43  ;;  %v3225_v39 = vand.u32 65535, %v7013_v45  ;;  %v3485_v45 = vand.u32 65535, %v7019_v8 }
 0x752   : > { %v7293_v34 = vcvt.s32.f32 %v3666_v3  ;;  %v7296_v41 = vcvt.s32.f32 %v3651_v59  ;;  %v3199_v4 = vcvt.s32.f32 %v3197_v9  ;;  %v3457_v33 = vcvt.s32.f32 %v3455_v19 }
 0x753   : > { %3383 = vmin.xlane.f32.xlu0 %v7289_v21  ;;  %v3253_v8 = vand.u32 65535, %v7053_v1  ;;  %v3515_v1 = vand.u32 65535, %v7059_v54  ;;  %v3281_v54 = vand.u32 65535, %v7093_v56 }
 0x754   : > { %8277 = vst [vmem:[#allocation65_spill] sm:$0xff] %v7293_v34  ;;  %8278 = vst [vmem:[#allocation42_spill] sm:$0xff] %v7296_v41 }
 0x755   : > { %3669 = vmin.xlane.f32.xlu1 %v7293_v34  ;;  %v3440_v34 = vand.u32 65535, %v6999_v28  ;;  %v3211_v28 = vand.u32 65535, %v7033_v16  ;;  %v3470_v16 = vand.u32 65535, %v7039_v14  ;;  %v3239_v14 = vand.u32 65535, %v7073_v40 }
 0x756   : > { %v3500_v40 = vand.u32 65535, %v7079_v20  ;;  %v3267_v20 = vand.u32 65535, %v7113_v62 }
 0x757   : > { %3654 = vmin.xlane.f32.xlu0 %v7296_v41  ;;  %v3185_v41 = vcvt.s32.f32 %v3183_v26  ;;  %v3442_v19 = vcvt.s32.f32 %v3440_v34  ;;  %v3487_v26 = vcvt.s32.f32 %v3485_v45  ;;  %v3213_v34 = vcvt.s32.f32 %v3211_v28 }
 0x758   : > { %v3517_v45 = vcvt.s32.f32 %v3515_v1  ;;  %v3241_v28 = vcvt.s32.f32 %v3239_v14  ;;  %v3269_v1 = vcvt.s32.f32 %v3267_v20  ;;  %v3309_v14 = vand.u32 65535, %v7134_v48 }
 0x79e   : > { %v7300_v22 = vpop.xlane.xlu1 %3201 }
 0x79f   : > { %vm3203_vm8 = vcmp.eq.f32.partialorder %v6990_v50, %v7300_v22 }
 0x7a0   : > { %v3204_v46 = vsel %vm3203_vm8, %v3199_v4, inf  ;;  %v3227_v4 = vcvt.s32.f32 %v3225_v39 }
 0x7a1   : > { %3205 = vmin.xlane.f32.xlu1 %v3204_v46 }
 0x7a2   : > { %v7306_v3 = vpop.xlane.xlu1 %3459  ;;  %v7308_v59 = vpop.xlane.xlu0 %3187 }
 0x7a3   : > { %vm3461_vm9 = vcmp.eq.f32.partialorder %v7001_v12, %v7306_v3  ;;  %vm3189_vm12 = vcmp.eq.f32.partialorder %v7009_v44, %v7308_v59 }
 0x7a4   : > { %v3462_v47 = vsel %vm3461_vm9, %v3457_v33, inf  ;;  %v3190_v50 = vsel %vm3189_vm12, %v3185_v41, inf }
 0x7a5   : > { %3463 = vmin.xlane.f32.xlu1 %v3462_v47  ;;  %3191 = vmin.xlane.f32.xlu0 %v3190_v50  ;;  %v3255_v47 = vcvt.s32.f32 %v3253_v8  ;;  %v3472_v50 = vcvt.s32.f32 %v3470_v16  ;;  %v3502_v8 = vcvt.s32.f32 %v3500_v40  ;;  %v8280_v16 = vld [vmem:[#allocation43_spill] sm:$0xff]  ;;  %v8282_v40 = vld [vmem:[#allocation49_spill] sm:$0xff] }
 0x7a6   : > { %v7316_v43 = vpop.xlane.xlu1 %3229  ;;  %v7318_v9 = vpop.xlane.xlu0 %3444  ;;  %v3545_v56 = vand.u32 65535, %v8280_v16  ;;  %v3575_v48 = vand.u32 65535, %v8282_v40  ;;  %v3337_v16 = vand.u32 65535, %v7176_v60  ;;  %v3605_v60 = vand.u32 65535, %v7182_v5 }
 0x7a7   : > { %vm3231_vm13 = vcmp.eq.f32.partialorder %v7029_v55, %v7316_v43  ;;  %vm3446_vm14 = vcmp.eq.f32.partialorder %v7021_v52, %v7318_v9  ;;  %v3590_v5 = vand.u32 65535, %v7203_v27  ;;  %v3365_v40 = vand.u32 65535, %v7220_v36 }
 0x7a8   : > { %v3232_v33 = vsel %vm3231_vm13, %v3227_v4, inf  ;;  %v3447_v12 = vsel %vm3446_vm14, %v3442_v19, inf }
 0x7a9   : > { %3233 = vmin.xlane.f32.xlu1 %v3232_v33  ;;  %3448 = vmin.xlane.f32.xlu0 %v3447_v12  ;;  %v3367_v27 = vcvt.s32.f32 %v3365_v40  ;;  %v3208_v40 = vcvt.f32.s32 %v7300_v22 }
 0x7aa   : > { %v7326_v44 = vpop.xlane.xlu1 %3489  ;;  %v7328_v41 = vpop.xlane.xlu0 %3215 }
 0x7ab   : > { %vm3491_vm15 = vcmp.eq.f32.partialorder %v7041_v2, %v7326_v44  ;;  %vm3217_vm1 = vcmp.eq.f32.partialorder %v7049_v10, %v7328_v41 }
 0x7ac   : > { %v3492_v52 = vsel %vm3491_vm15, %v3487_v26, inf  ;;  %v3218_v55 = vsel %vm3217_vm1, %v3213_v34, inf  ;;  %v3283_v34 = vcvt.s32.f32 %v3281_v54 }
 0x7ad   : > { %3493 = vmin.xlane.f32.xlu1 %v3492_v52  ;;  %3219 = vmin.xlane.f32.xlu0 %v3218_v55 }
 0x7ae   : > { %v7336_v46 = vpop.xlane.xlu1 %3257  ;;  %v7338_v39 = vpop.xlane.xlu0 %3474 }
 0x7af   : > { %vm3259_vm2 = vcmp.eq.f32.partialorder %v7069_v0, %v7336_v46  ;;  %vm3476_vm3 = vcmp.eq.f32.partialorder %v7061_v37, %v7338_v39  ;;  %v8279_v0 = vld [vmem:[#allocation83_spill] sm:$0xff] }
 0x7b0   : > { %v3260_v2 = vsel %vm3259_vm2, %v3255_v47, inf  ;;  %v3477_v10 = vsel %vm3476_vm3, %v3472_v50, inf  ;;  %v3547_v50 = vcvt.s32.f32 %v3545_v56  ;;  %v8283_v56 = vld [vmem:[#allocation84_spill] sm:$0xff] }
 0x7b1   : > { %3261 = vmin.xlane.f32.xlu1 %v3260_v2  ;;  %3478 = vmin.xlane.f32.xlu0 %v3477_v10  ;;  %v8281_v2 = vld [vmem:[#allocation82_spill] sm:$0xff] }
 0x7b2   : > { %v7346_v4 = vpop.xlane.xlu1 %3519  ;;  %v7348_v19 = vpop.xlane.xlu0 %3243  ;;  %v3530_v62 = vand.u32 65535, %v8281_v2  ;;  %v8285_v2 = vld [vmem:[#allocation85_spill] sm:$0xff] }
 0x7b3   : > { %vm3521_vm4 = vcmp.eq.f32.partialorder %v7081_v57, %v7346_v4  ;;  %vm3245_vm11 = vcmp.eq.f32.partialorder %v8279_v0, %v7348_v19  ;;  %v3295_v0 = vand.u32 65535, %v7155_v58  ;;  %v3560_v58 = vand.u32 65535, %v8283_v56 }
 0x7b4   : > { %v3522_v37 = vsel %vm3521_vm4, %v3517_v45, inf  ;;  %v3246_v33 = vsel %vm3245_vm11, %v3241_v28, inf  ;;  %v3311_v28 = vcvt.s32.f32 %v3309_v14  ;;  %v3532_v54 = vcvt.s32.f32 %v3530_v62 }
 0x7b5   : > { %3523 = vmin.xlane.f32.xlu1 %v3522_v37  ;;  %3247 = vmin.xlane.f32.xlu0 %v3246_v33 }
 0x7b6   : > { %v7356_v12 = vpop.xlane.xlu1 %3285  ;;  %v7358_v26 = vpop.xlane.xlu0 %3504 }
 0x7b7   : > { %vm3287_vm5 = vcmp.eq.f32.partialorder %v7109_v61, %v7356_v12  ;;  %vm3506_vm6 = vcmp.eq.f32.partialorder %v7101_v13, %v7358_v26 }
 0x7b8   : > { %v3288_v57 = vsel %vm3287_vm5, %v3283_v34, inf  ;;  %v3507_v52 = vsel %vm3506_vm6, %v3502_v8, inf  ;;  %v3577_v34 = vcvt.s32.f32 %v3575_v48  ;;  %v3297_v8 = vcvt.s32.f32 %v3295_v0 }
 0x7b9   : > { %3289 = vmin.xlane.f32.xlu1 %v3288_v57  ;;  %3508 = vmin.xlane.f32.xlu0 %v3507_v52  ;;  %v3339_v52 = vcvt.s32.f32 %v3337_v16 }
 0x7ba   : > { %v7366_v55 = vpop.xlane.xlu1 %3549  ;;  %v7368_v47 = vpop.xlane.xlu0 %3271 }
 0x7bb   : > { %vm3551_vm7 = vcmp.eq.f32.partialorder %v7121_v23, %v7366_v55  ;;  %vm3273_vm8 = vcmp.eq.f32.partialorder %v7129_v51, %v7368_v47 }
 0x7bc   : > { %v3552_v13 = vsel %vm3551_vm7, %v3547_v50, inf  ;;  %v3274_v61 = vsel %vm3273_vm8, %v3269_v1, inf  ;;  %v3562_v50 = vcvt.s32.f32 %v3560_v58  ;;  %v8284_v1 = vld [vmem:[#allocation86_spill] sm:$0xff]  ;;  %v8287_v58 = vld [vmem:[#allocation87_spill] sm:$0xff] }
 0x7bd   : > { %3553 = vmin.xlane.f32.xlu1 %v3552_v13  ;;  %3275 = vmin.xlane.f32.xlu0 %v3274_v61  ;;  %v3323_v14 = vand.u32 65535, %v8284_v1  ;;  %v3379_v1 = vand.u32 65535, %v7276_v42 }
 0x7be   : > { %v7376_v10 = vpop.xlane.xlu1 %3313  ;;  %v7378_v45 = vpop.xlane.xlu0 %3534 }
 0x7bf   : > { %vm3315_vm9 = vcmp.eq.f32.partialorder %v7150_v53, %v7376_v10  ;;  %vm3536_vm12 = vcmp.eq.f32.partialorder %v7142_v31, %v7378_v45 }
 0x7c0   : > { %v3316_v23 = vsel %vm3315_vm9, %v3311_v28, inf  ;;  %v3537_v51 = vsel %vm3536_vm12, %v3532_v54, inf  ;;  %v3607_v28 = vcvt.s32.f32 %v3605_v60  ;;  %v3325_v54 = vcvt.s32.f32 %v3323_v14 }
 0x7c1   : > { %3317 = vmin.xlane.f32.xlu1 %v3316_v23  ;;  %3538 = vmin.xlane.f32.xlu0 %v3537_v51  ;;  %v3592_v51 = vcvt.s32.f32 %v3590_v5  ;;  %v8289_v5 = vld [vmem:[#allocation42_spill] sm:$0xff] }
 0x7c2   : > { %v7386_v37 = vpop.xlane.xlu1 %3579  ;;  %v7388_v33 = vpop.xlane.xlu0 %3299 }
 0x7c3   : > { %vm3581_vm13 = vcmp.eq.f32.partialorder %v7163_v24, %v7386_v37  ;;  %vm3301_vm14 = vcmp.eq.f32.partialorder %v7171_v18, %v7388_v33  ;;  %v8286_v24 = vld [vmem:[#allocation45_spill] sm:$0xff] }
 0x7c4   : > { %v3582_v31 = vsel %vm3581_vm13, %v3577_v34, inf  ;;  %v3302_v53 = vsel %vm3301_vm14, %v3297_v8, inf  ;;  %v3351_v34 = vand.u32 65535, %v7239_v49  ;;  %v3620_v49 = vand.u32 65535, %v8287_v58 }
 0x7c5   : > { %3583 = vmin.xlane.f32.xlu1 %v3582_v31  ;;  %3303 = vmin.xlane.f32.xlu0 %v3302_v53 }
 0x7c6   : > { %v7396_v20 = vpop.xlane.xlu1 %3341  ;;  %v7398_v57 = vpop.xlane.xlu0 %3564  ;;  %v3353_v56 = vcvt.s32.f32 %v3351_v34 }
 0x7c7   : > { %vm3343_vm15 = vcmp.eq.f32.partialorder %v8285_v2, %v7396_v20  ;;  %vm3566_vm1 = vcmp.eq.f32.partialorder %v8286_v24, %v7398_v57 }
 0x7c8   : > { %v3344_v18 = vsel %vm3343_vm15, %v3339_v52, inf  ;;  %v3567_v62 = vsel %vm3566_vm1, %v3562_v50, inf  ;;  %v3622_v52 = vcvt.s32.f32 %v3620_v49  ;;  %v3393_v50 = vand.u32 65535, %v7264_v38 }
 0x7c9   : > { %3345 = vmin.xlane.f32.xlu1 %v3344_v18  ;;  %3568 = vmin.xlane.f32.xlu0 %v3567_v62  ;;  %v3381_v18 = vcvt.s32.f32 %v3379_v1  ;;  %v3650_v38 = vand.u32 65535, %v7286_v25 }
 0x7ca   : > { %v7406_v13 = vpop.xlane.xlu1 %3609  ;;  %v7408_v61 = vpop.xlane.xlu0 %3327  ;;  %v3395_v14 = vcvt.s32.f32 %v3393_v50 }
 0x7cb   : > { %vm3611_vm2 = vcmp.eq.f32.partialorder %v7205_v30, %v7406_v13  ;;  %vm3329_vm3 = vcmp.eq.f32.partialorder %v7207_v63, %v7408_v61  ;;  %v3635_v30 = vand.u32 65535, %v7224_v35 }
 0x7cc   : > { %v3612_v48 = vsel %vm3611_vm2, %v3607_v28, inf  ;;  %v3330_v0 = vsel %vm3329_vm3, %v3325_v54, inf  ;;  %v8288_v28 = vld [vmem:[#allocation65_spill] sm:$0xff]  ;;  %v3652_v54 = vcvt.s32.f32 %v3650_v38  ;;  %v3222_v38 = vcvt.f32.s32 %v7328_v41 }
 0x7cd   : > { %3613 = vmin.xlane.f32.xlu1 %v3612_v48  ;;  %3331 = vmin.xlane.f32.xlu0 %v3330_v0  ;;  %v3466_v48 = vcvt.f32.s32 %v7306_v3 }
 0x7ce   : > { %v7416_v23 = vpop.xlane.xlu0 %3594  ;;  %v7419_v8 = vpop.xlane.xlu1 %3369 }
 0x7cf   : > { %vm3596_vm4 = vcmp.eq.f32.partialorder %v7231_v15, %v7416_v23  ;;  %vm3371_vm11 = vcmp.eq.f32.partialorder %v7235_v29, %v7419_v8  ;;  %v3637_v15 = vcvt.s32.f32 %v3635_v30  ;;  %v3209_v30 = vshll.u32 %v3208_v40, 16 }
 0x7d0   : > { %v3597_v63 = vsel %vm3596_vm4, %v3592_v51, inf  ;;  %v3372_v36 = vsel %vm3371_vm11, %v3367_v27, inf  ;;  %v3194_v51 = vcvt.f32.s32 %v7308_v59  ;;  %v3496_v59 = vcvt.f32.s32 %v7326_v44 }
 0x7d1   : > { %3598 = vmin.xlane.f32.xlu0 %v3597_v63  ;;  %3373 = vmin.xlane.f32.xlu1 %v3372_v36  ;;  %v3467_v63 = vshll.u32 %v3466_v48, 16  ;;  %v3451_v36 = vcvt.f32.s32 %v7318_v9  ;;  %v3223_v48 = vshll.u32 %v3222_v38, 16  ;;  %v3556_v38 = vcvt.f32.s32 %v7366_v55 }
 0x7d2   : > { %v7426_v16 = vpop.xlane.xlu0 %3355  ;;  %v7429_v31 = vpop.xlane.xlu1 %3639 }
 0x7d3   : > { %vm3357_vm5 = vcmp.eq.f32.partialorder %v7248_v17, %v7426_v16  ;;  %vm3641_vm6 = vcmp.eq.f32.partialorder %v7250_v32, %v7429_v31  ;;  %v3665_v32 = vand.u32 65535, %v7279_v7  ;;  %v3452_v3 = vshll.u32 %v3451_v36, 16  ;;  %v8293_v36 = vld [vmem:[#allocation68_spill] sm:$0xff] }
 0x7d4   : > { %v3358_v35 = vsel %vm3357_vm5, %v3353_v56, inf  ;;  %v3642_v29 = vsel %vm3641_vm6, %v3637_v15, inf }
 0x7d5   : > { %3359 = vmin.xlane.f32.xlu0 %v3358_v35  ;;  %3643 = vmin.xlane.f32.xlu1 %v3642_v29  ;;  %v3667_v62 = vcvt.s32.f32 %v3665_v32  ;;  %v3195_v35 = vshll.u32 %v3194_v51, 16  ;;  %v3236_v29 = vcvt.f32.s32 %v7316_v43 }
 0x7d6   : > { %v7435_v53 = vpop.xlane.xlu0 %3624 }
 0x7d7   : > { %vm3626_vm7 = vcmp.eq.f32.partialorder %v7254_v11, %v7435_v53 }
 0x7d8   : > { %v3627_v60 = vsel %vm3626_vm7, %v3622_v52, inf }
 0x7d9   : > { %3628 = vmin.xlane.f32.xlu0 %v3627_v60  ;;  %v8290_v60 = vld [vmem:[#allocation67_spill] sm:$0xff] }
 0x7da   : > { %v7441_v17 = vpop.xlane.xlu1 %3397 }
 0x7db   : > { %vm3399_vm8 = vcmp.eq.f32.partialorder %v7281_v6, %v7441_v17 }
 0x7dc   : > { %v7446_v2 = vpop.xlane.xlu0 %3383  ;;  %v3400_v24 = vsel %vm3399_vm8, %v3395_v14, inf }
 0x7dd   : > { %vm3385_vm9 = vcmp.eq.f32.partialorder %v7289_v21, %v7446_v2  ;;  %3401 = vmin.xlane.f32.xlu1 %v3400_v24 }
 0x7de   : > { %v7451_v11 = vpop.xlane.xlu1 %3669  ;;  %v3386_v42 = vsel %vm3385_vm9, %v3381_v18, inf  ;;  %v3237_v18 = vshll.u32 %v3236_v29, 16 }
 0x7df   : > { %vm3671_vm12 = vcmp.eq.f32.partialorder %v8288_v28, %v7451_v11  ;;  %3387 = vmin.xlane.f32.xlu0 %v3386_v42  ;;  %v3481_v28 = vcvt.f32.s32 %v7338_v39 }
 0x7e0   : > { %v7455_v7 = vpop.xlane.xlu0 %3654  ;;  %v3672_v6 = vsel %vm3671_vm12, %v3667_v62, inf  ;;  %v3497_v62 = vshll.u32 %v3496_v59, 16 }
 0x7e1   : > { %vm3656_vm13 = vcmp.eq.f32.partialorder %v8289_v5, %v7455_v7  ;;  %3673 = vmin.xlane.f32.xlu1 %v3672_v6 }
 0x7e2   : > { %v3657_v25 = vsel %vm3656_vm13, %v3652_v54, inf }
 0x7e3   : > { %3658 = vmin.xlane.f32.xlu0 %v3657_v25  ;;  %v8292_v25 = vld [vmem:[#allocation57_spill] sm:$0xff] }
 0x82a   : > { %v3206_v21 = vpop.xlane.xlu1 %3205 }
 0x82b   : > { %v3207_v0 = vcvt.f32.s32 %v3206_v21 }
 0x82d   : > { %v3210_v58 = vadd.s32 %v3209_v30, %v3207_v0  ;;  %v3264_v0 = vcvt.f32.s32 %v7336_v46 }
 0x82e   : > { %v3464_v34 = vpop.xlane.xlu1 %3463  ;;  %v3192_v27 = vpop.xlane.xlu0 %3191 }
 0x82f   : > { %v3465_v56 = vcvt.f32.s32 %v3464_v34  ;;  %v3193_v15 = vcvt.f32.s32 %v3192_v27  ;;  %v3482_v34 = vshll.u32 %v3481_v28, 16  ;;  %v3526_v27 = vcvt.f32.s32 %v7346_v4 }
 0x831   : > { %v3468_v49 = vadd.s32 %v3467_v63, %v3465_v56  ;;  %v3196_v43 = vadd.s32 %v3195_v35, %v3193_v15  ;;  %v3265_v15 = vshll.u32 %v3264_v0, 16  ;;  %v3250_v35 = vcvt.f32.s32 %v7348_v19 }
 0x832   : > { %v3234_v22 = vpop.xlane.xlu1 %3233  ;;  %v3449_v52 = vpop.xlane.xlu0 %3448 }
 0x833   : > { %vm3681_vm14 = vcmp.lt.s32.totalorder %v3210_v58, %v3468_v49  ;;  %v3450_v9 = vcvt.f32.s32 %v3449_v52  ;;  %v3235_v32 = vcvt.f32.s32 %v3234_v22  ;;  %v3527_v22 = vshll.u32 %v3526_v27, 16 }
 0x834   : > { %v3682_v50 = vsel %vm3681_vm14, %v3210_v58, %v3468_v49  ;;  %v3511_v52 = vcvt.f32.s32 %v7358_v26 }
 0x835   : > { %v3729_v14 = vsel %vm3711_vm10, %v3682_v50, %v8290_v60  ;;  %v3453_v24 = vadd.s32 %v3452_v3, %v3450_v9  ;;  %v3238_v5 = vadd.s32 %v3237_v18, %v3235_v32  ;;  %v8294_v50 = vld [vmem:[#allocation23_spill] sm:$0xff]  ;;  %v3292_v32 = vcvt.f32.s32 %v7356_v12 }
 0x836   : > { %3761 = vst.msk [vmem:[#allocation3 + $0x8] sm:$0xff] %vm329_vm0, %v3729_v14  ;;  %3777 = vst.msk [vmem:[%s7469_s9 + $0x8] sm:$0xff] %vm329_vm0, %v3729_v14  ;;  %v3494_v42 = vpop.xlane.xlu1 %3493  ;;  %v3220_v44 = vpop.xlane.xlu0 %3219  ;;  %v3512_v18 = vshll.u32 %v3511_v52, 16  ;;  %v3306_v52 = vcvt.f32.s32 %v7388_v33 }
 0x837   : > { %vm3679_vm15 = vcmp.lt.s32.totalorder %v3196_v43, %v3453_v24  ;;  %v3495_v6 = vcvt.f32.s32 %v3494_v42  ;;  %v3221_v41 = vcvt.f32.s32 %v3220_v44 }
 0x838   : > { %v3680_v54 = vsel %vm3679_vm15, %v3196_v43, %v3453_v24  ;;  %v3251_v43 = vshll.u32 %v3250_v35, 16 }
 0x839   : > { %v3728_v21 = vsel %vm3711_vm10, %v3680_v54, %v8292_v25  ;;  %v3498_v40 = vadd.s32 %v3497_v62, %v3495_v6  ;;  %v3224_v58 = vadd.s32 %v3223_v48, %v3221_v41  ;;  %v8295_v62 = vld [vmem:[#allocation25_spill] sm:$0xff]  ;;  %v3278_v25 = vcvt.f32.s32 %v7368_v47 }
 0x83a   : > { %3760 = vst.msk [vmem:[#allocation3] sm:$0xff] %vm329_vm0, %v3728_v21  ;;  %3776 = vst.msk [vmem:[%s7469_s9] sm:$0xff] %vm329_vm0, %v3728_v21  ;;  %v3262_v51 = vpop.xlane.xlu1 %3261  ;;  %v3479_v39 = vpop.xlane.xlu0 %3478  ;;  %v3541_v41 = vcvt.f32.s32 %v7378_v45 }
 0x83b   : > { %vm3685_vm1 = vcmp.lt.s32.totalorder %v3238_v5, %v3498_v40  ;;  %v3480_v30 = vcvt.f32.s32 %v3479_v39  ;;  %v3263_v49 = vcvt.f32.s32 %v3262_v51  ;;  %v8296_v39 = vld [vmem:[#allocation37_spill] sm:$0xff] }
 0x83c   : > { %v3686_v63 = vsel %vm3685_vm1, %v3238_v5, %v3498_v40  ;;  %v3293_v5 = vshll.u32 %v3292_v32, 16  ;;  %v3557_v40 = vshll.u32 %v3556_v38, 16 }
 0x83d   : > { %v3731_v56 = vsel %vm3711_vm10, %v3686_v63, %v8293_v36  ;;  %v3483_v46 = vadd.s32 %v3482_v34, %v3480_v30  ;;  %v3266_v9 = vadd.s32 %v3265_v15, %v3263_v49  ;;  %v3279_v30 = vshll.u32 %v3278_v25, 16  ;;  %v8297_v15 = vld [vmem:[#allocation35_spill] sm:$0xff] }
 0x83e   : > { %3763 = vst.msk [vmem:[#allocation3 + $0x18] sm:$0xff] %vm329_vm0, %v3731_v56  ;;  %3779 = vst.msk [vmem:[%s7469_s9 + $0x18] sm:$0xff] %vm329_vm0, %v3731_v56  ;;  %v3524_v29 = vpop.xlane.xlu1 %3523  ;;  %v3248_v4 = vpop.xlane.xlu0 %3247  ;;  %v3320_v63 = vcvt.f32.s32 %v7376_v10  ;;  %v3542_v56 = vshll.u32 %v3541_v41, 16  ;;  %v3334_v25 = vcvt.f32.s32 %v7408_v61 }
 0x83f   : > { %vm3683_vm2 = vcmp.lt.s32.totalorder %v3224_v58, %v3483_v46  ;;  %v3525_v3 = vcvt.f32.s32 %v3524_v29  ;;  %v3249_v19 = vcvt.f32.s32 %v3248_v4 }
 0x840   : > { %v3684_v59 = vsel %vm3683_vm2, %v3224_v58, %v3483_v46  ;;  %v3586_v58 = vcvt.f32.s32 %v7386_v37 }
 0x841   : > { %v3730_v60 = vsel %vm3711_vm10, %v3684_v59, %v8294_v50  ;;  %v3528_v14 = vadd.s32 %v3527_v22, %v3525_v3  ;;  %v3252_v6 = vadd.s32 %v3251_v43, %v3249_v19  ;;  %v3321_v22 = vshll.u32 %v3320_v63, 16  ;;  %v8298_v19 = vld [vmem:[#allocation31_spill] sm:$0xff] }
 0x842   : > { %3762 = vst.msk [vmem:[#allocation3 + $0x10] sm:$0xff] %vm329_vm0, %v3730_v60  ;;  %3778 = vst.msk [vmem:[%s7469_s9 + $0x10] sm:$0xff] %vm329_vm0, %v3730_v60  ;;  %v3290_v24 = vpop.xlane.xlu1 %3289  ;;  %v3509_v26 = vpop.xlane.xlu0 %3508  ;;  %v3587_v59 = vshll.u32 %v3586_v58, 16  ;;  %v8301_v58 = vld [vmem:[#allocation58_spill] sm:$0xff] }
 0x843   : > { %vm3689_vm3 = vcmp.lt.s32.totalorder %v3266_v9, %v3528_v14  ;;  %v3510_v42 = vcvt.f32.s32 %v3509_v26  ;;  %v3291_v54 = vcvt.f32.s32 %v3290_v24  ;;  %v3307_v24 = vshll.u32 %v3306_v52, 16 }
 0x844   : > { %v3690_v44 = vsel %vm3689_vm3, %v3266_v9, %v3528_v14  ;;  %v3571_v9 = vcvt.f32.s32 %v7398_v57  ;;  %v3348_v26 = vcvt.f32.s32 %v7396_v20 }
 0x845   : > { %v3733_v28 = vsel %vm3711_vm10, %v3690_v44, %v8295_v62  ;;  %v3513_v12 = vadd.s32 %v3512_v18, %v3510_v42  ;;  %v3294_v51 = vadd.s32 %v3293_v5, %v3291_v54  ;;  %v3616_v42 = vcvt.f32.s32 %v7406_v13 }
 0x846   : > { %3765 = vst.msk [vmem:[#allocation3 + $0x28] sm:$0xff] %vm329_vm0, %v3733_v28  ;;  %3781 = vst.msk [vmem:[%s7469_s9 + $0x28] sm:$0xff] %vm329_vm0, %v3733_v28  ;;  %v3554_v21 = vpop.xlane.xlu1 %3553  ;;  %v3276_v55 = vpop.xlane.xlu0 %3275  ;;  %v3572_v38 = vshll.u32 %v3571_v9, 16  ;;  %v8299_v28 = vld [vmem:[#allocation79_spill] sm:$0xff]  ;;  %v3349_v5 = vshll.u32 %v3348_v26, 16 }
 0x847   : > { %vm3687_vm4 = vcmp.lt.s32.totalorder %v3252_v6, %v3513_v12  ;;  %v3555_v48 = vcvt.f32.s32 %v3554_v21  ;;  %v3277_v47 = vcvt.f32.s32 %v3276_v55  ;;  %v3617_v55 = vshll.u32 %v3616_v42, 16 }
 0x848   : > { %v3688_v0 = vsel %vm3687_vm4, %v3252_v6, %v3513_v12  ;;  %v3390_v42 = vcvt.f32.s32 %v7446_v2 }
 0x849   : > { %v3732_v34 = vsel %vm3711_vm10, %v3688_v0, %v8296_v39  ;;  %v3558_v27 = vadd.s32 %v3557_v40, %v3555_v48  ;;  %v3280_v29 = vadd.s32 %v3279_v30, %v3277_v47  ;;  %v3601_v40 = vcvt.f32.s32 %v7416_v23 }
 0x84a   : > { %3764 = vst.msk [vmem:[#allocation3 + $0x20] sm:$0xff] %vm329_vm0, %v3732_v34  ;;  %3780 = vst.msk [vmem:[%s7469_s9 + $0x20] sm:$0xff] %vm329_vm0, %v3732_v34  ;;  %v3318_v36 = vpop.xlane.xlu1 %3317  ;;  %v3539_v45 = vpop.xlane.xlu0 %3538  ;;  %v3335_v47 = vshll.u32 %v3334_v25, 16  ;;  %v3391_v2 = vshll.u32 %v3390_v42, 16 }
 0x84b   : > { %vm3693_vm11 = vcmp.lt.s32.totalorder %v3294_v51, %v3558_v27  ;;  %v3540_v49 = vcvt.f32.s32 %v3539_v45  ;;  %v3319_v4 = vcvt.f32.s32 %v3318_v36  ;;  %v3602_v30 = vshll.u32 %v3601_v40, 16 }
 0x84c   : > { %v3694_v46 = vsel %vm3693_vm11, %v3294_v51, %v3558_v27  ;;  %v8300_v51 = vld [vmem:[#allocation56_spill] sm:$0xff]  ;;  %v3376_v36 = vcvt.f32.s32 %v7419_v8  ;;  %v3646_v45 = vcvt.f32.s32 %v7429_v31  ;;  %v3631_v8 = vcvt.f32.s32 %v7435_v53 }
 0x84d   : > { %v3735_v35 = vsel %vm3711_vm10, %v3694_v46, %v8297_v15  ;;  %v3543_v10 = vadd.s32 %v3542_v56, %v3540_v49  ;;  %v3322_v14 = vadd.s32 %v3321_v22, %v3319_v4  ;;  %v3362_v4 = vcvt.f32.s32 %v7426_v16 }
 0x84e   : > { %3767 = vst.msk [vmem:[#allocation3 + $0x38] sm:$0xff] %vm329_vm0, %v3735_v35  ;;  %3783 = vst.msk [vmem:[%s7469_s9 + $0x38] sm:$0xff] %vm329_vm0, %v3735_v35  ;;  %v3584_v3 = vpop.xlane.xlu1 %3583  ;;  %v3304_v37 = vpop.xlane.xlu0 %3303  ;;  %v3647_v22 = vshll.u32 %v3646_v45, 16 }
 0x84f   : > { %vm3691_vm5 = vcmp.lt.s32.totalorder %v3280_v29, %v3543_v10  ;;  %v3585_v50 = vcvt.f32.s32 %v3584_v3  ;;  %v3305_v33 = vcvt.f32.s32 %v3304_v37  ;;  %v8302_v37 = vld [vmem:[#allocation77_spill] sm:$0xff]  ;;  %v3363_v53 = vshll.u32 %v3362_v4, 16 }
 0x850   : > { %v3692_v60 = vsel %vm3691_vm5, %v3280_v29, %v3543_v10  ;;  %v3377_v10 = vshll.u32 %v3376_v36, 16 }
 0x851   : > { %v3734_v43 = vsel %vm3711_vm10, %v3692_v60, %v8298_v19  ;;  %v3588_v32 = vadd.s32 %v3587_v59, %v3585_v50  ;;  %v3308_v54 = vadd.s32 %v3307_v24, %v3305_v33  ;;  %v8303_v24 = vld [vmem:[#allocation78_spill] sm:$0xff] }
 0x852   : > { %3766 = vst.msk [vmem:[#allocation3 + $0x30] sm:$0xff] %vm329_vm0, %v3734_v43  ;;  %3782 = vst.msk [vmem:[%s7469_s9 + $0x30] sm:$0xff] %vm329_vm0, %v3734_v43  ;;  %v3346_v18 = vpop.xlane.xlu1 %3345  ;;  %v3569_v57 = vpop.xlane.xlu0 %3568 }
 0x853   : > { %vm3697_vm6 = vcmp.lt.s32.totalorder %v3322_v14, %v3588_v32  ;;  %v3570_v44 = vcvt.f32.s32 %v3569_v57  ;;  %v3347_v12 = vcvt.f32.s32 %v3346_v18  ;;  %v3404_v57 = vcvt.f32.s32 %v7441_v17 }
 0x854   : > { %v3698_v62 = vsel %vm3697_vm6, %v3322_v14, %v3588_v32  ;;  %v3632_v14 = vshll.u32 %v3631_v8, 16 }
 0x855   : > { %v3737_v6 = vsel %vm3711_vm10, %v3698_v62, %v8299_v28  ;;  %v3573_v20 = vadd.s32 %v3572_v38, %v3570_v44  ;;  %v3350_v0 = vadd.s32 %v3349_v5, %v3347_v12  ;;  %v3676_v38 = vcvt.f32.s32 %v7451_v11 }
 0x856   : > { %3769 = vst.msk [vmem:[#allocation3 + $0x48] sm:$0xff] %vm329_vm0, %v3737_v6  ;;  %3785 = vst.msk [vmem:[%s7469_s9 + $0x48] sm:$0xff] %vm329_vm0, %v3737_v6  ;;  %v3614_v21 = vpop.xlane.xlu1 %3613  ;;  %v3332_v13 = vpop.xlane.xlu0 %3331  ;;  %v3661_v28 = vcvt.f32.s32 %v7455_v7  ;;  %v8304_v6 = vld [vmem:[#allocation40_spill] sm:$0xff]  ;;  %v3405_v11 = vshll.u32 %v3404_v57, 16 }
 0x857   : > { %vm3695_vm7 = vcmp.lt.s32.totalorder %v3308_v54, %v3573_v20  ;;  %v3615_v41 = vcvt.f32.s32 %v3614_v21  ;;  %v3333_v27 = vcvt.f32.s32 %v3332_v13 }
 0x858   : > { %v3696_v48 = vsel %vm3695_vm7, %v3308_v54, %v3573_v20  ;;  %v3677_v20 = vshll.u32 %v3676_v38, 16  ;;  %v3662_v13 = vshll.u32 %v3661_v28, 16 }
 0x859   : > { %v3736_v39 = vsel %vm3711_vm10, %v3696_v48, %v8300_v51  ;;  %v3618_v34 = vadd.s32 %v3617_v55, %v3615_v41  ;;  %v3336_v46 = vadd.s32 %v3335_v47, %v3333_v27  ;;  %v8305_v51 = vld [vmem:[#allocation44_spill] sm:$0xff] }
 0x85a   : > { %3768 = vst.msk [vmem:[#allocation3 + $0x40] sm:$0xff] %vm329_vm0, %v3736_v39  ;;  %3784 = vst.msk [vmem:[%s7469_s9 + $0x40] sm:$0xff] %vm329_vm0, %v3736_v39  ;;  %v3599_v61 = vpop.xlane.xlu0 %3598  ;;  %v3374_v23 = vpop.xlane.xlu1 %3373  ;;  %v8306_v27 = vld [vmem:[#allocation80_spill] sm:$0xff] }
 0x85b   : > { %vm3701_vm8 = vcmp.lt.s32.totalorder %v3350_v0, %v3618_v34  ;;  %v3600_v63 = vcvt.f32.s32 %v3599_v61  ;;  %v3375_v35 = vcvt.f32.s32 %v3374_v23 }
 0x85c   : > { %v3702_v56 = vsel %vm3701_vm8, %v3350_v0, %v3618_v34 }
 0x85d   : > { %v3739_v49 = vsel %vm3711_vm10, %v3702_v56, %v8301_v58  ;;  %v3603_v15 = vadd.s32 %v3602_v30, %v3600_v63  ;;  %v3378_v50 = vadd.s32 %v3377_v10, %v3375_v35 }
 0x85e   : > { %3771 = vst.msk [vmem:[#allocation3 + $0x58] sm:$0xff] %vm329_vm0, %v3739_v49  ;;  %3787 = vst.msk [vmem:[%s7469_s9 + $0x58] sm:$0xff] %vm329_vm0, %v3739_v49  ;;  %v3360_v29 = vpop.xlane.xlu0 %3359  ;;  %v3644_v31 = vpop.xlane.xlu1 %3643 }
 0x85f   : > { %vm3699_vm9 = vcmp.lt.s32.totalorder %v3336_v46, %v3603_v15  ;;  %v3645_v3 = vcvt.f32.s32 %v3644_v31  ;;  %v3361_v9 = vcvt.f32.s32 %v3360_v29 }
 0x860   : > { %v3700_v52 = vsel %vm3699_vm9, %v3336_v46, %v3603_v15 }
 0x861   : > { %v3738_v59 = vsel %vm3711_vm10, %v3700_v52, %v8302_v37  ;;  %v3648_v16 = vadd.s32 %v3647_v22, %v3645_v3  ;;  %v3364_v32 = vadd.s32 %v3363_v53, %v3361_v9 }
 0x862   : > { %3770 = vst.msk [vmem:[#allocation3 + $0x50] sm:$0xff] %vm329_vm0, %v3738_v59  ;;  %3786 = vst.msk [vmem:[%s7469_s9 + $0x50] sm:$0xff] %vm329_vm0, %v3738_v59  ;;  %v3629_v60 = vpop.xlane.xlu0 %3628 }
 0x863   : > { %v3630_v19 = vcvt.f32.s32 %v3629_v60  ;;  %vm3705_vm12 = vcmp.lt.s32.totalorder %v3378_v50, %v3648_v16 }
 0x864   : > { %v3706_v43 = vsel %vm3705_vm12, %v3378_v50, %v3648_v16 }
 0x865   : > { %v3633_v33 = vadd.s32 %v3632_v14, %v3630_v19  ;;  %v3741_v26 = vsel %vm3711_vm10, %v3706_v43, %v8303_v24 }
 0x866   : > { %v3402_v18 = vpop.xlane.xlu1 %3401  ;;  %3773 = vst.msk [vmem:[#allocation3 + $0x68] sm:$0xff] %vm329_vm0, %v3741_v26  ;;  %3789 = vst.msk [vmem:[%s7469_s9 + $0x68] sm:$0xff] %vm329_vm0, %v3741_v26 }
 0x867   : > { %vm3703_vm13 = vcmp.lt.s32.totalorder %v3364_v32, %v3633_v33  ;;  %v3403_v12 = vcvt.f32.s32 %v3402_v18 }
 0x868   : > { %v3704_v44 = vsel %vm3703_vm13, %v3364_v32, %v3633_v33  ;;  %v3388_v62 = vpop.xlane.xlu0 %3387 }
 0x869   : > { %v3740_v54 = vsel %vm3711_vm10, %v3704_v44, %v8304_v6  ;;  %v3389_v5 = vcvt.f32.s32 %v3388_v62  ;;  %v3406_v7 = vadd.s32 %v3405_v11, %v3403_v12 }
 0x86a   : > { %3772 = vst.msk [vmem:[#allocation3 + $0x60] sm:$0xff] %vm329_vm0, %v3740_v54  ;;  %3788 = vst.msk [vmem:[%s7469_s9 + $0x60] sm:$0xff] %vm329_vm0, %v3740_v54  ;;  %v3674_v17 = vpop.xlane.xlu1 %3673 }
 0x86b   : > { %v3675_v25 = vcvt.f32.s32 %v3674_v17  ;;  %v3392_v41 = vadd.s32 %v3391_v2, %v3389_v5 }
 0x86c   : > { %v3659_v21 = vpop.xlane.xlu0 %3658 }
 0x86d   : > { %v3678_v55 = vadd.s32 %v3677_v20, %v3675_v25  ;;  %v3660_v40 = vcvt.f32.s32 %v3659_v21 }
 0x86f   : > { %vm3709_vm14 = vcmp.lt.s32.totalorder %v3406_v7, %v3678_v55  ;;  %v3663_v48 = vadd.s32 %v3662_v13, %v3660_v40 }
 0x870   : > { %v3710_v0 = vsel %vm3709_vm14, %v3406_v7, %v3678_v55 }
 0x871   : > { %v3743_v39 = vsel %vm3711_vm10, %v3710_v0, %v8305_v51  ;;  %vm3707_vm15 = vcmp.lt.s32.totalorder %v3392_v41, %v3663_v48 }
 0x872   : > { %3775 = vst.msk [vmem:[#allocation3 + $0x78] sm:$0xff] %vm329_vm0, %v3743_v39  ;;  %3791 = vst.msk [vmem:[%s7469_s9 + $0x78] sm:$0xff] %vm329_vm0, %v3743_v39  ;;  %v3708_v34 = vsel %vm3707_vm15, %v3392_v41, %v3663_v48 }
 0x873   : > { %v3742_v61 = vsel %vm3711_vm10, %v3708_v34, %v8306_v27 }
 0x874   : > { %3774 = vst.msk [vmem:[#allocation3 + $0x70] sm:$0xff] %vm329_vm0, %v3742_v61  ;;  %3790 = vst.msk [vmem:[%s7469_s9 + $0x70] sm:$0xff] %vm329_vm0, %v3742_v61 }
 0x875 PF: > { %s14_s17 = sadd.s32 1, %s4117_s17   ;;  %s8307_s15 = smov %s4113_s16 }
 0x876   : > { %p11_p5 = scmp.ge.s32.totalorder %s14_s17, 4   ;;  %s8308_s16 = smov %s8310_s18 }
 0x878   :  { %13 = sbr.rel (!%p11_p5) target bundleno = 2 (0x2), region = 79 }

// kernel: affine_geometry_forward.5
= control target key start
LH: loop header
LB: loop body
LE: loop exit
PB: predicated region body
PF: predicated region fallthrough
CT: control target
= control target key end

     0   :  { %8 = vsyncpa [#allocation3], 0  ;;  %s567_s0 = inlined_call_operand.vmem [shape: f32[2,8,128], index: 0, kind: input, shape index: {}]   ;;  %s568_s1 = inlined_call_operand.vmem [shape: f32[8,1], index: 1, kind: input, shape index: {}]   ;;  %s569_s2 = inlined_call_operand.vmem [shape: f32[8,1], index: 2, kind: input, shape index: {}]   ;;  %s570_s3 = inlined_call_operand.hbm [shape: f32[2,8,128], index: 3, kind: output, shape index: {}]  }
   0x1   :  { %10 = vsyncpa [#allocation3 + $0x1], 0  ;;  %s462_s12 = smov 0   ;;  %s464_s13 = smov 0  }
   0x2   :  { %s466_s14 = smov 0   ;;  %s468_s15 = smov 0  }
   0x3   :  { %s470_s16 = smov 0   ;;  %s472_s17 = smov 0  }
   0x4 LB: > { %s294_s18 = sadd.s32 4294967295, %s438_s17   ;;  %s295_s19 = sadd.s32 4294967294, %s438_s17   ;;  %s438_s17 = sphi %s472_s17, %s16_s17   ;;  %s434_s16 = sphi %s470_s16, %s577_s16   ;;  %s430_s15 = sphi %s468_s15, %s576_s15   ;;  %s426_s14 = sphi %s466_s14, %s575_s14   ;;  %s422_s13 = sphi %s464_s13, %s574_s13   ;;  %s418_s12 = sphi %s462_s12, %s573_s12  }
   0x5   : > { %s28_s20 = sadd.s32 1, %s434_s16  ;;  %s107_s21 = sadd.s32 1, %s426_s14 }
   0x6   : > { %p30_p0 = scmp.ge.s32.totalorder %s28_s20, 2  ;;  %p117_p1 = scmp.ne.s32.totalorder %s426_s14, %s422_s13 }
   0x7   : > { %p118_p2 = scmp.eq.s32.totalorder %s294_s18, 1  ;;  %p123_p3 = scmp.ne.s32.totalorder %s422_s13, %s418_s12 }
   0x8   : > { %s579_s20 = smov (%p30_p0, %s28_s20), 0  ;;  %p124_p5 = scmp.eq.s32.totalorder %s295_s19, 1 }
   0x9   : > { %p502_p4 = por %p118_p2, %p117_p1  ;;  %s102_s23 = ssub.s32 %s434_s16, %s579_s20 }
   0xa   : > { %p298_p6 = scmp.ge.s32.totalorder %s438_s17, 1  ;;  %p105_p7 = scmp.eq.s32.totalorder %s102_s23, 0 }
   0xb   : > { %p509_p8 = por %p124_p5, %p123_p3  ;;  %p158_p9 = scmp.lt.s32.totalorder %s438_s17, 3 }
   0xc   : > { %s515_s25 = scalar_select %p105_p7, %s426_s14, %s107_s21  }
   0xd   : > { %p159_p10 = pnand %p298_p6, %p158_p9 }
   0xe   : > { %p184_p11 = scmp.lt.s32.totalorder (!%p159_p10), %s430_s15, 1  ;;  %s181_s5 = sand.u32 (!%p159_p10), 1, %s422_s13  }
   0xf   : > { %162 = sbr.rel (%p159_p10) target bundleno = 167 (0xa7), region = 32  ;;  %s299_s9 = sshll.u32 (!%p159_p10), %s181_s5, 3 }
  0x10   : > { %s302_s10 = sshll.u32 (!%p159_p10), %s430_s15, 7  ;;  %s183_s11 = scalar_lea.vmem (!%p159_p10), [#allocation2], %s299_s9 }
  0x11   : > { %s223_s18 = sshll.u32 (!%p159_p10), %s183_s11, 4  ;;  %s221_s23 = scalar_lea.hbm (!%p159_p10), %s570_s3, %s302_s10  ;;  %s224_s18 = int_to_ptr.vmem [resolvable:$true] %s223_s18 }
  0x12   : > { %s209_s26 = scalar_lea.sflag (!%p159_p10), [#allocation3], %s181_s5  ;;  %s362_s27 = scalar_lea.vmem (!%p159_p10), %s224_s18, 128 }
  0x13   : > { %p363_p12 = scmp.ne.s32.totalorder (!%p159_p10), %s224_s18, %s362_s27  ;;  %s441_s28 = smov (!%p159_p10), [#allocation2]  }
  0x14   : > { %v192_v0 = vld [vmem:[%s568_s1] sm:$0xff]  ;;  %v440_v1 = vmov 0   ;;  %s185_s30 = scalar_select %p184_p11, %s430_s15, 1 }
  0x15   : > { %361 = vset.pattern.permute.xlu0 %v440_v1  ;;  %v199_v2 = vld [vmem:[%s569_s2] sm:$0xff]  ;;  %p364_p13 = pnand %p363_p12, %p502_p4  ;;  %s366_s29 = sshll.u32 %s441_s28, 4  ;;  %s367_s29 = int_to_ptr.vmem [resolvable:$false] %s366_s29 }
  0x16   : > { %195 = vperm.xlu0 %361, %v192_v0   ;;  %s300_s4 = sshll.u32 %s185_s30, 3  ;;  %s368_s15 = scalar_lea.vmem %s367_s29, 256 }
  0x17   : > { %s190_s8 = scalar_lea.vmem %s567_s0, %s300_s4  ;;  %p365_p0 = pneg %p364_p13 }
  0x18   : > { %v191_v4 = vld [vmem:[%s190_s8] sm:$0xff]  ;;  %p369_p1 = scmp.lt.s32.totalorder %s224_s18, %s367_s29  ;;  %p370_p2 = scmp.lt.s32.totalorder %s368_s15, %s362_s27 }
  0x1a   : > { %202 = vperm.xlu0 %361, %v199_v2   ;;  %p371_p3 = por %p370_p2, %p369_p1 }
  0x1c   : > { %p372_p5 = pnand %p371_p3, %p365_p0 }
  0x91   : > { %v196_v3 = vpop.permute.xlu0 %195 }
  0x92   : > { %v198_v5 = vmul.f32 %v196_v3, %v191_v4 }
  0x95   : > { %v203_v6 = vpop.permute.xlu0 %202 }
  0x96   : > { %v205_v7 = vadd.f32 %v203_v6, %v198_v5 }
  0x98   : > { %v206_v8 = vmax.f32 %v205_v7, 0.0 }
  0x9a   : > { %207 = vst [vmem:[%s183_s11] sm:$0xff] %v206_v8 }
  0x9b   : > { %375 = shalt.err (!%p372_p5)
}
  0x9c   : > { %s376_s30 = scalar_lea.hbm %s221_s23, 128  ;;  %s380_s6 = scalar_lea.hbm %s570_s3, 256 }
  0x9d   : > { %p377_p6 = scmp.ne.s32.totalorder %s221_s23, %s376_s30  ;;  %p381_p10 = scmp.lt.s32.totalorder %s221_s23, %s570_s3 }
  0x9e   : > { %p382_p11 = scmp.lt.s32.totalorder %s380_s6, %s376_s30 }
  0x9f   : > { %p378_p7 = pnand %p377_p6, %p502_p4 }
  0xa0   : > { %p383_p12 = por %p382_p11, %p381_p10 }
  0xa1   : > { %p379_p9 = pneg %p378_p7 }
  0xa3   : > { %p384_p13 = pnand %p383_p12, %p379_p9 }
  0xa5   : > { %387 = shalt.err (!%p384_p13)
}
  0xa6   : > { %305 = dma.vmem_to_hbm [thread:$0]  (%p502_p4), %s224_s18, 128, %s221_s23, %s209_s26  }
  0xa7 PF: > { %p311_p0 = scmp.ge.s32.totalorder %s438_s17, 2  ;;  %s235_s9 = sand.u32 1, %s418_s12  }
  0xa8   : > { %s236_s10 = scalar_lea.sflag [#allocation3], %s235_s9 }
  0xa9   : > { %p308_p1 = pnand %p311_p0, %p509_p8 }
  0xab   : > { %p309_p2 = pneg %p308_p1 }
  0xad   : > { %413 = dma.done.wait (%p309_p2), %s236_s10, 128  }
  0xae   : > { %415 = vsyncadd (%p309_p2), %s236_s10, 4294967168  ;;  %s16_s17 = sadd.s32 1, %s438_s17   ;;  %s573_s12 = smov %s422_s13 }
  0xaf   : > { %p13_p3 = scmp.ge.s32.totalorder %s16_s17, 4   ;;  %s574_s13 = smov %s426_s14 }
  0xb0   : > { %s575_s14 = smov %s515_s25  ;;  %s576_s15 = smov %s434_s16 }
  0xb1   : > { %s577_s16 = smov %s579_s20  ;;  %15 = sbr.rel (!%p13_p3) target bundleno = 4 (0x4), region = 67 }
  0xb6   :  { %241 = vsyncpa [#allocation3], 1 }
  0xb7   :  { %243 = vsyncpa [#allocation3 + $0x1], 1 }

// kernel: affine_geometry_forward.4
= control target key start
LH: loop header
LB: loop body
LE: loop exit
PB: predicated region body
PF: predicated region fallthrough
CT: control target
= control target key end

     0   :  { %s581_s15 = smov 0   ;;  %s583_s16 = smov 0   ;;  %s632_s0 = inlined_call_operand.vmem [shape: f32[2,32,128], index: 0, kind: input, shape index: {}]   ;;  %s633_s1 = inlined_call_operand.vmem [shape: f32[8,32], index: 1, kind: input, shape index: {}]   ;;  %s634_s2 = inlined_call_operand.vmem [shape: f32[8,1], index: 2, kind: input, shape index: {}]   ;;  %s635_s3 = inlined_call_operand.vmem [shape: f32[2,8,128], index: 3, kind: output, shape index: {0}]   ;;  %s636_s4 = inlined_call_operand.vmem [shape: f32[2,8,2], index: 4, kind: output, shape index: {1}]  }
   0x1   :  { %s585_s17 = smov 0  }
   0x2 LB: > { %s27_s18 = sadd.s32 1, %s546_s16  ;;  %p474_p0 = scmp.ge.s32.totalorder %s550_s17, 1  ;;  %s550_s17 = sphi %s585_s17, %s15_s17   ;;  %s546_s16 = sphi %s583_s16, %s638_s16   ;;  %s542_s15 = sphi %s581_s15, %s637_s15  }
   0x3   : > { %p29_p1 = scmp.ge.s32.totalorder %s27_s18, 2  ;;  %p184_p2 = scmp.lt.s32.totalorder %s550_s17, 3 }
   0x5   : > { %s640_s18 = smov (%p29_p1, %s27_s18), 0  ;;  %p185_p3 = pnand %p474_p0, %p184_p2 }
   0x6   : > { %p219_p4 = scmp.lt.s32.totalorder (!%p185_p3), %s542_s15, 1  ;;  %s555_s8 = smov (!%p185_p3), 1  }
   0x7   : > { %188 = sbr.rel (%p185_p3) target bundleno = 485 (0x1e5), region = 32 }
   0xc   : > { %v552_v0 = vmov 0.0   ;;  %vm553_vm0 = vmmov 0   ;;  %v250_v1 = vld [vmem:[%s634_s2] sm:$0xff]  ;;  %s642_s15 = smov (!%p219_p4, %s542_s15), 1  ;;  %v554_v2 = vmov 0   ;;  %vm256_vm1 = vcmask 261120  }
   0xd   : > { %488 = vmatprep.subr.mxu0 %v552_v0  ;;  %496 = vmatprep.mubr.msk.f32.mxu0 %vm553_vm0, %v552_v0  ;;  %s482_s21 = sshll.u32 %s642_s15, 5  ;;  %v249_v7 = vld [vmem:[%s633_s1] sm:$0xff]  ;;  %vm242_vm2 = vcmask 7168   ;;  %v331_v8 = vlaneseq  ;;  %s477_s27 = sshll.u32 %s642_s15, 3  ;;  %vm360_vm4 = vcmask 15368  }
   0xe   : > { %527 = vset.pattern.permute.xlu0 %v554_v2  ;;  %s226_s24 = scalar_lea.vmem %s632_s0, %s482_s21  ;;  %243 = vst.msk [vmem:[#allocation2] sm:$0xff] %vm242_vm2, %v552_v0  ;;  %244 = vst.msk [vmem:[#allocation3] sm:$0xff] %vm242_vm2, %v552_v0  ;;  %s233_s30 = scalar_lea.vmem %s635_s3, %s477_s27 }
   0xf   : > { %253 = vperm.xlu0 %527, %v250_v1   ;;  %v248_v3 = vld [vmem:[%s226_s24 + $0x18] sm:$0xff]  ;;  %v247_v4 = vld [vmem:[%s226_s24 + $0x10] sm:$0xff]  ;;  %v246_v5 = vld [vmem:[%s226_s24 + $0x8] sm:$0xff]  ;;  %v332_v9 = vand.u32 127, %v331_v8  ;;  %s237_s7 = scalar_lea.vmem %s636_s4, %s477_s27 }
  0x10   : > { %489 = vmatpush3.msra.mxu0 %v248_v3  ;;  %v245_v6 = vld [vmem:[%s226_s24] sm:$0xff] }
  0x11   : > { %490 = vmatprep.subr.mxu0 %v552_v0  ;;  %vm336_vm3 = vcmp.lt.s32.totalorder %v332_v9, 16 }
  0x12   : > { %491 = vmatpush3.msra.mxu0 %v247_v4 }
  0x13   : > { %492 = vmatprep.subr.mxu0 %v552_v0 }
  0x14   : > { %493 = vmatpush3.msra.mxu0 %v246_v5 }
  0x15   : > { %494 = vmatprep.subr.mxu0 %v552_v0  ;;  %v338_v16 = vld [vmem:[#allocation2] sm:$0xff]  ;;  %v344_v18 = vld [vmem:[#allocation3] sm:$0xff] }
  0x16   : > { %495 = vmatpush3.msra.mxu0 %v245_v6 }
  0x17   : > { %497 = vmatmul.mubr.msk.f32.vlgmr.msra.gmra.mxu0 %vm256_vm1, %v249_v7 }
  0x8a   : > { %v254_v10 = vpop.permute.xlu0 %253 }
  0xd7   : > { %v326_v11 = vpop.f32.mrf.mxu0 }
  0xd8   : > { %v327_v12 = vadd.f32 %v326_v11, %v254_v10 }
  0xd9   : > { %v498_v13 = vpop.f32.mrf.mxu0 }
  0xda   : > { %330 = vst [vmem:[%s233_s30] sm:$0xff] %v327_v12  ;;  %v337_v14 = vsel %vm336_vm3, %v327_v12, 0.0 }
  0xdb   : > { %339 = vadd.xlane.f32.xlu1 %v337_v14  ;;  %v345_v15 = vmul.f32 %v337_v14, %v337_v14 }
  0xdd   : > { %346 = vadd.xlane.f32.xlu0 %v345_v15 }
 0x164   : > { %v340_v17 = vpop.xlane.xlu1 %339 }
 0x165   : > { %v341_v19 = vadd.f32 %v340_v17, %v338_v16 }
 0x166   : > { %v347_v20 = vpop.xlane.xlu0 %346 }
 0x167   : > { %343 = vst.msk [vmem:[#allocation2] sm:$0xff] %vm242_vm2, %v341_v19  ;;  %v348_v21 = vadd.f32 %v347_v20, %v344_v18 }
 0x169   : > { %349 = vst.msk [vmem:[#allocation3] sm:$0xff] %vm242_vm2, %v348_v21 }
 0x16e   : > { %v353_v22 = vld [vmem:[#allocation2] sm:$0xff] }
 0x16f   : > { %354 = vst.msk [vmem:[%s237_s7] sm:$0xff] %vm242_vm2, %v353_v22 }
 0x170   : > { %v355_v23 = vld [vmem:[#allocation3] sm:$0xff] }
 0x171   : > { %357 = vrot.lane.b32.xlu1 %v355_v23, %s555_s8 }
 0x1e3   : > { %v358_v24 = vpop.permute.xlu1 %357 }
 0x1e4   : > { %361 = vst.msk [vmem:[%s237_s7] sm:$0xff] %vm360_vm4, %v358_v24 }
 0x1e5 PF: > { %s15_s17 = sadd.s32 1, %s550_s17   ;;  %s637_s15 = smov %s546_s16 }
 0x1e6   : > { %p12_p5 = scmp.ge.s32.totalorder %s15_s17, 4   ;;  %s638_s16 = smov %s640_s18 }
 0x1e8   :  { %14 = sbr.rel (!%p12_p5) target bundleno = 2 (0x2), region = 82 }

</bundles_post_ra>
